<compile_context>
chip_gen: v6e
topology: v6e:2x2x1
jax: 0.10.0
libtpu: 0.0.40
codegen_flags: <defaults>
</compile_context>

<pallas_src>
import functools

import jax
import jax.numpy as jnp
from jax.experimental import pallas as pl
from jax.experimental.pallas import tpu as pltpu


def _transformer_kernel(
    x_ref, emb_w_ref, emb_b_ref, pos_ref,
    ln1_g_ref, ln1_b_ref,
    wq_ref, wk_ref, wv_ref, bq_ref, bk_ref, bv_ref,
    pw_ref, pb_ref,
    ln2_g_ref, ln2_b_ref,
    fc1_w_ref, fc1_b_ref, fc2_w_ref, fc2_b_ref,
    tn_g_ref, tn_b_ref, hln_g_ref, hln_b_ref,
    head_w_ref, head_b_ref,
    o_ref,
    *, depth, batch, frames, heads):
  f32 = jnp.float32
  D = emb_w_ref.shape[1]
  hd = D // heads
  scale = float(hd) ** -0.5

  def mm(a, b):
    return jnp.dot(a, b, preferred_element_type=f32)

  def layer_norm(z, g, b, eps=1e-6):
    mu = jnp.mean(z, axis=-1, keepdims=True)
    zc = z - mu
    var = jnp.mean(zc * zc, axis=-1, keepdims=True)
    return zc * jax.lax.rsqrt(var + eps) * g + b

  def gelu_tanh(z):
    c = 0.7978845608028654  # sqrt(2/pi)
    return 0.5 * z * (1.0 + jnp.tanh(c * (z + 0.044715 * z * z * z)))

  # Embedding + bias + positional embedding.  Rows = (batch * frame), lane = D.
  h = mm(x_ref[...], emb_w_ref[...]) + emb_b_ref[...] + pos_ref[...]

  for l in range(depth):                        # static unroll (depth is tiny)
    # ---- multi-head self-attention (pre-norm, residual) ----
    hn = layer_norm(h, ln1_g_ref[l], ln1_b_ref[l])
    per_batch = []
    for b in range(batch):
      hb = hn[b * frames:(b + 1) * frames, :]   # (F, D): 8-row-aligned slice
      acc = jnp.zeros((frames, D), dtype=f32)
      for hh in range(heads):
        q = mm(hb, wq_ref[l, hh]) + bq_ref[l, hh]     # (F, hd)
        k = mm(hb, wk_ref[l, hh]) + bk_ref[l, hh]
        v = mm(hb, wv_ref[l, hh]) + bv_ref[l, hh]
        s = jax.lax.dot_general(                       # q @ k.T -> (F, F)
            q, k, (((1,), (1,)), ((), ())),
            preferred_element_type=f32) * scale
        s = s - jnp.max(s, axis=-1, keepdims=True)
        e = jnp.exp(s)
        p = e / jnp.sum(e, axis=-1, keepdims=True)
        # Fold this head's slice of the output projection in directly:
        #   concat_h(o_h) @ W_proj == sum_h o_h @ W_proj[h*hd:(h+1)*hd, :]
        acc = acc + mm(mm(p, v), pw_ref[l, hh])        # (F, D)
      per_batch.append(acc)
    attn = jnp.concatenate(per_batch, axis=0)          # (B*F, D)
    h = h + attn + pb_ref[l]                           # proj bias once per row

    # ---- MLP (pre-norm, residual) ----
    hn2 = layer_norm(h, ln2_g_ref[l], ln2_b_ref[l])
    m = gelu_tanh(mm(hn2, fc1_w_ref[l]) + fc1_b_ref[l])
    h = h + mm(m, fc2_w_ref[l]) + fc2_b_ref[l]

  # Temporal_norm, then head = LayerNorm -> Linear(embed_dim -> num_joints)
  h = layer_norm(h, tn_g_ref[...], tn_b_ref[...])
  h = layer_norm(h, hln_g_ref[...], hln_b_ref[...])
  y = mm(h, head_w_ref[...]) + head_b_ref[...]
  o_ref[...] = y.astype(o_ref.dtype)


def transformer_forward(x, params, *, num_heads):
  """x: (B, num_joints, num_frame) -> (B, num_joints, num_frame)."""
  f32 = jnp.float32
  B, J, F = x.shape
  D = params["emb_w"].shape[1]
  L = params["qkv_w"].shape[0]
  H = num_heads
  hd = D // H
  R = B * F

  # ---- wrapper-side layout plumbing (cheap; keeps the kernel lane-friendly) ----
  # torch forward: x.permute(0, 2, 1); then flatten batch into rows.
  x_rows = jnp.transpose(x, (0, 2, 1)).reshape(R, J).astype(f32)
  pos_rows = jnp.broadcast_to(params["pos"][None], (B, F, D)).reshape(R, D)

  qkv_w = params["qkv_w"]           # (L, D, 3D): columns laid out [q|k|v][head][hd]
  qkv_b = params["qkv_b"]           # (L, 3D)

  def split_w(w):                   # (L, D, D) -> (L, H, D, hd)
    return w.reshape(L, D, H, hd).transpose(0, 2, 1, 3)

  def split_b(b):                   # (L, D) -> (L, H, 1, hd)
    return b.reshape(L, H, 1, hd)

  wq, wk, wv = (split_w(qkv_w[:, :, i * D:(i + 1) * D]) for i in range(3))
  bq, bk, bv = (split_b(qkv_b[:, i * D:(i + 1) * D]) for i in range(3))
  pw = params["proj_w"].reshape(L, H, hd, D)      # proj input rows grouped by head
  pb = params["proj_b"].reshape(L, 1, D)

  row = lambda v: v.reshape(1, -1)
  lrow = lambda v: v.reshape(L, 1, -1)

  operands = (
      x_rows, params["emb_w"], row(params["emb_b"]), pos_rows,
      lrow(params["ln1_g"]), lrow(params["ln1_b"]),
      wq, wk, wv, bq, bk, bv, pw, pb,
      lrow(params["ln2_g"]), lrow(params["ln2_b"]),
      params["fc1_w"], lrow(params["fc1_b"]),
      params["fc2_w"], lrow(params["fc2_b"]),
      row(params["tn_g"]), row(params["tn_b"]),
      row(params["hln_g"]), row(params["hln_b"]),
      params["head_w"], row(params["head_b"]),
  )

  vmem = pl.BlockSpec(memory_space=pltpu.MemorySpace.VMEM)
  kernel = functools.partial(
      _transformer_kernel, depth=L, batch=B, frames=F, heads=H)

  out_rows = pl.pallas_call(
      kernel,
      out_shape=jax.ShapeDtypeStruct((R, J), f32),
      in_specs=[vmem] * len(operands),
      out_specs=vmem,
  )(*operands)

  # (B*F, J) -> (B, F, J) -> permute(0, 2, 1) -> (B, num_joints, num_frame)
  return jnp.transpose(out_rows.reshape(B, F, J), (0, 2, 1))


def transformer_reference(x, params, *, num_heads):
  """Independent pure-JAX reference following the PyTorch code structure."""
  HI = jax.lax.Precision.HIGHEST
  B, J, F = x.shape
  D = params["emb_w"].shape[1]
  L = params["qkv_w"].shape[0]
  H = num_heads
  hd = D // H
  scale = float(hd) ** -0.5

  def layer_norm(z, g, b, eps=1e-6):
    mu = jnp.mean(z, axis=-1, keepdims=True)
    var = jnp.mean((z - mu) ** 2, axis=-1, keepdims=True)
    return (z - mu) * jax.lax.rsqrt(var + eps) * g + b

  def gelu_tanh(z):
    c = 0.7978845608028654
    return 0.5 * z * (1.0 + jnp.tanh(c * (z + 0.044715 * z ** 3)))

  xt = jnp.transpose(x, (0, 2, 1))                                     # (B, F, J)
  h = jnp.matmul(xt, params["emb_w"], precision=HI) + params["emb_b"]
  h = h + params["pos"][None]
  for l in range(L):
    hn = layer_norm(h, params["ln1_g"][l], params["ln1_b"][l])
    qkv = jnp.matmul(hn, params["qkv_w"][l], precision=HI) + params["qkv_b"][l]
    qkv = qkv.reshape(B, F, 3, H, hd).transpose(2, 0, 3, 1, 4)         # (3,B,H,F,hd)
    q, k, v = qkv[0], qkv[1], qkv[2]
    s = jnp.einsum("bhnd,bhmd->bhnm", q, k, precision=HI) * scale
    p = jax.nn.softmax(s, axis=-1)
    o = jnp.einsum("bhnm,bhmd->bhnd", p, v, precision=HI)
    o = o.transpose(0, 2, 1, 3).reshape(B, F, D)
    h = h + jnp.matmul(o, params["proj_w"][l], precision=HI) + params["proj_b"][l]
    hn2 = layer_norm(h, params["ln2_g"][l], params["ln2_b"][l])
    m = gelu_tanh(jnp.matmul(hn2, params["fc1_w"][l], precision=HI)
                  + params["fc1_b"][l])
    h = h + jnp.matmul(m, params["fc2_w"][l], precision=HI) + params["fc2_b"][l]
  h = layer_norm(h, params["tn_g"], params["tn_b"])
  y = (jnp.matmul(layer_norm(h, params["hln_g"], params["hln_b"]),
                  params["head_w"], precision=HI) + params["head_b"])
  return jnp.transpose(y, (0, 2, 1))                                    # (B, J, F)


if __name__ == "__main__":
  # Small config consistent with the module: forward input is
  # (batch, num_joints, num_frame); embed_dim_ratio is overwritten to num_heads
  # in __init__, so embed_dim = num_heads * num_joints.
  batch, num_joints, num_frame = 2, 16, 8
  num_heads, depth, mlp_ratio = 4, 2, 2.0
  embed_dim = num_heads * num_joints            # 64
  mlp_hidden = int(embed_dim * mlp_ratio)       # 128

  key = jax.random.PRNGKey(0)
  ks = jax.random.split(key, 24)
  rnd = lambda k, shape, s=0.05: s * jax.random.normal(k, shape, dtype=jnp.float32)

  # Weights are generated directly in (in, out) layout (equivalent
  # parameterization of nn.Linear's x @ W.T + b).  pos is trainable (zeros at
  # torch init) -- use small random values to exercise the add path.
  params = dict(
      emb_w=rnd(ks[0], (num_joints, embed_dim)),
      emb_b=rnd(ks[1], (embed_dim,)),
      pos=rnd(ks[2], (num_frame, embed_dim)),
      ln1_g=1.0 + rnd(ks[3], (depth, embed_dim)),
      ln1_b=rnd(ks[4], (depth, embed_dim)),
      qkv_w=rnd(ks[5], (depth, embed_dim, 3 * embed_dim)),
      qkv_b=rnd(ks[6], (depth, 3 * embed_dim)),
      proj_w=rnd(ks[7], (depth, embed_dim, embed_dim)),
      proj_b=rnd(ks[8], (depth, embed_dim)),
      ln2_g=1.0 + rnd(ks[9], (depth, embed_dim)),
      ln2_b=rnd(ks[10], (depth, embed_dim)),
      fc1_w=rnd(ks[11], (depth, embed_dim, mlp_hidden)),
      fc1_b=rnd(ks[12], (depth, mlp_hidden)),
      fc2_w=rnd(ks[13], (depth, mlp_hidden, embed_dim)),
      fc2_b=rnd(ks[14], (depth, embed_dim)),
      tn_g=1.0 + rnd(ks[15], (embed_dim,)),
      tn_b=rnd(ks[16], (embed_dim,)),
      hln_g=1.0 + rnd(ks[17], (embed_dim,)),
      hln_b=rnd(ks[18], (embed_dim,)),
      head_w=rnd(ks[19], (embed_dim, num_joints)),
      head_b=rnd(ks[20], (num_joints,)),
  )

  x = jax.random.normal(ks[21], (batch, num_joints, num_frame), dtype=jnp.float32)

  out = jax.block_until_ready(transformer_forward(x, params, num_heads=num_heads))
  ref = transformer_reference(x, params, num_heads=num_heads)

  assert out.shape == (batch, num_joints, num_frame)
  # 1e-2 tolerance absorbs MXU f32-via-bf16-pass differences between Mosaic's
  # in-kernel dots and the HIGHEST-precision XLA reference path.
  assert jnp.allclose(out, ref, atol=1e-2, rtol=1e-2), \
      float(jnp.max(jnp.abs(out - ref)))
  print("KERNEL_OK")
</pallas_src>

<mosaic_0001>
module attributes {stable_mosaic.version = 11 : i64} {
  func.func @_transformer_kernel(%arg0: memref<16x16xf32, #tpu.memory_space<vmem>>, %arg1: memref<16x64xf32, #tpu.memory_space<vmem>>, %arg2: memref<1x64xf32, #tpu.memory_space<vmem>>, %arg3: memref<16x64xf32, #tpu.memory_space<vmem>>, %arg4: memref<2x1x64xf32, #tpu.memory_space<vmem>>, %arg5: memref<2x1x64xf32, #tpu.memory_space<vmem>>, %arg6: memref<2x4x64x16xf32, #tpu.memory_space<vmem>>, %arg7: memref<2x4x64x16xf32, #tpu.memory_space<vmem>>, %arg8: memref<2x4x64x16xf32, #tpu.memory_space<vmem>>, %arg9: memref<2x4x1x16xf32, #tpu.memory_space<vmem>>, %arg10: memref<2x4x1x16xf32, #tpu.memory_space<vmem>>, %arg11: memref<2x4x1x16xf32, #tpu.memory_space<vmem>>, %arg12: memref<2x4x16x64xf32, #tpu.memory_space<vmem>>, %arg13: memref<2x1x64xf32, #tpu.memory_space<vmem>>, %arg14: memref<2x1x64xf32, #tpu.memory_space<vmem>>, %arg15: memref<2x1x64xf32, #tpu.memory_space<vmem>>, %arg16: memref<2x64x128xf32, #tpu.memory_space<vmem>>, %arg17: memref<2x1x128xf32, #tpu.memory_space<vmem>>, %arg18: memref<2x128x64xf32, #tpu.memory_space<vmem>>, %arg19: memref<2x1x64xf32, #tpu.memory_space<vmem>>, %arg20: memref<1x64xf32, #tpu.memory_space<vmem>>, %arg21: memref<1x64xf32, #tpu.memory_space<vmem>>, %arg22: memref<1x64xf32, #tpu.memory_space<vmem>>, %arg23: memref<1x64xf32, #tpu.memory_space<vmem>>, %arg24: memref<64x16xf32, #tpu.memory_space<vmem>>, %arg25: memref<1x16xf32, #tpu.memory_space<vmem>>, %arg26: memref<16x16xf32, #tpu.memory_space<vmem>>) attributes {dimension_semantics = [], scalar_prefetch = 0 : i64, scratch_operands = 0 : i64, tpu.core_type = #tpu.core_type<tc>} {
    %c0 = arith.constant 0 : index
    %c0_0 = arith.constant 0 : index
    %0 = vector.load %arg0[%c0, %c0_0] : memref<16x16xf32, #tpu.memory_space<vmem>>, vector<16x16xf32>
    %c0_1 = arith.constant 0 : index
    %c0_2 = arith.constant 0 : index
    %1 = vector.load %arg1[%c0_1, %c0_2] : memref<16x64xf32, #tpu.memory_space<vmem>>, vector<16x64xf32>
    %cst = arith.constant dense<0.000000e+00> : vector<16x64xf32>
    %2 = tpu.matmul %0, %1, %cst {dimension_numbers = #tpu.dot_dimension_numbers<[1], [0], [0], [1], [0, 0, 1, 1], [], []>} : vector<16x16xf32>, vector<16x64xf32>, vector<16x64xf32> -> vector<16x64xf32>
    %c0_3 = arith.constant 0 : index
    %c0_4 = arith.constant 0 : index
    %3 = vector.load %arg2[%c0_3, %c0_4] : memref<1x64xf32, #tpu.memory_space<vmem>>, vector<1x64xf32>
    %4 = vector.broadcast %3 : vector<1x64xf32> to vector<16x64xf32>
    %5 = arith.addf %2, %4 : vector<16x64xf32>
    %c0_5 = arith.constant 0 : index
    %c0_6 = arith.constant 0 : index
    %6 = vector.load %arg3[%c0_5, %c0_6] : memref<16x64xf32, #tpu.memory_space<vmem>>, vector<16x64xf32>
    %7 = arith.addf %5, %6 : vector<16x64xf32>
    %c0_7 = arith.constant 0 : index
    %c0_8 = arith.constant 0 : index
    %c0_9 = arith.constant 0 : index
    %8 = vector.load %arg4[%c0_7, %c0_8, %c0_9] : memref<2x1x64xf32, #tpu.memory_space<vmem>>, vector<1x1x64xf32>
    %9 = vector.shape_cast %8 : vector<1x1x64xf32> to vector<1x64xf32>
    %c0_10 = arith.constant 0 : index
    %c0_11 = arith.constant 0 : index
    %c0_12 = arith.constant 0 : index
    %10 = vector.load %arg5[%c0_10, %c0_11, %c0_12] : memref<2x1x64xf32, #tpu.memory_space<vmem>>, vector<1x1x64xf32>
    %11 = vector.shape_cast %10 : vector<1x1x64xf32> to vector<1x64xf32>
    %cst_13 = arith.constant dense<0.000000e+00> : vector<16xf32>
    %12 = vector.multi_reduction <add>, %7, %cst_13 [1] : vector<16x64xf32> to vector<16xf32>
    %13 = vector.shape_cast %12 : vector<16xf32> to vector<16x1xf32>
    %cst_14 = arith.constant 6.400000e+01 : f32
    %14 = vector.broadcast %cst_14 : f32 to vector<16x1xf32>
    %15 = arith.divf %13, %14 : vector<16x1xf32>
    %16 = vector.broadcast %15 : vector<16x1xf32> to vector<16x64xf32>
    %17 = arith.subf %7, %16 : vector<16x64xf32>
    %18 = arith.mulf %17, %17 : vector<16x64xf32>
    %cst_15 = arith.constant dense<0.000000e+00> : vector<16xf32>
    %19 = vector.multi_reduction <add>, %18, %cst_15 [1] : vector<16x64xf32> to vector<16xf32>
    %20 = vector.shape_cast %19 : vector<16xf32> to vector<16x1xf32>
    %cst_16 = arith.constant 6.400000e+01 : f32
    %21 = vector.broadcast %cst_16 : f32 to vector<16x1xf32>
    %22 = arith.divf %20, %21 : vector<16x1xf32>
    %cst_17 = arith.constant 9.99999997E-7 : f32
    %23 = vector.broadcast %cst_17 : f32 to vector<16x1xf32>
    %24 = arith.addf %22, %23 : vector<16x1xf32>
    %25 = math.rsqrt %24 : vector<16x1xf32>
    %26 = vector.broadcast %25 : vector<16x1xf32> to vector<16x64xf32>
    %27 = arith.mulf %17, %26 : vector<16x64xf32>
    %28 = vector.broadcast %9 : vector<1x64xf32> to vector<16x64xf32>
    %29 = arith.mulf %27, %28 : vector<16x64xf32>
    %30 = vector.broadcast %11 : vector<1x64xf32> to vector<16x64xf32>
    %31 = arith.addf %29, %30 : vector<16x64xf32>
    %32 = vector.extract_strided_slice %31 {offsets = [0, 0], sizes = [8, 64], strides = [1, 1]} : vector<16x64xf32> to vector<8x64xf32>
    %cst_18 = arith.constant 0.000000e+00 : f32
    %33 = vector.broadcast %cst_18 : f32 to vector<8x64xf32>
    %c0_19 = arith.constant 0 : index
    %c0_20 = arith.constant 0 : index
    %c0_21 = arith.constant 0 : index
    %c0_22 = arith.constant 0 : index
    %34 = vector.load %arg6[%c0_19, %c0_20, %c0_21, %c0_22] : memref<2x4x64x16xf32, #tpu.memory_space<vmem>>, vector<1x1x64x16xf32>
    %35 = vector.shape_cast %34 : vector<1x1x64x16xf32> to vector<64x16xf32>
    %cst_23 = arith.constant dense<0.000000e+00> : vector<8x16xf32>
    %36 = tpu.matmul %32, %35, %cst_23 {dimension_numbers = #tpu.dot_dimension_numbers<[1], [0], [0], [1], [0, 0, 1, 1], [], []>} : vector<8x64xf32>, vector<64x16xf32>, vector<8x16xf32> -> vector<8x16xf32>
    %c0_24 = arith.constant 0 : index
    %c0_25 = arith.constant 0 : index
    %c0_26 = arith.constant 0 : index
    %c0_27 = arith.constant 0 : index
    %37 = vector.load %arg9[%c0_24, %c0_25, %c0_26, %c0_27] : memref<2x4x1x16xf32, #tpu.memory_space<vmem>>, vector<1x1x1x16xf32>
    %38 = vector.shape_cast %37 : vector<1x1x1x16xf32> to vector<1x16xf32>
    %39 = vector.broadcast %38 : vector<1x16xf32> to vector<8x16xf32>
    %40 = arith.addf %36, %39 : vector<8x16xf32>
    %c0_28 = arith.constant 0 : index
    %c0_29 = arith.constant 0 : index
    %c0_30 = arith.constant 0 : index
    %c0_31 = arith.constant 0 : index
    %41 = vector.load %arg7[%c0_28, %c0_29, %c0_30, %c0_31] : memref<2x4x64x16xf32, #tpu.memory_space<vmem>>, vector<1x1x64x16xf32>
    %42 = vector.shape_cast %41 : vector<1x1x64x16xf32> to vector<64x16xf32>
    %cst_32 = arith.constant dense<0.000000e+00> : vector<8x16xf32>
    %43 = tpu.matmul %32, %42, %cst_32 {dimension_numbers = #tpu.dot_dimension_numbers<[1], [0], [0], [1], [0, 0, 1, 1], [], []>} : vector<8x64xf32>, vector<64x16xf32>, vector<8x16xf32> -> vector<8x16xf32>
    %c0_33 = arith.constant 0 : index
    %c0_34 = arith.constant 0 : index
    %c0_35 = arith.constant 0 : index
    %c0_36 = arith.constant 0 : index
    %44 = vector.load %arg10[%c0_33, %c0_34, %c0_35, %c0_36] : memref<2x4x1x16xf32, #tpu.memory_space<vmem>>, vector<1x1x1x16xf32>
    %45 = vector.shape_cast %44 : vector<1x1x1x16xf32> to vector<1x16xf32>
    %46 = vector.broadcast %45 : vector<1x16xf32> to vector<8x16xf32>
    %47 = arith.addf %43, %46 : vector<8x16xf32>
    %c0_37 = arith.constant 0 : index
    %c0_38 = arith.constant 0 : index
    %c0_39 = arith.constant 0 : index
    %c0_40 = arith.constant 0 : index
    %48 = vector.load %arg8[%c0_37, %c0_38, %c0_39, %c0_40] : memref<2x4x64x16xf32, #tpu.memory_space<vmem>>, vector<1x1x64x16xf32>
    %49 = vector.shape_cast %48 : vector<1x1x64x16xf32> to vector<64x16xf32>
    %cst_41 = arith.constant dense<0.000000e+00> : vector<8x16xf32>
    %50 = tpu.matmul %32, %49, %cst_41 {dimension_numbers = #tpu.dot_dimension_numbers<[1], [0], [0], [1], [0, 0, 1, 1], [], []>} : vector<8x64xf32>, vector<64x16xf32>, vector<8x16xf32> -> vector<8x16xf32>
    %c0_42 = arith.constant 0 : index
    %c0_43 = arith.constant 0 : index
    %c0_44 = arith.constant 0 : index
    %c0_45 = arith.constant 0 : index
    %51 = vector.load %arg11[%c0_42, %c0_43, %c0_44, %c0_45] : memref<2x4x1x16xf32, #tpu.memory_space<vmem>>, vector<1x1x1x16xf32>
    %52 = vector.shape_cast %51 : vector<1x1x1x16xf32> to vector<1x16xf32>
    %53 = vector.broadcast %52 : vector<1x16xf32> to vector<8x16xf32>
    %54 = arith.addf %50, %53 : vector<8x16xf32>
    %cst_46 = arith.constant dense<0.000000e+00> : vector<8x8xf32>
    %55 = tpu.matmul %40, %47, %cst_46 {dimension_numbers = #tpu.dot_dimension_numbers<[1], [1], [0], [0], [0, 0, 1, 0], [], []>} : vector<8x16xf32>, vector<8x16xf32>, vector<8x8xf32> -> vector<8x8xf32>
    %cst_47 = arith.constant 2.500000e-01 : f32
    %56 = vector.broadcast %cst_47 : f32 to vector<8x8xf32>
    %57 = arith.mulf %55, %56 : vector<8x8xf32>
    %cst_48 = arith.constant dense<0xFF800000> : vector<8xf32>
    %58 = vector.multi_reduction <maximumf>, %57, %cst_48 [1] : vector<8x8xf32> to vector<8xf32>
    %59 = vector.shape_cast %58 : vector<8xf32> to vector<8x1xf32>
    %60 = vector.broadcast %59 : vector<8x1xf32> to vector<8x8xf32>
    %61 = arith.subf %57, %60 : vector<8x8xf32>
    %62 = math.exp %61 : vector<8x8xf32>
    %cst_49 = arith.constant dense<0.000000e+00> : vector<8xf32>
    %63 = vector.multi_reduction <add>, %62, %cst_49 [1] : vector<8x8xf32> to vector<8xf32>
    %64 = vector.shape_cast %63 : vector<8xf32> to vector<8x1xf32>
    %65 = vector.broadcast %64 : vector<8x1xf32> to vector<8x8xf32>
    %66 = arith.divf %62, %65 : vector<8x8xf32>
    %cst_50 = arith.constant dense<0.000000e+00> : vector<8x16xf32>
    %67 = tpu.matmul %66, %54, %cst_50 {dimension_numbers = #tpu.dot_dimension_numbers<[1], [0], [0], [1], [0, 0, 1, 1], [], []>} : vector<8x8xf32>, vector<8x16xf32>, vector<8x16xf32> -> vector<8x16xf32>
    %c0_51 = arith.constant 0 : index
    %c0_52 = arith.constant 0 : index
    %c0_53 = arith.constant 0 : index
    %c0_54 = arith.constant 0 : index
    %68 = vector.load %arg12[%c0_51, %c0_52, %c0_53, %c0_54] : memref<2x4x16x64xf32, #tpu.memory_space<vmem>>, vector<1x1x16x64xf32>
    %69 = vector.shape_cast %68 : vector<1x1x16x64xf32> to vector<16x64xf32>
    %cst_55 = arith.constant dense<0.000000e+00> : vector<8x64xf32>
    %70 = tpu.matmul %67, %69, %cst_55 {dimension_numbers = #tpu.dot_dimension_numbers<[1], [0], [0], [1], [0, 0, 1, 1], [], []>} : vector<8x16xf32>, vector<16x64xf32>, vector<8x64xf32> -> vector<8x64xf32>
    %71 = arith.addf %33, %70 : vector<8x64xf32>
    %c0_56 = arith.constant 0 : index
    %c1 = arith.constant 1 : index
    %c0_57 = arith.constant 0 : index
    %c0_58 = arith.constant 0 : index
    %72 = vector.load %arg6[%c0_56, %c1, %c0_57, %c0_58] : memref<2x4x64x16xf32, #tpu.memory_space<vmem>>, vector<1x1x64x16xf32>
    %73 = vector.shape_cast %72 : vector<1x1x64x16xf32> to vector<64x16xf32>
    %cst_59 = arith.constant dense<0.000000e+00> : vector<8x16xf32>
    %74 = tpu.matmul %32, %73, %cst_59 {dimension_numbers = #tpu.dot_dimension_numbers<[1], [0], [0], [1], [0, 0, 1, 1], [], []>} : vector<8x64xf32>, vector<64x16xf32>, vector<8x16xf32> -> vector<8x16xf32>
    %c0_60 = arith.constant 0 : index
    %c1_61 = arith.constant 1 : index
    %c0_62 = arith.constant 0 : index
    %c0_63 = arith.constant 0 : index
    %75 = vector.load %arg9[%c0_60, %c1_61, %c0_62, %c0_63] : memref<2x4x1x16xf32, #tpu.memory_space<vmem>>, vector<1x1x1x16xf32>
    %76 = vector.shape_cast %75 : vector<1x1x1x16xf32> to vector<1x16xf32>
    %77 = vector.broadcast %76 : vector<1x16xf32> to vector<8x16xf32>
    %78 = arith.addf %74, %77 : vector<8x16xf32>
    %c0_64 = arith.constant 0 : index
    %c1_65 = arith.constant 1 : index
    %c0_66 = arith.constant 0 : index
    %c0_67 = arith.constant 0 : index
    %79 = vector.load %arg7[%c0_64, %c1_65, %c0_66, %c0_67] : memref<2x4x64x16xf32, #tpu.memory_space<vmem>>, vector<1x1x64x16xf32>
    %80 = vector.shape_cast %79 : vector<1x1x64x16xf32> to vector<64x16xf32>
    %cst_68 = arith.constant dense<0.000000e+00> : vector<8x16xf32>
    %81 = tpu.matmul %32, %80, %cst_68 {dimension_numbers = #tpu.dot_dimension_numbers<[1], [0], [0], [1], [0, 0, 1, 1], [], []>} : vector<8x64xf32>, vector<64x16xf32>, vector<8x16xf32> -> vector<8x16xf32>
    %c0_69 = arith.constant 0 : index
    %c1_70 = arith.constant 1 : index
    %c0_71 = arith.constant 0 : index
    %c0_72 = arith.constant 0 : index
    %82 = vector.load %arg10[%c0_69, %c1_70, %c0_71, %c0_72] : memref<2x4x1x16xf32, #tpu.memory_space<vmem>>, vector<1x1x1x16xf32>
    %83 = vector.shape_cast %82 : vector<1x1x1x16xf32> to vector<1x16xf32>
    %84 = vector.broadcast %83 : vector<1x16xf32> to vector<8x16xf32>
    %85 = arith.addf %81, %84 : vector<8x16xf32>
    %c0_73 = arith.constant 0 : index
    %c1_74 = arith.constant 1 : index
    %c0_75 = arith.constant 0 : index
    %c0_76 = arith.constant 0 : index
    %86 = vector.load %arg8[%c0_73, %c1_74, %c0_75, %c0_76] : memref<2x4x64x16xf32, #tpu.memory_space<vmem>>, vector<1x1x64x16xf32>
    %87 = vector.shape_cast %86 : vector<1x1x64x16xf32> to vector<64x16xf32>
    %cst_77 = arith.constant dense<0.000000e+00> : vector<8x16xf32>
    %88 = tpu.matmul %32, %87, %cst_77 {dimension_numbers = #tpu.dot_dimension_numbers<[1], [0], [0], [1], [0, 0, 1, 1], [], []>} : vector<8x64xf32>, vector<64x16xf32>, vector<8x16xf32> -> vector<8x16xf32>
    %c0_78 = arith.constant 0 : index
    %c1_79 = arith.constant 1 : index
    %c0_80 = arith.constant 0 : index
    %c0_81 = arith.constant 0 : index
    %89 = vector.load %arg11[%c0_78, %c1_79, %c0_80, %c0_81] : memref<2x4x1x16xf32, #tpu.memory_space<vmem>>, vector<1x1x1x16xf32>
    %90 = vector.shape_cast %89 : vector<1x1x1x16xf32> to vector<1x16xf32>
    %91 = vector.broadcast %90 : vector<1x16xf32> to vector<8x16xf32>
    %92 = arith.addf %88, %91 : vector<8x16xf32>
    %cst_82 = arith.constant dense<0.000000e+00> : vector<8x8xf32>
    %93 = tpu.matmul %78, %85, %cst_82 {dimension_numbers = #tpu.dot_dimension_numbers<[1], [1], [0], [0], [0, 0, 1, 0], [], []>} : vector<8x16xf32>, vector<8x16xf32>, vector<8x8xf32> -> vector<8x8xf32>
    %cst_83 = arith.constant 2.500000e-01 : f32
    %94 = vector.broadcast %cst_83 : f32 to vector<8x8xf32>
    %95 = arith.mulf %93, %94 : vector<8x8xf32>
    %cst_84 = arith.constant dense<0xFF800000> : vector<8xf32>
    %96 = vector.multi_reduction <maximumf>, %95, %cst_84 [1] : vector<8x8xf32> to vector<8xf32>
    %97 = vector.shape_cast %96 : vector<8xf32> to vector<8x1xf32>
    %98 = vector.broadcast %97 : vector<8x1xf32> to vector<8x8xf32>
    %99 = arith.subf %95, %98 : vector<8x8xf32>
    %100 = math.exp %99 : vector<8x8xf32>
    %cst_85 = arith.constant dense<0.000000e+00> : vector<8xf32>
    %101 = vector.multi_reduction <add>, %100, %cst_85 [1] : vector<8x8xf32> to vector<8xf32>
    %102 = vector.shape_cast %101 : vector<8xf32> to vector<8x1xf32>
    %103 = vector.broadcast %102 : vector<8x1xf32> to vector<8x8xf32>
    %104 = arith.divf %100, %103 : vector<8x8xf32>
    %cst_86 = arith.constant dense<0.000000e+00> : vector<8x16xf32>
    %105 = tpu.matmul %104, %92, %cst_86 {dimension_numbers = #tpu.dot_dimension_numbers<[1], [0], [0], [1], [0, 0, 1, 1], [], []>} : vector<8x8xf32>, vector<8x16xf32>, vector<8x16xf32> -> vector<8x16xf32>
    %c0_87 = arith.constant 0 : index
    %c1_88 = arith.constant 1 : index
    %c0_89 = arith.constant 0 : index
    %c0_90 = arith.constant 0 : index
    %106 = vector.load %arg12[%c0_87, %c1_88, %c0_89, %c0_90] : memref<2x4x16x64xf32, #tpu.memory_space<vmem>>, vector<1x1x16x64xf32>
    %107 = vector.shape_cast %106 : vector<1x1x16x64xf32> to vector<16x64xf32>
    %cst_91 = arith.constant dense<0.000000e+00> : vector<8x64xf32>
    %108 = tpu.matmul %105, %107, %cst_91 {dimension_numbers = #tpu.dot_dimension_numbers<[1], [0], [0], [1], [0, 0, 1, 1], [], []>} : vector<8x16xf32>, vector<16x64xf32>, vector<8x64xf32> -> vector<8x64xf32>
    %109 = arith.addf %71, %108 : vector<8x64xf32>
    %c0_92 = arith.constant 0 : index
    %c2 = arith.constant 2 : index
    %c0_93 = arith.constant 0 : index
    %c0_94 = arith.constant 0 : index
    %110 = vector.load %arg6[%c0_92, %c2, %c0_93, %c0_94] : memref<2x4x64x16xf32, #tpu.memory_space<vmem>>, vector<1x1x64x16xf32>
    %111 = vector.shape_cast %110 : vector<1x1x64x16xf32> to vector<64x16xf32>
    %cst_95 = arith.constant dense<0.000000e+00> : vector<8x16xf32>
    %112 = tpu.matmul %32, %111, %cst_95 {dimension_numbers = #tpu.dot_dimension_numbers<[1], [0], [0], [1], [0, 0, 1, 1], [], []>} : vector<8x64xf32>, vector<64x16xf32>, vector<8x16xf32> -> vector<8x16xf32>
    %c0_96 = arith.constant 0 : index
    %c2_97 = arith.constant 2 : index
    %c0_98 = arith.constant 0 : index
    %c0_99 = arith.constant 0 : index
    %113 = vector.load %arg9[%c0_96, %c2_97, %c0_98, %c0_99] : memref<2x4x1x16xf32, #tpu.memory_space<vmem>>, vector<1x1x1x16xf32>
    %114 = vector.shape_cast %113 : vector<1x1x1x16xf32> to vector<1x16xf32>
    %115 = vector.broadcast %114 : vector<1x16xf32> to vector<8x16xf32>
    %116 = arith.addf %112, %115 : vector<8x16xf32>
    %c0_100 = arith.constant 0 : index
    %c2_101 = arith.constant 2 : index
    %c0_102 = arith.constant 0 : index
    %c0_103 = arith.constant 0 : index
    %117 = vector.load %arg7[%c0_100, %c2_101, %c0_102, %c0_103] : memref<2x4x64x16xf32, #tpu.memory_space<vmem>>, vector<1x1x64x16xf32>
    %118 = vector.shape_cast %117 : vector<1x1x64x16xf32> to vector<64x16xf32>
    %cst_104 = arith.constant dense<0.000000e+00> : vector<8x16xf32>
    %119 = tpu.matmul %32, %118, %cst_104 {dimension_numbers = #tpu.dot_dimension_numbers<[1], [0], [0], [1], [0, 0, 1, 1], [], []>} : vector<8x64xf32>, vector<64x16xf32>, vector<8x16xf32> -> vector<8x16xf32>
    %c0_105 = arith.constant 0 : index
    %c2_106 = arith.constant 2 : index
    %c0_107 = arith.constant 0 : index
    %c0_108 = arith.constant 0 : index
    %120 = vector.load %arg10[%c0_105, %c2_106, %c0_107, %c0_108] : memref<2x4x1x16xf32, #tpu.memory_space<vmem>>, vector<1x1x1x16xf32>
    %121 = vector.shape_cast %120 : vector<1x1x1x16xf32> to vector<1x16xf32>
    %122 = vector.broadcast %121 : vector<1x16xf32> to vector<8x16xf32>
    %123 = arith.addf %119, %122 : vector<8x16xf32>
    %c0_109 = arith.constant 0 : index
    %c2_110 = arith.constant 2 : index
    %c0_111 = arith.constant 0 : index
    %c0_112 = arith.constant 0 : index
    %124 = vector.load %arg8[%c0_109, %c2_110, %c0_111, %c0_112] : memref<2x4x64x16xf32, #tpu.memory_space<vmem>>, vector<1x1x64x16xf32>
    %125 = vector.shape_cast %124 : vector<1x1x64x16xf32> to vector<64x16xf32>
    %cst_113 = arith.constant dense<0.000000e+00> : vector<8x16xf32>
    %126 = tpu.matmul %32, %125, %cst_113 {dimension_numbers = #tpu.dot_dimension_numbers<[1], [0], [0], [1], [0, 0, 1, 1], [], []>} : vector<8x64xf32>, vector<64x16xf32>, vector<8x16xf32> -> vector<8x16xf32>
    %c0_114 = arith.constant 0 : index
    %c2_115 = arith.constant 2 : index
    %c0_116 = arith.constant 0 : index
    %c0_117 = arith.constant 0 : index
    %127 = vector.load %arg11[%c0_114, %c2_115, %c0_116, %c0_117] : memref<2x4x1x16xf32, #tpu.memory_space<vmem>>, vector<1x1x1x16xf32>
    %128 = vector.shape_cast %127 : vector<1x1x1x16xf32> to vector<1x16xf32>
    %129 = vector.broadcast %128 : vector<1x16xf32> to vector<8x16xf32>
    %130 = arith.addf %126, %129 : vector<8x16xf32>
    %cst_118 = arith.constant dense<0.000000e+00> : vector<8x8xf32>
    %131 = tpu.matmul %116, %123, %cst_118 {dimension_numbers = #tpu.dot_dimension_numbers<[1], [1], [0], [0], [0, 0, 1, 0], [], []>} : vector<8x16xf32>, vector<8x16xf32>, vector<8x8xf32> -> vector<8x8xf32>
    %cst_119 = arith.constant 2.500000e-01 : f32
    %132 = vector.broadcast %cst_119 : f32 to vector<8x8xf32>
    %133 = arith.mulf %131, %132 : vector<8x8xf32>
    %cst_120 = arith.constant dense<0xFF800000> : vector<8xf32>
    %134 = vector.multi_reduction <maximumf>, %133, %cst_120 [1] : vector<8x8xf32> to vector<8xf32>
    %135 = vector.shape_cast %134 : vector<8xf32> to vector<8x1xf32>
    %136 = vector.broadcast %135 : vector<8x1xf32> to vector<8x8xf32>
    %137 = arith.subf %133, %136 : vector<8x8xf32>
    %138 = math.exp %137 : vector<8x8xf32>
    %cst_121 = arith.constant dense<0.000000e+00> : vector<8xf32>
    %139 = vector.multi_reduction <add>, %138, %cst_121 [1] : vector<8x8xf32> to vector<8xf32>
    %140 = vector.shape_cast %139 : vector<8xf32> to vector<8x1xf32>
    %141 = vector.broadcast %140 : vector<8x1xf32> to vector<8x8xf32>
    %142 = arith.divf %138, %141 : vector<8x8xf32>
    %cst_122 = arith.constant dense<0.000000e+00> : vector<8x16xf32>
    %143 = tpu.matmul %142, %130, %cst_122 {dimension_numbers = #tpu.dot_dimension_numbers<[1], [0], [0], [1], [0, 0, 1, 1], [], []>} : vector<8x8xf32>, vector<8x16xf32>, vector<8x16xf32> -> vector<8x16xf32>
    %c0_123 = arith.constant 0 : index
    %c2_124 = arith.constant 2 : index
    %c0_125 = arith.constant 0 : index
    %c0_126 = arith.constant 0 : index
    %144 = vector.load %arg12[%c0_123, %c2_124, %c0_125, %c0_126] : memref<2x4x16x64xf32, #tpu.memory_space<vmem>>, vector<1x1x16x64xf32>
    %145 = vector.shape_cast %144 : vector<1x1x16x64xf32> to vector<16x64xf32>
    %cst_127 = arith.constant dense<0.000000e+00> : vector<8x64xf32>
    %146 = tpu.matmul %143, %145, %cst_127 {dimension_numbers = #tpu.dot_dimension_numbers<[1], [0], [0], [1], [0, 0, 1, 1], [], []>} : vector<8x16xf32>, vector<16x64xf32>, vector<8x64xf32> -> vector<8x64xf32>
    %147 = arith.addf %109, %146 : vector<8x64xf32>
    %c0_128 = arith.constant 0 : index
    %c3 = arith.constant 3 : index
    %c0_129 = arith.constant 0 : index
    %c0_130 = arith.constant 0 : index
    %148 = vector.load %arg6[%c0_128, %c3, %c0_129, %c0_130] : memref<2x4x64x16xf32, #tpu.memory_space<vmem>>, vector<1x1x64x16xf32>
    %149 = vector.shape_cast %148 : vector<1x1x64x16xf32> to vector<64x16xf32>
    %cst_131 = arith.constant dense<0.000000e+00> : vector<8x16xf32>
    %150 = tpu.matmul %32, %149, %cst_131 {dimension_numbers = #tpu.dot_dimension_numbers<[1], [0], [0], [1], [0, 0, 1, 1], [], []>} : vector<8x64xf32>, vector<64x16xf32>, vector<8x16xf32> -> vector<8x16xf32>
    %c0_132 = arith.constant 0 : index
    %c3_133 = arith.constant 3 : index
    %c0_134 = arith.constant 0 : index
    %c0_135 = arith.constant 0 : index
    %151 = vector.load %arg9[%c0_132, %c3_133, %c0_134, %c0_135] : memref<2x4x1x16xf32, #tpu.memory_space<vmem>>, vector<1x1x1x16xf32>
    %152 = vector.shape_cast %151 : vector<1x1x1x16xf32> to vector<1x16xf32>
    %153 = vector.broadcast %152 : vector<1x16xf32> to vector<8x16xf32>
    %154 = arith.addf %150, %153 : vector<8x16xf32>
    %c0_136 = arith.constant 0 : index
    %c3_137 = arith.constant 3 : index
    %c0_138 = arith.constant 0 : index
    %c0_139 = arith.constant 0 : index
    %155 = vector.load %arg7[%c0_136, %c3_137, %c0_138, %c0_139] : memref<2x4x64x16xf32, #tpu.memory_space<vmem>>, vector<1x1x64x16xf32>
    %156 = vector.shape_cast %155 : vector<1x1x64x16xf32> to vector<64x16xf32>
    %cst_140 = arith.constant dense<0.000000e+00> : vector<8x16xf32>
    %157 = tpu.matmul %32, %156, %cst_140 {dimension_numbers = #tpu.dot_dimension_numbers<[1], [0], [0], [1], [0, 0, 1, 1], [], []>} : vector<8x64xf32>, vector<64x16xf32>, vector<8x16xf32> -> vector<8x16xf32>
    %c0_141 = arith.constant 0 : index
    %c3_142 = arith.constant 3 : index
    %c0_143 = arith.constant 0 : index
    %c0_144 = arith.constant 0 : index
    %158 = vector.load %arg10[%c0_141, %c3_142, %c0_143, %c0_144] : memref<2x4x1x16xf32, #tpu.memory_space<vmem>>, vector<1x1x1x16xf32>
    %159 = vector.shape_cast %158 : vector<1x1x1x16xf32> to vector<1x16xf32>
    %160 = vector.broadcast %159 : vector<1x16xf32> to vector<8x16xf32>
    %161 = arith.addf %157, %160 : vector<8x16xf32>
    %c0_145 = arith.constant 0 : index
    %c3_146 = arith.constant 3 : index
    %c0_147 = arith.constant 0 : index
    %c0_148 = arith.constant 0 : index
    %162 = vector.load %arg8[%c0_145, %c3_146, %c0_147, %c0_148] : memref<2x4x64x16xf32, #tpu.memory_space<vmem>>, vector<1x1x64x16xf32>
    %163 = vector.shape_cast %162 : vector<1x1x64x16xf32> to vector<64x16xf32>
    %cst_149 = arith.constant dense<0.000000e+00> : vector<8x16xf32>
    %164 = tpu.matmul %32, %163, %cst_149 {dimension_numbers = #tpu.dot_dimension_numbers<[1], [0], [0], [1], [0, 0, 1, 1], [], []>} : vector<8x64xf32>, vector<64x16xf32>, vector<8x16xf32> -> vector<8x16xf32>
    %c0_150 = arith.constant 0 : index
    %c3_151 = arith.constant 3 : index
    %c0_152 = arith.constant 0 : index
    %c0_153 = arith.constant 0 : index
    %165 = vector.load %arg11[%c0_150, %c3_151, %c0_152, %c0_153] : memref<2x4x1x16xf32, #tpu.memory_space<vmem>>, vector<1x1x1x16xf32>
    %166 = vector.shape_cast %165 : vector<1x1x1x16xf32> to vector<1x16xf32>
    %167 = vector.broadcast %166 : vector<1x16xf32> to vector<8x16xf32>
    %168 = arith.addf %164, %167 : vector<8x16xf32>
    %cst_154 = arith.constant dense<0.000000e+00> : vector<8x8xf32>
    %169 = tpu.matmul %154, %161, %cst_154 {dimension_numbers = #tpu.dot_dimension_numbers<[1], [1], [0], [0], [0, 0, 1, 0], [], []>} : vector<8x16xf32>, vector<8x16xf32>, vector<8x8xf32> -> vector<8x8xf32>
    %cst_155 = arith.constant 2.500000e-01 : f32
    %170 = vector.broadcast %cst_155 : f32 to vector<8x8xf32>
    %171 = arith.mulf %169, %170 : vector<8x8xf32>
    %cst_156 = arith.constant dense<0xFF800000> : vector<8xf32>
    %172 = vector.multi_reduction <maximumf>, %171, %cst_156 [1] : vector<8x8xf32> to vector<8xf32>
    %173 = vector.shape_cast %172 : vector<8xf32> to vector<8x1xf32>
    %174 = vector.broadcast %173 : vector<8x1xf32> to vector<8x8xf32>
    %175 = arith.subf %171, %174 : vector<8x8xf32>
    %176 = math.exp %175 : vector<8x8xf32>
    %cst_157 = arith.constant dense<0.000000e+00> : vector<8xf32>
    %177 = vector.multi_reduction <add>, %176, %cst_157 [1] : vector<8x8xf32> to vector<8xf32>
    %178 = vector.shape_cast %177 : vector<8xf32> to vector<8x1xf32>
    %179 = vector.broadcast %178 : vector<8x1xf32> to vector<8x8xf32>
    %180 = arith.divf %176, %179 : vector<8x8xf32>
    %cst_158 = arith.constant dense<0.000000e+00> : vector<8x16xf32>
    %181 = tpu.matmul %180, %168, %cst_158 {dimension_numbers = #tpu.dot_dimension_numbers<[1], [0], [0], [1], [0, 0, 1, 1], [], []>} : vector<8x8xf32>, vector<8x16xf32>, vector<8x16xf32> -> vector<8x16xf32>
    %c0_159 = arith.constant 0 : index
    %c3_160 = arith.constant 3 : index
    %c0_161 = arith.constant 0 : index
    %c0_162 = arith.constant 0 : index
    %182 = vector.load %arg12[%c0_159, %c3_160, %c0_161, %c0_162] : memref<2x4x16x64xf32, #tpu.memory_space<vmem>>, vector<1x1x16x64xf32>
    %183 = vector.shape_cast %182 : vector<1x1x16x64xf32> to vector<16x64xf32>
    %cst_163 = arith.constant dense<0.000000e+00> : vector<8x64xf32>
    %184 = tpu.matmul %181, %183, %cst_163 {dimension_numbers = #tpu.dot_dimension_numbers<[1], [0], [0], [1], [0, 0, 1, 1], [], []>} : vector<8x16xf32>, vector<16x64xf32>, vector<8x64xf32> -> vector<8x64xf32>
    %185 = arith.addf %147, %184 : vector<8x64xf32>
    %186 = vector.extract_strided_slice %31 {offsets = [8, 0], sizes = [8, 64], strides = [1, 1]} : vector<16x64xf32> to vector<8x64xf32>
    %cst_164 = arith.constant 0.000000e+00 : f32
    %187 = vector.broadcast %cst_164 : f32 to vector<8x64xf32>
    %c0_165 = arith.constant 0 : index
    %c0_166 = arith.constant 0 : index
    %c0_167 = arith.constant 0 : index
    %c0_168 = arith.constant 0 : index
    %188 = vector.load %arg6[%c0_165, %c0_166, %c0_167, %c0_168] : memref<2x4x64x16xf32, #tpu.memory_space<vmem>>, vector<1x1x64x16xf32>
    %189 = vector.shape_cast %188 : vector<1x1x64x16xf32> to vector<64x16xf32>
    %cst_169 = arith.constant dense<0.000000e+00> : vector<8x16xf32>
    %190 = tpu.matmul %186, %189, %cst_169 {dimension_numbers = #tpu.dot_dimension_numbers<[1], [0], [0], [1], [0, 0, 1, 1], [], []>} : vector<8x64xf32>, vector<64x16xf32>, vector<8x16xf32> -> vector<8x16xf32>
    %c0_170 = arith.constant 0 : index
    %c0_171 = arith.constant 0 : index
    %c0_172 = arith.constant 0 : index
    %c0_173 = arith.constant 0 : index
    %191 = vector.load %arg9[%c0_170, %c0_171, %c0_172, %c0_173] : memref<2x4x1x16xf32, #tpu.memory_space<vmem>>, vector<1x1x1x16xf32>
    %192 = vector.shape_cast %191 : vector<1x1x1x16xf32> to vector<1x16xf32>
    %193 = vector.broadcast %192 : vector<1x16xf32> to vector<8x16xf32>
    %194 = arith.addf %190, %193 : vector<8x16xf32>
    %c0_174 = arith.constant 0 : index
    %c0_175 = arith.constant 0 : index
    %c0_176 = arith.constant 0 : index
    %c0_177 = arith.constant 0 : index
    %195 = vector.load %arg7[%c0_174, %c0_175, %c0_176, %c0_177] : memref<2x4x64x16xf32, #tpu.memory_space<vmem>>, vector<1x1x64x16xf32>
    %196 = vector.shape_cast %195 : vector<1x1x64x16xf32> to vector<64x16xf32>
    %cst_178 = arith.constant dense<0.000000e+00> : vector<8x16xf32>
    %197 = tpu.matmul %186, %196, %cst_178 {dimension_numbers = #tpu.dot_dimension_numbers<[1], [0], [0], [1], [0, 0, 1, 1], [], []>} : vector<8x64xf32>, vector<64x16xf32>, vector<8x16xf32> -> vector<8x16xf32>
    %c0_179 = arith.constant 0 : index
    %c0_180 = arith.constant 0 : index
    %c0_181 = arith.constant 0 : index
    %c0_182 = arith.constant 0 : index
    %198 = vector.load %arg10[%c0_179, %c0_180, %c0_181, %c0_182] : memref<2x4x1x16xf32, #tpu.memory_space<vmem>>, vector<1x1x1x16xf32>
    %199 = vector.shape_cast %198 : vector<1x1x1x16xf32> to vector<1x16xf32>
    %200 = vector.broadcast %199 : vector<1x16xf32> to vector<8x16xf32>
    %201 = arith.addf %197, %200 : vector<8x16xf32>
    %c0_183 = arith.constant 0 : index
    %c0_184 = arith.constant 0 : index
    %c0_185 = arith.constant 0 : index
    %c0_186 = arith.constant 0 : index
    %202 = vector.load %arg8[%c0_183, %c0_184, %c0_185, %c0_186] : memref<2x4x64x16xf32, #tpu.memory_space<vmem>>, vector<1x1x64x16xf32>
    %203 = vector.shape_cast %202 : vector<1x1x64x16xf32> to vector<64x16xf32>
    %cst_187 = arith.constant dense<0.000000e+00> : vector<8x16xf32>
    %204 = tpu.matmul %186, %203, %cst_187 {dimension_numbers = #tpu.dot_dimension_numbers<[1], [0], [0], [1], [0, 0, 1, 1], [], []>} : vector<8x64xf32>, vector<64x16xf32>, vector<8x16xf32> -> vector<8x16xf32>
    %c0_188 = arith.constant 0 : index
    %c0_189 = arith.constant 0 : index
    %c0_190 = arith.constant 0 : index
    %c0_191 = arith.constant 0 : index
    %205 = vector.load %arg11[%c0_188, %c0_189, %c0_190, %c0_191] : memref<2x4x1x16xf32, #tpu.memory_space<vmem>>, vector<1x1x1x16xf32>
    %206 = vector.shape_cast %205 : vector<1x1x1x16xf32> to vector<1x16xf32>
    %207 = vector.broadcast %206 : vector<1x16xf32> to vector<8x16xf32>
    %208 = arith.addf %204, %207 : vector<8x16xf32>
    %cst_192 = arith.constant dense<0.000000e+00> : vector<8x8xf32>
    %209 = tpu.matmul %194, %201, %cst_192 {dimension_numbers = #tpu.dot_dimension_numbers<[1], [1], [0], [0], [0, 0, 1, 0], [], []>} : vector<8x16xf32>, vector<8x16xf32>, vector<8x8xf32> -> vector<8x8xf32>
    %cst_193 = arith.constant 2.500000e-01 : f32
    %210 = vector.broadcast %cst_193 : f32 to vector<8x8xf32>
    %211 = arith.mulf %209, %210 : vector<8x8xf32>
    %cst_194 = arith.constant dense<0xFF800000> : vector<8xf32>
    %212 = vector.multi_reduction <maximumf>, %211, %cst_194 [1] : vector<8x8xf32> to vector<8xf32>
    %213 = vector.shape_cast %212 : vector<8xf32> to vector<8x1xf32>
    %214 = vector.broadcast %213 : vector<8x1xf32> to vector<8x8xf32>
    %215 = arith.subf %211, %214 : vector<8x8xf32>
    %216 = math.exp %215 : vector<8x8xf32>
    %cst_195 = arith.constant dense<0.000000e+00> : vector<8xf32>
    %217 = vector.multi_reduction <add>, %216, %cst_195 [1] : vector<8x8xf32> to vector<8xf32>
    %218 = vector.shape_cast %217 : vector<8xf32> to vector<8x1xf32>
    %219 = vector.broadcast %218 : vector<8x1xf32> to vector<8x8xf32>
    %220 = arith.divf %216, %219 : vector<8x8xf32>
    %cst_196 = arith.constant dense<0.000000e+00> : vector<8x16xf32>
    %221 = tpu.matmul %220, %208, %cst_196 {dimension_numbers = #tpu.dot_dimension_numbers<[1], [0], [0], [1], [0, 0, 1, 1], [], []>} : vector<8x8xf32>, vector<8x16xf32>, vector<8x16xf32> -> vector<8x16xf32>
    %c0_197 = arith.constant 0 : index
    %c0_198 = arith.constant 0 : index
    %c0_199 = arith.constant 0 : index
    %c0_200 = arith.constant 0 : index
    %222 = vector.load %arg12[%c0_197, %c0_198, %c0_199, %c0_200] : memref<2x4x16x64xf32, #tpu.memory_space<vmem>>, vector<1x1x16x64xf32>
    %223 = vector.shape_cast %222 : vector<1x1x16x64xf32> to vector<16x64xf32>
    %cst_201 = arith.constant dense<0.000000e+00> : vector<8x64xf32>
    %224 = tpu.matmul %221, %223, %cst_201 {dimension_numbers = #tpu.dot_dimension_numbers<[1], [0], [0], [1], [0, 0, 1, 1], [], []>} : vector<8x16xf32>, vector<16x64xf32>, vector<8x64xf32> -> vector<8x64xf32>
    %225 = arith.addf %187, %224 : vector<8x64xf32>
    %c0_202 = arith.constant 0 : index
    %c1_203 = arith.constant 1 : index
    %c0_204 = arith.constant 0 : index
    %c0_205 = arith.constant 0 : index
    %226 = vector.load %arg6[%c0_202, %c1_203, %c0_204, %c0_205] : memref<2x4x64x16xf32, #tpu.memory_space<vmem>>, vector<1x1x64x16xf32>
    %227 = vector.shape_cast %226 : vector<1x1x64x16xf32> to vector<64x16xf32>
    %cst_206 = arith.constant dense<0.000000e+00> : vector<8x16xf32>
    %228 = tpu.matmul %186, %227, %cst_206 {dimension_numbers = #tpu.dot_dimension_numbers<[1], [0], [0], [1], [0, 0, 1, 1], [], []>} : vector<8x64xf32>, vector<64x16xf32>, vector<8x16xf32> -> vector<8x16xf32>
    %c0_207 = arith.constant 0 : index
    %c1_208 = arith.constant 1 : index
    %c0_209 = arith.constant 0 : index
    %c0_210 = arith.constant 0 : index
    %229 = vector.load %arg9[%c0_207, %c1_208, %c0_209, %c0_210] : memref<2x4x1x16xf32, #tpu.memory_space<vmem>>, vector<1x1x1x16xf32>
    %230 = vector.shape_cast %229 : vector<1x1x1x16xf32> to vector<1x16xf32>
    %231 = vector.broadcast %230 : vector<1x16xf32> to vector<8x16xf32>
    %232 = arith.addf %228, %231 : vector<8x16xf32>
    %c0_211 = arith.constant 0 : index
    %c1_212 = arith.constant 1 : index
    %c0_213 = arith.constant 0 : index
    %c0_214 = arith.constant 0 : index
    %233 = vector.load %arg7[%c0_211, %c1_212, %c0_213, %c0_214] : memref<2x4x64x16xf32, #tpu.memory_space<vmem>>, vector<1x1x64x16xf32>
    %234 = vector.shape_cast %233 : vector<1x1x64x16xf32> to vector<64x16xf32>
    %cst_215 = arith.constant dense<0.000000e+00> : vector<8x16xf32>
    %235 = tpu.matmul %186, %234, %cst_215 {dimension_numbers = #tpu.dot_dimension_numbers<[1], [0], [0], [1], [0, 0, 1, 1], [], []>} : vector<8x64xf32>, vector<64x16xf32>, vector<8x16xf32> -> vector<8x16xf32>
    %c0_216 = arith.constant 0 : index
    %c1_217 = arith.constant 1 : index
    %c0_218 = arith.constant 0 : index
    %c0_219 = arith.constant 0 : index
    %236 = vector.load %arg10[%c0_216, %c1_217, %c0_218, %c0_219] : memref<2x4x1x16xf32, #tpu.memory_space<vmem>>, vector<1x1x1x16xf32>
    %237 = vector.shape_cast %236 : vector<1x1x1x16xf32> to vector<1x16xf32>
    %238 = vector.broadcast %237 : vector<1x16xf32> to vector<8x16xf32>
    %239 = arith.addf %235, %238 : vector<8x16xf32>
    %c0_220 = arith.constant 0 : index
    %c1_221 = arith.constant 1 : index
    %c0_222 = arith.constant 0 : index
    %c0_223 = arith.constant 0 : index
    %240 = vector.load %arg8[%c0_220, %c1_221, %c0_222, %c0_223] : memref<2x4x64x16xf32, #tpu.memory_space<vmem>>, vector<1x1x64x16xf32>
    %241 = vector.shape_cast %240 : vector<1x1x64x16xf32> to vector<64x16xf32>
    %cst_224 = arith.constant dense<0.000000e+00> : vector<8x16xf32>
    %242 = tpu.matmul %186, %241, %cst_224 {dimension_numbers = #tpu.dot_dimension_numbers<[1], [0], [0], [1], [0, 0, 1, 1], [], []>} : vector<8x64xf32>, vector<64x16xf32>, vector<8x16xf32> -> vector<8x16xf32>
    %c0_225 = arith.constant 0 : index
    %c1_226 = arith.constant 1 : index
    %c0_227 = arith.constant 0 : index
    %c0_228 = arith.constant 0 : index
    %243 = vector.load %arg11[%c0_225, %c1_226, %c0_227, %c0_228] : memref<2x4x1x16xf32, #tpu.memory_space<vmem>>, vector<1x1x1x16xf32>
    %244 = vector.shape_cast %243 : vector<1x1x1x16xf32> to vector<1x16xf32>
    %245 = vector.broadcast %244 : vector<1x16xf32> to vector<8x16xf32>
    %246 = arith.addf %242, %245 : vector<8x16xf32>
    %cst_229 = arith.constant dense<0.000000e+00> : vector<8x8xf32>
    %247 = tpu.matmul %232, %239, %cst_229 {dimension_numbers = #tpu.dot_dimension_numbers<[1], [1], [0], [0], [0, 0, 1, 0], [], []>} : vector<8x16xf32>, vector<8x16xf32>, vector<8x8xf32> -> vector<8x8xf32>
    %cst_230 = arith.constant 2.500000e-01 : f32
    %248 = vector.broadcast %cst_230 : f32 to vector<8x8xf32>
    %249 = arith.mulf %247, %248 : vector<8x8xf32>
    %cst_231 = arith.constant dense<0xFF800000> : vector<8xf32>
    %250 = vector.multi_reduction <maximumf>, %249, %cst_231 [1] : vector<8x8xf32> to vector<8xf32>
    %251 = vector.shape_cast %250 : vector<8xf32> to vector<8x1xf32>
    %252 = vector.broadcast %251 : vector<8x1xf32> to vector<8x8xf32>
    %253 = arith.subf %249, %252 : vector<8x8xf32>
    %254 = math.exp %253 : vector<8x8xf32>
    %cst_232 = arith.constant dense<0.000000e+00> : vector<8xf32>
    %255 = vector.multi_reduction <add>, %254, %cst_232 [1] : vector<8x8xf32> to vector<8xf32>
    %256 = vector.shape_cast %255 : vector<8xf32> to vector<8x1xf32>
    %257 = vector.broadcast %256 : vector<8x1xf32> to vector<8x8xf32>
    %258 = arith.divf %254, %257 : vector<8x8xf32>
    %cst_233 = arith.constant dense<0.000000e+00> : vector<8x16xf32>
    %259 = tpu.matmul %258, %246, %cst_233 {dimension_numbers = #tpu.dot_dimension_numbers<[1], [0], [0], [1], [0, 0, 1, 1], [], []>} : vector<8x8xf32>, vector<8x16xf32>, vector<8x16xf32> -> vector<8x16xf32>
    %c0_234 = arith.constant 0 : index
    %c1_235 = arith.constant 1 : index
    %c0_236 = arith.constant 0 : index
    %c0_237 = arith.constant 0 : index
    %260 = vector.load %arg12[%c0_234, %c1_235, %c0_236, %c0_237] : memref<2x4x16x64xf32, #tpu.memory_space<vmem>>, vector<1x1x16x64xf32>
    %261 = vector.shape_cast %260 : vector<1x1x16x64xf32> to vector<16x64xf32>
    %cst_238 = arith.constant dense<0.000000e+00> : vector<8x64xf32>
    %262 = tpu.matmul %259, %261, %cst_238 {dimension_numbers = #tpu.dot_dimension_numbers<[1], [0], [0], [1], [0, 0, 1, 1], [], []>} : vector<8x16xf32>, vector<16x64xf32>, vector<8x64xf32> -> vector<8x64xf32>
    %263 = arith.addf %225, %262 : vector<8x64xf32>
    %c0_239 = arith.constant 0 : index
    %c2_240 = arith.constant 2 : index
    %c0_241 = arith.constant 0 : index
    %c0_242 = arith.constant 0 : index
    %264 = vector.load %arg6[%c0_239, %c2_240, %c0_241, %c0_242] : memref<2x4x64x16xf32, #tpu.memory_space<vmem>>, vector<1x1x64x16xf32>
    %265 = vector.shape_cast %264 : vector<1x1x64x16xf32> to vector<64x16xf32>
    %cst_243 = arith.constant dense<0.000000e+00> : vector<8x16xf32>
    %266 = tpu.matmul %186, %265, %cst_243 {dimension_numbers = #tpu.dot_dimension_numbers<[1], [0], [0], [1], [0, 0, 1, 1], [], []>} : vector<8x64xf32>, vector<64x16xf32>, vector<8x16xf32> -> vector<8x16xf32>
    %c0_244 = arith.constant 0 : index
    %c2_245 = arith.constant 2 : index
    %c0_246 = arith.constant 0 : index
    %c0_247 = arith.constant 0 : index
    %267 = vector.load %arg9[%c0_244, %c2_245, %c0_246, %c0_247] : memref<2x4x1x16xf32, #tpu.memory_space<vmem>>, vector<1x1x1x16xf32>
    %268 = vector.shape_cast %267 : vector<1x1x1x16xf32> to vector<1x16xf32>
    %269 = vector.broadcast %268 : vector<1x16xf32> to vector<8x16xf32>
    %270 = arith.addf %266, %269 : vector<8x16xf32>
    %c0_248 = arith.constant 0 : index
    %c2_249 = arith.constant 2 : index
    %c0_250 = arith.constant 0 : index
    %c0_251 = arith.constant 0 : index
    %271 = vector.load %arg7[%c0_248, %c2_249, %c0_250, %c0_251] : memref<2x4x64x16xf32, #tpu.memory_space<vmem>>, vector<1x1x64x16xf32>
    %272 = vector.shape_cast %271 : vector<1x1x64x16xf32> to vector<64x16xf32>
    %cst_252 = arith.constant dense<0.000000e+00> : vector<8x16xf32>
    %273 = tpu.matmul %186, %272, %cst_252 {dimension_numbers = #tpu.dot_dimension_numbers<[1], [0], [0], [1], [0, 0, 1, 1], [], []>} : vector<8x64xf32>, vector<64x16xf32>, vector<8x16xf32> -> vector<8x16xf32>
    %c0_253 = arith.constant 0 : index
    %c2_254 = arith.constant 2 : index
    %c0_255 = arith.constant 0 : index
    %c0_256 = arith.constant 0 : index
    %274 = vector.load %arg10[%c0_253, %c2_254, %c0_255, %c0_256] : memref<2x4x1x16xf32, #tpu.memory_space<vmem>>, vector<1x1x1x16xf32>
    %275 = vector.shape_cast %274 : vector<1x1x1x16xf32> to vector<1x16xf32>
    %276 = vector.broadcast %275 : vector<1x16xf32> to vector<8x16xf32>
    %277 = arith.addf %273, %276 : vector<8x16xf32>
    %c0_257 = arith.constant 0 : index
    %c2_258 = arith.constant 2 : index
    %c0_259 = arith.constant 0 : index
    %c0_260 = arith.constant 0 : index
    %278 = vector.load %arg8[%c0_257, %c2_258, %c0_259, %c0_260] : memref<2x4x64x16xf32, #tpu.memory_space<vmem>>, vector<1x1x64x16xf32>
    %279 = vector.shape_cast %278 : vector<1x1x64x16xf32> to vector<64x16xf32>
    %cst_261 = arith.constant dense<0.000000e+00> : vector<8x16xf32>
    %280 = tpu.matmul %186, %279, %cst_261 {dimension_numbers = #tpu.dot_dimension_numbers<[1], [0], [0], [1], [0, 0, 1, 1], [], []>} : vector<8x64xf32>, vector<64x16xf32>, vector<8x16xf32> -> vector<8x16xf32>
    %c0_262 = arith.constant 0 : index
    %c2_263 = arith.constant 2 : index
    %c0_264 = arith.constant 0 : index
    %c0_265 = arith.constant 0 : index
    %281 = vector.load %arg11[%c0_262, %c2_263, %c0_264, %c0_265] : memref<2x4x1x16xf32, #tpu.memory_space<vmem>>, vector<1x1x1x16xf32>
    %282 = vector.shape_cast %281 : vector<1x1x1x16xf32> to vector<1x16xf32>
    %283 = vector.broadcast %282 : vector<1x16xf32> to vector<8x16xf32>
    %284 = arith.addf %280, %283 : vector<8x16xf32>
    %cst_266 = arith.constant dense<0.000000e+00> : vector<8x8xf32>
    %285 = tpu.matmul %270, %277, %cst_266 {dimension_numbers = #tpu.dot_dimension_numbers<[1], [1], [0], [0], [0, 0, 1, 0], [], []>} : vector<8x16xf32>, vector<8x16xf32>, vector<8x8xf32> -> vector<8x8xf32>
    %cst_267 = arith.constant 2.500000e-01 : f32
    %286 = vector.broadcast %cst_267 : f32 to vector<8x8xf32>
    %287 = arith.mulf %285, %286 : vector<8x8xf32>
    %cst_268 = arith.constant dense<0xFF800000> : vector<8xf32>
    %288 = vector.multi_reduction <maximumf>, %287, %cst_268 [1] : vector<8x8xf32> to vector<8xf32>
    %289 = vector.shape_cast %288 : vector<8xf32> to vector<8x1xf32>
    %290 = vector.broadcast %289 : vector<8x1xf32> to vector<8x8xf32>
    %291 = arith.subf %287, %290 : vector<8x8xf32>
    %292 = math.exp %291 : vector<8x8xf32>
    %cst_269 = arith.constant dense<0.000000e+00> : vector<8xf32>
    %293 = vector.multi_reduction <add>, %292, %cst_269 [1] : vector<8x8xf32> to vector<8xf32>
    %294 = vector.shape_cast %293 : vector<8xf32> to vector<8x1xf32>
    %295 = vector.broadcast %294 : vector<8x1xf32> to vector<8x8xf32>
    %296 = arith.divf %292, %295 : vector<8x8xf32>
    %cst_270 = arith.constant dense<0.000000e+00> : vector<8x16xf32>
    %297 = tpu.matmul %296, %284, %cst_270 {dimension_numbers = #tpu.dot_dimension_numbers<[1], [0], [0], [1], [0, 0, 1, 1], [], []>} : vector<8x8xf32>, vector<8x16xf32>, vector<8x16xf32> -> vector<8x16xf32>
    %c0_271 = arith.constant 0 : index
    %c2_272 = arith.constant 2 : index
    %c0_273 = arith.constant 0 : index
    %c0_274 = arith.constant 0 : index
    %298 = vector.load %arg12[%c0_271, %c2_272, %c0_273, %c0_274] : memref<2x4x16x64xf32, #tpu.memory_space<vmem>>, vector<1x1x16x64xf32>
    %299 = vector.shape_cast %298 : vector<1x1x16x64xf32> to vector<16x64xf32>
    %cst_275 = arith.constant dense<0.000000e+00> : vector<8x64xf32>
    %300 = tpu.matmul %297, %299, %cst_275 {dimension_numbers = #tpu.dot_dimension_numbers<[1], [0], [0], [1], [0, 0, 1, 1], [], []>} : vector<8x16xf32>, vector<16x64xf32>, vector<8x64xf32> -> vector<8x64xf32>
    %301 = arith.addf %263, %300 : vector<8x64xf32>
    %c0_276 = arith.constant 0 : index
    %c3_277 = arith.constant 3 : index
    %c0_278 = arith.constant 0 : index
    %c0_279 = arith.constant 0 : index
    %302 = vector.load %arg6[%c0_276, %c3_277, %c0_278, %c0_279] : memref<2x4x64x16xf32, #tpu.memory_space<vmem>>, vector<1x1x64x16xf32>
    %303 = vector.shape_cast %302 : vector<1x1x64x16xf32> to vector<64x16xf32>
    %cst_280 = arith.constant dense<0.000000e+00> : vector<8x16xf32>
    %304 = tpu.matmul %186, %303, %cst_280 {dimension_numbers = #tpu.dot_dimension_numbers<[1], [0], [0], [1], [0, 0, 1, 1], [], []>} : vector<8x64xf32>, vector<64x16xf32>, vector<8x16xf32> -> vector<8x16xf32>
    %c0_281 = arith.constant 0 : index
    %c3_282 = arith.constant 3 : index
    %c0_283 = arith.constant 0 : index
    %c0_284 = arith.constant 0 : index
    %305 = vector.load %arg9[%c0_281, %c3_282, %c0_283, %c0_284] : memref<2x4x1x16xf32, #tpu.memory_space<vmem>>, vector<1x1x1x16xf32>
    %306 = vector.shape_cast %305 : vector<1x1x1x16xf32> to vector<1x16xf32>
    %307 = vector.broadcast %306 : vector<1x16xf32> to vector<8x16xf32>
    %308 = arith.addf %304, %307 : vector<8x16xf32>
    %c0_285 = arith.constant 0 : index
    %c3_286 = arith.constant 3 : index
    %c0_287 = arith.constant 0 : index
    %c0_288 = arith.constant 0 : index
    %309 = vector.load %arg7[%c0_285, %c3_286, %c0_287, %c0_288] : memref<2x4x64x16xf32, #tpu.memory_space<vmem>>, vector<1x1x64x16xf32>
    %310 = vector.shape_cast %309 : vector<1x1x64x16xf32> to vector<64x16xf32>
    %cst_289 = arith.constant dense<0.000000e+00> : vector<8x16xf32>
    %311 = tpu.matmul %186, %310, %cst_289 {dimension_numbers = #tpu.dot_dimension_numbers<[1], [0], [0], [1], [0, 0, 1, 1], [], []>} : vector<8x64xf32>, vector<64x16xf32>, vector<8x16xf32> -> vector<8x16xf32>
    %c0_290 = arith.constant 0 : index
    %c3_291 = arith.constant 3 : index
    %c0_292 = arith.constant 0 : index
    %c0_293 = arith.constant 0 : index
    %312 = vector.load %arg10[%c0_290, %c3_291, %c0_292, %c0_293] : memref<2x4x1x16xf32, #tpu.memory_space<vmem>>, vector<1x1x1x16xf32>
    %313 = vector.shape_cast %312 : vector<1x1x1x16xf32> to vector<1x16xf32>
    %314 = vector.broadcast %313 : vector<1x16xf32> to vector<8x16xf32>
    %315 = arith.addf %311, %314 : vector<8x16xf32>
    %c0_294 = arith.constant 0 : index
    %c3_295 = arith.constant 3 : index
    %c0_296 = arith.constant 0 : index
    %c0_297 = arith.constant 0 : index
    %316 = vector.load %arg8[%c0_294, %c3_295, %c0_296, %c0_297] : memref<2x4x64x16xf32, #tpu.memory_space<vmem>>, vector<1x1x64x16xf32>
    %317 = vector.shape_cast %316 : vector<1x1x64x16xf32> to vector<64x16xf32>
    %cst_298 = arith.constant dense<0.000000e+00> : vector<8x16xf32>
    %318 = tpu.matmul %186, %317, %cst_298 {dimension_numbers = #tpu.dot_dimension_numbers<[1], [0], [0], [1], [0, 0, 1, 1], [], []>} : vector<8x64xf32>, vector<64x16xf32>, vector<8x16xf32> -> vector<8x16xf32>
    %c0_299 = arith.constant 0 : index
    %c3_300 = arith.constant 3 : index
    %c0_301 = arith.constant 0 : index
    %c0_302 = arith.constant 0 : index
    %319 = vector.load %arg11[%c0_299, %c3_300, %c0_301, %c0_302] : memref<2x4x1x16xf32, #tpu.memory_space<vmem>>, vector<1x1x1x16xf32>
    %320 = vector.shape_cast %319 : vector<1x1x1x16xf32> to vector<1x16xf32>
    %321 = vector.broadcast %320 : vector<1x16xf32> to vector<8x16xf32>
    %322 = arith.addf %318, %321 : vector<8x16xf32>
    %cst_303 = arith.constant dense<0.000000e+00> : vector<8x8xf32>
    %323 = tpu.matmul %308, %315, %cst_303 {dimension_numbers = #tpu.dot_dimension_numbers<[1], [1], [0], [0], [0, 0, 1, 0], [], []>} : vector<8x16xf32>, vector<8x16xf32>, vector<8x8xf32> -> vector<8x8xf32>
    %cst_304 = arith.constant 2.500000e-01 : f32
    %324 = vector.broadcast %cst_304 : f32 to vector<8x8xf32>
    %325 = arith.mulf %323, %324 : vector<8x8xf32>
    %cst_305 = arith.constant dense<0xFF800000> : vector<8xf32>
    %326 = vector.multi_reduction <maximumf>, %325, %cst_305 [1] : vector<8x8xf32> to vector<8xf32>
    %327 = vector.shape_cast %326 : vector<8xf32> to vector<8x1xf32>
    %328 = vector.broadcast %327 : vector<8x1xf32> to vector<8x8xf32>
    %329 = arith.subf %325, %328 : vector<8x8xf32>
    %330 = math.exp %329 : vector<8x8xf32>
    %cst_306 = arith.constant dense<0.000000e+00> : vector<8xf32>
    %331 = vector.multi_reduction <add>, %330, %cst_306 [1] : vector<8x8xf32> to vector<8xf32>
    %332 = vector.shape_cast %331 : vector<8xf32> to vector<8x1xf32>
    %333 = vector.broadcast %332 : vector<8x1xf32> to vector<8x8xf32>
    %334 = arith.divf %330, %333 : vector<8x8xf32>
    %cst_307 = arith.constant dense<0.000000e+00> : vector<8x16xf32>
    %335 = tpu.matmul %334, %322, %cst_307 {dimension_numbers = #tpu.dot_dimension_numbers<[1], [0], [0], [1], [0, 0, 1, 1], [], []>} : vector<8x8xf32>, vector<8x16xf32>, vector<8x16xf32> -> vector<8x16xf32>
    %c0_308 = arith.constant 0 : index
    %c3_309 = arith.constant 3 : index
    %c0_310 = arith.constant 0 : index
    %c0_311 = arith.constant 0 : index
    %336 = vector.load %arg12[%c0_308, %c3_309, %c0_310, %c0_311] : memref<2x4x16x64xf32, #tpu.memory_space<vmem>>, vector<1x1x16x64xf32>
    %337 = vector.shape_cast %336 : vector<1x1x16x64xf32> to vector<16x64xf32>
    %cst_312 = arith.constant dense<0.000000e+00> : vector<8x64xf32>
    %338 = tpu.matmul %335, %337, %cst_312 {dimension_numbers = #tpu.dot_dimension_numbers<[1], [0], [0], [1], [0, 0, 1, 1], [], []>} : vector<8x16xf32>, vector<16x64xf32>, vector<8x64xf32> -> vector<8x64xf32>
    %339 = arith.addf %301, %338 : vector<8x64xf32>
    %340 = tpu.concatenate %185, %339 in 0 : vector<8x64xf32>, vector<8x64xf32> -> vector<16x64xf32>
    %341 = arith.addf %7, %340 : vector<16x64xf32>
    %c0_313 = arith.constant 0 : index
    %c0_314 = arith.constant 0 : index
    %c0_315 = arith.constant 0 : index
    %342 = vector.load %arg13[%c0_313, %c0_314, %c0_315] : memref<2x1x64xf32, #tpu.memory_space<vmem>>, vector<1x1x64xf32>
    %343 = vector.shape_cast %342 : vector<1x1x64xf32> to vector<1x64xf32>
    %344 = vector.broadcast %343 : vector<1x64xf32> to vector<16x64xf32>
    %345 = arith.addf %341, %344 : vector<16x64xf32>
    %c0_316 = arith.constant 0 : index
    %c0_317 = arith.constant 0 : index
    %c0_318 = arith.constant 0 : index
    %346 = vector.load %arg14[%c0_316, %c0_317, %c0_318] : memref<2x1x64xf32, #tpu.memory_space<vmem>>, vector<1x1x64xf32>
    %347 = vector.shape_cast %346 : vector<1x1x64xf32> to vector<1x64xf32>
    %c0_319 = arith.constant 0 : index
    %c0_320 = arith.constant 0 : index
    %c0_321 = arith.constant 0 : index
    %348 = vector.load %arg15[%c0_319, %c0_320, %c0_321] : memref<2x1x64xf32, #tpu.memory_space<vmem>>, vector<1x1x64xf32>
    %349 = vector.shape_cast %348 : vector<1x1x64xf32> to vector<1x64xf32>
    %cst_322 = arith.constant dense<0.000000e+00> : vector<16xf32>
    %350 = vector.multi_reduction <add>, %345, %cst_322 [1] : vector<16x64xf32> to vector<16xf32>
    %351 = vector.shape_cast %350 : vector<16xf32> to vector<16x1xf32>
    %cst_323 = arith.constant 6.400000e+01 : f32
    %352 = vector.broadcast %cst_323 : f32 to vector<16x1xf32>
    %353 = arith.divf %351, %352 : vector<16x1xf32>
    %354 = vector.broadcast %353 : vector<16x1xf32> to vector<16x64xf32>
    %355 = arith.subf %345, %354 : vector<16x64xf32>
    %356 = arith.mulf %355, %355 : vector<16x64xf32>
    %cst_324 = arith.constant dense<0.000000e+00> : vector<16xf32>
    %357 = vector.multi_reduction <add>, %356, %cst_324 [1] : vector<16x64xf32> to vector<16xf32>
    %358 = vector.shape_cast %357 : vector<16xf32> to vector<16x1xf32>
    %cst_325 = arith.constant 6.400000e+01 : f32
    %359 = vector.broadcast %cst_325 : f32 to vector<16x1xf32>
    %360 = arith.divf %358, %359 : vector<16x1xf32>
    %cst_326 = arith.constant 9.99999997E-7 : f32
    %361 = vector.broadcast %cst_326 : f32 to vector<16x1xf32>
    %362 = arith.addf %360, %361 : vector<16x1xf32>
    %363 = math.rsqrt %362 : vector<16x1xf32>
    %364 = vector.broadcast %363 : vector<16x1xf32> to vector<16x64xf32>
    %365 = arith.mulf %355, %364 : vector<16x64xf32>
    %366 = vector.broadcast %347 : vector<1x64xf32> to vector<16x64xf32>
    %367 = arith.mulf %365, %366 : vector<16x64xf32>
    %368 = vector.broadcast %349 : vector<1x64xf32> to vector<16x64xf32>
    %369 = arith.addf %367, %368 : vector<16x64xf32>
    %c0_327 = arith.constant 0 : index
    %c0_328 = arith.constant 0 : index
    %c0_329 = arith.constant 0 : index
    %370 = vector.load %arg16[%c0_327, %c0_328, %c0_329] : memref<2x64x128xf32, #tpu.memory_space<vmem>>, vector<1x64x128xf32>
    %371 = vector.shape_cast %370 : vector<1x64x128xf32> to vector<64x128xf32>
    %cst_330 = arith.constant dense<0.000000e+00> : vector<16x128xf32>
    %372 = tpu.matmul %369, %371, %cst_330 {dimension_numbers = #tpu.dot_dimension_numbers<[1], [0], [0], [1], [0, 0, 1, 1], [], []>} : vector<16x64xf32>, vector<64x128xf32>, vector<16x128xf32> -> vector<16x128xf32>
    %c0_331 = arith.constant 0 : index
    %c0_332 = arith.constant 0 : index
    %c0_333 = arith.constant 0 : index
    %373 = vector.load %arg17[%c0_331, %c0_332, %c0_333] : memref<2x1x128xf32, #tpu.memory_space<vmem>>, vector<1x1x128xf32>
    %374 = vector.shape_cast %373 : vector<1x1x128xf32> to vector<1x128xf32>
    %375 = vector.broadcast %374 : vector<1x128xf32> to vector<16x128xf32>
    %376 = arith.addf %372, %375 : vector<16x128xf32>
    %cst_334 = arith.constant 5.000000e-01 : f32
    %377 = vector.broadcast %cst_334 : f32 to vector<16x128xf32>
    %378 = arith.mulf %377, %376 : vector<16x128xf32>
    %cst_335 = arith.constant 4.471500e-02 : f32
    %379 = vector.broadcast %cst_335 : f32 to vector<16x128xf32>
    %380 = arith.mulf %379, %376 : vector<16x128xf32>
    %381 = arith.mulf %380, %376 : vector<16x128xf32>
    %382 = arith.mulf %381, %376 : vector<16x128xf32>
    %383 = arith.addf %376, %382 : vector<16x128xf32>
    %cst_336 = arith.constant 0.797884583 : f32
    %384 = vector.broadcast %cst_336 : f32 to vector<16x128xf32>
    %385 = arith.mulf %384, %383 : vector<16x128xf32>
    %386 = math.tanh %385 : vector<16x128xf32>
    %cst_337 = arith.constant 1.000000e+00 : f32
    %387 = vector.broadcast %cst_337 : f32 to vector<16x128xf32>
    %388 = arith.addf %387, %386 : vector<16x128xf32>
    %389 = arith.mulf %378, %388 : vector<16x128xf32>
    %c0_338 = arith.constant 0 : index
    %c0_339 = arith.constant 0 : index
    %c0_340 = arith.constant 0 : index
    %390 = vector.load %arg18[%c0_338, %c0_339, %c0_340] : memref<2x128x64xf32, #tpu.memory_space<vmem>>, vector<1x128x64xf32>
    %391 = vector.shape_cast %390 : vector<1x128x64xf32> to vector<128x64xf32>
    %cst_341 = arith.constant dense<0.000000e+00> : vector<16x64xf32>
    %392 = tpu.matmul %389, %391, %cst_341 {dimension_numbers = #tpu.dot_dimension_numbers<[1], [0], [0], [1], [0, 0, 1, 1], [], []>} : vector<16x128xf32>, vector<128x64xf32>, vector<16x64xf32> -> vector<16x64xf32>
    %393 = arith.addf %345, %392 : vector<16x64xf32>
    %c0_342 = arith.constant 0 : index
    %c0_343 = arith.constant 0 : index
    %c0_344 = arith.constant 0 : index
    %394 = vector.load %arg19[%c0_342, %c0_343, %c0_344] : memref<2x1x64xf32, #tpu.memory_space<vmem>>, vector<1x1x64xf32>
    %395 = vector.shape_cast %394 : vector<1x1x64xf32> to vector<1x64xf32>
    %396 = vector.broadcast %395 : vector<1x64xf32> to vector<16x64xf32>
    %397 = arith.addf %393, %396 : vector<16x64xf32>
    %c1_345 = arith.constant 1 : index
    %c0_346 = arith.constant 0 : index
    %c0_347 = arith.constant 0 : index
    %398 = vector.load %arg4[%c1_345, %c0_346, %c0_347] : memref<2x1x64xf32, #tpu.memory_space<vmem>>, vector<1x1x64xf32>
    %399 = vector.shape_cast %398 : vector<1x1x64xf32> to vector<1x64xf32>
    %c1_348 = arith.constant 1 : index
    %c0_349 = arith.constant 0 : index
    %c0_350 = arith.constant 0 : index
    %400 = vector.load %arg5[%c1_348, %c0_349, %c0_350] : memref<2x1x64xf32, #tpu.memory_space<vmem>>, vector<1x1x64xf32>
    %401 = vector.shape_cast %400 : vector<1x1x64xf32> to vector<1x64xf32>
    %cst_351 = arith.constant dense<0.000000e+00> : vector<16xf32>
    %402 = vector.multi_reduction <add>, %397, %cst_351 [1] : vector<16x64xf32> to vector<16xf32>
    %403 = vector.shape_cast %402 : vector<16xf32> to vector<16x1xf32>
    %cst_352 = arith.constant 6.400000e+01 : f32
    %404 = vector.broadcast %cst_352 : f32 to vector<16x1xf32>
    %405 = arith.divf %403, %404 : vector<16x1xf32>
    %406 = vector.broadcast %405 : vector<16x1xf32> to vector<16x64xf32>
    %407 = arith.subf %397, %406 : vector<16x64xf32>
    %408 = arith.mulf %407, %407 : vector<16x64xf32>
    %cst_353 = arith.constant dense<0.000000e+00> : vector<16xf32>
    %409 = vector.multi_reduction <add>, %408, %cst_353 [1] : vector<16x64xf32> to vector<16xf32>
    %410 = vector.shape_cast %409 : vector<16xf32> to vector<16x1xf32>
    %cst_354 = arith.constant 6.400000e+01 : f32
    %411 = vector.broadcast %cst_354 : f32 to vector<16x1xf32>
    %412 = arith.divf %410, %411 : vector<16x1xf32>
    %cst_355 = arith.constant 9.99999997E-7 : f32
    %413 = vector.broadcast %cst_355 : f32 to vector<16x1xf32>
    %414 = arith.addf %412, %413 : vector<16x1xf32>
    %415 = math.rsqrt %414 : vector<16x1xf32>
    %416 = vector.broadcast %415 : vector<16x1xf32> to vector<16x64xf32>
    %417 = arith.mulf %407, %416 : vector<16x64xf32>
    %418 = vector.broadcast %399 : vector<1x64xf32> to vector<16x64xf32>
    %419 = arith.mulf %417, %418 : vector<16x64xf32>
    %420 = vector.broadcast %401 : vector<1x64xf32> to vector<16x64xf32>
    %421 = arith.addf %419, %420 : vector<16x64xf32>
    %422 = vector.extract_strided_slice %421 {offsets = [0, 0], sizes = [8, 64], strides = [1, 1]} : vector<16x64xf32> to vector<8x64xf32>
    %cst_356 = arith.constant 0.000000e+00 : f32
    %423 = vector.broadcast %cst_356 : f32 to vector<8x64xf32>
    %c1_357 = arith.constant 1 : index
    %c0_358 = arith.constant 0 : index
    %c0_359 = arith.constant 0 : index
    %c0_360 = arith.constant 0 : index
    %424 = vector.load %arg6[%c1_357, %c0_358, %c0_359, %c0_360] : memref<2x4x64x16xf32, #tpu.memory_space<vmem>>, vector<1x1x64x16xf32>
    %425 = vector.shape_cast %424 : vector<1x1x64x16xf32> to vector<64x16xf32>
    %cst_361 = arith.constant dense<0.000000e+00> : vector<8x16xf32>
    %426 = tpu.matmul %422, %425, %cst_361 {dimension_numbers = #tpu.dot_dimension_numbers<[1], [0], [0], [1], [0, 0, 1, 1], [], []>} : vector<8x64xf32>, vector<64x16xf32>, vector<8x16xf32> -> vector<8x16xf32>
    %c1_362 = arith.constant 1 : index
    %c0_363 = arith.constant 0 : index
    %c0_364 = arith.constant 0 : index
    %c0_365 = arith.constant 0 : index
    %427 = vector.load %arg9[%c1_362, %c0_363, %c0_364, %c0_365] : memref<2x4x1x16xf32, #tpu.memory_space<vmem>>, vector<1x1x1x16xf32>
    %428 = vector.shape_cast %427 : vector<1x1x1x16xf32> to vector<1x16xf32>
    %429 = vector.broadcast %428 : vector<1x16xf32> to vector<8x16xf32>
    %430 = arith.addf %426, %429 : vector<8x16xf32>
    %c1_366 = arith.constant 1 : index
    %c0_367 = arith.constant 0 : index
    %c0_368 = arith.constant 0 : index
    %c0_369 = arith.constant 0 : index
    %431 = vector.load %arg7[%c1_366, %c0_367, %c0_368, %c0_369] : memref<2x4x64x16xf32, #tpu.memory_space<vmem>>, vector<1x1x64x16xf32>
    %432 = vector.shape_cast %431 : vector<1x1x64x16xf32> to vector<64x16xf32>
    %cst_370 = arith.constant dense<0.000000e+00> : vector<8x16xf32>
    %433 = tpu.matmul %422, %432, %cst_370 {dimension_numbers = #tpu.dot_dimension_numbers<[1], [0], [0], [1], [0, 0, 1, 1], [], []>} : vector<8x64xf32>, vector<64x16xf32>, vector<8x16xf32> -> vector<8x16xf32>
    %c1_371 = arith.constant 1 : index
    %c0_372 = arith.constant 0 : index
    %c0_373 = arith.constant 0 : index
    %c0_374 = arith.constant 0 : index
    %434 = vector.load %arg10[%c1_371, %c0_372, %c0_373, %c0_374] : memref<2x4x1x16xf32, #tpu.memory_space<vmem>>, vector<1x1x1x16xf32>
    %435 = vector.shape_cast %434 : vector<1x1x1x16xf32> to vector<1x16xf32>
    %436 = vector.broadcast %435 : vector<1x16xf32> to vector<8x16xf32>
    %437 = arith.addf %433, %436 : vector<8x16xf32>
    %c1_375 = arith.constant 1 : index
    %c0_376 = arith.constant 0 : index
    %c0_377 = arith.constant 0 : index
    %c0_378 = arith.constant 0 : index
    %438 = vector.load %arg8[%c1_375, %c0_376, %c0_377, %c0_378] : memref<2x4x64x16xf32, #tpu.memory_space<vmem>>, vector<1x1x64x16xf32>
    %439 = vector.shape_cast %438 : vector<1x1x64x16xf32> to vector<64x16xf32>
    %cst_379 = arith.constant dense<0.000000e+00> : vector<8x16xf32>
    %440 = tpu.matmul %422, %439, %cst_379 {dimension_numbers = #tpu.dot_dimension_numbers<[1], [0], [0], [1], [0, 0, 1, 1], [], []>} : vector<8x64xf32>, vector<64x16xf32>, vector<8x16xf32> -> vector<8x16xf32>
    %c1_380 = arith.constant 1 : index
    %c0_381 = arith.constant 0 : index
    %c0_382 = arith.constant 0 : index
    %c0_383 = arith.constant 0 : index
    %441 = vector.load %arg11[%c1_380, %c0_381, %c0_382, %c0_383] : memref<2x4x1x16xf32, #tpu.memory_space<vmem>>, vector<1x1x1x16xf32>
    %442 = vector.shape_cast %441 : vector<1x1x1x16xf32> to vector<1x16xf32>
    %443 = vector.broadcast %442 : vector<1x16xf32> to vector<8x16xf32>
    %444 = arith.addf %440, %443 : vector<8x16xf32>
    %cst_384 = arith.constant dense<0.000000e+00> : vector<8x8xf32>
    %445 = tpu.matmul %430, %437, %cst_384 {dimension_numbers = #tpu.dot_dimension_numbers<[1], [1], [0], [0], [0, 0, 1, 0], [], []>} : vector<8x16xf32>, vector<8x16xf32>, vector<8x8xf32> -> vector<8x8xf32>
    %cst_385 = arith.constant 2.500000e-01 : f32
    %446 = vector.broadcast %cst_385 : f32 to vector<8x8xf32>
    %447 = arith.mulf %445, %446 : vector<8x8xf32>
    %cst_386 = arith.constant dense<0xFF800000> : vector<8xf32>
    %448 = vector.multi_reduction <maximumf>, %447, %cst_386 [1] : vector<8x8xf32> to vector<8xf32>
    %449 = vector.shape_cast %448 : vector<8xf32> to vector<8x1xf32>
    %450 = vector.broadcast %449 : vector<8x1xf32> to vector<8x8xf32>
    %451 = arith.subf %447, %450 : vector<8x8xf32>
    %452 = math.exp %451 : vector<8x8xf32>
    %cst_387 = arith.constant dense<0.000000e+00> : vector<8xf32>
    %453 = vector.multi_reduction <add>, %452, %cst_387 [1] : vector<8x8xf32> to vector<8xf32>
    %454 = vector.shape_cast %453 : vector<8xf32> to vector<8x1xf32>
    %455 = vector.broadcast %454 : vector<8x1xf32> to vector<8x8xf32>
    %456 = arith.divf %452, %455 : vector<8x8xf32>
    %cst_388 = arith.constant dense<0.000000e+00> : vector<8x16xf32>
    %457 = tpu.matmul %456, %444, %cst_388 {dimension_numbers = #tpu.dot_dimension_numbers<[1], [0], [0], [1], [0, 0, 1, 1], [], []>} : vector<8x8xf32>, vector<8x16xf32>, vector<8x16xf32> -> vector<8x16xf32>
    %c1_389 = arith.constant 1 : index
    %c0_390 = arith.constant 0 : index
    %c0_391 = arith.constant 0 : index
    %c0_392 = arith.constant 0 : index
    %458 = vector.load %arg12[%c1_389, %c0_390, %c0_391, %c0_392] : memref<2x4x16x64xf32, #tpu.memory_space<vmem>>, vector<1x1x16x64xf32>
    %459 = vector.shape_cast %458 : vector<1x1x16x64xf32> to vector<16x64xf32>
    %cst_393 = arith.constant dense<0.000000e+00> : vector<8x64xf32>
    %460 = tpu.matmul %457, %459, %cst_393 {dimension_numbers = #tpu.dot_dimension_numbers<[1], [0], [0], [1], [0, 0, 1, 1], [], []>} : vector<8x16xf32>, vector<16x64xf32>, vector<8x64xf32> -> vector<8x64xf32>
    %461 = arith.addf %423, %460 : vector<8x64xf32>
    %c1_394 = arith.constant 1 : index
    %c1_395 = arith.constant 1 : index
    %c0_396 = arith.constant 0 : index
    %c0_397 = arith.constant 0 : index
    %462 = vector.load %arg6[%c1_394, %c1_395, %c0_396, %c0_397] : memref<2x4x64x16xf32, #tpu.memory_space<vmem>>, vector<1x1x64x16xf32>
    %463 = vector.shape_cast %462 : vector<1x1x64x16xf32> to vector<64x16xf32>
    %cst_398 = arith.constant dense<0.000000e+00> : vector<8x16xf32>
    %464 = tpu.matmul %422, %463, %cst_398 {dimension_numbers = #tpu.dot_dimension_numbers<[1], [0], [0], [1], [0, 0, 1, 1], [], []>} : vector<8x64xf32>, vector<64x16xf32>, vector<8x16xf32> -> vector<8x16xf32>
    %c1_399 = arith.constant 1 : index
    %c1_400 = arith.constant 1 : index
    %c0_401 = arith.constant 0 : index
    %c0_402 = arith.constant 0 : index
    %465 = vector.load %arg9[%c1_399, %c1_400, %c0_401, %c0_402] : memref<2x4x1x16xf32, #tpu.memory_space<vmem>>, vector<1x1x1x16xf32>
    %466 = vector.shape_cast %465 : vector<1x1x1x16xf32> to vector<1x16xf32>
    %467 = vector.broadcast %466 : vector<1x16xf32> to vector<8x16xf32>
    %468 = arith.addf %464, %467 : vector<8x16xf32>
    %c1_403 = arith.constant 1 : index
    %c1_404 = arith.constant 1 : index
    %c0_405 = arith.constant 0 : index
    %c0_406 = arith.constant 0 : index
    %469 = vector.load %arg7[%c1_403, %c1_404, %c0_405, %c0_406] : memref<2x4x64x16xf32, #tpu.memory_space<vmem>>, vector<1x1x64x16xf32>
    %470 = vector.shape_cast %469 : vector<1x1x64x16xf32> to vector<64x16xf32>
    %cst_407 = arith.constant dense<0.000000e+00> : vector<8x16xf32>
    %471 = tpu.matmul %422, %470, %cst_407 {dimension_numbers = #tpu.dot_dimension_numbers<[1], [0], [0], [1], [0, 0, 1, 1], [], []>} : vector<8x64xf32>, vector<64x16xf32>, vector<8x16xf32> -> vector<8x16xf32>
    %c1_408 = arith.constant 1 : index
    %c1_409 = arith.constant 1 : index
    %c0_410 = arith.constant 0 : index
    %c0_411 = arith.constant 0 : index
    %472 = vector.load %arg10[%c1_408, %c1_409, %c0_410, %c0_411] : memref<2x4x1x16xf32, #tpu.memory_space<vmem>>, vector<1x1x1x16xf32>
    %473 = vector.shape_cast %472 : vector<1x1x1x16xf32> to vector<1x16xf32>
    %474 = vector.broadcast %473 : vector<1x16xf32> to vector<8x16xf32>
    %475 = arith.addf %471, %474 : vector<8x16xf32>
    %c1_412 = arith.constant 1 : index
    %c1_413 = arith.constant 1 : index
    %c0_414 = arith.constant 0 : index
    %c0_415 = arith.constant 0 : index
    %476 = vector.load %arg8[%c1_412, %c1_413, %c0_414, %c0_415] : memref<2x4x64x16xf32, #tpu.memory_space<vmem>>, vector<1x1x64x16xf32>
    %477 = vector.shape_cast %476 : vector<1x1x64x16xf32> to vector<64x16xf32>
    %cst_416 = arith.constant dense<0.000000e+00> : vector<8x16xf32>
    %478 = tpu.matmul %422, %477, %cst_416 {dimension_numbers = #tpu.dot_dimension_numbers<[1], [0], [0], [1], [0, 0, 1, 1], [], []>} : vector<8x64xf32>, vector<64x16xf32>, vector<8x16xf32> -> vector<8x16xf32>
    %c1_417 = arith.constant 1 : index
    %c1_418 = arith.constant 1 : index
    %c0_419 = arith.constant 0 : index
    %c0_420 = arith.constant 0 : index
    %479 = vector.load %arg11[%c1_417, %c1_418, %c0_419, %c0_420] : memref<2x4x1x16xf32, #tpu.memory_space<vmem>>, vector<1x1x1x16xf32>
    %480 = vector.shape_cast %479 : vector<1x1x1x16xf32> to vector<1x16xf32>
    %481 = vector.broadcast %480 : vector<1x16xf32> to vector<8x16xf32>
    %482 = arith.addf %478, %481 : vector<8x16xf32>
    %cst_421 = arith.constant dense<0.000000e+00> : vector<8x8xf32>
    %483 = tpu.matmul %468, %475, %cst_421 {dimension_numbers = #tpu.dot_dimension_numbers<[1], [1], [0], [0], [0, 0, 1, 0], [], []>} : vector<8x16xf32>, vector<8x16xf32>, vector<8x8xf32> -> vector<8x8xf32>
    %cst_422 = arith.constant 2.500000e-01 : f32
    %484 = vector.broadcast %cst_422 : f32 to vector<8x8xf32>
    %485 = arith.mulf %483, %484 : vector<8x8xf32>
    %cst_423 = arith.constant dense<0xFF800000> : vector<8xf32>
    %486 = vector.multi_reduction <maximumf>, %485, %cst_423 [1] : vector<8x8xf32> to vector<8xf32>
    %487 = vector.shape_cast %486 : vector<8xf32> to vector<8x1xf32>
    %488 = vector.broadcast %487 : vector<8x1xf32> to vector<8x8xf32>
    %489 = arith.subf %485, %488 : vector<8x8xf32>
    %490 = math.exp %489 : vector<8x8xf32>
    %cst_424 = arith.constant dense<0.000000e+00> : vector<8xf32>
    %491 = vector.multi_reduction <add>, %490, %cst_424 [1] : vector<8x8xf32> to vector<8xf32>
    %492 = vector.shape_cast %491 : vector<8xf32> to vector<8x1xf32>
    %493 = vector.broadcast %492 : vector<8x1xf32> to vector<8x8xf32>
    %494 = arith.divf %490, %493 : vector<8x8xf32>
    %cst_425 = arith.constant dense<0.000000e+00> : vector<8x16xf32>
    %495 = tpu.matmul %494, %482, %cst_425 {dimension_numbers = #tpu.dot_dimension_numbers<[1], [0], [0], [1], [0, 0, 1, 1], [], []>} : vector<8x8xf32>, vector<8x16xf32>, vector<8x16xf32> -> vector<8x16xf32>
    %c1_426 = arith.constant 1 : index
    %c1_427 = arith.constant 1 : index
    %c0_428 = arith.constant 0 : index
    %c0_429 = arith.constant 0 : index
    %496 = vector.load %arg12[%c1_426, %c1_427, %c0_428, %c0_429] : memref<2x4x16x64xf32, #tpu.memory_space<vmem>>, vector<1x1x16x64xf32>
    %497 = vector.shape_cast %496 : vector<1x1x16x64xf32> to vector<16x64xf32>
    %cst_430 = arith.constant dense<0.000000e+00> : vector<8x64xf32>
    %498 = tpu.matmul %495, %497, %cst_430 {dimension_numbers = #tpu.dot_dimension_numbers<[1], [0], [0], [1], [0, 0, 1, 1], [], []>} : vector<8x16xf32>, vector<16x64xf32>, vector<8x64xf32> -> vector<8x64xf32>
    %499 = arith.addf %461, %498 : vector<8x64xf32>
    %c1_431 = arith.constant 1 : index
    %c2_432 = arith.constant 2 : index
    %c0_433 = arith.constant 0 : index
    %c0_434 = arith.constant 0 : index
    %500 = vector.load %arg6[%c1_431, %c2_432, %c0_433, %c0_434] : memref<2x4x64x16xf32, #tpu.memory_space<vmem>>, vector<1x1x64x16xf32>
    %501 = vector.shape_cast %500 : vector<1x1x64x16xf32> to vector<64x16xf32>
    %cst_435 = arith.constant dense<0.000000e+00> : vector<8x16xf32>
    %502 = tpu.matmul %422, %501, %cst_435 {dimension_numbers = #tpu.dot_dimension_numbers<[1], [0], [0], [1], [0, 0, 1, 1], [], []>} : vector<8x64xf32>, vector<64x16xf32>, vector<8x16xf32> -> vector<8x16xf32>
    %c1_436 = arith.constant 1 : index
    %c2_437 = arith.constant 2 : index
    %c0_438 = arith.constant 0 : index
    %c0_439 = arith.constant 0 : index
    %503 = vector.load %arg9[%c1_436, %c2_437, %c0_438, %c0_439] : memref<2x4x1x16xf32, #tpu.memory_space<vmem>>, vector<1x1x1x16xf32>
    %504 = vector.shape_cast %503 : vector<1x1x1x16xf32> to vector<1x16xf32>
    %505 = vector.broadcast %504 : vector<1x16xf32> to vector<8x16xf32>
    %506 = arith.addf %502, %505 : vector<8x16xf32>
    %c1_440 = arith.constant 1 : index
    %c2_441 = arith.constant 2 : index
    %c0_442 = arith.constant 0 : index
    %c0_443 = arith.constant 0 : index
    %507 = vector.load %arg7[%c1_440, %c2_441, %c0_442, %c0_443] : memref<2x4x64x16xf32, #tpu.memory_space<vmem>>, vector<1x1x64x16xf32>
    %508 = vector.shape_cast %507 : vector<1x1x64x16xf32> to vector<64x16xf32>
    %cst_444 = arith.constant dense<0.000000e+00> : vector<8x16xf32>
    %509 = tpu.matmul %422, %508, %cst_444 {dimension_numbers = #tpu.dot_dimension_numbers<[1], [0], [0], [1], [0, 0, 1, 1], [], []>} : vector<8x64xf32>, vector<64x16xf32>, vector<8x16xf32> -> vector<8x16xf32>
    %c1_445 = arith.constant 1 : index
    %c2_446 = arith.constant 2 : index
    %c0_447 = arith.constant 0 : index
    %c0_448 = arith.constant 0 : index
    %510 = vector.load %arg10[%c1_445, %c2_446, %c0_447, %c0_448] : memref<2x4x1x16xf32, #tpu.memory_space<vmem>>, vector<1x1x1x16xf32>
    %511 = vector.shape_cast %510 : vector<1x1x1x16xf32> to vector<1x16xf32>
    %512 = vector.broadcast %511 : vector<1x16xf32> to vector<8x16xf32>
    %513 = arith.addf %509, %512 : vector<8x16xf32>
    %c1_449 = arith.constant 1 : index
    %c2_450 = arith.constant 2 : index
    %c0_451 = arith.constant 0 : index
    %c0_452 = arith.constant 0 : index
    %514 = vector.load %arg8[%c1_449, %c2_450, %c0_451, %c0_452] : memref<2x4x64x16xf32, #tpu.memory_space<vmem>>, vector<1x1x64x16xf32>
    %515 = vector.shape_cast %514 : vector<1x1x64x16xf32> to vector<64x16xf32>
    %cst_453 = arith.constant dense<0.000000e+00> : vector<8x16xf32>
    %516 = tpu.matmul %422, %515, %cst_453 {dimension_numbers = #tpu.dot_dimension_numbers<[1], [0], [0], [1], [0, 0, 1, 1], [], []>} : vector<8x64xf32>, vector<64x16xf32>, vector<8x16xf32> -> vector<8x16xf32>
    %c1_454 = arith.constant 1 : index
    %c2_455 = arith.constant 2 : index
    %c0_456 = arith.constant 0 : index
    %c0_457 = arith.constant 0 : index
    %517 = vector.load %arg11[%c1_454, %c2_455, %c0_456, %c0_457] : memref<2x4x1x16xf32, #tpu.memory_space<vmem>>, vector<1x1x1x16xf32>
    %518 = vector.shape_cast %517 : vector<1x1x1x16xf32> to vector<1x16xf32>
    %519 = vector.broadcast %518 : vector<1x16xf32> to vector<8x16xf32>
    %520 = arith.addf %516, %519 : vector<8x16xf32>
    %cst_458 = arith.constant dense<0.000000e+00> : vector<8x8xf32>
    %521 = tpu.matmul %506, %513, %cst_458 {dimension_numbers = #tpu.dot_dimension_numbers<[1], [1], [0], [0], [0, 0, 1, 0], [], []>} : vector<8x16xf32>, vector<8x16xf32>, vector<8x8xf32> -> vector<8x8xf32>
    %cst_459 = arith.constant 2.500000e-01 : f32
    %522 = vector.broadcast %cst_459 : f32 to vector<8x8xf32>
    %523 = arith.mulf %521, %522 : vector<8x8xf32>
    %cst_460 = arith.constant dense<0xFF800000> : vector<8xf32>
    %524 = vector.multi_reduction <maximumf>, %523, %cst_460 [1] : vector<8x8xf32> to vector<8xf32>
    %525 = vector.shape_cast %524 : vector<8xf32> to vector<8x1xf32>
    %526 = vector.broadcast %525 : vector<8x1xf32> to vector<8x8xf32>
    %527 = arith.subf %523, %526 : vector<8x8xf32>
    %528 = math.exp %527 : vector<8x8xf32>
    %cst_461 = arith.constant dense<0.000000e+00> : vector<8xf32>
    %529 = vector.multi_reduction <add>, %528, %cst_461 [1] : vector<8x8xf32> to vector<8xf32>
    %530 = vector.shape_cast %529 : vector<8xf32> to vector<8x1xf32>
    %531 = vector.broadcast %530 : vector<8x1xf32> to vector<8x8xf32>
    %532 = arith.divf %528, %531 : vector<8x8xf32>
    %cst_462 = arith.constant dense<0.000000e+00> : vector<8x16xf32>
    %533 = tpu.matmul %532, %520, %cst_462 {dimension_numbers = #tpu.dot_dimension_numbers<[1], [0], [0], [1], [0, 0, 1, 1], [], []>} : vector<8x8xf32>, vector<8x16xf32>, vector<8x16xf32> -> vector<8x16xf32>
    %c1_463 = arith.constant 1 : index
    %c2_464 = arith.constant 2 : index
    %c0_465 = arith.constant 0 : index
    %c0_466 = arith.constant 0 : index
    %534 = vector.load %arg12[%c1_463, %c2_464, %c0_465, %c0_466] : memref<2x4x16x64xf32, #tpu.memory_space<vmem>>, vector<1x1x16x64xf32>
    %535 = vector.shape_cast %534 : vector<1x1x16x64xf32> to vector<16x64xf32>
    %cst_467 = arith.constant dense<0.000000e+00> : vector<8x64xf32>
    %536 = tpu.matmul %533, %535, %cst_467 {dimension_numbers = #tpu.dot_dimension_numbers<[1], [0], [0], [1], [0, 0, 1, 1], [], []>} : vector<8x16xf32>, vector<16x64xf32>, vector<8x64xf32> -> vector<8x64xf32>
    %537 = arith.addf %499, %536 : vector<8x64xf32>
    %c1_468 = arith.constant 1 : index
    %c3_469 = arith.constant 3 : index
    %c0_470 = arith.constant 0 : index
    %c0_471 = arith.constant 0 : index
    %538 = vector.load %arg6[%c1_468, %c3_469, %c0_470, %c0_471] : memref<2x4x64x16xf32, #tpu.memory_space<vmem>>, vector<1x1x64x16xf32>
    %539 = vector.shape_cast %538 : vector<1x1x64x16xf32> to vector<64x16xf32>
    %cst_472 = arith.constant dense<0.000000e+00> : vector<8x16xf32>
    %540 = tpu.matmul %422, %539, %cst_472 {dimension_numbers = #tpu.dot_dimension_numbers<[1], [0], [0], [1], [0, 0, 1, 1], [], []>} : vector<8x64xf32>, vector<64x16xf32>, vector<8x16xf32> -> vector<8x16xf32>
    %c1_473 = arith.constant 1 : index
    %c3_474 = arith.constant 3 : index
    %c0_475 = arith.constant 0 : index
    %c0_476 = arith.constant 0 : index
    %541 = vector.load %arg9[%c1_473, %c3_474, %c0_475, %c0_476] : memref<2x4x1x16xf32, #tpu.memory_space<vmem>>, vector<1x1x1x16xf32>
    %542 = vector.shape_cast %541 : vector<1x1x1x16xf32> to vector<1x16xf32>
    %543 = vector.broadcast %542 : vector<1x16xf32> to vector<8x16xf32>
    %544 = arith.addf %540, %543 : vector<8x16xf32>
    %c1_477 = arith.constant 1 : index
    %c3_478 = arith.constant 3 : index
    %c0_479 = arith.constant 0 : index
    %c0_480 = arith.constant 0 : index
    %545 = vector.load %arg7[%c1_477, %c3_478, %c0_479, %c0_480] : memref<2x4x64x16xf32, #tpu.memory_space<vmem>>, vector<1x1x64x16xf32>
    %546 = vector.shape_cast %545 : vector<1x1x64x16xf32> to vector<64x16xf32>
    %cst_481 = arith.constant dense<0.000000e+00> : vector<8x16xf32>
    %547 = tpu.matmul %422, %546, %cst_481 {dimension_numbers = #tpu.dot_dimension_numbers<[1], [0], [0], [1], [0, 0, 1, 1], [], []>} : vector<8x64xf32>, vector<64x16xf32>, vector<8x16xf32> -> vector<8x16xf32>
    %c1_482 = arith.constant 1 : index
    %c3_483 = arith.constant 3 : index
    %c0_484 = arith.constant 0 : index
    %c0_485 = arith.constant 0 : index
    %548 = vector.load %arg10[%c1_482, %c3_483, %c0_484, %c0_485] : memref<2x4x1x16xf32, #tpu.memory_space<vmem>>, vector<1x1x1x16xf32>
    %549 = vector.shape_cast %548 : vector<1x1x1x16xf32> to vector<1x16xf32>
    %550 = vector.broadcast %549 : vector<1x16xf32> to vector<8x16xf32>
    %551 = arith.addf %547, %550 : vector<8x16xf32>
    %c1_486 = arith.constant 1 : index
    %c3_487 = arith.constant 3 : index
    %c0_488 = arith.constant 0 : index
    %c0_489 = arith.constant 0 : index
    %552 = vector.load %arg8[%c1_486, %c3_487, %c0_488, %c0_489] : memref<2x4x64x16xf32, #tpu.memory_space<vmem>>, vector<1x1x64x16xf32>
    %553 = vector.shape_cast %552 : vector<1x1x64x16xf32> to vector<64x16xf32>
    %cst_490 = arith.constant dense<0.000000e+00> : vector<8x16xf32>
    %554 = tpu.matmul %422, %553, %cst_490 {dimension_numbers = #tpu.dot_dimension_numbers<[1], [0], [0], [1], [0, 0, 1, 1], [], []>} : vector<8x64xf32>, vector<64x16xf32>, vector<8x16xf32> -> vector<8x16xf32>
    %c1_491 = arith.constant 1 : index
    %c3_492 = arith.constant 3 : index
    %c0_493 = arith.constant 0 : index
    %c0_494 = arith.constant 0 : index
    %555 = vector.load %arg11[%c1_491, %c3_492, %c0_493, %c0_494] : memref<2x4x1x16xf32, #tpu.memory_space<vmem>>, vector<1x1x1x16xf32>
    %556 = vector.shape_cast %555 : vector<1x1x1x16xf32> to vector<1x16xf32>
    %557 = vector.broadcast %556 : vector<1x16xf32> to vector<8x16xf32>
    %558 = arith.addf %554, %557 : vector<8x16xf32>
    %cst_495 = arith.constant dense<0.000000e+00> : vector<8x8xf32>
    %559 = tpu.matmul %544, %551, %cst_495 {dimension_numbers = #tpu.dot_dimension_numbers<[1], [1], [0], [0], [0, 0, 1, 0], [], []>} : vector<8x16xf32>, vector<8x16xf32>, vector<8x8xf32> -> vector<8x8xf32>
    %cst_496 = arith.constant 2.500000e-01 : f32
    %560 = vector.broadcast %cst_496 : f32 to vector<8x8xf32>
    %561 = arith.mulf %559, %560 : vector<8x8xf32>
    %cst_497 = arith.constant dense<0xFF800000> : vector<8xf32>
    %562 = vector.multi_reduction <maximumf>, %561, %cst_497 [1] : vector<8x8xf32> to vector<8xf32>
    %563 = vector.shape_cast %562 : vector<8xf32> to vector<8x1xf32>
    %564 = vector.broadcast %563 : vector<8x1xf32> to vector<8x8xf32>
    %565 = arith.subf %561, %564 : vector<8x8xf32>
    %566 = math.exp %565 : vector<8x8xf32>
    %cst_498 = arith.constant dense<0.000000e+00> : vector<8xf32>
    %567 = vector.multi_reduction <add>, %566, %cst_498 [1] : vector<8x8xf32> to vector<8xf32>
    %568 = vector.shape_cast %567 : vector<8xf32> to vector<8x1xf32>
    %569 = vector.broadcast %568 : vector<8x1xf32> to vector<8x8xf32>
    %570 = arith.divf %566, %569 : vector<8x8xf32>
    %cst_499 = arith.constant dense<0.000000e+00> : vector<8x16xf32>
    %571 = tpu.matmul %570, %558, %cst_499 {dimension_numbers = #tpu.dot_dimension_numbers<[1], [0], [0], [1], [0, 0, 1, 1], [], []>} : vector<8x8xf32>, vector<8x16xf32>, vector<8x16xf32> -> vector<8x16xf32>
    %c1_500 = arith.constant 1 : index
    %c3_501 = arith.constant 3 : index
    %c0_502 = arith.constant 0 : index
    %c0_503 = arith.constant 0 : index
    %572 = vector.load %arg12[%c1_500, %c3_501, %c0_502, %c0_503] : memref<2x4x16x64xf32, #tpu.memory_space<vmem>>, vector<1x1x16x64xf32>
    %573 = vector.shape_cast %572 : vector<1x1x16x64xf32> to vector<16x64xf32>
    %cst_504 = arith.constant dense<0.000000e+00> : vector<8x64xf32>
    %574 = tpu.matmul %571, %573, %cst_504 {dimension_numbers = #tpu.dot_dimension_numbers<[1], [0], [0], [1], [0, 0, 1, 1], [], []>} : vector<8x16xf32>, vector<16x64xf32>, vector<8x64xf32> -> vector<8x64xf32>
    %575 = arith.addf %537, %574 : vector<8x64xf32>
    %576 = vector.extract_strided_slice %421 {offsets = [8, 0], sizes = [8, 64], strides = [1, 1]} : vector<16x64xf32> to vector<8x64xf32>
    %cst_505 = arith.constant 0.000000e+00 : f32
    %577 = vector.broadcast %cst_505 : f32 to vector<8x64xf32>
    %c1_506 = arith.constant 1 : index
    %c0_507 = arith.constant 0 : index
    %c0_508 = arith.constant 0 : index
    %c0_509 = arith.constant 0 : index
    %578 = vector.load %arg6[%c1_506, %c0_507, %c0_508, %c0_509] : memref<2x4x64x16xf32, #tpu.memory_space<vmem>>, vector<1x1x64x16xf32>
    %579 = vector.shape_cast %578 : vector<1x1x64x16xf32> to vector<64x16xf32>
    %cst_510 = arith.constant dense<0.000000e+00> : vector<8x16xf32>
    %580 = tpu.matmul %576, %579, %cst_510 {dimension_numbers = #tpu.dot_dimension_numbers<[1], [0], [0], [1], [0, 0, 1, 1], [], []>} : vector<8x64xf32>, vector<64x16xf32>, vector<8x16xf32> -> vector<8x16xf32>
    %c1_511 = arith.constant 1 : index
    %c0_512 = arith.constant 0 : index
    %c0_513 = arith.constant 0 : index
    %c0_514 = arith.constant 0 : index
    %581 = vector.load %arg9[%c1_511, %c0_512, %c0_513, %c0_514] : memref<2x4x1x16xf32, #tpu.memory_space<vmem>>, vector<1x1x1x16xf32>
    %582 = vector.shape_cast %581 : vector<1x1x1x16xf32> to vector<1x16xf32>
    %583 = vector.broadcast %582 : vector<1x16xf32> to vector<8x16xf32>
    %584 = arith.addf %580, %583 : vector<8x16xf32>
    %c1_515 = arith.constant 1 : index
    %c0_516 = arith.constant 0 : index
    %c0_517 = arith.constant 0 : index
    %c0_518 = arith.constant 0 : index
    %585 = vector.load %arg7[%c1_515, %c0_516, %c0_517, %c0_518] : memref<2x4x64x16xf32, #tpu.memory_space<vmem>>, vector<1x1x64x16xf32>
    %586 = vector.shape_cast %585 : vector<1x1x64x16xf32> to vector<64x16xf32>
    %cst_519 = arith.constant dense<0.000000e+00> : vector<8x16xf32>
    %587 = tpu.matmul %576, %586, %cst_519 {dimension_numbers = #tpu.dot_dimension_numbers<[1], [0], [0], [1], [0, 0, 1, 1], [], []>} : vector<8x64xf32>, vector<64x16xf32>, vector<8x16xf32> -> vector<8x16xf32>
    %c1_520 = arith.constant 1 : index
    %c0_521 = arith.constant 0 : index
    %c0_522 = arith.constant 0 : index
    %c0_523 = arith.constant 0 : index
    %588 = vector.load %arg10[%c1_520, %c0_521, %c0_522, %c0_523] : memref<2x4x1x16xf32, #tpu.memory_space<vmem>>, vector<1x1x1x16xf32>
    %589 = vector.shape_cast %588 : vector<1x1x1x16xf32> to vector<1x16xf32>
    %590 = vector.broadcast %589 : vector<1x16xf32> to vector<8x16xf32>
    %591 = arith.addf %587, %590 : vector<8x16xf32>
    %c1_524 = arith.constant 1 : index
    %c0_525 = arith.constant 0 : index
    %c0_526 = arith.constant 0 : index
    %c0_527 = arith.constant 0 : index
    %592 = vector.load %arg8[%c1_524, %c0_525, %c0_526, %c0_527] : memref<2x4x64x16xf32, #tpu.memory_space<vmem>>, vector<1x1x64x16xf32>
    %593 = vector.shape_cast %592 : vector<1x1x64x16xf32> to vector<64x16xf32>
    %cst_528 = arith.constant dense<0.000000e+00> : vector<8x16xf32>
    %594 = tpu.matmul %576, %593, %cst_528 {dimension_numbers = #tpu.dot_dimension_numbers<[1], [0], [0], [1], [0, 0, 1, 1], [], []>} : vector<8x64xf32>, vector<64x16xf32>, vector<8x16xf32> -> vector<8x16xf32>
    %c1_529 = arith.constant 1 : index
    %c0_530 = arith.constant 0 : index
    %c0_531 = arith.constant 0 : index
    %c0_532 = arith.constant 0 : index
    %595 = vector.load %arg11[%c1_529, %c0_530, %c0_531, %c0_532] : memref<2x4x1x16xf32, #tpu.memory_space<vmem>>, vector<1x1x1x16xf32>
    %596 = vector.shape_cast %595 : vector<1x1x1x16xf32> to vector<1x16xf32>
    %597 = vector.broadcast %596 : vector<1x16xf32> to vector<8x16xf32>
    %598 = arith.addf %594, %597 : vector<8x16xf32>
    %cst_533 = arith.constant dense<0.000000e+00> : vector<8x8xf32>
    %599 = tpu.matmul %584, %591, %cst_533 {dimension_numbers = #tpu.dot_dimension_numbers<[1], [1], [0], [0], [0, 0, 1, 0], [], []>} : vector<8x16xf32>, vector<8x16xf32>, vector<8x8xf32> -> vector<8x8xf32>
    %cst_534 = arith.constant 2.500000e-01 : f32
    %600 = vector.broadcast %cst_534 : f32 to vector<8x8xf32>
    %601 = arith.mulf %599, %600 : vector<8x8xf32>
    %cst_535 = arith.constant dense<0xFF800000> : vector<8xf32>
    %602 = vector.multi_reduction <maximumf>, %601, %cst_535 [1] : vector<8x8xf32> to vector<8xf32>
    %603 = vector.shape_cast %602 : vector<8xf32> to vector<8x1xf32>
    %604 = vector.broadcast %603 : vector<8x1xf32> to vector<8x8xf32>
    %605 = arith.subf %601, %604 : vector<8x8xf32>
    %606 = math.exp %605 : vector<8x8xf32>
    %cst_536 = arith.constant dense<0.000000e+00> : vector<8xf32>
    %607 = vector.multi_reduction <add>, %606, %cst_536 [1] : vector<8x8xf32> to vector<8xf32>
    %608 = vector.shape_cast %607 : vector<8xf32> to vector<8x1xf32>
    %609 = vector.broadcast %608 : vector<8x1xf32> to vector<8x8xf32>
    %610 = arith.divf %606, %609 : vector<8x8xf32>
    %cst_537 = arith.constant dense<0.000000e+00> : vector<8x16xf32>
    %611 = tpu.matmul %610, %598, %cst_537 {dimension_numbers = #tpu.dot_dimension_numbers<[1], [0], [0], [1], [0, 0, 1, 1], [], []>} : vector<8x8xf32>, vector<8x16xf32>, vector<8x16xf32> -> vector<8x16xf32>
    %c1_538 = arith.constant 1 : index
    %c0_539 = arith.constant 0 : index
    %c0_540 = arith.constant 0 : index
    %c0_541 = arith.constant 0 : index
    %612 = vector.load %arg12[%c1_538, %c0_539, %c0_540, %c0_541] : memref<2x4x16x64xf32, #tpu.memory_space<vmem>>, vector<1x1x16x64xf32>
    %613 = vector.shape_cast %612 : vector<1x1x16x64xf32> to vector<16x64xf32>
    %cst_542 = arith.constant dense<0.000000e+00> : vector<8x64xf32>
    %614 = tpu.matmul %611, %613, %cst_542 {dimension_numbers = #tpu.dot_dimension_numbers<[1], [0], [0], [1], [0, 0, 1, 1], [], []>} : vector<8x16xf32>, vector<16x64xf32>, vector<8x64xf32> -> vector<8x64xf32>
    %615 = arith.addf %577, %614 : vector<8x64xf32>
    %c1_543 = arith.constant 1 : index
    %c1_544 = arith.constant 1 : index
    %c0_545 = arith.constant 0 : index
    %c0_546 = arith.constant 0 : index
    %616 = vector.load %arg6[%c1_543, %c1_544, %c0_545, %c0_546] : memref<2x4x64x16xf32, #tpu.memory_space<vmem>>, vector<1x1x64x16xf32>
    %617 = vector.shape_cast %616 : vector<1x1x64x16xf32> to vector<64x16xf32>
    %cst_547 = arith.constant dense<0.000000e+00> : vector<8x16xf32>
    %618 = tpu.matmul %576, %617, %cst_547 {dimension_numbers = #tpu.dot_dimension_numbers<[1], [0], [0], [1], [0, 0, 1, 1], [], []>} : vector<8x64xf32>, vector<64x16xf32>, vector<8x16xf32> -> vector<8x16xf32>
    %c1_548 = arith.constant 1 : index
    %c1_549 = arith.constant 1 : index
    %c0_550 = arith.constant 0 : index
    %c0_551 = arith.constant 0 : index
    %619 = vector.load %arg9[%c1_548, %c1_549, %c0_550, %c0_551] : memref<2x4x1x16xf32, #tpu.memory_space<vmem>>, vector<1x1x1x16xf32>
    %620 = vector.shape_cast %619 : vector<1x1x1x16xf32> to vector<1x16xf32>
    %621 = vector.broadcast %620 : vector<1x16xf32> to vector<8x16xf32>
    %622 = arith.addf %618, %621 : vector<8x16xf32>
    %c1_552 = arith.constant 1 : index
    %c1_553 = arith.constant 1 : index
    %c0_554 = arith.constant 0 : index
    %c0_555 = arith.constant 0 : index
    %623 = vector.load %arg7[%c1_552, %c1_553, %c0_554, %c0_555] : memref<2x4x64x16xf32, #tpu.memory_space<vmem>>, vector<1x1x64x16xf32>
    %624 = vector.shape_cast %623 : vector<1x1x64x16xf32> to vector<64x16xf32>
    %cst_556 = arith.constant dense<0.000000e+00> : vector<8x16xf32>
    %625 = tpu.matmul %576, %624, %cst_556 {dimension_numbers = #tpu.dot_dimension_numbers<[1], [0], [0], [1], [0, 0, 1, 1], [], []>} : vector<8x64xf32>, vector<64x16xf32>, vector<8x16xf32> -> vector<8x16xf32>
    %c1_557 = arith.constant 1 : index
    %c1_558 = arith.constant 1 : index
    %c0_559 = arith.constant 0 : index
    %c0_560 = arith.constant 0 : index
    %626 = vector.load %arg10[%c1_557, %c1_558, %c0_559, %c0_560] : memref<2x4x1x16xf32, #tpu.memory_space<vmem>>, vector<1x1x1x16xf32>
    %627 = vector.shape_cast %626 : vector<1x1x1x16xf32> to vector<1x16xf32>
    %628 = vector.broadcast %627 : vector<1x16xf32> to vector<8x16xf32>
    %629 = arith.addf %625, %628 : vector<8x16xf32>
    %c1_561 = arith.constant 1 : index
    %c1_562 = arith.constant 1 : index
    %c0_563 = arith.constant 0 : index
    %c0_564 = arith.constant 0 : index
    %630 = vector.load %arg8[%c1_561, %c1_562, %c0_563, %c0_564] : memref<2x4x64x16xf32, #tpu.memory_space<vmem>>, vector<1x1x64x16xf32>
    %631 = vector.shape_cast %630 : vector<1x1x64x16xf32> to vector<64x16xf32>
    %cst_565 = arith.constant dense<0.000000e+00> : vector<8x16xf32>
    %632 = tpu.matmul %576, %631, %cst_565 {dimension_numbers = #tpu.dot_dimension_numbers<[1], [0], [0], [1], [0, 0, 1, 1], [], []>} : vector<8x64xf32>, vector<64x16xf32>, vector<8x16xf32> -> vector<8x16xf32>
    %c1_566 = arith.constant 1 : index
    %c1_567 = arith.constant 1 : index
    %c0_568 = arith.constant 0 : index
    %c0_569 = arith.constant 0 : index
    %633 = vector.load %arg11[%c1_566, %c1_567, %c0_568, %c0_569] : memref<2x4x1x16xf32, #tpu.memory_space<vmem>>, vector<1x1x1x16xf32>
    %634 = vector.shape_cast %633 : vector<1x1x1x16xf32> to vector<1x16xf32>
    %635 = vector.broadcast %634 : vector<1x16xf32> to vector<8x16xf32>
    %636 = arith.addf %632, %635 : vector<8x16xf32>
    %cst_570 = arith.constant dense<0.000000e+00> : vector<8x8xf32>
    %637 = tpu.matmul %622, %629, %cst_570 {dimension_numbers = #tpu.dot_dimension_numbers<[1], [1], [0], [0], [0, 0, 1, 0], [], []>} : vector<8x16xf32>, vector<8x16xf32>, vector<8x8xf32> -> vector<8x8xf32>
    %cst_571 = arith.constant 2.500000e-01 : f32
    %638 = vector.broadcast %cst_571 : f32 to vector<8x8xf32>
    %639 = arith.mulf %637, %638 : vector<8x8xf32>
    %cst_572 = arith.constant dense<0xFF800000> : vector<8xf32>
    %640 = vector.multi_reduction <maximumf>, %639, %cst_572 [1] : vector<8x8xf32> to vector<8xf32>
    %641 = vector.shape_cast %640 : vector<8xf32> to vector<8x1xf32>
    %642 = vector.broadcast %641 : vector<8x1xf32> to vector<8x8xf32>
    %643 = arith.subf %639, %642 : vector<8x8xf32>
    %644 = math.exp %643 : vector<8x8xf32>
    %cst_573 = arith.constant dense<0.000000e+00> : vector<8xf32>
    %645 = vector.multi_reduction <add>, %644, %cst_573 [1] : vector<8x8xf32> to vector<8xf32>
    %646 = vector.shape_cast %645 : vector<8xf32> to vector<8x1xf32>
    %647 = vector.broadcast %646 : vector<8x1xf32> to vector<8x8xf32>
    %648 = arith.divf %644, %647 : vector<8x8xf32>
    %cst_574 = arith.constant dense<0.000000e+00> : vector<8x16xf32>
    %649 = tpu.matmul %648, %636, %cst_574 {dimension_numbers = #tpu.dot_dimension_numbers<[1], [0], [0], [1], [0, 0, 1, 1], [], []>} : vector<8x8xf32>, vector<8x16xf32>, vector<8x16xf32> -> vector<8x16xf32>
    %c1_575 = arith.constant 1 : index
    %c1_576 = arith.constant 1 : index
    %c0_577 = arith.constant 0 : index
    %c0_578 = arith.constant 0 : index
    %650 = vector.load %arg12[%c1_575, %c1_576, %c0_577, %c0_578] : memref<2x4x16x64xf32, #tpu.memory_space<vmem>>, vector<1x1x16x64xf32>
    %651 = vector.shape_cast %650 : vector<1x1x16x64xf32> to vector<16x64xf32>
    %cst_579 = arith.constant dense<0.000000e+00> : vector<8x64xf32>
    %652 = tpu.matmul %649, %651, %cst_579 {dimension_numbers = #tpu.dot_dimension_numbers<[1], [0], [0], [1], [0, 0, 1, 1], [], []>} : vector<8x16xf32>, vector<16x64xf32>, vector<8x64xf32> -> vector<8x64xf32>
    %653 = arith.addf %615, %652 : vector<8x64xf32>
    %c1_580 = arith.constant 1 : index
    %c2_581 = arith.constant 2 : index
    %c0_582 = arith.constant 0 : index
    %c0_583 = arith.constant 0 : index
    %654 = vector.load %arg6[%c1_580, %c2_581, %c0_582, %c0_583] : memref<2x4x64x16xf32, #tpu.memory_space<vmem>>, vector<1x1x64x16xf32>
    %655 = vector.shape_cast %654 : vector<1x1x64x16xf32> to vector<64x16xf32>
    %cst_584 = arith.constant dense<0.000000e+00> : vector<8x16xf32>
    %656 = tpu.matmul %576, %655, %cst_584 {dimension_numbers = #tpu.dot_dimension_numbers<[1], [0], [0], [1], [0, 0, 1, 1], [], []>} : vector<8x64xf32>, vector<64x16xf32>, vector<8x16xf32> -> vector<8x16xf32>
    %c1_585 = arith.constant 1 : index
    %c2_586 = arith.constant 2 : index
    %c0_587 = arith.constant 0 : index
    %c0_588 = arith.constant 0 : index
    %657 = vector.load %arg9[%c1_585, %c2_586, %c0_587, %c0_588] : memref<2x4x1x16xf32, #tpu.memory_space<vmem>>, vector<1x1x1x16xf32>
    %658 = vector.shape_cast %657 : vector<1x1x1x16xf32> to vector<1x16xf32>
    %659 = vector.broadcast %658 : vector<1x16xf32> to vector<8x16xf32>
    %660 = arith.addf %656, %659 : vector<8x16xf32>
    %c1_589 = arith.constant 1 : index
    %c2_590 = arith.constant 2 : index
    %c0_591 = arith.constant 0 : index
    %c0_592 = arith.constant 0 : index
    %661 = vector.load %arg7[%c1_589, %c2_590, %c0_591, %c0_592] : memref<2x4x64x16xf32, #tpu.memory_space<vmem>>, vector<1x1x64x16xf32>
    %662 = vector.shape_cast %661 : vector<1x1x64x16xf32> to vector<64x16xf32>
    %cst_593 = arith.constant dense<0.000000e+00> : vector<8x16xf32>
    %663 = tpu.matmul %576, %662, %cst_593 {dimension_numbers = #tpu.dot_dimension_numbers<[1], [0], [0], [1], [0, 0, 1, 1], [], []>} : vector<8x64xf32>, vector<64x16xf32>, vector<8x16xf32> -> vector<8x16xf32>
    %c1_594 = arith.constant 1 : index
    %c2_595 = arith.constant 2 : index
    %c0_596 = arith.constant 0 : index
    %c0_597 = arith.constant 0 : index
    %664 = vector.load %arg10[%c1_594, %c2_595, %c0_596, %c0_597] : memref<2x4x1x16xf32, #tpu.memory_space<vmem>>, vector<1x1x1x16xf32>
    %665 = vector.shape_cast %664 : vector<1x1x1x16xf32> to vector<1x16xf32>
    %666 = vector.broadcast %665 : vector<1x16xf32> to vector<8x16xf32>
    %667 = arith.addf %663, %666 : vector<8x16xf32>
    %c1_598 = arith.constant 1 : index
    %c2_599 = arith.constant 2 : index
    %c0_600 = arith.constant 0 : index
    %c0_601 = arith.constant 0 : index
    %668 = vector.load %arg8[%c1_598, %c2_599, %c0_600, %c0_601] : memref<2x4x64x16xf32, #tpu.memory_space<vmem>>, vector<1x1x64x16xf32>
    %669 = vector.shape_cast %668 : vector<1x1x64x16xf32> to vector<64x16xf32>
    %cst_602 = arith.constant dense<0.000000e+00> : vector<8x16xf32>
    %670 = tpu.matmul %576, %669, %cst_602 {dimension_numbers = #tpu.dot_dimension_numbers<[1], [0], [0], [1], [0, 0, 1, 1], [], []>} : vector<8x64xf32>, vector<64x16xf32>, vector<8x16xf32> -> vector<8x16xf32>
    %c1_603 = arith.constant 1 : index
    %c2_604 = arith.constant 2 : index
    %c0_605 = arith.constant 0 : index
    %c0_606 = arith.constant 0 : index
    %671 = vector.load %arg11[%c1_603, %c2_604, %c0_605, %c0_606] : memref<2x4x1x16xf32, #tpu.memory_space<vmem>>, vector<1x1x1x16xf32>
    %672 = vector.shape_cast %671 : vector<1x1x1x16xf32> to vector<1x16xf32>
    %673 = vector.broadcast %672 : vector<1x16xf32> to vector<8x16xf32>
    %674 = arith.addf %670, %673 : vector<8x16xf32>
    %cst_607 = arith.constant dense<0.000000e+00> : vector<8x8xf32>
    %675 = tpu.matmul %660, %667, %cst_607 {dimension_numbers = #tpu.dot_dimension_numbers<[1], [1], [0], [0], [0, 0, 1, 0], [], []>} : vector<8x16xf32>, vector<8x16xf32>, vector<8x8xf32> -> vector<8x8xf32>
    %cst_608 = arith.constant 2.500000e-01 : f32
    %676 = vector.broadcast %cst_608 : f32 to vector<8x8xf32>
    %677 = arith.mulf %675, %676 : vector<8x8xf32>
    %cst_609 = arith.constant dense<0xFF800000> : vector<8xf32>
    %678 = vector.multi_reduction <maximumf>, %677, %cst_609 [1] : vector<8x8xf32> to vector<8xf32>
    %679 = vector.shape_cast %678 : vector<8xf32> to vector<8x1xf32>
    %680 = vector.broadcast %679 : vector<8x1xf32> to vector<8x8xf32>
    %681 = arith.subf %677, %680 : vector<8x8xf32>
    %682 = math.exp %681 : vector<8x8xf32>
    %cst_610 = arith.constant dense<0.000000e+00> : vector<8xf32>
    %683 = vector.multi_reduction <add>, %682, %cst_610 [1] : vector<8x8xf32> to vector<8xf32>
    %684 = vector.shape_cast %683 : vector<8xf32> to vector<8x1xf32>
    %685 = vector.broadcast %684 : vector<8x1xf32> to vector<8x8xf32>
    %686 = arith.divf %682, %685 : vector<8x8xf32>
    %cst_611 = arith.constant dense<0.000000e+00> : vector<8x16xf32>
    %687 = tpu.matmul %686, %674, %cst_611 {dimension_numbers = #tpu.dot_dimension_numbers<[1], [0], [0], [1], [0, 0, 1, 1], [], []>} : vector<8x8xf32>, vector<8x16xf32>, vector<8x16xf32> -> vector<8x16xf32>
    %c1_612 = arith.constant 1 : index
    %c2_613 = arith.constant 2 : index
    %c0_614 = arith.constant 0 : index
    %c0_615 = arith.constant 0 : index
    %688 = vector.load %arg12[%c1_612, %c2_613, %c0_614, %c0_615] : memref<2x4x16x64xf32, #tpu.memory_space<vmem>>, vector<1x1x16x64xf32>
    %689 = vector.shape_cast %688 : vector<1x1x16x64xf32> to vector<16x64xf32>
    %cst_616 = arith.constant dense<0.000000e+00> : vector<8x64xf32>
    %690 = tpu.matmul %687, %689, %cst_616 {dimension_numbers = #tpu.dot_dimension_numbers<[1], [0], [0], [1], [0, 0, 1, 1], [], []>} : vector<8x16xf32>, vector<16x64xf32>, vector<8x64xf32> -> vector<8x64xf32>
    %691 = arith.addf %653, %690 : vector<8x64xf32>
    %c1_617 = arith.constant 1 : index
    %c3_618 = arith.constant 3 : index
    %c0_619 = arith.constant 0 : index
    %c0_620 = arith.constant 0 : index
    %692 = vector.load %arg6[%c1_617, %c3_618, %c0_619, %c0_620] : memref<2x4x64x16xf32, #tpu.memory_space<vmem>>, vector<1x1x64x16xf32>
    %693 = vector.shape_cast %692 : vector<1x1x64x16xf32> to vector<64x16xf32>
    %cst_621 = arith.constant dense<0.000000e+00> : vector<8x16xf32>
    %694 = tpu.matmul %576, %693, %cst_621 {dimension_numbers = #tpu.dot_dimension_numbers<[1], [0], [0], [1], [0, 0, 1, 1], [], []>} : vector<8x64xf32>, vector<64x16xf32>, vector<8x16xf32> -> vector<8x16xf32>
    %c1_622 = arith.constant 1 : index
    %c3_623 = arith.constant 3 : index
    %c0_624 = arith.constant 0 : index
    %c0_625 = arith.constant 0 : index
    %695 = vector.load %arg9[%c1_622, %c3_623, %c0_624, %c0_625] : memref<2x4x1x16xf32, #tpu.memory_space<vmem>>, vector<1x1x1x16xf32>
    %696 = vector.shape_cast %695 : vector<1x1x1x16xf32> to vector<1x16xf32>
    %697 = vector.broadcast %696 : vector<1x16xf32> to vector<8x16xf32>
    %698 = arith.addf %694, %697 : vector<8x16xf32>
    %c1_626 = arith.constant 1 : index
    %c3_627 = arith.constant 3 : index
    %c0_628 = arith.constant 0 : index
    %c0_629 = arith.constant 0 : index
    %699 = vector.load %arg7[%c1_626, %c3_627, %c0_628, %c0_629] : memref<2x4x64x16xf32, #tpu.memory_space<vmem>>, vector<1x1x64x16xf32>
    %700 = vector.shape_cast %699 : vector<1x1x64x16xf32> to vector<64x16xf32>
    %cst_630 = arith.constant dense<0.000000e+00> : vector<8x16xf32>
    %701 = tpu.matmul %576, %700, %cst_630 {dimension_numbers = #tpu.dot_dimension_numbers<[1], [0], [0], [1], [0, 0, 1, 1], [], []>} : vector<8x64xf32>, vector<64x16xf32>, vector<8x16xf32> -> vector<8x16xf32>
    %c1_631 = arith.constant 1 : index
    %c3_632 = arith.constant 3 : index
    %c0_633 = arith.constant 0 : index
    %c0_634 = arith.constant 0 : index
    %702 = vector.load %arg10[%c1_631, %c3_632, %c0_633, %c0_634] : memref<2x4x1x16xf32, #tpu.memory_space<vmem>>, vector<1x1x1x16xf32>
    %703 = vector.shape_cast %702 : vector<1x1x1x16xf32> to vector<1x16xf32>
    %704 = vector.broadcast %703 : vector<1x16xf32> to vector<8x16xf32>
    %705 = arith.addf %701, %704 : vector<8x16xf32>
    %c1_635 = arith.constant 1 : index
    %c3_636 = arith.constant 3 : index
    %c0_637 = arith.constant 0 : index
    %c0_638 = arith.constant 0 : index
    %706 = vector.load %arg8[%c1_635, %c3_636, %c0_637, %c0_638] : memref<2x4x64x16xf32, #tpu.memory_space<vmem>>, vector<1x1x64x16xf32>
    %707 = vector.shape_cast %706 : vector<1x1x64x16xf32> to vector<64x16xf32>
    %cst_639 = arith.constant dense<0.000000e+00> : vector<8x16xf32>
    %708 = tpu.matmul %576, %707, %cst_639 {dimension_numbers = #tpu.dot_dimension_numbers<[1], [0], [0], [1], [0, 0, 1, 1], [], []>} : vector<8x64xf32>, vector<64x16xf32>, vector<8x16xf32> -> vector<8x16xf32>
    %c1_640 = arith.constant 1 : index
    %c3_641 = arith.constant 3 : index
    %c0_642 = arith.constant 0 : index
    %c0_643 = arith.constant 0 : index
    %709 = vector.load %arg11[%c1_640, %c3_641, %c0_642, %c0_643] : memref<2x4x1x16xf32, #tpu.memory_space<vmem>>, vector<1x1x1x16xf32>
    %710 = vector.shape_cast %709 : vector<1x1x1x16xf32> to vector<1x16xf32>
    %711 = vector.broadcast %710 : vector<1x16xf32> to vector<8x16xf32>
    %712 = arith.addf %708, %711 : vector<8x16xf32>
    %cst_644 = arith.constant dense<0.000000e+00> : vector<8x8xf32>
    %713 = tpu.matmul %698, %705, %cst_644 {dimension_numbers = #tpu.dot_dimension_numbers<[1], [1], [0], [0], [0, 0, 1, 0], [], []>} : vector<8x16xf32>, vector<8x16xf32>, vector<8x8xf32> -> vector<8x8xf32>
    %cst_645 = arith.constant 2.500000e-01 : f32
    %714 = vector.broadcast %cst_645 : f32 to vector<8x8xf32>
    %715 = arith.mulf %713, %714 : vector<8x8xf32>
    %cst_646 = arith.constant dense<0xFF800000> : vector<8xf32>
    %716 = vector.multi_reduction <maximumf>, %715, %cst_646 [1] : vector<8x8xf32> to vector<8xf32>
    %717 = vector.shape_cast %716 : vector<8xf32> to vector<8x1xf32>
    %718 = vector.broadcast %717 : vector<8x1xf32> to vector<8x8xf32>
    %719 = arith.subf %715, %718 : vector<8x8xf32>
    %720 = math.exp %719 : vector<8x8xf32>
    %cst_647 = arith.constant dense<0.000000e+00> : vector<8xf32>
    %721 = vector.multi_reduction <add>, %720, %cst_647 [1] : vector<8x8xf32> to vector<8xf32>
    %722 = vector.shape_cast %721 : vector<8xf32> to vector<8x1xf32>
    %723 = vector.broadcast %722 : vector<8x1xf32> to vector<8x8xf32>
    %724 = arith.divf %720, %723 : vector<8x8xf32>
    %cst_648 = arith.constant dense<0.000000e+00> : vector<8x16xf32>
    %725 = tpu.matmul %724, %712, %cst_648 {dimension_numbers = #tpu.dot_dimension_numbers<[1], [0], [0], [1], [0, 0, 1, 1], [], []>} : vector<8x8xf32>, vector<8x16xf32>, vector<8x16xf32> -> vector<8x16xf32>
    %c1_649 = arith.constant 1 : index
    %c3_650 = arith.constant 3 : index
    %c0_651 = arith.constant 0 : index
    %c0_652 = arith.constant 0 : index
    %726 = vector.load %arg12[%c1_649, %c3_650, %c0_651, %c0_652] : memref<2x4x16x64xf32, #tpu.memory_space<vmem>>, vector<1x1x16x64xf32>
    %727 = vector.shape_cast %726 : vector<1x1x16x64xf32> to vector<16x64xf32>
    %cst_653 = arith.constant dense<0.000000e+00> : vector<8x64xf32>
    %728 = tpu.matmul %725, %727, %cst_653 {dimension_numbers = #tpu.dot_dimension_numbers<[1], [0], [0], [1], [0, 0, 1, 1], [], []>} : vector<8x16xf32>, vector<16x64xf32>, vector<8x64xf32> -> vector<8x64xf32>
    %729 = arith.addf %691, %728 : vector<8x64xf32>
    %730 = tpu.concatenate %575, %729 in 0 : vector<8x64xf32>, vector<8x64xf32> -> vector<16x64xf32>
    %731 = arith.addf %397, %730 : vector<16x64xf32>
    %c1_654 = arith.constant 1 : index
    %c0_655 = arith.constant 0 : index
    %c0_656 = arith.constant 0 : index
    %732 = vector.load %arg13[%c1_654, %c0_655, %c0_656] : memref<2x1x64xf32, #tpu.memory_space<vmem>>, vector<1x1x64xf32>
    %733 = vector.shape_cast %732 : vector<1x1x64xf32> to vector<1x64xf32>
    %734 = vector.broadcast %733 : vector<1x64xf32> to vector<16x64xf32>
    %735 = arith.addf %731, %734 : vector<16x64xf32>
    %c1_657 = arith.constant 1 : index
    %c0_658 = arith.constant 0 : index
    %c0_659 = arith.constant 0 : index
    %736 = vector.load %arg14[%c1_657, %c0_658, %c0_659] : memref<2x1x64xf32, #tpu.memory_space<vmem>>, vector<1x1x64xf32>
    %737 = vector.shape_cast %736 : vector<1x1x64xf32> to vector<1x64xf32>
    %c1_660 = arith.constant 1 : index
    %c0_661 = arith.constant 0 : index
    %c0_662 = arith.constant 0 : index
    %738 = vector.load %arg15[%c1_660, %c0_661, %c0_662] : memref<2x1x64xf32, #tpu.memory_space<vmem>>, vector<1x1x64xf32>
    %739 = vector.shape_cast %738 : vector<1x1x64xf32> to vector<1x64xf32>
    %cst_663 = arith.constant dense<0.000000e+00> : vector<16xf32>
    %740 = vector.multi_reduction <add>, %735, %cst_663 [1] : vector<16x64xf32> to vector<16xf32>
    %741 = vector.shape_cast %740 : vector<16xf32> to vector<16x1xf32>
    %cst_664 = arith.constant 6.400000e+01 : f32
    %742 = vector.broadcast %cst_664 : f32 to vector<16x1xf32>
    %743 = arith.divf %741, %742 : vector<16x1xf32>
    %744 = vector.broadcast %743 : vector<16x1xf32> to vector<16x64xf32>
    %745 = arith.subf %735, %744 : vector<16x64xf32>
    %746 = arith.mulf %745, %745 : vector<16x64xf32>
    %cst_665 = arith.constant dense<0.000000e+00> : vector<16xf32>
    %747 = vector.multi_reduction <add>, %746, %cst_665 [1] : vector<16x64xf32> to vector<16xf32>
    %748 = vector.shape_cast %747 : vector<16xf32> to vector<16x1xf32>
    %cst_666 = arith.constant 6.400000e+01 : f32
    %749 = vector.broadcast %cst_666 : f32 to vector<16x1xf32>
    %750 = arith.divf %748, %749 : vector<16x1xf32>
    %cst_667 = arith.constant 9.99999997E-7 : f32
    %751 = vector.broadcast %cst_667 : f32 to vector<16x1xf32>
    %752 = arith.addf %750, %751 : vector<16x1xf32>
    %753 = math.rsqrt %752 : vector<16x1xf32>
    %754 = vector.broadcast %753 : vector<16x1xf32> to vector<16x64xf32>
    %755 = arith.mulf %745, %754 : vector<16x64xf32>
    %756 = vector.broadcast %737 : vector<1x64xf32> to vector<16x64xf32>
    %757 = arith.mulf %755, %756 : vector<16x64xf32>
    %758 = vector.broadcast %739 : vector<1x64xf32> to vector<16x64xf32>
    %759 = arith.addf %757, %758 : vector<16x64xf32>
    %c1_668 = arith.constant 1 : index
    %c0_669 = arith.constant 0 : index
    %c0_670 = arith.constant 0 : index
    %760 = vector.load %arg16[%c1_668, %c0_669, %c0_670] : memref<2x64x128xf32, #tpu.memory_space<vmem>>, vector<1x64x128xf32>
    %761 = vector.shape_cast %760 : vector<1x64x128xf32> to vector<64x128xf32>
    %cst_671 = arith.constant dense<0.000000e+00> : vector<16x128xf32>
    %762 = tpu.matmul %759, %761, %cst_671 {dimension_numbers = #tpu.dot_dimension_numbers<[1], [0], [0], [1], [0, 0, 1, 1], [], []>} : vector<16x64xf32>, vector<64x128xf32>, vector<16x128xf32> -> vector<16x128xf32>
    %c1_672 = arith.constant 1 : index
    %c0_673 = arith.constant 0 : index
    %c0_674 = arith.constant 0 : index
    %763 = vector.load %arg17[%c1_672, %c0_673, %c0_674] : memref<2x1x128xf32, #tpu.memory_space<vmem>>, vector<1x1x128xf32>
    %764 = vector.shape_cast %763 : vector<1x1x128xf32> to vector<1x128xf32>
    %765 = vector.broadcast %764 : vector<1x128xf32> to vector<16x128xf32>
    %766 = arith.addf %762, %765 : vector<16x128xf32>
    %cst_675 = arith.constant 5.000000e-01 : f32
    %767 = vector.broadcast %cst_675 : f32 to vector<16x128xf32>
    %768 = arith.mulf %767, %766 : vector<16x128xf32>
    %cst_676 = arith.constant 4.471500e-02 : f32
    %769 = vector.broadcast %cst_676 : f32 to vector<16x128xf32>
    %770 = arith.mulf %769, %766 : vector<16x128xf32>
    %771 = arith.mulf %770, %766 : vector<16x128xf32>
    %772 = arith.mulf %771, %766 : vector<16x128xf32>
    %773 = arith.addf %766, %772 : vector<16x128xf32>
    %cst_677 = arith.constant 0.797884583 : f32
    %774 = vector.broadcast %cst_677 : f32 to vector<16x128xf32>
    %775 = arith.mulf %774, %773 : vector<16x128xf32>
    %776 = math.tanh %775 : vector<16x128xf32>
    %cst_678 = arith.constant 1.000000e+00 : f32
    %777 = vector.broadcast %cst_678 : f32 to vector<16x128xf32>
    %778 = arith.addf %777, %776 : vector<16x128xf32>
    %779 = arith.mulf %768, %778 : vector<16x128xf32>
    %c1_679 = arith.constant 1 : index
    %c0_680 = arith.constant 0 : index
    %c0_681 = arith.constant 0 : index
    %780 = vector.load %arg18[%c1_679, %c0_680, %c0_681] : memref<2x128x64xf32, #tpu.memory_space<vmem>>, vector<1x128x64xf32>
    %781 = vector.shape_cast %780 : vector<1x128x64xf32> to vector<128x64xf32>
    %cst_682 = arith.constant dense<0.000000e+00> : vector<16x64xf32>
    %782 = tpu.matmul %779, %781, %cst_682 {dimension_numbers = #tpu.dot_dimension_numbers<[1], [0], [0], [1], [0, 0, 1, 1], [], []>} : vector<16x128xf32>, vector<128x64xf32>, vector<16x64xf32> -> vector<16x64xf32>
    %783 = arith.addf %735, %782 : vector<16x64xf32>
    %c1_683 = arith.constant 1 : index
    %c0_684 = arith.constant 0 : index
    %c0_685 = arith.constant 0 : index
    %784 = vector.load %arg19[%c1_683, %c0_684, %c0_685] : memref<2x1x64xf32, #tpu.memory_space<vmem>>, vector<1x1x64xf32>
    %785 = vector.shape_cast %784 : vector<1x1x64xf32> to vector<1x64xf32>
    %786 = vector.broadcast %785 : vector<1x64xf32> to vector<16x64xf32>
    %787 = arith.addf %783, %786 : vector<16x64xf32>
    %c0_686 = arith.constant 0 : index
    %c0_687 = arith.constant 0 : index
    %788 = vector.load %arg20[%c0_686, %c0_687] : memref<1x64xf32, #tpu.memory_space<vmem>>, vector<1x64xf32>
    %c0_688 = arith.constant 0 : index
    %c0_689 = arith.constant 0 : index
    %789 = vector.load %arg21[%c0_688, %c0_689] : memref<1x64xf32, #tpu.memory_space<vmem>>, vector<1x64xf32>
    %cst_690 = arith.constant dense<0.000000e+00> : vector<16xf32>
    %790 = vector.multi_reduction <add>, %787, %cst_690 [1] : vector<16x64xf32> to vector<16xf32>
    %791 = vector.shape_cast %790 : vector<16xf32> to vector<16x1xf32>
    %cst_691 = arith.constant 6.400000e+01 : f32
    %792 = vector.broadcast %cst_691 : f32 to vector<16x1xf32>
    %793 = arith.divf %791, %792 : vector<16x1xf32>
    %794 = vector.broadcast %793 : vector<16x1xf32> to vector<16x64xf32>
    %795 = arith.subf %787, %794 : vector<16x64xf32>
    %796 = arith.mulf %795, %795 : vector<16x64xf32>
    %cst_692 = arith.constant dense<0.000000e+00> : vector<16xf32>
    %797 = vector.multi_reduction <add>, %796, %cst_692 [1] : vector<16x64xf32> to vector<16xf32>
    %798 = vector.shape_cast %797 : vector<16xf32> to vector<16x1xf32>
    %cst_693 = arith.constant 6.400000e+01 : f32
    %799 = vector.broadcast %cst_693 : f32 to vector<16x1xf32>
    %800 = arith.divf %798, %799 : vector<16x1xf32>
    %cst_694 = arith.constant 9.99999997E-7 : f32
    %801 = vector.broadcast %cst_694 : f32 to vector<16x1xf32>
    %802 = arith.addf %800, %801 : vector<16x1xf32>
    %803 = math.rsqrt %802 : vector<16x1xf32>
    %804 = vector.broadcast %803 : vector<16x1xf32> to vector<16x64xf32>
    %805 = arith.mulf %795, %804 : vector<16x64xf32>
    %806 = vector.broadcast %788 : vector<1x64xf32> to vector<16x64xf32>
    %807 = arith.mulf %805, %806 : vector<16x64xf32>
    %808 = vector.broadcast %789 : vector<1x64xf32> to vector<16x64xf32>
    %809 = arith.addf %807, %808 : vector<16x64xf32>
    %c0_695 = arith.constant 0 : index
    %c0_696 = arith.constant 0 : index
    %810 = vector.load %arg22[%c0_695, %c0_696] : memref<1x64xf32, #tpu.memory_space<vmem>>, vector<1x64xf32>
    %c0_697 = arith.constant 0 : index
    %c0_698 = arith.constant 0 : index
    %811 = vector.load %arg23[%c0_697, %c0_698] : memref<1x64xf32, #tpu.memory_space<vmem>>, vector<1x64xf32>
    %cst_699 = arith.constant dense<0.000000e+00> : vector<16xf32>
    %812 = vector.multi_reduction <add>, %809, %cst_699 [1] : vector<16x64xf32> to vector<16xf32>
    %813 = vector.shape_cast %812 : vector<16xf32> to vector<16x1xf32>
    %cst_700 = arith.constant 6.400000e+01 : f32
    %814 = vector.broadcast %cst_700 : f32 to vector<16x1xf32>
    %815 = arith.divf %813, %814 : vector<16x1xf32>
    %816 = vector.broadcast %815 : vector<16x1xf32> to vector<16x64xf32>
    %817 = arith.subf %809, %816 : vector<16x64xf32>
    %818 = arith.mulf %817, %817 : vector<16x64xf32>
    %cst_701 = arith.constant dense<0.000000e+00> : vector<16xf32>
    %819 = vector.multi_reduction <add>, %818, %cst_701 [1] : vector<16x64xf32> to vector<16xf32>
    %820 = vector.shape_cast %819 : vector<16xf32> to vector<16x1xf32>
    %cst_702 = arith.constant 6.400000e+01 : f32
    %821 = vector.broadcast %cst_702 : f32 to vector<16x1xf32>
    %822 = arith.divf %820, %821 : vector<16x1xf32>
    %cst_703 = arith.constant 9.99999997E-7 : f32
    %823 = vector.broadcast %cst_703 : f32 to vector<16x1xf32>
    %824 = arith.addf %822, %823 : vector<16x1xf32>
    %825 = math.rsqrt %824 : vector<16x1xf32>
    %826 = vector.broadcast %825 : vector<16x1xf32> to vector<16x64xf32>
    %827 = arith.mulf %817, %826 : vector<16x64xf32>
    %828 = vector.broadcast %810 : vector<1x64xf32> to vector<16x64xf32>
    %829 = arith.mulf %827, %828 : vector<16x64xf32>
    %830 = vector.broadcast %811 : vector<1x64xf32> to vector<16x64xf32>
    %831 = arith.addf %829, %830 : vector<16x64xf32>
    %c0_704 = arith.constant 0 : index
    %c0_705 = arith.constant 0 : index
    %832 = vector.load %arg24[%c0_704, %c0_705] : memref<64x16xf32, #tpu.memory_space<vmem>>, vector<64x16xf32>
    %cst_706 = arith.constant dense<0.000000e+00> : vector<16x16xf32>
    %833 = tpu.matmul %831, %832, %cst_706 {dimension_numbers = #tpu.dot_dimension_numbers<[1], [0], [0], [1], [0, 0, 1, 1], [], []>} : vector<16x64xf32>, vector<64x16xf32>, vector<16x16xf32> -> vector<16x16xf32>
    %c0_707 = arith.constant 0 : index
    %c0_708 = arith.constant 0 : index
    %834 = vector.load %arg25[%c0_707, %c0_708] : memref<1x16xf32, #tpu.memory_space<vmem>>, vector<1x16xf32>
    %835 = vector.broadcast %834 : vector<1x16xf32> to vector<16x16xf32>
    %836 = arith.addf %833, %835 : vector<16x16xf32>
    %c0_709 = arith.constant 0 : index
    %c0_710 = arith.constant 0 : index
    %837 = vector.load %arg26[%c0_709, %c0_710] : memref<16x16xf32, #tpu.memory_space<vmem>>, vector<16x16xf32>
    tpu.vector_store %arg26[%c0_709, %c0_710], %836 {strides = array<i32>} : memref<16x16xf32, #tpu.memory_space<vmem>>, vector<16x16xf32>,
    return
  }
}

</mosaic_0001>

<bundles_post_ra>
// kernel: tpu_custom_call.1
= control target key start
LH: loop header
LB: loop body
LE: loop exit
PB: predicated region body
PF: predicated region fallthrough
CT: control target
= control target key end

     0   :  { %s14017_s0 = inlined_call_operand.vmem [shape: f32[16,16], index: 0, kind: input, shape index: {}]   ;;  %s14018_s1 = inlined_call_operand.vmem [shape: f32[16,64], index: 1, kind: input, shape index: {}]   ;;  %s14019_s2 = inlined_call_operand.vmem [shape: f32[1,64], index: 2, kind: input, shape index: {}]   ;;  %s14020_s3 = inlined_call_operand.vmem [shape: f32[16,64], index: 3, kind: input, shape index: {}]   ;;  %s14021_s4 = inlined_call_operand.vmem [shape: f32[2,1,64], index: 4, kind: input, shape index: {}]   ;;  %s14022_s5 = inlined_call_operand.vmem [shape: f32[2,1,64], index: 5, kind: input, shape index: {}]   ;;  %s14023_s6 = inlined_call_operand.vmem [shape: f32[2,4,64,16], index: 6, kind: input, shape index: {}]   ;;  %s14024_s7 = inlined_call_operand.vmem [shape: f32[2,4,64,16], index: 7, kind: input, shape index: {}]   ;;  %s14025_s8 = inlined_call_operand.vmem [shape: f32[2,4,64,16], index: 8, kind: input, shape index: {}]   ;;  %s14026_s9 = inlined_call_operand.vmem [shape: f32[2,4,1,16], index: 9, kind: input, shape index: {}]   ;;  %s14027_s10 = inlined_call_operand.vmem [shape: f32[2,4,1,16], index: 10, kind: input, shape index: {}]   ;;  %s14028_s11 = inlined_call_operand.vmem [shape: f32[2,4,1,16], index: 11, kind: input, shape index: {}]   ;;  %s14029_s12 = inlined_call_operand.vmem [shape: f32[2,4,16,64], index: 12, kind: input, shape index: {}]   ;;  %s14030_s13 = inlined_call_operand.vmem [shape: f32[2,1,64], index: 13, kind: input, shape index: {}]   ;;  %s14031_s14 = inlined_call_operand.vmem [shape: f32[2,1,64], index: 14, kind: input, shape index: {}]   ;;  %s14032_s15 = inlined_call_operand.vmem [shape: f32[2,1,64], index: 15, kind: input, shape index: {}]   ;;  %s14033_s16 = inlined_call_operand.vmem [shape: f32[2,64,128], index: 16, kind: input, shape index: {}]   ;;  %s14034_s17 = inlined_call_operand.vmem [shape: f32[2,1,128], index: 17, kind: input, shape index: {}]   ;;  %s14035_s18 = inlined_call_operand.vmem [shape: f32[2,128,64], index: 18, kind: input, shape index: {}]   ;;  %s14036_s19 = inlined_call_operand.vmem [shape: f32[2,1,64], index: 19, kind: input, shape index: {}]   ;;  %s14037_s20 = inlined_call_operand.vmem [shape: f32[1,64], index: 20, kind: input, shape index: {}]   ;;  %s14038_s21 = inlined_call_operand.vmem [shape: f32[1,64], index: 21, kind: input, shape index: {}]   ;;  %s14039_s22 = inlined_call_operand.vmem [shape: f32[1,64], index: 22, kind: input, shape index: {}]   ;;  %s14040_s23 = inlined_call_operand.vmem [shape: f32[1,64], index: 23, kind: input, shape index: {}]   ;;  %s14041_s24 = inlined_call_operand.vmem [shape: f32[64,16], index: 24, kind: input, shape index: {}]   ;;  %s14042_s25 = inlined_call_operand.vmem [shape: f32[1,16], index: 25, kind: input, shape index: {}]   ;;  %s14043_s26 = inlined_call_operand.hbm [shape: f32[16,16], index: 26, kind: output, shape index: {}]  }
   0x1   :  { %14111 = sst [smem:[#allocation56_spill]] %s14017_s0 }
   0x2   :  { %14112 = sst [smem:[#allocation57_spill]] %s14018_s1 }
   0x3   :  { %14113 = sst [smem:[#allocation58_spill]] %s14019_s2 }
   0x4   :  { %14114 = sst [smem:[#allocation59_spill]] %s14020_s3 }
   0x5   :  { %14115 = sst [smem:[#allocation60_spill]] %s14021_s4 }
   0x6   :  { %14116 = sst [smem:[#allocation61_spill]] %s14022_s5 }
   0x7   :  { %14117 = sst [smem:[#allocation62_spill]] %s14023_s6 }
   0x8   :  { %14118 = sst [smem:[#allocation63_spill]] %s14024_s7 }
   0x9   :  { %14119 = sst [smem:[#allocation64_spill]] %s14025_s8 }
   0xa   :  { %14120 = sst [smem:[#allocation65_spill]] %s14026_s9 }
   0xb   :  { %14121 = sst [smem:[#allocation66_spill]] %s14027_s10 }
   0xc   :  { %s14122_s7 = sld [smem:[#allocation57_spill]]  ;;  %vm95_vm0 = vcmask 130048  }
   0xd   :  { %s14123_s0 = sld [smem:[#allocation56_spill]] }
  0x12   :  { %v87_v0 = vld [vmem:[%s14122_s7 + $0x8] sm:$0xff]  ;;  %v86_v1 = vld [vmem:[%s14122_s7] sm:$0xff] }
  0x13   :  { %v84_v2 = vld [vmem:[%s14123_s0] sm:$0xff]  ;;  %9586 = vmatprep.subr.mxu0 %v87_v0 }
  0x14   :  { %9590 = vmatprep.mubr.msk.f32.mxu0 %vm95_vm0, %v84_v2 }
  0x15   :  { %31 = vsyncpa [#allocation3], 0  ;;  %9587 = vmatpush3.msra.mxu0 %v87_v0  ;;  %v85_v3 = vld [vmem:[%s14123_s0 + $0x8] sm:$0xff]  ;;  %s14124_s10 = sld [smem:[#allocation58_spill]]  ;;  %vm183_vm1 = vcmask 523264   ;;  %v14100_v17 = vmov 0.0  }
  0x16   :  { %9588 = vmatprep.subr.mxu0 %v86_v1  ;;  %s14125_s27 = sld [smem:[#allocation59_spill]]  ;;  %9593 = vmatprep.subr.mxu1 %v14100_v17  ;;  %vm11098_vm2 = vmmov 0   ;;  %vm562_vm3 = vcmask 64512  }
  0x17   :  { %9589 = vmatpush3.msra.mxu0 %v86_v1  ;;  %s14127_s28 = sld [smem:[#allocation62_spill]]  ;;  %9609 = vmatprep.mubr.msk.f32.mxu1 %vm11098_vm2, %v14100_v17 }
  0x18   :  { %9591 = vmatmul.mubr.msk.f32.vlgmr.msra.gmra.mxu0 %vm95_vm0, %v85_v3  ;;  %9612 = vmatprep.subr.mxu0 %v14100_v17  ;;  %s14128_s29 = sld [smem:[#allocation63_spill]]  ;;  %v11517_v3 = vld [vmem:[%s14028_s11] ss:$0 sm:$0xff] }
  0x19   :  { %9628 = vmatprep.mubr.msk.f32.mxu0 %vm11098_vm2, %v14100_v17  ;;  %s14129_s6 = sld [smem:[#allocation60_spill]] }
  0x1a   :  { %s14130_s7 = sld [smem:[#allocation61_spill]] }
  0x1b   :  { %v8574_v4 = vld [vmem:[%s14124_s10] ss:$0 sm:$0xff]  ;;  %s14131_s0 = sld [smem:[#allocation64_spill]] }
  0x1c   :  { %v177_v8 = vld [vmem:[%s14125_s27] sm:$0xff]  ;;  %s14132_s1 = sld [smem:[#allocation66_spill]] }
  0x1d   :  { %v234_v18 = vld [vmem:[%s14127_s28 + $0x38] sm:$0xff]  ;;  %v233_v20 = vld [vmem:[%s14127_s28 + $0x30] sm:$0xff]  ;;  %v232_v22 = vld [vmem:[%s14127_s28 + $0x28] sm:$0xff]  ;;  %s14133_s4 = sld [smem:[#allocation65_spill]] }
  0x1e   :  { %9594 = vmatpush3.msra.mxu1 %v234_v18  ;;  %v11277_v19 = vld [vmem:[%s14128_s29 + $0x38] sm:$0xff]  ;;  %v11288_v21 = vld [vmem:[%s14128_s29 + $0x30] sm:$0xff]  ;;  %v11299_v23 = vld [vmem:[%s14128_s29 + $0x28] sm:$0xff] }
  0x1f   :  { %9595 = vmatprep.subr.mxu1 %v14100_v17  ;;  %9613 = vmatpush3.msra.mxu0 %v11277_v19  ;;  %v231_v24 = vld [vmem:[%s14127_s28 + $0x20] sm:$0xff]  ;;  %v230_v26 = vld [vmem:[%s14127_s28 + $0x18] sm:$0xff]  ;;  %v229_v28 = vld [vmem:[%s14127_s28 + $0x10] sm:$0xff] }
  0x20   :  { %9596 = vmatpush3.msra.mxu1 %v233_v20  ;;  %9614 = vmatprep.subr.mxu0 %v14100_v17  ;;  %v11310_v25 = vld [vmem:[%s14128_s29 + $0x20] sm:$0xff]  ;;  %v11321_v27 = vld [vmem:[%s14128_s29 + $0x18] sm:$0xff]  ;;  %v11332_v29 = vld [vmem:[%s14128_s29 + $0x10] sm:$0xff] }
  0x21   :  { %9597 = vmatprep.subr.mxu1 %v14100_v17  ;;  %9615 = vmatpush3.msra.mxu0 %v11288_v21  ;;  %v228_v30 = vld [vmem:[%s14127_s28 + $0x8] sm:$0xff]  ;;  %v227_v32 = vld [vmem:[%s14127_s28] sm:$0xff]  ;;  %v407_v43 = vld [vmem:[%s14131_s0 + $0x38] sm:$0xff] }
  0x22   :  { %9598 = vmatpush3.msra.mxu1 %v232_v22  ;;  %9616 = vmatprep.subr.mxu0 %v14100_v17  ;;  %v11343_v31 = vld [vmem:[%s14128_s29 + $0x8] sm:$0xff]  ;;  %v11354_v33 = vld [vmem:[%s14128_s29] sm:$0xff]  ;;  %v406_v44 = vld [vmem:[%s14131_s0 + $0x30] sm:$0xff] }
  0x23   :  { %9599 = vmatprep.subr.mxu1 %v14100_v17  ;;  %9617 = vmatpush3.msra.mxu0 %v11299_v23  ;;  %v11366_v38 = vld [vmem:[%s14129_s6] ss:$0 sm:$0xff]  ;;  %v405_v45 = vld [vmem:[%s14131_s0 + $0x28] sm:$0xff]  ;;  %v11406_v47 = vld [vmem:[%s14131_s0 + $0x18] sm:$0xff] }
  0x24   :  { %9600 = vmatpush3.msra.mxu1 %v231_v24  ;;  %9618 = vmatprep.subr.mxu0 %v14100_v17  ;;  %v11372_v40 = vld [vmem:[%s14130_s7] ss:$0 sm:$0xff]  ;;  %v11413_v48 = vld [vmem:[%s14131_s0 + $0x10] sm:$0xff]  ;;  %v11420_v49 = vld [vmem:[%s14131_s0 + $0x8] sm:$0xff] }
  0x25   :  { %9601 = vmatprep.subr.mxu1 %v14100_v17  ;;  %9619 = vmatpush3.msra.mxu0 %v11310_v25  ;;  %v11400_v46 = vld [vmem:[%s14131_s0 + $0x20] sm:$0xff]  ;;  %v11434_v51 = vld [vmem:[%s14128_s29 + $0x78] sm:$0xff]  ;;  %v11443_v52 = vld [vmem:[%s14128_s29 + $0x70] sm:$0xff] }
  0x26   :  { %9602 = vmatpush3.msra.mxu1 %v230_v26  ;;  %9620 = vmatprep.subr.mxu0 %v14100_v17  ;;  %v11427_v50 = vld [vmem:[%s14131_s0] sm:$0xff]  ;;  %v11452_v53 = vld [vmem:[%s14128_s29 + $0x68] sm:$0xff]  ;;  %v11466_v55 = vld [vmem:[%s14128_s29 + $0x58] sm:$0xff] }
  0x27   :  { %9603 = vmatprep.subr.mxu1 %v14100_v17  ;;  %9621 = vmatpush3.msra.mxu0 %v11321_v27  ;;  %v11459_v54 = vld [vmem:[%s14128_s29 + $0x60] sm:$0xff]  ;;  %v11473_v56 = vld [vmem:[%s14128_s29 + $0x50] sm:$0xff]  ;;  %v11480_v57 = vld [vmem:[%s14128_s29 + $0x48] sm:$0xff] }
  0x28   :  { %9604 = vmatpush3.msra.mxu1 %v229_v28  ;;  %9622 = vmatprep.subr.mxu0 %v14100_v17  ;;  %v11487_v58 = vld [vmem:[%s14128_s29 + $0x40] sm:$0xff] }
  0x29   :  { %9605 = vmatprep.subr.mxu1 %v14100_v17  ;;  %9623 = vmatpush3.msra.mxu0 %v11332_v29  ;;  %v11500_v59 = vld [vmem:[%s14132_s1] ss:$0 sm:$0xff] }
  0x2a   :  { %9606 = vmatpush3.msra.mxu1 %v228_v30  ;;  %9624 = vmatprep.subr.mxu0 %v14100_v17  ;;  %v11505_v62 = vld [vmem:[%s14133_s4] ss:$0 sm:$0xff] }
  0x2b   :  { %9607 = vmatprep.subr.mxu1 %v14100_v17  ;;  %9625 = vmatpush3.msra.mxu0 %v11343_v31 }
  0x2c   :  { %9608 = vmatpush3.msra.mxu1 %v227_v32  ;;  %9626 = vmatprep.subr.mxu0 %v14100_v17 }
  0x2d   :  { %9627 = vmatpush3.msra.mxu0 %v11354_v33  ;;  %9631 = vmatprep.subr.mxu1 %v14100_v17 }
  0x2e   :  { %9650 = vmatprep.subr.mxu0 %v14100_v17 }
  0xd8   :  { %v9592_v5 = vpop.f32.mrf.mxu0 }
  0xd9   :  { %v11254_v6 = vadd.f32 %v9592_v5, %v8574_v4 }
  0xda   :  { %v168_v7 = vpop.f32.mrf.mxu0 }
  0xdb   :  { %v169_v9 = vadd.f32 %v8574_v4, %v168_v7 }
  0xdd   :  { %v11259_v10 = vadd.f32 %v177_v8, %v169_v9  ;;  %v11524_v8 = vld [vmem:[%s14132_s1 + $0x1] ss:$0 sm:$0xff] }
  0xdf   :  { %14126 = vst [vmem:[#allocation5_spill] sm:$0xff] %v11259_v10  ;;  %v184_v11 = vsel %vm183_vm1, %v11259_v10, 0.0 }
  0xe0   :  { %185 = vadd.xlane.f32.xlu0 %v184_v11 }
 0x169   :  { %v186_v12 = vpop.xlane.xlu0 %185 }
 0x16a   :  { %v191_v13 = vmul.f32 0.015625, %v186_v12 }
 0x16c   :  { %v11264_v14 = vsub.f32 %v11259_v10, %v191_v13 }
 0x16e   :  { %v195_v15 = vmul.f32 %v11264_v14, %v11264_v14 }
 0x170   :  { %v197_v16 = vsel %vm183_vm1, %v195_v15, 0.0 }
 0x171   :  { %198 = vadd.xlane.f32.xlu0 %v197_v16 }
 0x1fa   :  { %v199_v34 = vpop.xlane.xlu0 %198 }
 0x1fb   :  { %v203_v35 = vmul.f32 0.015625, %v199_v34  ;;  %v11534_v34 = vld [vmem:[%s14127_s28 + $0x78] sm:$0xff] }
 0x1fd   :  { %v205_v36 = vadd.f32 1e-06, %v203_v35  ;;  %v11540_v35 = vld [vmem:[%s14127_s28 + $0x70] sm:$0xff] }
 0x1ff   :  { %10909 = vrsqrt.f32 %v205_v36  ;;  %v11549_v36 = vld [vmem:[%s14127_s28 + $0x68] sm:$0xff] }
 0x20c   :  { %v10910_v37 = vpop.eup %10909 }
 0x20d   :  { %v209_v39 = vmul.f32 %v10910_v37, %v11264_v14  ;;  %v11556_v37 = vld [vmem:[%s14127_s28 + $0x60] sm:$0xff] }
 0x20f   :  { %v217_v41 = vmul.f32 %v11366_v38, %v209_v39  ;;  %v11563_v39 = vld [vmem:[%s14127_s28 + $0x58] sm:$0xff] }
 0x211   :  { %v11376_v42 = vadd.f32 %v11372_v40, %v217_v41  ;;  %v11570_v41 = vld [vmem:[%s14127_s28 + $0x50] sm:$0xff] }
 0x213   :  { %9610 = vmatmul.mubr.msk.f32.vlgmr.msra.gmra.mxu1 %vm183_vm1, %v11376_v42  ;;  %9629 = vmatmul.mubr.msk.f32.vlgmr.msra.gmra.mxu0 %vm183_vm1, %v11376_v42 }
 0x214   :  { %9632 = vmatpush3.msra.mxu1 %v407_v43  ;;  %9647 = vmatprep.mubr.msk.f32.mxu1 %vm11098_vm2, %v14100_v17  ;;  %v11577_v43 = vld [vmem:[%s14127_s28 + $0x48] sm:$0xff] }
 0x215   :  { %9633 = vmatprep.subr.mxu1 %v14100_v17  ;;  %9652 = vmatprep.mubr.msk.f32.mxu0 %vm11098_vm2, %v14100_v17 }
 0x216   :  { %9634 = vmatpush3.msra.mxu1 %v406_v44  ;;  %v11584_v44 = vld [vmem:[%s14127_s28 + $0x40] sm:$0xff] }
 0x217   :  { %9635 = vmatprep.subr.mxu1 %v14100_v17 }
 0x218   :  { %9636 = vmatpush3.msra.mxu1 %v405_v45  ;;  %v11591_v45 = vld [vmem:[%s14131_s0 + $0x78] sm:$0xff] }
 0x219   :  { %9637 = vmatprep.subr.mxu1 %v14100_v17 }
 0x21a   :  { %9638 = vmatpush3.msra.mxu1 %v11400_v46 }
 0x21b   :  { %9639 = vmatprep.subr.mxu1 %v14100_v17 }
 0x21c   :  { %9640 = vmatpush3.msra.mxu1 %v11406_v47 }
 0x21d   :  { %9641 = vmatprep.subr.mxu1 %v14100_v17 }
 0x21e   :  { %9642 = vmatpush3.msra.mxu1 %v11413_v48 }
 0x21f   :  { %9643 = vmatprep.subr.mxu1 %v14100_v17 }
 0x220   :  { %9644 = vmatpush3.msra.mxu1 %v11420_v49 }
 0x221   :  { %9645 = vmatprep.subr.mxu1 %v14100_v17 }
 0x222   :  { %9646 = vmatpush3.msra.mxu1 %v11427_v50 }
 0x223   :  { %9648 = vmatmul.mubr.msk.f32.vlgmr.msra.gmra.mxu1 %vm183_vm1, %v11376_v42  ;;  %9679 = vmatprep.subr.mxu1 %v14100_v17 }
 0x224   :  { %9680 = vmatpush3.msra.mxu1 %v11434_v51  ;;  %9695 = vmatprep.mubr.msk.f32.mxu1 %vm11098_vm2, %v14100_v17 }
 0x225   :  { %9681 = vmatprep.subr.mxu1 %v14100_v17 }
 0x226   :  { %9682 = vmatpush3.msra.mxu1 %v11443_v52 }
 0x227   :  { %9683 = vmatprep.subr.mxu1 %v14100_v17 }
 0x228   :  { %9684 = vmatpush3.msra.mxu1 %v11452_v53 }
 0x229   :  { %9685 = vmatprep.subr.mxu1 %v14100_v17 }
 0x22a   :  { %9686 = vmatpush3.msra.mxu1 %v11459_v54 }
 0x22b   :  { %9687 = vmatprep.subr.mxu1 %v14100_v17 }
 0x22c   :  { %9688 = vmatpush3.msra.mxu1 %v11466_v55 }
 0x22d   :  { %9689 = vmatprep.subr.mxu1 %v14100_v17 }
 0x22e   :  { %9690 = vmatpush3.msra.mxu1 %v11473_v56 }
 0x22f   :  { %9691 = vmatprep.subr.mxu1 %v14100_v17 }
 0x230   :  { %9692 = vmatpush3.msra.mxu1 %v11480_v57 }
 0x231   :  { %9693 = vmatprep.subr.mxu1 %v14100_v17 }
 0x232   :  { %9694 = vmatpush3.msra.mxu1 %v11487_v58 }
 0x233   :  { %9696 = vmatmul.mubr.msk.f32.vlgmr.msra.gmra.mxu1 %vm183_vm1, %v11376_v42  ;;  %9717 = vmatprep.subr.mxu1 %v14100_v17 }
 0x234   :  { %9719 = vmatprep.mubr.msk.f32.mxu1 %vm11098_vm2, %v14100_v17 }
 0x2d3   :  { %v311_v60 = vpop.f32.mrf.mxu1  ;;  %v396_v61 = vpop.f32.mrf.mxu0 }
 0x2d4   :  { %v397_v63 = vadd.f32 %v11500_v59, %v396_v61  ;;  %v312_v2 = vadd.f32 %v11505_v62, %v311_v60  ;;  %v11600_v60 = vld [vmem:[%s14131_s0 + $0x70] sm:$0xff]  ;;  %v11609_v61 = vld [vmem:[%s14131_s0 + $0x68] sm:$0xff] }
 0x2d5   :  { %v9611_v0 = vpop.f32.mrf.mxu1  ;;  %v9630_v1 = vpop.f32.mrf.mxu0 }
 0x2d6   :  { %9651 = vmatpush3.xpose.msk.msra.mxu0 %vm95_vm0, %v397_v63  ;;  %v11616_v63 = vld [vmem:[%s14131_s0 + $0x60] sm:$0xff]  ;;  %v11623_v0 = vld [vmem:[%s14131_s0 + $0x58] sm:$0xff]  ;;  %v11630_v1 = vld [vmem:[%s14131_s0 + $0x50] sm:$0xff] }
 0x2d7   :  { %9655 = vmatprep.subr.mxu0 %v14100_v17 }
 0x2d9   :  { %9653 = vmatmul.mubr.msk.f32.vlgmr.msra.gmra.mxu0 %vm95_vm0, %v312_v2  ;;  %v11637_v2 = vld [vmem:[%s14131_s0 + $0x48] sm:$0xff] }
 0x2da   :  { %9657 = vmatprep.mubr.msk.f32.mxu0 %vm11098_vm2, %v14100_v17 }
 0x2e3   :  { %v481_v4 = vpop.f32.mrf.mxu1 }
 0x2e4   :  { %v482_v5 = vadd.f32 %v11517_v3, %v481_v4  ;;  %v11644_v4 = vld [vmem:[%s14131_s0 + $0x40] sm:$0xff] }
 0x2e5   :  { %v9649_v7 = vpop.f32.mrf.mxu1 }
 0x2e6   :  { %9656 = vmatpush3.msra.mxu0 %v482_v5  ;;  %v11651_v5 = vld [vmem:[%s14029_s12 + $0x8] sm:$0xff]  ;;  %v11660_v7 = vld [vmem:[%s14029_s12] sm:$0xff] }
 0x2e7   :  { %9660 = vmatprep.subr.mxu0 %v14100_v17 }
 0x2f3   :  { %v819_v9 = vpop.f32.mrf.mxu1 }
 0x2f4   :  { %v820_v11 = vadd.f32 %v11524_v8, %v819_v9  ;;  %v11671_v9 = vld [vmem:[%s14128_s29 + $0xb8] sm:$0xff] }
 0x2f5   :  { %v9697_v12 = vpop.f32.mrf.mxu1 }
 0x2f6   :  { %9718 = vmatpush3.xpose.msk.msra.mxu1 %vm95_vm0, %v820_v11  ;;  %v11677_v12 = vld [vmem:[%s14128_s29 + $0xb0] sm:$0xff] }
 0x2f7   :  { %9722 = vmatprep.subr.mxu1 %v14100_v17  ;;  %14134 = vst [vmem:[#allocation6_spill] sm:$0xff] %v11677_v12 }
 0x399   :  { %v557_v13 = vpop.f32.mrf.mxu0 }
 0x39a   :  { %v561_v14 = vmul.f32 0.25, %v557_v13 }
 0x39b   :  { %v9654_v15 = vpop.f32.mrf.mxu0 }
 0x39c   :  { %v563_v16 = vsel %vm562_vm3, %v561_v14, -inf  ;;  %v11693_v15 = vld [vmem:[%s14128_s29 + $0xa0] sm:$0xff] }
 0x39d   :  { %564 = vmax.xlane.f32.xlu1 %v563_v16  ;;  %14136 = vst [vmem:[#allocation8_spill] sm:$0xff] %v11693_v15  ;;  %v11700_v16 = vld [vmem:[%s14128_s29 + $0x98] sm:$0xff] }
 0x39e   :  { %14137 = vst [vmem:[#allocation9_spill] sm:$0xff] %v11700_v16 }
 0x426   :  { %v565_v18 = vpop.xlane.xlu1 %564 }
 0x427   :  { %v566_v20 = vsub.f32 %v561_v14, %v565_v18  ;;  %v11686_v14 = vld [vmem:[%s14128_s29 + $0xa8] sm:$0xff]  ;;  %v11707_v18 = vld [vmem:[%s14128_s29 + $0x90] sm:$0xff] }
 0x428   :  { %14135 = vst [vmem:[#allocation7_spill] sm:$0xff] %v11686_v14  ;;  %14138 = vst [vmem:[#allocation10_spill] sm:$0xff] %v11707_v18 }
 0x429   :  { %v567_v22 = vmul.f32 1.442695, %v566_v20  ;;  %v11714_v20 = vld [vmem:[%s14128_s29 + $0x88] sm:$0xff] }
 0x42a   :  { %14139 = vst [vmem:[#allocation11_spill] sm:$0xff] %v11714_v20 }
 0x42b   :  { %10911 = vpow2.f32 %v567_v22  ;;  %v11721_v22 = vld [vmem:[%s14128_s29 + $0x80] sm:$0xff] }
 0x42c   :  { %14140 = vst [vmem:[#allocation12_spill] sm:$0xff] %v11721_v22 }
 0x438   :  { %v10912_v24 = vpop.eup %10911 }
 0x439   :  { %v569_v26 = vsel %vm562_vm3, %v10912_v24, 0.0 }
 0x43a   :  { %570 = vadd.xlane.f32.xlu1 %v569_v26 }
 0x4c3   :  { %v571_v28 = vpop.xlane.xlu1 %570 }
 0x4c4   :  { %10913 = vrcp.f32 %v571_v28 }
 0x4d1   :  { %v10914_v30 = vpop.eup %10913 }
 0x4d2   :  { %v573_v32 = vmul.f32 %v10914_v30, %v10912_v24  ;;  %v11727_v24 = vld [vmem:[%s14133_s4 + $0x1] ss:$0 sm:$0xff] }
 0x4d3   :  { %14141 = vst [vmem:[#allocation13_spill] sm:$0xff] %v11727_v24 }
 0x4d4   :  { %9658 = vmatmul.mubr.msk.f32.vlgmr.msra.gmra.mxu0 %vm562_vm3, %v573_v32  ;;  %v11743_v32 = vld [vmem:[%s14028_s11 + $0x1] ss:$0 sm:$0xff] }
 0x4d5   :  { %9661 = vmatpush3.msra.mxu0 %v11534_v34  ;;  %9676 = vmatprep.mubr.msk.f32.mxu0 %vm11098_vm2, %v14100_v17  ;;  %14142 = vst [vmem:[#allocation14_spill] sm:$0xff] %v11743_v32 }
 0x4d6   :  { %9662 = vmatprep.subr.mxu0 %v14100_v17 }
 0x4d7   :  { %9663 = vmatpush3.msra.mxu0 %v11540_v35 }
 0x4d8   :  { %9664 = vmatprep.subr.mxu0 %v14100_v17 }
 0x4d9   :  { %9665 = vmatpush3.msra.mxu0 %v11549_v36 }
 0x4da   :  { %9666 = vmatprep.subr.mxu0 %v14100_v17 }
 0x4db   :  { %9667 = vmatpush3.msra.mxu0 %v11556_v37 }
 0x4dc   :  { %9668 = vmatprep.subr.mxu0 %v14100_v17 }
 0x4dd   :  { %9669 = vmatpush3.msra.mxu0 %v11563_v39 }
 0x4de   :  { %9670 = vmatprep.subr.mxu0 %v14100_v17 }
 0x4df   :  { %9671 = vmatpush3.msra.mxu0 %v11570_v41 }
 0x4e0   :  { %9672 = vmatprep.subr.mxu0 %v14100_v17 }
 0x4e1   :  { %9673 = vmatpush3.msra.mxu0 %v11577_v43 }
 0x4e2   :  { %9674 = vmatprep.subr.mxu0 %v14100_v17 }
 0x4e3   :  { %9675 = vmatpush3.msra.mxu0 %v11584_v44 }
 0x4e4   :  { %9677 = vmatmul.mubr.msk.f32.vlgmr.msra.gmra.mxu0 %vm183_vm1, %v11376_v42  ;;  %9698 = vmatprep.subr.mxu0 %v14100_v17 }
 0x4e5   :  { %9699 = vmatpush3.msra.mxu0 %v11591_v45  ;;  %9714 = vmatprep.mubr.msk.f32.mxu0 %vm11098_vm2, %v14100_v17 }
 0x4e6   :  { %9700 = vmatprep.subr.mxu0 %v14100_v17 }
 0x4e7   :  { %9701 = vmatpush3.msra.mxu0 %v11600_v60 }
 0x4e8   :  { %9702 = vmatprep.subr.mxu0 %v14100_v17 }
 0x4e9   :  { %9703 = vmatpush3.msra.mxu0 %v11609_v61 }
 0x4ea   :  { %9704 = vmatprep.subr.mxu0 %v14100_v17 }
 0x4eb   :  { %9705 = vmatpush3.msra.mxu0 %v11616_v63 }
 0x4ec   :  { %9706 = vmatprep.subr.mxu0 %v14100_v17 }
 0x4ed   :  { %9707 = vmatpush3.msra.mxu0 %v11623_v0 }
 0x4ee   :  { %9708 = vmatprep.subr.mxu0 %v14100_v17 }
 0x4ef   :  { %9709 = vmatpush3.msra.mxu0 %v11630_v1 }
 0x4f0   :  { %9710 = vmatprep.subr.mxu0 %v14100_v17 }
 0x4f1   :  { %9711 = vmatpush3.msra.mxu0 %v11637_v2 }
 0x4f2   :  { %9712 = vmatprep.subr.mxu0 %v14100_v17 }
 0x4f3   :  { %9713 = vmatpush3.msra.mxu0 %v11644_v4 }
 0x4f4   :  { %9715 = vmatmul.mubr.msk.f32.vlgmr.msra.gmra.mxu0 %vm183_vm1, %v11376_v42  ;;  %9734 = vmatprep.subr.mxu0 %v14100_v17 }
 0x4f5   :  { %9735 = vmatpush3.msra.mxu0 %v11651_v5  ;;  %9738 = vmatprep.mubr.msk.f32.mxu0 %vm11098_vm2, %v14100_v17 }
 0x4f6   :  { %9736 = vmatprep.subr.mxu0 %v14100_v17 }
 0x4f7   :  { %9737 = vmatpush3.msra.mxu0 %v11660_v7 }
 0x4f8   :  { %9760 = vmatprep.subr.mxu0 %v14100_v17 }
 0x594   :  { %v643_v11 = vpop.f32.mrf.mxu0 }
 0x595   :  { %9739 = vmatmul.mubr.msk.f32.vlgmr.msra.gmra.mxu0 %vm95_vm0, %v643_v11 }
 0x596   :  { %9761 = vmatpush3.msra.mxu0 %v11671_v9  ;;  %v9659_v13 = vpop.f32.mrf.mxu0  ;;  %9776 = vmatprep.mubr.msk.f32.mxu0 %vm11098_vm2, %v14100_v17 }
 0x597   :  { %9762 = vmatprep.subr.mxu0 %v14100_v17 }
 0x598   :  { %9763 = vmatpush3.msra.mxu0 %v11677_v12 }
 0x599   :  { %9764 = vmatprep.subr.mxu0 %v14100_v17 }
 0x59a   :  { %9765 = vmatpush3.msra.mxu0 %v11686_v14 }
 0x59b   :  { %9766 = vmatprep.subr.mxu0 %v14100_v17 }
 0x59c   :  { %9767 = vmatpush3.msra.mxu0 %v11693_v15 }
 0x59d   :  { %9768 = vmatprep.subr.mxu0 %v14100_v17 }
 0x59e   :  { %9769 = vmatpush3.msra.mxu0 %v11700_v16 }
 0x59f   :  { %9770 = vmatprep.subr.mxu0 %v14100_v17 }
 0x5a0   :  { %9771 = vmatpush3.msra.mxu0 %v11707_v18 }
 0x5a1   :  { %9772 = vmatprep.subr.mxu0 %v14100_v17 }
 0x5a2   :  { %9773 = vmatpush3.msra.mxu0 %v11714_v20 }
 0x5a3   :  { %9774 = vmatprep.subr.mxu0 %v14100_v17 }
 0x5a4   :  { %v732_v26 = vpop.f32.mrf.mxu0  ;;  %9775 = vmatpush3.msra.mxu0 %v11721_v22 }
 0x5a5   :  { %v733_v28 = vadd.f32 %v11727_v24, %v732_v26  ;;  %9777 = vmatmul.mubr.msk.f32.vlgmr.msra.gmra.mxu0 %vm183_vm1, %v11376_v42  ;;  %9798 = vmatprep.subr.mxu0 %v14100_v17 }
 0x5a6   :  { %v9678_v30 = vpop.f32.mrf.mxu0  ;;  %9800 = vmatprep.mubr.msk.f32.mxu0 %vm11098_vm2, %v14100_v17 }
 0x5a7   :  { %9720 = vmatmul.mubr.msk.f32.vlgmr.msra.gmra.mxu1 %vm95_vm0, %v733_v28  ;;  %v11752_v28 = vld [vmem:[%s14132_s1 + $0x2] ss:$0 sm:$0xff] }
 0x5a8   :  { %9724 = vmatprep.mubr.msk.f32.mxu1 %vm11098_vm2, %v14100_v17  ;;  %14143 = vst [vmem:[#allocation15_spill] sm:$0xff] %v11752_v28 }
 0x5b4   :  { %v906_v11 = vpop.f32.mrf.mxu0 }
 0x5b5   :  { %v907_v13 = vadd.f32 %v11743_v32, %v906_v11 }
 0x5b6   :  { %v9716_v26 = vpop.f32.mrf.mxu0 }
 0x5b7   :  { %9723 = vmatpush3.msra.mxu1 %v907_v13 }
 0x5b8   :  { %9727 = vmatprep.subr.mxu1 %v14100_v17 }
 0x655   :  { %v11747_v30 = vpop.f32.mrf.mxu0 }
 0x657   :  { %v9740_v10 = vpop.f32.mrf.mxu0 }
 0x665   :  { %v1390_v24 = vpop.f32.mrf.mxu0 }
 0x666   :  { %v1391_v22 = vadd.f32 %v11752_v28, %v1390_v24 }
 0x667   :  { %v982_v20 = vpop.f32.mrf.mxu1  ;;  %v9778_v18 = vpop.f32.mrf.mxu0 }
 0x668   :  { %v986_v16 = vmul.f32 0.25, %v982_v20  ;;  %9799 = vmatpush3.xpose.msk.msra.mxu0 %vm95_vm0, %v1391_v22  ;;  %v11762_v22 = vld [vmem:[%s14029_s12 + $0x18] sm:$0xff] }
 0x669   :  { %v9721_v11 = vpop.f32.mrf.mxu1  ;;  %9803 = vmatprep.subr.mxu0 %v14100_v17  ;;  %14144 = vst [vmem:[#allocation16_spill] sm:$0xff] %v11762_v22 }
 0x66a   :  { %v987_v13 = vsel %vm562_vm3, %v986_v16, -inf }
 0x66b   :  { %988 = vmax.xlane.f32.xlu0 %v987_v13  ;;  %v11794_v13 = vld [vmem:[%s14127_s28 + $0xa8] sm:$0xff] }
 0x66c   :  { %14148 = vst [vmem:[#allocation20_spill] sm:$0xff] %v11794_v13 }
 0x6f4   :  { %v989_v10 = vpop.xlane.xlu0 %988 }
 0x6f5   :  { %v990_v26 = vsub.f32 %v986_v16, %v989_v10  ;;  %v11768_v16 = vld [vmem:[%s14029_s12 + $0x10] sm:$0xff]  ;;  %v11801_v10 = vld [vmem:[%s14127_s28 + $0xa0] sm:$0xff] }
 0x6f6   :  { %14145 = vst [vmem:[#allocation17_spill] sm:$0xff] %v11768_v16  ;;  %14149 = vst [vmem:[#allocation21_spill] sm:$0xff] %v11801_v10 }
 0x6f7   :  { %v991_v32 = vmul.f32 1.442695, %v990_v26  ;;  %v11808_v26 = vld [vmem:[%s14127_s28 + $0x98] sm:$0xff] }
 0x6f8   :  { %14150 = vst [vmem:[#allocation22_spill] sm:$0xff] %v11808_v26 }
 0x6f9   :  { %10915 = vpow2.f32 %v991_v32  ;;  %v11785_v32 = vld [vmem:[%s14127_s28 + $0xb0] sm:$0xff] }
 0x6fa   :  { %14147 = vst [vmem:[#allocation19_spill] sm:$0xff] %v11785_v32 }
 0x706   :  { %v10916_v15 = vpop.eup %10915 }
 0x707   :  { %v993_v14 = vsel %vm562_vm3, %v10916_v15, 0.0 }
 0x708   :  { %994 = vadd.xlane.f32.xlu1 %v993_v14  ;;  %v11779_v14 = vld [vmem:[%s14127_s28 + $0xb8] sm:$0xff] }
 0x709   :  { %14146 = vst [vmem:[#allocation18_spill] sm:$0xff] %v11779_v14 }
 0x791   :  { %v995_v24 = vpop.xlane.xlu1 %994 }
 0x792   :  { %10917 = vrcp.f32 %v995_v24  ;;  %v11815_v24 = vld [vmem:[%s14127_s28 + $0x90] sm:$0xff] }
 0x793   :  { %14151 = vst [vmem:[#allocation23_spill] sm:$0xff] %v11815_v24 }
 0x79f   :  { %v10918_v18 = vpop.eup %10917 }
 0x7a0   :  { %v997_v20 = vmul.f32 %v10918_v18, %v10916_v15  ;;  %v11822_v18 = vld [vmem:[%s14127_s28 + $0x88] sm:$0xff] }
 0x7a1   :  { %14152 = vst [vmem:[#allocation24_spill] sm:$0xff] %v11822_v18 }
 0x7a2   :  { %9725 = vmatmul.mubr.msk.f32.vlgmr.msra.gmra.mxu1 %vm562_vm3, %v997_v20  ;;  %v11829_v20 = vld [vmem:[%s14127_s28 + $0x80] sm:$0xff] }
 0x7a3   :  { %9728 = vmatpush3.msra.mxu1 %v11762_v22  ;;  %9731 = vmatprep.mubr.msk.f32.mxu1 %vm11098_vm2, %v14100_v17  ;;  %14153 = vst [vmem:[#allocation25_spill] sm:$0xff] %v11829_v20 }
 0x7a4   :  { %9729 = vmatprep.subr.mxu1 %v14100_v17 }
 0x7a5   :  { %9730 = vmatpush3.msra.mxu1 %v11768_v16 }
 0x7a6   :  { %9741 = vmatprep.subr.mxu1 %v14100_v17 }
 0x862   :  { %v1067_v15 = vpop.f32.mrf.mxu1 }
 0x863   :  { %9732 = vmatmul.mubr.msk.f32.vlgmr.msra.gmra.mxu1 %vm95_vm0, %v1067_v15  ;;  %v11836_v15 = vld [vmem:[%s14131_s0 + $0xb8] sm:$0xff] }
 0x864   :  { %9742 = vmatpush3.msra.mxu1 %v11779_v14  ;;  %v9726_v11 = vpop.f32.mrf.mxu1  ;;  %9757 = vmatprep.mubr.msk.f32.mxu1 %vm11098_vm2, %v14100_v17  ;;  %14154 = vst [vmem:[#allocation26_spill] sm:$0xff] %v11836_v15 }
 0x865   :  { %9743 = vmatprep.subr.mxu1 %v14100_v17  ;;  %v11845_v11 = vld [vmem:[%s14131_s0 + $0xb0] sm:$0xff] }
 0x866   :  { %9744 = vmatpush3.msra.mxu1 %v11785_v32  ;;  %14155 = vst [vmem:[#allocation27_spill] sm:$0xff] %v11845_v11 }
 0x867   :  { %9745 = vmatprep.subr.mxu1 %v14100_v17 }
 0x868   :  { %9746 = vmatpush3.msra.mxu1 %v11794_v13 }
 0x869   :  { %9747 = vmatprep.subr.mxu1 %v14100_v17 }
 0x86a   :  { %9748 = vmatpush3.msra.mxu1 %v11801_v10  ;;  %v11973_v10 = vld [vmem:[%s14028_s11 + $0x2] ss:$0 sm:$0xff] }
 0x86b   :  { %9749 = vmatprep.subr.mxu1 %v14100_v17  ;;  %14171 = vst [vmem:[#allocation43_spill] sm:$0xff] %v11973_v10 }
 0x86c   :  { %9750 = vmatpush3.msra.mxu1 %v11808_v26 }
 0x86d   :  { %9751 = vmatprep.subr.mxu1 %v14100_v17 }
 0x86e   :  { %9752 = vmatpush3.msra.mxu1 %v11815_v24  ;;  %v11964_v24 = vld [vmem:[%s14133_s4 + $0x2] ss:$0 sm:$0xff] }
 0x86f   :  { %9753 = vmatprep.subr.mxu1 %v14100_v17  ;;  %14170 = vst [vmem:[#allocation42_spill] sm:$0xff] %v11964_v24 }
 0x870   :  { %9754 = vmatpush3.msra.mxu1 %v11822_v18  ;;  %v11861_v18 = vld [vmem:[%s14131_s0 + $0xa0] sm:$0xff] }
 0x871   :  { %9755 = vmatprep.subr.mxu1 %v14100_v17  ;;  %14157 = vst [vmem:[#allocation29_spill] sm:$0xff] %v11861_v18 }
 0x872   :  { %9756 = vmatpush3.msra.mxu1 %v11829_v20  ;;  %v11854_v20 = vld [vmem:[%s14131_s0 + $0xa8] sm:$0xff] }
 0x873   :  { %9758 = vmatmul.mubr.msk.f32.vlgmr.msra.gmra.mxu1 %vm183_vm1, %v11376_v42  ;;  %9779 = vmatprep.subr.mxu1 %v14100_v17  ;;  %14156 = vst [vmem:[#allocation28_spill] sm:$0xff] %v11854_v20 }
 0x874   :  { %9780 = vmatpush3.msra.mxu1 %v11836_v15  ;;  %9795 = vmatprep.mubr.msk.f32.mxu1 %vm11098_vm2, %v14100_v17  ;;  %v11868_v15 = vld [vmem:[%s14131_s0 + $0x98] sm:$0xff] }
 0x875   :  { %9781 = vmatprep.subr.mxu1 %v14100_v17  ;;  %14158 = vst [vmem:[#allocation30_spill] sm:$0xff] %v11868_v15 }
 0x876   :  { %9782 = vmatpush3.msra.mxu1 %v11845_v11  ;;  %v11875_v11 = vld [vmem:[%s14131_s0 + $0x90] sm:$0xff] }
 0x877   :  { %9783 = vmatprep.subr.mxu1 %v14100_v17  ;;  %14159 = vst [vmem:[#allocation31_spill] sm:$0xff] %v11875_v11 }
 0x878   :  { %9784 = vmatpush3.msra.mxu1 %v11854_v20  ;;  %v11882_v20 = vld [vmem:[%s14131_s0 + $0x88] sm:$0xff] }
 0x879   :  { %9785 = vmatprep.subr.mxu1 %v14100_v17  ;;  %14160 = vst [vmem:[#allocation32_spill] sm:$0xff] %v11882_v20 }
 0x87a   :  { %9786 = vmatpush3.msra.mxu1 %v11861_v18  ;;  %v11889_v18 = vld [vmem:[%s14131_s0 + $0x80] sm:$0xff] }
 0x87b   :  { %9787 = vmatprep.subr.mxu1 %v14100_v17  ;;  %14161 = vst [vmem:[#allocation33_spill] sm:$0xff] %v11889_v18 }
 0x87c   :  { %9788 = vmatpush3.msra.mxu1 %v11868_v15  ;;  %v11896_v15 = vld [vmem:[%s14128_s29 + $0xf8] sm:$0xff] }
 0x87d   :  { %9789 = vmatprep.subr.mxu1 %v14100_v17  ;;  %14162 = vst [vmem:[#allocation34_spill] sm:$0xff] %v11896_v15 }
 0x87e   :  { %9790 = vmatpush3.msra.mxu1 %v11875_v11  ;;  %v11905_v11 = vld [vmem:[%s14128_s29 + $0xf0] sm:$0xff] }
 0x87f   :  { %9791 = vmatprep.subr.mxu1 %v14100_v17  ;;  %14163 = vst [vmem:[#allocation35_spill] sm:$0xff] %v11905_v11 }
 0x880   :  { %9792 = vmatpush3.msra.mxu1 %v11882_v20  ;;  %v11921_v20 = vld [vmem:[%s14128_s29 + $0xe0] sm:$0xff] }
 0x881   :  { %9793 = vmatprep.subr.mxu1 %v14100_v17  ;;  %14165 = vst [vmem:[#allocation37_spill] sm:$0xff] %v11921_v20 }
 0x882   :  { %9794 = vmatpush3.msra.mxu1 %v11889_v18  ;;  %v11914_v18 = vld [vmem:[%s14128_s29 + $0xe8] sm:$0xff] }
 0x883   :  { %9796 = vmatmul.mubr.msk.f32.vlgmr.msra.gmra.mxu1 %vm183_vm1, %v11376_v42  ;;  %9834 = vmatprep.subr.mxu1 %v14100_v17  ;;  %14164 = vst [vmem:[#allocation36_spill] sm:$0xff] %v11914_v18 }
 0x884   :  { %9835 = vmatpush3.msra.mxu1 %v11896_v15  ;;  %9850 = vmatprep.mubr.msk.f32.mxu1 %vm11098_vm2, %v14100_v17  ;;  %v11928_v15 = vld [vmem:[%s14128_s29 + $0xd8] sm:$0xff] }
 0x885   :  { %9836 = vmatprep.subr.mxu1 %v14100_v17  ;;  %14166 = vst [vmem:[#allocation38_spill] sm:$0xff] %v11928_v15 }
 0x886   :  { %9837 = vmatpush3.msra.mxu1 %v11905_v11  ;;  %v11935_v11 = vld [vmem:[%s14128_s29 + $0xd0] sm:$0xff] }
 0x887   :  { %9838 = vmatprep.subr.mxu1 %v14100_v17  ;;  %14167 = vst [vmem:[#allocation39_spill] sm:$0xff] %v11935_v11 }
 0x888   :  { %9839 = vmatpush3.msra.mxu1 %v11914_v18  ;;  %v11942_v18 = vld [vmem:[%s14128_s29 + $0xc8] sm:$0xff] }
 0x889   :  { %9840 = vmatprep.subr.mxu1 %v14100_v17  ;;  %14168 = vst [vmem:[#allocation40_spill] sm:$0xff] %v11942_v18 }
 0x88a   :  { %9841 = vmatpush3.msra.mxu1 %v11921_v20  ;;  %v11949_v20 = vld [vmem:[%s14128_s29 + $0xc0] sm:$0xff] }
 0x88b   :  { %9842 = vmatprep.subr.mxu1 %v14100_v17  ;;  %14169 = vst [vmem:[#allocation41_spill] sm:$0xff] %v11949_v20 }
 0x88c   :  { %9843 = vmatpush3.msra.mxu1 %v11928_v15 }
 0x88d   :  { %9844 = vmatprep.subr.mxu1 %v14100_v17 }
 0x88e   :  { %9845 = vmatpush3.msra.mxu1 %v11935_v11 }
 0x88f   :  { %9846 = vmatprep.subr.mxu1 %v14100_v17 }
 0x890   :  { %9847 = vmatpush3.msra.mxu1 %v11942_v18 }
 0x891   :  { %9848 = vmatprep.subr.mxu1 %v14100_v17 }
 0x892   :  { %9849 = vmatpush3.msra.mxu1 %v11949_v20 }
 0x893   :  { %9851 = vmatmul.mubr.msk.f32.vlgmr.msra.gmra.mxu1 %vm183_vm1, %v11376_v42  ;;  %9872 = vmatprep.subr.mxu1 %v14100_v17 }
 0x894   :  { %9874 = vmatprep.mubr.msk.f32.mxu1 %vm11098_vm2, %v14100_v17 }
 0x923   :  { %v11959_v11 = vpop.f32.mrf.mxu1 }
 0x925   :  { %v9733_v15 = vpop.f32.mrf.mxu1 }
 0x933   :  { %v1303_v18 = vpop.f32.mrf.mxu1 }
 0x934   :  { %v1304_v26 = vadd.f32 %v11964_v24, %v1303_v18  ;;  %v11980_v18 = vld [vmem:[%s14132_s1 + $0x3] ss:$0 sm:$0xff] }
 0x935   :  { %v9759_v20 = vpop.f32.mrf.mxu1 }
 0x936   :  { %9801 = vmatmul.mubr.msk.f32.vlgmr.msra.gmra.mxu0 %vm95_vm0, %v1304_v26 }
 0x937   :  { %9805 = vmatprep.mubr.msk.f32.mxu0 %vm11098_vm2, %v14100_v17 }
 0x943   :  { %v1477_v15 = vpop.f32.mrf.mxu1 }
 0x944   :  { %v1478_v13 = vadd.f32 %v11973_v10, %v1477_v15 }
 0x945   :  { %v9797_v32 = vpop.f32.mrf.mxu1 }
 0x946   :  { %9804 = vmatpush3.msra.mxu0 %v1478_v13 }
 0x947   :  { %9808 = vmatprep.subr.mxu0 %v14100_v17 }
 0x953   :  { %v1889_v26 = vpop.f32.mrf.mxu1 }
 0x954   :  { %v1890_v20 = vadd.f32 %v11980_v18, %v1889_v26 }
 0x955   :  { %v9852_v24 = vpop.f32.mrf.mxu1 }
 0x956   :  { %9873 = vmatpush3.xpose.msk.msra.mxu1 %vm95_vm0, %v1890_v20 }
 0x957   :  { %9877 = vmatprep.subr.mxu1 %v14100_v17 }
 0x9f6   :  { %v1553_v14 = vpop.f32.mrf.mxu0 }
 0x9f7   :  { %v1557_v16 = vmul.f32 0.25, %v1553_v14  ;;  %v11990_v14 = vld [vmem:[%s14029_s12 + $0x28] sm:$0xff] }
 0x9f8   :  { %v9802_v15 = vpop.f32.mrf.mxu0 }
 0x9f9   :  { %v1558_v32 = vsel %vm562_vm3, %v1557_v16, -inf  ;;  %v12022_v15 = vld [vmem:[%s14127_s28 + $0xe8] sm:$0xff] }
 0x9fa   :  { %1559 = vmax.xlane.f32.xlu0 %v1558_v32  ;;  %v12029_v32 = vld [vmem:[%s14127_s28 + $0xe0] sm:$0xff] }
 0xa83   :  { %v1560_v13 = vpop.xlane.xlu0 %1559 }
 0xa84   :  { %v1561_v10 = vsub.f32 %v1557_v16, %v1560_v13  ;;  %v11996_v16 = vld [vmem:[%s14029_s12 + $0x20] sm:$0xff]  ;;  %v12036_v13 = vld [vmem:[%s14127_s28 + $0xd8] sm:$0xff] }
 0xa86   :  { %v1562_v22 = vmul.f32 1.442695, %v1561_v10 }
 0xa88   :  { %10919 = vpow2.f32 %v1562_v22  ;;  %v12013_v22 = vld [vmem:[%s14127_s28 + $0xf0] sm:$0xff] }
 0xa95   :  { %v10920_v28 = vpop.eup %10919 }
 0xa96   :  { %v1564_v12 = vsel %vm562_vm3, %v10920_v28, 0.0 }
 0xa97   :  { %1565 = vadd.xlane.f32.xlu1 %v1564_v12  ;;  %v12007_v12 = vld [vmem:[%s14127_s28 + $0xf8] sm:$0xff] }
 0xb20   :  { %v1566_v26 = vpop.xlane.xlu1 %1565 }
 0xb21   :  { %10921 = vrcp.f32 %v1566_v26  ;;  %v12043_v26 = vld [vmem:[%s14127_s28 + $0xd0] sm:$0xff] }
 0xb2e   :  { %v10922_v24 = vpop.eup %10921 }
 0xb2f   :  { %v1568_v20 = vmul.f32 %v10922_v24, %v10920_v28  ;;  %v12050_v24 = vld [vmem:[%s14127_s28 + $0xc8] sm:$0xff] }
 0xb30   :  { %14172 = vst [vmem:[#allocation44_spill] sm:$0xff] %v12050_v24 }
 0xb31   :  { %9806 = vmatmul.mubr.msk.f32.vlgmr.msra.gmra.mxu0 %vm562_vm3, %v1568_v20  ;;  %v12057_v20 = vld [vmem:[%s14127_s28 + $0xc0] sm:$0xff] }
 0xb32   :  { %9809 = vmatpush3.msra.mxu0 %v11990_v14  ;;  %9812 = vmatprep.mubr.msk.f32.mxu0 %vm11098_vm2, %v14100_v17  ;;  %14173 = vst [vmem:[#allocation45_spill] sm:$0xff] %v12057_v20 }
 0xb33   :  { %9810 = vmatprep.subr.mxu0 %v14100_v17 }
 0xb34   :  { %9811 = vmatpush3.msra.mxu0 %v11996_v16 }
 0xb35   :  { %9815 = vmatprep.subr.mxu0 %v14100_v17 }
 0xbf1   :  { %v1638_v28 = vpop.f32.mrf.mxu0 }
 0xbf2   :  { %9813 = vmatmul.mubr.msk.f32.vlgmr.msra.gmra.mxu0 %vm95_vm0, %v1638_v28  ;;  %v12064_v28 = vld [vmem:[%s14131_s0 + $0xf8] sm:$0xff] }
 0xbf3   :  { %9816 = vmatpush3.msra.mxu0 %v12007_v12  ;;  %v9807_v10 = vpop.f32.mrf.mxu0  ;;  %9831 = vmatprep.mubr.msk.f32.mxu0 %vm11098_vm2, %v14100_v17  ;;  %14174 = vst [vmem:[#allocation46_spill] sm:$0xff] %v12064_v28 }
 0xbf4   :  { %9817 = vmatprep.subr.mxu0 %v14100_v17  ;;  %v12073_v10 = vld [vmem:[%s14131_s0 + $0xf0] sm:$0xff] }
 0xbf5   :  { %9818 = vmatpush3.msra.mxu0 %v12013_v22  ;;  %14175 = vst [vmem:[#allocation47_spill] sm:$0xff] %v12073_v10 }
 0xbf6   :  { %9819 = vmatprep.subr.mxu0 %v14100_v17 }
 0xbf7   :  { %9820 = vmatpush3.msra.mxu0 %v12022_v15 }
 0xbf8   :  { %9821 = vmatprep.subr.mxu0 %v14100_v17 }
 0xbf9   :  { %9822 = vmatpush3.msra.mxu0 %v12029_v32 }
 0xbfa   :  { %9823 = vmatprep.subr.mxu0 %v14100_v17 }
 0xbfb   :  { %9824 = vmatpush3.msra.mxu0 %v12036_v13 }
 0xbfc   :  { %9825 = vmatprep.subr.mxu0 %v14100_v17 }
 0xbfd   :  { %9826 = vmatpush3.msra.mxu0 %v12043_v26 }
 0xbfe   :  { %9827 = vmatprep.subr.mxu0 %v14100_v17 }
 0xbff   :  { %9828 = vmatpush3.msra.mxu0 %v12050_v24  ;;  %v12089_v24 = vld [vmem:[%s14131_s0 + $0xe0] sm:$0xff] }
 0xc00   :  { %9829 = vmatprep.subr.mxu0 %v14100_v17  ;;  %14177 = vst [vmem:[#allocation49_spill] sm:$0xff] %v12089_v24 }
 0xc01   :  { %9830 = vmatpush3.msra.mxu0 %v12057_v20  ;;  %v12082_v20 = vld [vmem:[%s14131_s0 + $0xe8] sm:$0xff] }
 0xc02   :  { %9832 = vmatmul.mubr.msk.f32.vlgmr.msra.gmra.mxu0 %vm183_vm1, %v11376_v42  ;;  %9853 = vmatprep.subr.mxu0 %v14100_v17  ;;  %14176 = vst [vmem:[#allocation48_spill] sm:$0xff] %v12082_v20 }
 0xc03   :  { %9854 = vmatpush3.msra.mxu0 %v12064_v28  ;;  %9869 = vmatprep.mubr.msk.f32.mxu0 %vm11098_vm2, %v14100_v17  ;;  %v12096_v28 = vld [vmem:[%s14131_s0 + $0xd8] sm:$0xff] }
 0xc04   :  { %9855 = vmatprep.subr.mxu0 %v14100_v17  ;;  %14178 = vst [vmem:[#allocation50_spill] sm:$0xff] %v12096_v28 }
 0xc05   :  { %9856 = vmatpush3.msra.mxu0 %v12073_v10  ;;  %v12103_v10 = vld [vmem:[%s14131_s0 + $0xd0] sm:$0xff] }
 0xc06   :  { %9857 = vmatprep.subr.mxu0 %v14100_v17  ;;  %14179 = vst [vmem:[#allocation51_spill] sm:$0xff] %v12103_v10 }
 0xc07   :  { %9858 = vmatpush3.msra.mxu0 %v12082_v20  ;;  %v12110_v20 = vld [vmem:[%s14131_s0 + $0xc8] sm:$0xff] }
 0xc08   :  { %9859 = vmatprep.subr.mxu0 %v14100_v17  ;;  %14180 = vst [vmem:[#allocation52_spill] sm:$0xff] %v12110_v20 }
 0xc09   :  { %9860 = vmatpush3.msra.mxu0 %v12089_v24  ;;  %v12117_v24 = vld [vmem:[%s14131_s0 + $0xc0] sm:$0xff] }
 0xc0a   :  { %9861 = vmatprep.subr.mxu0 %v14100_v17  ;;  %14181 = vst [vmem:[#allocation53_spill] sm:$0xff] %v12117_v24 }
 0xc0b   :  { %9862 = vmatpush3.msra.mxu0 %v12096_v28 }
 0xc0c   :  { %9863 = vmatprep.subr.mxu0 %v14100_v17 }
 0xc0d   :  { %9864 = vmatpush3.msra.mxu0 %v12103_v10 }
 0xc0e   :  { %9865 = vmatprep.subr.mxu0 %v14100_v17 }
 0xc0f   :  { %9866 = vmatpush3.msra.mxu0 %v12110_v20 }
 0xc10   :  { %9867 = vmatprep.subr.mxu0 %v14100_v17 }
 0xc11   :  { %9868 = vmatpush3.msra.mxu0 %v12117_v24 }
 0xc12   :  { %9870 = vmatmul.mubr.msk.f32.vlgmr.msra.gmra.mxu0 %vm183_vm1, %v11376_v42  ;;  %9908 = vmatprep.subr.mxu0 %v14100_v17 }
 0xc13   :  { %9909 = vmatpush3.msra.mxu0 %v11277_v19  ;;  %9924 = vmatprep.mubr.msk.f32.mxu0 %vm11098_vm2, %v14100_v17  ;;  %v1217_v19 = vadd.f32 %v11747_v30, %v11959_v11 }
 0xc14   :  { %9910 = vmatprep.subr.mxu0 %v14100_v17 }
 0xc15   :  { %9911 = vmatpush3.msra.mxu0 %v11288_v21 }
 0xc16   :  { %9912 = vmatprep.subr.mxu0 %v14100_v17 }
 0xc17   :  { %9913 = vmatpush3.msra.mxu0 %v11299_v23 }
 0xc18   :  { %9914 = vmatprep.subr.mxu0 %v14100_v17 }
 0xc19   :  { %9915 = vmatpush3.msra.mxu0 %v11310_v25 }
 0xc1a   :  { %9916 = vmatprep.subr.mxu0 %v14100_v17 }
 0xc1b   :  { %9917 = vmatpush3.msra.mxu0 %v11321_v27  ;;  %v12150_v27 = vld [vmem:[%s14133_s4 + $0x3] ss:$0 sm:$0xff] }
 0xc1c   :  { %9918 = vmatprep.subr.mxu0 %v14100_v17  ;;  %14182 = vst [vmem:[#allocation54_spill] sm:$0xff] %v12150_v27 }
 0xc1d   :  { %9919 = vmatpush3.msra.mxu0 %v11332_v29 }
 0xc1e   :  { %9920 = vmatprep.subr.mxu0 %v14100_v17 }
 0xc1f   :  { %9921 = vmatpush3.msra.mxu0 %v11343_v31 }
 0xc20   :  { %9922 = vmatprep.subr.mxu0 %v14100_v17 }
 0xc21   :  { %9923 = vmatpush3.msra.mxu0 %v11354_v33  ;;  %v12159_v33 = vld [vmem:[%s14028_s11 + $0x3] ss:$0 sm:$0xff] }
 0xc22   :  { %9946 = vmatprep.subr.mxu0 %v14100_v17  ;;  %14183 = vst [vmem:[#allocation55_spill] sm:$0xff] %v12159_v33 }
 0xcb2   :  { %v1714_v21 = vpop.f32.mrf.mxu0 }
 0xcb3   :  { %v12145_v23 = vadd.f32 %v1714_v21, %v1217_v19  ;;  %v178_v21 = vld [vmem:[%s14125_s27 + $0x8] sm:$0xff] }
 0xcb4   :  { %v9814_v25 = vpop.f32.mrf.mxu0 }
 0xcc2   :  { %v1802_v29 = vpop.f32.mrf.mxu0 }
 0xcc3   :  { %v1803_v31 = vadd.f32 %v12150_v27, %v1802_v29 }
 0xcc4   :  { %v9833_v42 = vpop.f32.mrf.mxu0 }
 0xcc5   :  { %9875 = vmatmul.mubr.msk.f32.vlgmr.msra.gmra.mxu1 %vm95_vm0, %v1803_v31  ;;  %v12167_v42 = vadd.f32 %v178_v21, %v11254_v6 }
 0xcc6   :  { %9879 = vmatprep.mubr.msk.f32.mxu1 %vm11098_vm2, %v14100_v17 }
 0xcd2   :  { %v1976_v30 = vpop.f32.mrf.mxu0 }
 0xcd3   :  { %v1977_v11 = vadd.f32 %v12159_v33, %v1976_v30  ;;  %v187_v30 = vsel %vm183_vm1, %v12167_v42, 0.0 }
 0xcd4   :  { %v9871_v19 = vpop.f32.mrf.mxu0 }
 0xcd5   :  { %9878 = vmatpush3.msra.mxu1 %v1977_v11 }
 0xcd6   :  { %9882 = vmatprep.subr.mxu1 %v14100_v17 }
 0xd85   :  { %v2052_v25 = vpop.f32.mrf.mxu1 }
 0xd86   :  { %v2056_v29 = vmul.f32 0.25, %v2052_v25 }
 0xd87   :  { %v9876_v31 = vpop.f32.mrf.mxu1 }
 0xd88   :  { %v2057_v27 = vsel %vm562_vm3, %v2056_v29, -inf }
 0xd89   :  { %2058 = vmax.xlane.f32.xlu0 %v2057_v27 }
 0xd8d   :  { %188 = vadd.xlane.f32.xlu0 %v187_v30 }
 0xe12   :  { %v2059_v11 = vpop.xlane.xlu0 %2058 }
 0xe13   :  { %v2060_v19 = vsub.f32 %v2056_v29, %v2059_v11  ;;  %v14184_v11 = vmov 0.0  }
 0xe15   :  { %v2061_v17 = vmul.f32 1.442695, %v2060_v19 }
 0xe16   :  { %v189_v33 = vpop.xlane.xlu0 %188 }
 0xe17   :  { %10923 = vpow2.f32 %v2061_v17  ;;  %v192_v24 = vmul.f32 0.015625, %v189_v33  ;;  %v12184_v33 = vld [vmem:[%s14029_s12 + $0x30] sm:$0xff] }
 0xe19   :  { %v194_v20 = vsub.f32 %v12167_v42, %v192_v24  ;;  %v12178_v24 = vld [vmem:[%s14029_s12 + $0x38] sm:$0xff] }
 0xe1b   :  { %v196_v6 = vmul.f32 %v194_v20, %v194_v20 }
 0xe1d   :  { %v200_v21 = vsel %vm183_vm1, %v196_v6, 0.0  ;;  %v11005_v6 = vld [vmem:[%s14127_s28 + $0x38] sm:$0xff] }
 0xe24   :  { %v10924_v25 = vpop.eup %10923 }
 0xe25   :  { %v2063_v31 = vsel %vm562_vm3, %v10924_v25, 0.0 }
 0xe26   :  { %2064 = vadd.xlane.f32.xlu1 %v2063_v31 }
 0xe2a   :  { %201 = vadd.xlane.f32.xlu1 %v200_v21  ;;  %v11008_v21 = vld [vmem:[%s14127_s28 + $0x20] sm:$0xff] }
 0xeaf   :  { %v2065_v27 = vpop.xlane.xlu1 %2064 }
 0xeb0   :  { %10925 = vrcp.f32 %v2065_v27  ;;  %v11009_v27 = vld [vmem:[%s14127_s28 + $0x18] sm:$0xff] }
 0xeb3   :  { %v202_v10 = vpop.xlane.xlu1 %201 }
 0xeb4   :  { %v204_v30 = vmul.f32 0.015625, %v202_v10 }
 0xeb6   :  { %v206_v28 = vadd.f32 1e-06, %v204_v30  ;;  %v11010_v30 = vld [vmem:[%s14127_s28 + $0x10] sm:$0xff] }
 0xeb8   :  { %10927 = vrsqrt.f32 %v206_v28 }
 0xebd   :  { %v10926_v29 = vpop.eup %10925 }
 0xebe   :  { %v2067_v17 = vmul.f32 %v10926_v29, %v10924_v25 }
 0xec0   :  { %9880 = vmatmul.mubr.msk.f32.vlgmr.msra.gmra.mxu1 %vm562_vm3, %v2067_v17 }
 0xec1   :  { %9883 = vmatpush3.msra.mxu1 %v12178_v24  ;;  %9886 = vmatprep.mubr.msk.f32.mxu1 %vm11098_vm2, %v14184_v11 }
 0xec2   :  { %9884 = vmatprep.subr.mxu1 %v14184_v11 }
 0xec3   :  { %9885 = vmatpush3.msra.mxu1 %v12184_v33 }
 0xec4   :  { %9889 = vmatprep.subr.mxu1 %v14184_v11 }
 0xec5   :  { %v10928_v28 = vpop.eup %10927 }
 0xec6   :  { %v210_v10 = vmul.f32 %v10928_v28, %v194_v20  ;;  %v11011_v28 = vld [vmem:[%s14127_s28 + $0x8] sm:$0xff] }
 0xec8   :  { %v218_v19 = vmul.f32 %v11366_v38, %v210_v10  ;;  %v11006_v38 = vld [vmem:[%s14127_s28 + $0x30] sm:$0xff] }
 0xeca   :  { %v12194_v25 = vadd.f32 %v11372_v40, %v218_v19  ;;  %v11007_v40 = vld [vmem:[%s14127_s28 + $0x28] sm:$0xff]  ;;  %v11012_v19 = vld [vmem:[%s14127_s28] sm:$0xff] }
 0xecc   :  { %9925 = vmatmul.mubr.msk.f32.vlgmr.msra.gmra.mxu0 %vm183_vm1, %v12194_v25 }
 0xecd   :  { %9948 = vmatprep.mubr.msk.f32.mxu0 %vm11098_vm2, %v14184_v11 }
 0xf80   :  { %v2137_v31 = vpop.f32.mrf.mxu1 }
 0xf81   :  { %9887 = vmatmul.mubr.msk.f32.vlgmr.msra.gmra.mxu1 %vm95_vm0, %v2137_v31  ;;  %v11014_v31 = vld [vmem:[%s14131_s0 + $0x30] sm:$0xff] }
 0xf82   :  { %9890 = vmatpush3.msra.mxu1 %v11005_v6  ;;  %v9881_v20 = vpop.f32.mrf.mxu1  ;;  %9905 = vmatprep.mubr.msk.f32.mxu1 %vm11098_vm2, %v14184_v11  ;;  %v11015_v6 = vld [vmem:[%s14131_s0 + $0x28] sm:$0xff] }
 0xf83   :  { %9891 = vmatprep.subr.mxu1 %v14184_v11 }
 0xf84   :  { %9892 = vmatpush3.msra.mxu1 %v11006_v38 }
 0xf85   :  { %9893 = vmatprep.subr.mxu1 %v14184_v11 }
 0xf86   :  { %9894 = vmatpush3.msra.mxu1 %v11007_v40 }
 0xf87   :  { %9895 = vmatprep.subr.mxu1 %v14184_v11 }
 0xf88   :  { %9896 = vmatpush3.msra.mxu1 %v11008_v21 }
 0xf89   :  { %9897 = vmatprep.subr.mxu1 %v14184_v11 }
 0xf8a   :  { %9898 = vmatpush3.msra.mxu1 %v11009_v27 }
 0xf8b   :  { %9899 = vmatprep.subr.mxu1 %v14184_v11 }
 0xf8c   :  { %9900 = vmatpush3.msra.mxu1 %v11010_v30  ;;  %v2357_v29 = vpop.f32.mrf.mxu0 }
 0xf8d   :  { %9901 = vmatprep.subr.mxu1 %v14184_v11  ;;  %v2358_v17 = vadd.f32 %v11500_v59, %v2357_v29  ;;  %v11013_v59 = vld [vmem:[%s14131_s0 + $0x38] sm:$0xff] }
 0xf8e   :  { %9902 = vmatpush3.msra.mxu1 %v11011_v28  ;;  %v9926_v10 = vpop.f32.mrf.mxu0  ;;  %v14194_v28 = vld [vmem:[#allocation15_spill] sm:$0xff] }
 0xf8f   :  { %9903 = vmatprep.subr.mxu1 %v14184_v11  ;;  %9947 = vmatpush3.xpose.msk.msra.mxu0 %vm95_vm0, %v2358_v17 }
 0xf90   :  { %9904 = vmatpush3.msra.mxu1 %v11012_v19  ;;  %9951 = vmatprep.subr.mxu0 %v14184_v11 }
 0xf91   :  { %9906 = vmatmul.mubr.msk.f32.vlgmr.msra.gmra.mxu1 %vm183_vm1, %v12194_v25  ;;  %9927 = vmatprep.subr.mxu1 %v14184_v11 }
 0xf92   :  { %9928 = vmatpush3.msra.mxu1 %v11013_v59  ;;  %9943 = vmatprep.mubr.msk.f32.mxu1 %vm11098_vm2, %v14184_v11 }
 0xf93   :  { %9929 = vmatprep.subr.mxu1 %v14184_v11 }
 0xf94   :  { %9930 = vmatpush3.msra.mxu1 %v11014_v31 }
 0xf95   :  { %9931 = vmatprep.subr.mxu1 %v14184_v11 }
 0xf96   :  { %9932 = vmatpush3.msra.mxu1 %v11015_v6 }
 0xf97   :  { %9933 = vmatprep.subr.mxu1 %v14184_v11 }
 0xf98   :  { %9934 = vmatpush3.msra.mxu1 %v11400_v46 }
 0xf99   :  { %9935 = vmatprep.subr.mxu1 %v14184_v11 }
 0xf9a   :  { %9936 = vmatpush3.msra.mxu1 %v11406_v47 }
 0xf9b   :  { %9937 = vmatprep.subr.mxu1 %v14184_v11 }
 0xf9c   :  { %9938 = vmatpush3.msra.mxu1 %v11413_v48 }
 0xf9d   :  { %9939 = vmatprep.subr.mxu1 %v14184_v11 }
 0xf9e   :  { %9940 = vmatpush3.msra.mxu1 %v11420_v49 }
 0xf9f   :  { %9941 = vmatprep.subr.mxu1 %v14184_v11 }
 0xfa0   :  { %9942 = vmatpush3.msra.mxu1 %v11427_v50 }
 0xfa1   :  { %9944 = vmatmul.mubr.msk.f32.vlgmr.msra.gmra.mxu1 %vm183_vm1, %v12194_v25  ;;  %9975 = vmatprep.subr.mxu1 %v14184_v11 }
 0xfa2   :  { %9976 = vmatpush3.msra.mxu1 %v11434_v51  ;;  %9991 = vmatprep.mubr.msk.f32.mxu1 %vm11098_vm2, %v14184_v11 }
 0xfa3   :  { %9977 = vmatprep.subr.mxu1 %v14184_v11 }
 0xfa4   :  { %9978 = vmatpush3.msra.mxu1 %v11443_v52 }
 0xfa5   :  { %9979 = vmatprep.subr.mxu1 %v14184_v11 }
 0xfa6   :  { %9980 = vmatpush3.msra.mxu1 %v11452_v53 }
 0xfa7   :  { %9981 = vmatprep.subr.mxu1 %v14184_v11 }
 0xfa8   :  { %9982 = vmatpush3.msra.mxu1 %v11459_v54 }
 0xfa9   :  { %9983 = vmatprep.subr.mxu1 %v14184_v11 }
 0xfaa   :  { %9984 = vmatpush3.msra.mxu1 %v11466_v55 }
 0xfab   :  { %9985 = vmatprep.subr.mxu1 %v14184_v11 }
 0xfac   :  { %9986 = vmatpush3.msra.mxu1 %v11473_v56 }
 0xfad   :  { %9987 = vmatprep.subr.mxu1 %v14184_v11 }
 0xfae   :  { %9988 = vmatpush3.msra.mxu1 %v11480_v57 }
 0xfaf   :  { %9989 = vmatprep.subr.mxu1 %v14184_v11 }
 0xfb0   :  { %9990 = vmatpush3.msra.mxu1 %v11487_v58 }
 0xfb1   :  { %9992 = vmatmul.mubr.msk.f32.vlgmr.msra.gmra.mxu1 %vm183_vm1, %v12194_v25  ;;  %10013 = vmatprep.subr.mxu1 %v14184_v11 }
 0xfb2   :  { %10015 = vmatprep.mubr.msk.f32.mxu1 %vm11098_vm2, %v14184_v11 }
0x1041   :  { %v2213_v46 = vpop.f32.mrf.mxu1 }
0x1042   :  { %v12289_v47 = vadd.f32 %v2213_v46, %v12145_v23 }
0x1043   :  { %v9888_v48 = vpop.f32.mrf.mxu1 }
0x1051   :  { %v2287_v49 = vpop.f32.mrf.mxu1 }
0x1052   :  { %v2288_v50 = vadd.f32 %v11505_v62, %v2287_v49 }
0x1053   :  { %v9907_v51 = vpop.f32.mrf.mxu1 }
0x1054   :  { %9949 = vmatmul.mubr.msk.f32.vlgmr.msra.gmra.mxu0 %vm95_vm0, %v2288_v50 }
0x1055   :  { %9953 = vmatprep.mubr.msk.f32.mxu0 %vm11098_vm2, %v14184_v11 }
0x1061   :  { %v2427_v52 = vpop.f32.mrf.mxu1 }
0x1062   :  { %v2428_v53 = vadd.f32 %v11517_v3, %v2427_v52 }
0x1063   :  { %v9945_v54 = vpop.f32.mrf.mxu1 }
0x1064   :  { %9952 = vmatpush3.msra.mxu0 %v2428_v53 }
0x1065   :  { %9956 = vmatprep.subr.mxu0 %v14184_v11 }
0x1071   :  { %v2728_v55 = vpop.f32.mrf.mxu1 }
0x1072   :  { %v2729_v56 = vadd.f32 %v11524_v8, %v2728_v55 }
0x1073   :  { %v9993_v57 = vpop.f32.mrf.mxu1 }
0x1074   :  { %10014 = vmatpush3.xpose.msk.msra.mxu1 %vm95_vm0, %v2729_v56  ;;  %v14195_v56 = vld [vmem:[#allocation16_spill] sm:$0xff]  ;;  %v14196_v57 = vld [vmem:[#allocation17_spill] sm:$0xff] }
0x1075   :  { %10018 = vmatprep.subr.mxu1 %v14184_v11 }
0x1114   :  { %v2503_v58 = vpop.f32.mrf.mxu0 }
0x1115   :  { %v2507_v62 = vmul.f32 0.25, %v2503_v58 }
0x1116   :  { %v9950_v23 = vpop.f32.mrf.mxu0 }
0x1117   :  { %v2508_v20 = vsel %vm562_vm3, %v2507_v62, -inf }
0x1118   :  { %2509 = vmax.xlane.f32.xlu0 %v2508_v20  ;;  %v14198_v20 = vld [vmem:[#allocation19_spill] sm:$0xff] }
0x11a1   :  { %v2510_v38 = vpop.xlane.xlu0 %2509 }
0x11a2   :  { %v2511_v3 = vsub.f32 %v2507_v62, %v2510_v38  ;;  %v14197_v62 = vld [vmem:[#allocation18_spill] sm:$0xff]  ;;  %v14199_v38 = vld [vmem:[#allocation20_spill] sm:$0xff] }
0x11a4   :  { %v2512_v40 = vmul.f32 1.442695, %v2511_v3  ;;  %v14200_v3 = vld [vmem:[#allocation21_spill] sm:$0xff] }
0x11a6   :  { %10929 = vpow2.f32 %v2512_v40  ;;  %v14201_v40 = vld [vmem:[#allocation22_spill] sm:$0xff] }
0x11b3   :  { %v10930_v21 = vpop.eup %10929 }
0x11b4   :  { %v2514_v27 = vsel %vm562_vm3, %v10930_v21, 0.0 }
0x11b5   :  { %2515 = vadd.xlane.f32.xlu1 %v2514_v27  ;;  %v14203_v27 = vld [vmem:[#allocation24_spill] sm:$0xff] }
0x123e   :  { %v2516_v8 = vpop.xlane.xlu1 %2515 }
0x123f   :  { %10931 = vrcp.f32 %v2516_v8  ;;  %v14204_v8 = vld [vmem:[#allocation25_spill] sm:$0xff] }
0x124c   :  { %v10932_v30 = vpop.eup %10931 }
0x124d   :  { %v2518_v29 = vmul.f32 %v10932_v30, %v10930_v21  ;;  %v14202_v21 = vld [vmem:[#allocation23_spill] sm:$0xff]  ;;  %v14205_v30 = vld [vmem:[#allocation26_spill] sm:$0xff] }
0x124f   :  { %9954 = vmatmul.mubr.msk.f32.vlgmr.msra.gmra.mxu0 %vm562_vm3, %v2518_v29  ;;  %v14206_v29 = vld [vmem:[#allocation27_spill] sm:$0xff] }
0x1250   :  { %9957 = vmatpush3.msra.mxu0 %v11534_v34  ;;  %9972 = vmatprep.mubr.msk.f32.mxu0 %vm11098_vm2, %v14184_v11 }
0x1251   :  { %9958 = vmatprep.subr.mxu0 %v14184_v11 }
0x1252   :  { %9959 = vmatpush3.msra.mxu0 %v11540_v35 }
0x1253   :  { %9960 = vmatprep.subr.mxu0 %v14184_v11 }
0x1254   :  { %9961 = vmatpush3.msra.mxu0 %v11549_v36  ;;  %v14185_v36 = vld [vmem:[#allocation6_spill] sm:$0xff] }
0x1255   :  { %9962 = vmatprep.subr.mxu0 %v14184_v11 }
0x1256   :  { %9963 = vmatpush3.msra.mxu0 %v11556_v37  ;;  %v14186_v37 = vld [vmem:[#allocation7_spill] sm:$0xff] }
0x1257   :  { %9964 = vmatprep.subr.mxu0 %v14184_v11 }
0x1258   :  { %9965 = vmatpush3.msra.mxu0 %v11563_v39  ;;  %v14187_v39 = vld [vmem:[#allocation8_spill] sm:$0xff] }
0x1259   :  { %9966 = vmatprep.subr.mxu0 %v14184_v11 }
0x125a   :  { %9967 = vmatpush3.msra.mxu0 %v11570_v41  ;;  %v14188_v41 = vld [vmem:[#allocation9_spill] sm:$0xff] }
0x125b   :  { %9968 = vmatprep.subr.mxu0 %v14184_v11 }
0x125c   :  { %9969 = vmatpush3.msra.mxu0 %v11577_v43  ;;  %v14189_v43 = vld [vmem:[#allocation10_spill] sm:$0xff] }
0x125d   :  { %9970 = vmatprep.subr.mxu0 %v14184_v11 }
0x125e   :  { %9971 = vmatpush3.msra.mxu0 %v11584_v44  ;;  %v14190_v44 = vld [vmem:[#allocation11_spill] sm:$0xff] }
0x125f   :  { %9973 = vmatmul.mubr.msk.f32.vlgmr.msra.gmra.mxu0 %vm183_vm1, %v12194_v25  ;;  %9994 = vmatprep.subr.mxu0 %v14184_v11 }
0x1260   :  { %9995 = vmatpush3.msra.mxu0 %v11591_v45  ;;  %10010 = vmatprep.mubr.msk.f32.mxu0 %vm11098_vm2, %v14184_v11 }
0x1261   :  { %9996 = vmatprep.subr.mxu0 %v14184_v11 }
0x1262   :  { %9997 = vmatpush3.msra.mxu0 %v11600_v60  ;;  %v14191_v60 = vld [vmem:[#allocation12_spill] sm:$0xff] }
0x1263   :  { %9998 = vmatprep.subr.mxu0 %v14184_v11 }
0x1264   :  { %9999 = vmatpush3.msra.mxu0 %v11609_v61  ;;  %v14192_v61 = vld [vmem:[#allocation13_spill] sm:$0xff] }
0x1265   :  { %10000 = vmatprep.subr.mxu0 %v14184_v11 }
0x1266   :  { %10001 = vmatpush3.msra.mxu0 %v11616_v63 }
0x1267   :  { %10002 = vmatprep.subr.mxu0 %v14184_v11 }
0x1268   :  { %10003 = vmatpush3.msra.mxu0 %v11623_v0 }
0x1269   :  { %10004 = vmatprep.subr.mxu0 %v14184_v11 }
0x126a   :  { %10005 = vmatpush3.msra.mxu0 %v11630_v1 }
0x126b   :  { %10006 = vmatprep.subr.mxu0 %v14184_v11 }
0x126c   :  { %10007 = vmatpush3.msra.mxu0 %v11637_v2  ;;  %v14193_v2 = vld [vmem:[#allocation14_spill] sm:$0xff] }
0x126d   :  { %10008 = vmatprep.subr.mxu0 %v14184_v11 }
0x126e   :  { %10009 = vmatpush3.msra.mxu0 %v11644_v4 }
0x126f   :  { %10011 = vmatmul.mubr.msk.f32.vlgmr.msra.gmra.mxu0 %vm183_vm1, %v12194_v25  ;;  %10030 = vmatprep.subr.mxu0 %v14184_v11 }
0x1270   :  { %10031 = vmatpush3.msra.mxu0 %v11651_v5  ;;  %10034 = vmatprep.mubr.msk.f32.mxu0 %vm11098_vm2, %v14184_v11 }
0x1271   :  { %10032 = vmatprep.subr.mxu0 %v14184_v11 }
0x1272   :  { %10033 = vmatpush3.msra.mxu0 %v11660_v7 }
0x1273   :  { %10056 = vmatprep.subr.mxu0 %v14184_v11 }
0x130f   :  { %v2588_v34 = vpop.f32.mrf.mxu0 }
0x1310   :  { %10035 = vmatmul.mubr.msk.f32.vlgmr.msra.gmra.mxu0 %vm95_vm0, %v2588_v34  ;;  %v14207_v34 = vld [vmem:[#allocation28_spill] sm:$0xff] }
0x1311   :  { %10057 = vmatpush3.msra.mxu0 %v11671_v9  ;;  %v9955_v35 = vpop.f32.mrf.mxu0  ;;  %10072 = vmatprep.mubr.msk.f32.mxu0 %vm11098_vm2, %v14184_v11 }
0x1312   :  { %10058 = vmatprep.subr.mxu0 %v14184_v11  ;;  %v14208_v35 = vld [vmem:[#allocation29_spill] sm:$0xff] }
0x1313   :  { %10059 = vmatpush3.msra.mxu0 %v14185_v36  ;;  %v14209_v36 = vld [vmem:[#allocation30_spill] sm:$0xff] }
0x1314   :  { %10060 = vmatprep.subr.mxu0 %v14184_v11 }
0x1315   :  { %10061 = vmatpush3.msra.mxu0 %v14186_v37  ;;  %v14210_v37 = vld [vmem:[#allocation31_spill] sm:$0xff] }
0x1316   :  { %10062 = vmatprep.subr.mxu0 %v14184_v11 }
0x1317   :  { %10063 = vmatpush3.msra.mxu0 %v14187_v39  ;;  %v14211_v39 = vld [vmem:[#allocation32_spill] sm:$0xff] }
0x1318   :  { %10064 = vmatprep.subr.mxu0 %v14184_v11 }
0x1319   :  { %10065 = vmatpush3.msra.mxu0 %v14188_v41  ;;  %v14212_v41 = vld [vmem:[#allocation33_spill] sm:$0xff] }
0x131a   :  { %10066 = vmatprep.subr.mxu0 %v14184_v11 }
0x131b   :  { %10067 = vmatpush3.msra.mxu0 %v14189_v43  ;;  %v14213_v43 = vld [vmem:[#allocation34_spill] sm:$0xff] }
0x131c   :  { %10068 = vmatprep.subr.mxu0 %v14184_v11 }
0x131d   :  { %10069 = vmatpush3.msra.mxu0 %v14190_v44  ;;  %v14214_v44 = vld [vmem:[#allocation35_spill] sm:$0xff] }
0x131e   :  { %10070 = vmatprep.subr.mxu0 %v14184_v11 }
0x131f   :  { %v2658_v45 = vpop.f32.mrf.mxu0  ;;  %10071 = vmatpush3.msra.mxu0 %v14191_v60  ;;  %v14216_v60 = vld [vmem:[#allocation37_spill] sm:$0xff] }
0x1320   :  { %v2659_v63 = vadd.f32 %v14192_v61, %v2658_v45  ;;  %10073 = vmatmul.mubr.msk.f32.vlgmr.msra.gmra.mxu0 %vm183_vm1, %v12194_v25  ;;  %10094 = vmatprep.subr.mxu0 %v14184_v11  ;;  %v14215_v45 = vld [vmem:[#allocation36_spill] sm:$0xff]  ;;  %v14217_v61 = vld [vmem:[#allocation38_spill] sm:$0xff] }
0x1321   :  { %v9974_v0 = vpop.f32.mrf.mxu0  ;;  %10096 = vmatprep.mubr.msk.f32.mxu0 %vm11098_vm2, %v14184_v11 }
0x1322   :  { %10016 = vmatmul.mubr.msk.f32.vlgmr.msra.gmra.mxu1 %vm95_vm0, %v2659_v63  ;;  %v14218_v63 = vld [vmem:[#allocation39_spill] sm:$0xff]  ;;  %v14219_v0 = vld [vmem:[#allocation40_spill] sm:$0xff] }
0x1323   :  { %10020 = vmatprep.mubr.msk.f32.mxu1 %vm11098_vm2, %v14184_v11 }
0x132f   :  { %v2798_v1 = vpop.f32.mrf.mxu0 }
0x1330   :  { %v2799_v4 = vadd.f32 %v14193_v2, %v2798_v1  ;;  %v14220_v1 = vld [vmem:[#allocation41_spill] sm:$0xff] }
0x1331   :  { %v10012_v5 = vpop.f32.mrf.mxu0 }
0x1332   :  { %10019 = vmatpush3.msra.mxu1 %v2799_v4 }
0x1333   :  { %10023 = vmatprep.subr.mxu1 %v14184_v11 }
0x13d0   :  { %v12378_v7 = vpop.f32.mrf.mxu0 }
0x13d2   :  { %v10036_v9 = vpop.f32.mrf.mxu0 }
0x13d3   :  { %v14221_v9 = vld [vmem:[#allocation42_spill] sm:$0xff] }
0x13e0   :  { %v3245_v17 = vpop.f32.mrf.mxu0 }
0x13e1   :  { %v3246_v10 = vadd.f32 %v14194_v28, %v3245_v17 }
0x13e2   :  { %v2874_v19 = vpop.f32.mrf.mxu1  ;;  %v10074_v59 = vpop.f32.mrf.mxu0 }
0x13e3   :  { %v2878_v31 = vmul.f32 0.25, %v2874_v19  ;;  %10095 = vmatpush3.xpose.msk.msra.mxu0 %vm95_vm0, %v3246_v10  ;;  %v14222_v19 = vld [vmem:[#allocation43_spill] sm:$0xff] }
0x13e4   :  { %v10017_v6 = vpop.f32.mrf.mxu1  ;;  %10099 = vmatprep.subr.mxu0 %v14184_v11 }
0x13e5   :  { %v2879_v46 = vsel %vm562_vm3, %v2878_v31, -inf }
0x13e6   :  { %2880 = vmax.xlane.f32.xlu0 %v2879_v46 }
0x146f   :  { %v2881_v48 = vpop.xlane.xlu0 %2880 }
0x1470   :  { %v2882_v49 = vsub.f32 %v2878_v31, %v2881_v48 }
0x1472   :  { %v2883_v50 = vmul.f32 1.442695, %v2882_v49 }
0x1474   :  { %10933 = vpow2.f32 %v2883_v50 }
0x1481   :  { %v10934_v51 = vpop.eup %10933 }
0x1482   :  { %v2885_v52 = vsel %vm562_vm3, %v10934_v51, 0.0 }
0x1483   :  { %2886 = vadd.xlane.f32.xlu1 %v2885_v52 }
0x150c   :  { %v2887_v53 = vpop.xlane.xlu1 %2886 }
0x150d   :  { %10935 = vrcp.f32 %v2887_v53 }
0x151a   :  { %v10936_v54 = vpop.eup %10935 }
0x151b   :  { %v2889_v55 = vmul.f32 %v10936_v54, %v10934_v51 }
0x151d   :  { %10021 = vmatmul.mubr.msk.f32.vlgmr.msra.gmra.mxu1 %vm562_vm3, %v2889_v55 }
0x151e   :  { %10024 = vmatpush3.msra.mxu1 %v14195_v56  ;;  %10027 = vmatprep.mubr.msk.f32.mxu1 %vm11098_vm2, %v14184_v11 }
0x151f   :  { %10025 = vmatprep.subr.mxu1 %v14184_v11 }
0x1520   :  { %10026 = vmatpush3.msra.mxu1 %v14196_v57 }
0x1521   :  { %10037 = vmatprep.subr.mxu1 %v14184_v11 }
0x15dd   :  { %v2959_v58 = vpop.f32.mrf.mxu1 }
0x15de   :  { %10028 = vmatmul.mubr.msk.f32.vlgmr.msra.gmra.mxu1 %vm95_vm0, %v2959_v58 }
0x15df   :  { %10038 = vmatpush3.msra.mxu1 %v14197_v62  ;;  %v10022_v23 = vpop.f32.mrf.mxu1  ;;  %10053 = vmatprep.mubr.msk.f32.mxu1 %vm11098_vm2, %v14184_v11 }
0x15e0   :  { %10039 = vmatprep.subr.mxu1 %v14184_v11 }
0x15e1   :  { %10040 = vmatpush3.msra.mxu1 %v14198_v20 }
0x15e2   :  { %10041 = vmatprep.subr.mxu1 %v14184_v11 }
0x15e3   :  { %10042 = vmatpush3.msra.mxu1 %v14199_v38  ;;  %v14231_v38 = vld [vmem:[#allocation52_spill] sm:$0xff] }
0x15e4   :  { %10043 = vmatprep.subr.mxu1 %v14184_v11 }
0x15e5   :  { %10044 = vmatpush3.msra.mxu1 %v14200_v3  ;;  %v14232_v3 = vld [vmem:[#allocation53_spill] sm:$0xff] }
0x15e6   :  { %10045 = vmatprep.subr.mxu1 %v14184_v11 }
0x15e7   :  { %10046 = vmatpush3.msra.mxu1 %v14201_v40 }
0x15e8   :  { %10047 = vmatprep.subr.mxu1 %v14184_v11 }
0x15e9   :  { %10048 = vmatpush3.msra.mxu1 %v14202_v21 }
0x15ea   :  { %10049 = vmatprep.subr.mxu1 %v14184_v11 }
0x15eb   :  { %10050 = vmatpush3.msra.mxu1 %v14203_v27 }
0x15ec   :  { %10051 = vmatprep.subr.mxu1 %v14184_v11 }
0x15ed   :  { %10052 = vmatpush3.msra.mxu1 %v14204_v8 }
0x15ee   :  { %10054 = vmatmul.mubr.msk.f32.vlgmr.msra.gmra.mxu1 %vm183_vm1, %v12194_v25  ;;  %10075 = vmatprep.subr.mxu1 %v14184_v11 }
0x15ef   :  { %10076 = vmatpush3.msra.mxu1 %v14205_v30  ;;  %10091 = vmatprep.mubr.msk.f32.mxu1 %vm11098_vm2, %v14184_v11 }
0x15f0   :  { %10077 = vmatprep.subr.mxu1 %v14184_v11 }
0x15f1   :  { %10078 = vmatpush3.msra.mxu1 %v14206_v29  ;;  %v14233_v29 = vld [vmem:[#allocation54_spill] sm:$0xff] }
0x15f2   :  { %10079 = vmatprep.subr.mxu1 %v14184_v11 }
0x15f3   :  { %10080 = vmatpush3.msra.mxu1 %v14207_v34 }
0x15f4   :  { %10081 = vmatprep.subr.mxu1 %v14184_v11 }
0x15f5   :  { %10082 = vmatpush3.msra.mxu1 %v14208_v35 }
0x15f6   :  { %10083 = vmatprep.subr.mxu1 %v14184_v11 }
0x15f7   :  { %10084 = vmatpush3.msra.mxu1 %v14209_v36 }
0x15f8   :  { %10085 = vmatprep.subr.mxu1 %v14184_v11 }
0x15f9   :  { %10086 = vmatpush3.msra.mxu1 %v14210_v37  ;;  %v14234_v37 = vld [vmem:[#allocation55_spill] sm:$0xff] }
0x15fa   :  { %10087 = vmatprep.subr.mxu1 %v14184_v11 }
0x15fb   :  { %10088 = vmatpush3.msra.mxu1 %v14211_v39 }
0x15fc   :  { %10089 = vmatprep.subr.mxu1 %v14184_v11 }
0x15fd   :  { %10090 = vmatpush3.msra.mxu1 %v14212_v41 }
0x15fe   :  { %10092 = vmatmul.mubr.msk.f32.vlgmr.msra.gmra.mxu1 %vm183_vm1, %v12194_v25  ;;  %10130 = vmatprep.subr.mxu1 %v14184_v11 }
0x15ff   :  { %10131 = vmatpush3.msra.mxu1 %v14213_v43  ;;  %10146 = vmatprep.mubr.msk.f32.mxu1 %vm11098_vm2, %v14184_v11  ;;  %v8734_v43 = vld [vmem:[%s14030_s13] ss:$0 sm:$0xff] }
0x1600   :  { %10132 = vmatprep.subr.mxu1 %v14184_v11 }
0x1601   :  { %10133 = vmatpush3.msra.mxu1 %v14214_v44 }
0x1602   :  { %10134 = vmatprep.subr.mxu1 %v14184_v11 }
0x1603   :  { %10135 = vmatpush3.msra.mxu1 %v14215_v45 }
0x1604   :  { %10136 = vmatprep.subr.mxu1 %v14184_v11 }
0x1605   :  { %10137 = vmatpush3.msra.mxu1 %v14216_v60 }
0x1606   :  { %10138 = vmatprep.subr.mxu1 %v14184_v11 }
0x1607   :  { %10139 = vmatpush3.msra.mxu1 %v14217_v61 }
0x1608   :  { %10140 = vmatprep.subr.mxu1 %v14184_v11 }
0x1609   :  { %10141 = vmatpush3.msra.mxu1 %v14218_v63 }
0x160a   :  { %10142 = vmatprep.subr.mxu1 %v14184_v11 }
0x160b   :  { %10143 = vmatpush3.msra.mxu1 %v14219_v0 }
0x160c   :  { %10144 = vmatprep.subr.mxu1 %v14184_v11 }
0x160d   :  { %10145 = vmatpush3.msra.mxu1 %v14220_v1 }
0x160e   :  { %10147 = vmatmul.mubr.msk.f32.vlgmr.msra.gmra.mxu1 %vm183_vm1, %v12194_v25  ;;  %10168 = vmatprep.subr.mxu1 %v14184_v11 }
0x160f   :  { %10170 = vmatprep.mubr.msk.f32.mxu1 %vm11098_vm2, %v14184_v11 }
0x169e   :  { %v12455_v2 = vpop.f32.mrf.mxu1 }
0x169f   :  { %v3106_v40 = vadd.f32 %v12378_v7, %v12455_v2 }
0x16a0   :  { %v10029_v4 = vpop.f32.mrf.mxu1 }
0x16ae   :  { %v3175_v5 = vpop.f32.mrf.mxu1 }
0x16af   :  { %v3176_v17 = vadd.f32 %v14221_v9, %v3175_v5 }
0x16b0   :  { %v10055_v28 = vpop.f32.mrf.mxu1 }
0x16b1   :  { %10097 = vmatmul.mubr.msk.f32.vlgmr.msra.gmra.mxu0 %vm95_vm0, %v3176_v17 }
0x16b2   :  { %10101 = vmatprep.mubr.msk.f32.mxu0 %vm11098_vm2, %v14184_v11 }
0x16be   :  { %v3315_v10 = vpop.f32.mrf.mxu1 }
0x16bf   :  { %v3316_v59 = vadd.f32 %v14222_v19, %v3315_v10 }
0x16c0   :  { %v10093_v31 = vpop.f32.mrf.mxu1 }
0x16c1   :  { %10100 = vmatpush3.msra.mxu0 %v3316_v59 }
0x16c2   :  { %10104 = vmatprep.subr.mxu0 %v14184_v11 }
0x16ce   :  { %v3690_v6 = vpop.f32.mrf.mxu1 }
0x16cf   :  { %v3691_v46 = vadd.f32 %v11980_v18, %v3690_v6 }
0x16d0   :  { %v10148_v48 = vpop.f32.mrf.mxu1 }
0x16d1   :  { %10169 = vmatpush3.xpose.msk.msra.mxu1 %vm95_vm0, %v3691_v46 }
0x16d2   :  { %10173 = vmatprep.subr.mxu1 %v14184_v11 }
0x1771   :  { %v3391_v49 = vpop.f32.mrf.mxu0 }
0x1772   :  { %v3395_v50 = vmul.f32 0.25, %v3391_v49 }
0x1773   :  { %v10098_v51 = vpop.f32.mrf.mxu0 }
0x1774   :  { %v3396_v52 = vsel %vm562_vm3, %v3395_v50, -inf }
0x1775   :  { %3397 = vmax.xlane.f32.xlu0 %v3396_v52  ;;  %v8735_v52 = vld [vmem:[%s14031_s14] ss:$0 sm:$0xff] }
0x17fe   :  { %v3398_v53 = vpop.xlane.xlu0 %3397 }
0x17ff   :  { %v3399_v54 = vsub.f32 %v3395_v50, %v3398_v53 }
0x1801   :  { %v3400_v55 = vmul.f32 1.442695, %v3399_v54 }
0x1803   :  { %10937 = vpow2.f32 %v3400_v55 }
0x1810   :  { %v10938_v56 = vpop.eup %10937 }
0x1811   :  { %v3402_v57 = vsel %vm562_vm3, %v10938_v56, 0.0 }
0x1812   :  { %3403 = vadd.xlane.f32.xlu1 %v3402_v57 }
0x189b   :  { %v3404_v18 = vpop.xlane.xlu1 %3403 }
0x189c   :  { %10939 = vrcp.f32 %v3404_v18 }
0x18a9   :  { %v10940_v58 = vpop.eup %10939 }
0x18aa   :  { %v3406_v62 = vmul.f32 %v10940_v58, %v10938_v56 }
0x18ac   :  { %10102 = vmatmul.mubr.msk.f32.vlgmr.msra.gmra.mxu0 %vm562_vm3, %v3406_v62 }
0x18ad   :  { %10105 = vmatpush3.msra.mxu0 %v11990_v14  ;;  %10108 = vmatprep.mubr.msk.f32.mxu0 %vm11098_vm2, %v14184_v11  ;;  %v14223_v14 = vld [vmem:[#allocation44_spill] sm:$0xff] }
0x18ae   :  { %10106 = vmatprep.subr.mxu0 %v14184_v11 }
0x18af   :  { %10107 = vmatpush3.msra.mxu0 %v11996_v16  ;;  %v14224_v16 = vld [vmem:[#allocation45_spill] sm:$0xff] }
0x18b0   :  { %10111 = vmatprep.subr.mxu0 %v14184_v11 }
0x196c   :  { %v3476_v23 = vpop.f32.mrf.mxu0 }
0x196d   :  { %10109 = vmatmul.mubr.msk.f32.vlgmr.msra.gmra.mxu0 %vm95_vm0, %v3476_v23 }
0x196e   :  { %10112 = vmatpush3.msra.mxu0 %v12007_v12  ;;  %v10103_v20 = vpop.f32.mrf.mxu0  ;;  %10127 = vmatprep.mubr.msk.f32.mxu0 %vm11098_vm2, %v14184_v11  ;;  %v14225_v12 = vld [vmem:[#allocation46_spill] sm:$0xff] }
0x196f   :  { %10113 = vmatprep.subr.mxu0 %v14184_v11 }
0x1970   :  { %10114 = vmatpush3.msra.mxu0 %v12013_v22  ;;  %v14226_v22 = vld [vmem:[#allocation47_spill] sm:$0xff] }
0x1971   :  { %10115 = vmatprep.subr.mxu0 %v14184_v11 }
0x1972   :  { %10116 = vmatpush3.msra.mxu0 %v12022_v15  ;;  %v14227_v15 = vld [vmem:[#allocation48_spill] sm:$0xff] }
0x1973   :  { %10117 = vmatprep.subr.mxu0 %v14184_v11 }
0x1974   :  { %10118 = vmatpush3.msra.mxu0 %v12029_v32  ;;  %v14228_v32 = vld [vmem:[#allocation49_spill] sm:$0xff] }
0x1975   :  { %10119 = vmatprep.subr.mxu0 %v14184_v11 }
0x1976   :  { %10120 = vmatpush3.msra.mxu0 %v12036_v13  ;;  %v14229_v13 = vld [vmem:[#allocation50_spill] sm:$0xff] }
0x1977   :  { %10121 = vmatprep.subr.mxu0 %v14184_v11 }
0x1978   :  { %10122 = vmatpush3.msra.mxu0 %v12043_v26  ;;  %v14230_v26 = vld [vmem:[#allocation51_spill] sm:$0xff] }
0x1979   :  { %10123 = vmatprep.subr.mxu0 %v14184_v11 }
0x197a   :  { %10124 = vmatpush3.msra.mxu0 %v14223_v14 }
0x197b   :  { %10125 = vmatprep.subr.mxu0 %v14184_v11 }
0x197c   :  { %10126 = vmatpush3.msra.mxu0 %v14224_v16 }
0x197d   :  { %10128 = vmatmul.mubr.msk.f32.vlgmr.msra.gmra.mxu0 %vm183_vm1, %v12194_v25  ;;  %10149 = vmatprep.subr.mxu0 %v14184_v11 }
0x197e   :  { %10150 = vmatpush3.msra.mxu0 %v14225_v12  ;;  %10165 = vmatprep.mubr.msk.f32.mxu0 %vm11098_vm2, %v14184_v11 }
0x197f   :  { %10151 = vmatprep.subr.mxu0 %v14184_v11 }
0x1980   :  { %10152 = vmatpush3.msra.mxu0 %v14226_v22 }
0x1981   :  { %10153 = vmatprep.subr.mxu0 %v14184_v11 }
0x1982   :  { %10154 = vmatpush3.msra.mxu0 %v14227_v15  ;;  %v4061_v15 = vld [vmem:[%s14033_s16 + $0x38] sm:$0xff] }
0x1983   :  { %10155 = vmatprep.subr.mxu0 %v14184_v11 }
0x1984   :  { %10156 = vmatpush3.msra.mxu0 %v14228_v32  ;;  %v4059_v32 = vld [vmem:[%s14033_s16 + $0x28] sm:$0xff] }
0x1985   :  { %10157 = vmatprep.subr.mxu0 %v14184_v11 }
0x1986   :  { %10158 = vmatpush3.msra.mxu0 %v14229_v13  ;;  %v4058_v13 = vld [vmem:[%s14033_s16 + $0x20] sm:$0xff] }
0x1987   :  { %10159 = vmatprep.subr.mxu0 %v14184_v11 }
0x1988   :  { %10160 = vmatpush3.msra.mxu0 %v14230_v26  ;;  %v4057_v26 = vld [vmem:[%s14033_s16 + $0x18] sm:$0xff] }
0x1989   :  { %10161 = vmatprep.subr.mxu0 %v14184_v11 }
0x198a   :  { %10162 = vmatpush3.msra.mxu0 %v14231_v38  ;;  %v4056_v38 = vld [vmem:[%s14033_s16 + $0x10] sm:$0xff] }
0x198b   :  { %10163 = vmatprep.subr.mxu0 %v14184_v11 }
0x198c   :  { %10164 = vmatpush3.msra.mxu0 %v14232_v3  ;;  %v4055_v3 = vld [vmem:[%s14033_s16 + $0x8] sm:$0xff] }
0x198d   :  { %10166 = vmatmul.mubr.msk.f32.vlgmr.msra.gmra.mxu0 %vm183_vm1, %v12194_v25  ;;  %v14235_v25 = vld [vmem:[#allocation5_spill] sm:$0xff] }
0x198e   :  { %v3999_v7 = vadd.f32 %v12289_v47, %v14235_v25  ;;  %v4179_v25 = vld [vmem:[%s14035_s18 + $0x58] sm:$0xff] }
0x1990   :  { %v12528_v61 = vadd.f32 %v8734_v43, %v3999_v7  ;;  %v4178_v7 = vld [vmem:[%s14035_s18 + $0x50] sm:$0xff] }
0x1992   :  { %v4012_v0 = vsel %vm183_vm1, %v12528_v61, 0.0 }
0x1a2d   :  { %v3549_v21 = vpop.f32.mrf.mxu0 }
0x1a2e   :  { %v3553_v27 = vadd.f32 %v3549_v21, %v3106_v40  ;;  %v4054_v40 = vld [vmem:[%s14033_s16] sm:$0xff] }
0x1a2f   :  { %v10110_v8 = vpop.f32.mrf.mxu0 }
0x1a3d   :  { %v3620_v30 = vpop.f32.mrf.mxu0 }
0x1a3e   :  { %v3621_v34 = vadd.f32 %v14233_v29, %v3620_v30 }
0x1a3f   :  { %v10129_v35 = vpop.f32.mrf.mxu0 }
0x1a40   :  { %10171 = vmatmul.mubr.msk.f32.vlgmr.msra.gmra.mxu1 %vm95_vm0, %v3621_v34 }
0x1a41   :  { %10175 = vmatprep.mubr.msk.f32.mxu1 %vm11098_vm2, %v14184_v11 }
0x1a4d   :  { %v3760_v36 = vpop.f32.mrf.mxu0 }
0x1a4e   :  { %v3761_v39 = vadd.f32 %v14234_v37, %v3760_v36  ;;  %v4183_v36 = vld [vmem:[%s14035_s18 + $0x78] sm:$0xff]  ;;  %v4182_v37 = vld [vmem:[%s14035_s18 + $0x70] sm:$0xff] }
0x1a4f   :  { %v10167_v41 = vpop.f32.mrf.mxu0  ;;  %10204 = vmatprep.subr.mxu0 %v4183_v36 }
0x1a50   :  { %10174 = vmatpush3.msra.mxu1 %v3761_v39  ;;  %10205 = vmatpush3.msra.mxu0 %v4183_v36  ;;  %v4181_v39 = vld [vmem:[%s14035_s18 + $0x68] sm:$0xff]  ;;  %v4180_v41 = vld [vmem:[%s14035_s18 + $0x60] sm:$0xff]  ;;  %v8769_v36 = vld [vmem:[%s14131_s0 + $0x110] sm:$0xff] }
0x1a51   :  { %10178 = vmatprep.subr.mxu1 %v14184_v11  ;;  %10206 = vmatprep.subr.mxu0 %v4182_v37 }
0x1a52   :  { %10207 = vmatpush3.msra.mxu0 %v4182_v37  ;;  %v8746_v37 = vld [vmem:[%s14127_s28 + $0x108] sm:$0xff] }
0x1a53   :  { %10208 = vmatprep.subr.mxu0 %v4181_v39 }
0x1a54   :  { %10209 = vmatpush3.msra.mxu0 %v4181_v39  ;;  %v8768_v39 = vld [vmem:[%s14131_s0 + $0x108] sm:$0xff] }
0x1a55   :  { %10210 = vmatprep.subr.mxu0 %v4180_v41 }
0x1a56   :  { %10211 = vmatpush3.msra.mxu0 %v4180_v41  ;;  %v8745_v41 = vld [vmem:[%s14127_s28 + $0x100] sm:$0xff] }
0x1a57   :  { %10212 = vmatprep.subr.mxu0 %v4179_v25 }
0x1a58   :  { %10213 = vmatpush3.msra.mxu0 %v4179_v25  ;;  %v8767_v25 = vld [vmem:[%s14131_s0 + $0x100] sm:$0xff] }
0x1a59   :  { %10214 = vmatprep.subr.mxu0 %v4178_v7 }
0x1a5a   :  { %10215 = vmatpush3.msra.mxu0 %v4178_v7 }
0x1b00   :  { %v3836_v44 = vpop.f32.mrf.mxu1 }
0x1b01   :  { %v3840_v45 = vmul.f32 0.25, %v3836_v44  ;;  %v4176_v44 = vld [vmem:[%s14035_s18 + $0x40] sm:$0xff] }
0x1b02   :  { %v10172_v60 = vpop.f32.mrf.mxu1 }
0x1b03   :  { %v3841_v63 = vsel %vm562_vm3, %v3840_v45, -inf  ;;  %v4174_v60 = vld [vmem:[%s14035_s18 + $0x30] sm:$0xff] }
0x1b04   :  { %3842 = vmax.xlane.f32.xlu0 %v3841_v63  ;;  %v4173_v63 = vld [vmem:[%s14035_s18 + $0x28] sm:$0xff] }
0x1b08   :  { %4013 = vadd.xlane.f32.xlu0 %v4012_v0  ;;  %v4172_v0 = vld [vmem:[%s14035_s18 + $0x20] sm:$0xff] }
0x1b8d   :  { %v3843_v1 = vpop.xlane.xlu0 %3842 }
0x1b8e   :  { %v3844_v2 = vsub.f32 %v3840_v45, %v3843_v1  ;;  %v4175_v45 = vld [vmem:[%s14035_s18 + $0x38] sm:$0xff] }
0x1b8f   :  { %v4171_v1 = vld [vmem:[%s14035_s18 + $0x18] sm:$0xff] }
0x1b90   :  { %v3845_v4 = vmul.f32 1.442695, %v3844_v2  ;;  %v4170_v2 = vld [vmem:[%s14035_s18 + $0x10] sm:$0xff] }
0x1b91   :  { %v4014_v47 = vpop.xlane.xlu0 %4013 }
0x1b92   :  { %10941 = vpow2.f32 %v3845_v4  ;;  %v4018_v5 = vmul.f32 0.015625, %v4014_v47  ;;  %v4169_v4 = vld [vmem:[%s14035_s18 + $0x8] sm:$0xff]  ;;  %v4168_v47 = vld [vmem:[%s14035_s18] sm:$0xff] }
0x1b94   :  { %v4020_v9 = vsub.f32 %v12528_v61, %v4018_v5  ;;  %v8737_v5 = vld [vmem:[%s14034_s17] ss:$0 sm:$0xff] }
0x1b96   :  { %v4022_v17 = vmul.f32 %v4020_v9, %v4020_v9 }
0x1b98   :  { %v4024_v28 = vsel %vm183_vm1, %v4022_v17, 0.0 }
0x1b99   :  { %4025 = vadd.xlane.f32.xlu0 %v4024_v28 }
0x1b9f   :  { %v10942_v10 = vpop.eup %10941 }
0x1ba0   :  { %v3847_v19 = vsel %vm562_vm3, %v10942_v10, 0.0 }
0x1ba1   :  { %3848 = vadd.xlane.f32.xlu1 %v3847_v19 }
0x1c22   :  { %v4026_v46 = vpop.xlane.xlu0 %4025 }
0x1c23   :  { %v4030_v48 = vmul.f32 0.015625, %v4026_v46 }
0x1c25   :  { %v4032_v49 = vadd.f32 1e-06, %v4030_v48 }
0x1c2a   :  { %v3849_v59 = vpop.xlane.xlu1 %3848 }
0x1c2b   :  { %10943 = vrcp.f32 %v3849_v59 }
0x1c2c   :  { %10945 = vrsqrt.f32 %v4032_v49 }
0x1c38   :  { %v10944_v31 = vpop.eup %10943 }
0x1c39   :  { %v3851_v6 = vmul.f32 %v10944_v31, %v10942_v10  ;;  %v10946_v50 = vpop.eup %10945 }
0x1c3a   :  { %v4036_v51 = vmul.f32 %v10946_v50, %v4020_v9 }
0x1c3b   :  { %10176 = vmatmul.mubr.msk.f32.vlgmr.msra.gmra.mxu1 %vm562_vm3, %v3851_v6 }
0x1c3c   :  { %10179 = vmatpush3.msra.mxu1 %v12178_v24  ;;  %10182 = vmatprep.mubr.msk.f32.mxu1 %vm11098_vm2, %v14184_v11  ;;  %v4044_v53 = vmul.f32 %v8735_v52, %v4036_v51  ;;  %v8736_v24 = vld [vmem:[%s14032_s15] ss:$0 sm:$0xff] }
0x1c3d   :  { %10180 = vmatprep.subr.mxu1 %v14184_v11 }
0x1c3e   :  { %10181 = vmatpush3.msra.mxu1 %v12184_v33  ;;  %v4052_v55 = vadd.f32 %v8736_v24, %v4044_v53 }
0x1c3f   :  { %10185 = vmatprep.subr.mxu1 %v4061_v15 }
0x1cfb   :  { %v3921_v54 = vpop.f32.mrf.mxu1 }
0x1cfc   :  { %10183 = vmatmul.mubr.msk.f32.vlgmr.msra.gmra.mxu1 %vm95_vm0, %v3921_v54 }
0x1cfd   :  { %v10177_v33 = vpop.f32.mrf.mxu1  ;;  %10201 = vmatprep.mubr.msk.f32.mxu1 %vm183_vm1, %v4052_v55  ;;  %10186 = vmatpush3.msra.mxu1 %v4061_v15 }
0x1dbc   :  { %v3994_v56 = vpop.f32.mrf.mxu1 }
0x1dbd   :  { %v3998_v57 = vadd.f32 %v3994_v56, %v3553_v27 }
0x1dbe   :  { %v10184_v18 = vpop.f32.mrf.mxu1 }
0x1dbf   :  { %v4000_v58 = vadd.f32 %v3998_v57, %v12167_v42  ;;  %v4060_v42 = vld [vmem:[%s14033_s16 + $0x30] sm:$0xff] }
0x1dc0   :  { %10187 = vmatprep.subr.mxu1 %v4060_v42 }
0x1dc1   :  { %v12551_v62 = vadd.f32 %v8734_v43, %v4000_v58  ;;  %10188 = vmatpush3.msra.mxu1 %v4060_v42  ;;  %v4177_v43 = vld [vmem:[%s14035_s18 + $0x48] sm:$0xff] }
0x1dc2   :  { %10189 = vmatprep.subr.mxu1 %v4059_v32  ;;  %10216 = vmatprep.subr.mxu0 %v4177_v43 }
0x1dc3   :  { %v4015_v23 = vsel %vm183_vm1, %v12551_v62, 0.0  ;;  %10190 = vmatpush3.msra.mxu1 %v4059_v32  ;;  %10217 = vmatpush3.msra.mxu0 %v4177_v43 }
0x1dc4   :  { %4016 = vadd.xlane.f32.xlu1 %v4015_v23  ;;  %10191 = vmatprep.subr.mxu1 %v4058_v13  ;;  %v8740_v23 = vld [vmem:[%s14036_s19] ss:$0 sm:$0xff] }
0x1dc5   :  { %10192 = vmatpush3.msra.mxu1 %v4058_v13  ;;  %10218 = vmatprep.subr.mxu0 %v4176_v44 }
0x1dc6   :  { %10193 = vmatprep.subr.mxu1 %v4057_v26  ;;  %10219 = vmatpush3.msra.mxu0 %v4176_v44 }
0x1dc7   :  { %10194 = vmatpush3.msra.mxu1 %v4057_v26  ;;  %10220 = vmatprep.subr.mxu0 %v4175_v45 }
0x1dc8   :  { %10195 = vmatprep.subr.mxu1 %v4056_v38  ;;  %10221 = vmatpush3.msra.mxu0 %v4175_v45 }
0x1dc9   :  { %10196 = vmatpush3.msra.mxu1 %v4056_v38  ;;  %10222 = vmatprep.subr.mxu0 %v4174_v60 }
0x1dca   :  { %10197 = vmatprep.subr.mxu1 %v4055_v3  ;;  %10223 = vmatpush3.msra.mxu0 %v4174_v60  ;;  %v12719_v60 = vld [vmem:[%s14129_s6 + $0x1] ss:$0 sm:$0xff] }
0x1dcb   :  { %10198 = vmatpush3.msra.mxu1 %v4055_v3  ;;  %10224 = vmatprep.subr.mxu0 %v4173_v63  ;;  %v8751_v3 = vld [vmem:[%s14127_s28 + $0x130] sm:$0xff] }
0x1dcc   :  { %10199 = vmatprep.subr.mxu1 %v4054_v40  ;;  %10225 = vmatpush3.msra.mxu0 %v4173_v63 }
0x1dcd   :  { %10200 = vmatpush3.msra.mxu1 %v4054_v40  ;;  %10226 = vmatprep.subr.mxu0 %v4172_v0  ;;  %v8773_v40 = vld [vmem:[%s14131_s0 + $0x130] sm:$0xff] }
0x1dce   :  { %10239 = vmatprep.subr.mxu1 %v14184_v11  ;;  %10227 = vmatpush3.msra.mxu0 %v4172_v0  ;;  %v12724_v0 = vld [vmem:[%s14130_s7 + $0x1] ss:$0 sm:$0xff] }
0x1dcf   :  { %10228 = vmatprep.subr.mxu0 %v4171_v1 }
0x1dd0   :  { %10229 = vmatpush3.msra.mxu0 %v4171_v1 }
0x1dd1   :  { %10230 = vmatprep.subr.mxu0 %v4170_v2 }
0x1dd2   :  { %10231 = vmatpush3.msra.mxu0 %v4170_v2 }
0x1dd3   :  { %10232 = vmatprep.subr.mxu0 %v4169_v4 }
0x1dd4   :  { %10233 = vmatpush3.msra.mxu0 %v4169_v4  ;;  %v12733_v4 = vld [vmem:[%s14128_s29 + $0x138] sm:$0xff] }
0x1dd5   :  { %10234 = vmatprep.subr.mxu0 %v4168_v47 }
0x1dd6   :  { %10235 = vmatpush3.msra.mxu0 %v4168_v47  ;;  %v12742_v47 = vld [vmem:[%s14128_s29 + $0x130] sm:$0xff] }
0x1dd7   :  { %10277 = vmatprep.subr.mxu0 %v14184_v11 }
0x1e4d   :  { %v4017_v20 = vpop.xlane.xlu1 %4016 }
0x1e4e   :  { %v4019_v14 = vmul.f32 0.015625, %v4017_v20 }
0x1e50   :  { %v4021_v16 = vsub.f32 %v12551_v62, %v4019_v14 }
0x1e52   :  { %v4023_v12 = vmul.f32 %v4021_v16, %v4021_v16 }
0x1e54   :  { %v4027_v22 = vsel %vm183_vm1, %v4023_v12, 0.0 }
0x1e55   :  { %4028 = vadd.xlane.f32.xlu1 %v4027_v22 }
0x1ede   :  { %v4029_v21 = vpop.xlane.xlu1 %4028 }
0x1edf   :  { %v4031_v27 = vmul.f32 0.015625, %v4029_v21  ;;  %v8750_v21 = vld [vmem:[%s14127_s28 + $0x128] sm:$0xff] }
0x1ee1   :  { %v4033_v8 = vadd.f32 1e-06, %v4031_v27  ;;  %v8772_v27 = vld [vmem:[%s14131_s0 + $0x128] sm:$0xff] }
0x1ee3   :  { %10947 = vrsqrt.f32 %v4033_v8  ;;  %v8749_v8 = vld [vmem:[%s14127_s28 + $0x120] sm:$0xff] }
0x1ef0   :  { %v10948_v30 = vpop.eup %10947 }
0x1ef1   :  { %v4037_v29 = vmul.f32 %v10948_v30, %v4021_v16  ;;  %v8771_v30 = vld [vmem:[%s14131_s0 + $0x120] sm:$0xff] }
0x1ef3   :  { %v4045_v34 = vmul.f32 %v8735_v52, %v4037_v29  ;;  %v8748_v29 = vld [vmem:[%s14127_s28 + $0x118] sm:$0xff] }
0x1ef5   :  { %v4053_v35 = vadd.f32 %v8736_v24, %v4045_v34  ;;  %v8770_v34 = vld [vmem:[%s14131_s0 + $0x118] sm:$0xff] }
0x1ef7   :  { %10202 = vmatmul.mubr.msk.f32.vlgmr.msra.gmra.mxu1 %vm183_vm1, %v4053_v35  ;;  %v8747_v35 = vld [vmem:[%s14127_s28 + $0x110] sm:$0xff] }
0x1ef8   :  { %10255 = vmatprep.mubr.msk.f32.mxu1 %vm11098_vm2, %v14184_v11 }
0x1fb7   :  { %v10203_v9 = vpop.f32.mrf.mxu1 }
0x1fb8   :  { %v4147_v17 = vadd.f32 %v10203_v9, %v8737_v5  ;;  %v12760_v9 = vld [vmem:[%s14128_s29 + $0x120] sm:$0xff] }
0x1fb9   :  { %v4141_v28 = vpop.f32.mrf.mxu1 }
0x1fba   :  { %v4153_v10 = vmul.f32 0.044715, %v4147_v17  ;;  %v4142_v19 = vadd.f32 %v8737_v5, %v4141_v28  ;;  %v4151_v56 = vmul.f32 0.5, %v4147_v17  ;;  %v12751_v5 = vld [vmem:[%s14128_s29 + $0x128] sm:$0xff]  ;;  %v12774_v28 = vld [vmem:[%s14128_s29 + $0x110] sm:$0xff] }
0x1fbc   :  { %v4155_v59 = vmul.f32 %v4153_v10, %v4147_v17  ;;  %v4152_v31 = vmul.f32 0.044715, %v4142_v19  ;;  %v4150_v55 = vmul.f32 0.5, %v4142_v19  ;;  %v12781_v10 = vld [vmem:[%s14128_s29 + $0x108] sm:$0xff] }
0x1fbe   :  { %v4157_v6 = vmul.f32 %v4155_v59, %v4147_v17  ;;  %v4154_v46 = vmul.f32 %v4152_v31, %v4142_v19  ;;  %v8776_v59 = vld [vmem:[%s14028_s11 + $0x4] ss:$0 sm:$0xff] }
0x1fc0   :  { %v4159_v48 = vadd.f32 %v4157_v6, %v4147_v17  ;;  %v4156_v49 = vmul.f32 %v4154_v46, %v4142_v19  ;;  %v12767_v17 = vld [vmem:[%s14128_s29 + $0x118] sm:$0xff] }
0x1fc2   :  { %v4158_v50 = vadd.f32 %v4156_v49, %v4142_v19  ;;  %v4161_v51 = vmul.f32 0.7978846, %v4159_v48  ;;  %v12788_v19 = vld [vmem:[%s14128_s29 + $0x100] sm:$0xff] }
0x1fc4   :  { %v4160_v52 = vmul.f32 0.7978846, %v4158_v50  ;;  %10949 = vtanh.f32 %v4161_v51  ;;  %v12805_v50 = vld [vmem:[%s14132_s1 + $0x4] ss:$0 sm:$0xff] }
0x1fc6   :  { %10951 = vtanh.f32 %v4160_v52  ;;  %v8754_v52 = vld [vmem:[%s14133_s4 + $0x4] ss:$0 sm:$0xff] }
0x1fd1   :  { %v10950_v53 = vpop.eup %10949 }
0x1fd2   :  { %v4165_v54 = vadd.f32 1.0, %v10950_v53 }
0x1fd3   :  { %v10952_v24 = vpop.eup %10951 }
0x1fd4   :  { %v4164_v33 = vadd.f32 1.0, %v10952_v24  ;;  %v4167_v18 = vmul.f32 %v4165_v54, %v4151_v56  ;;  %v8788_v56 = vld [vmem:[%s14127_s28 + $0x168] sm:$0xff] }
0x1fd6   :  { %v4166_v57 = vmul.f32 %v4164_v33, %v4150_v55  ;;  %v8790_v55 = vld [vmem:[%s14127_s28 + $0x178] sm:$0xff]  ;;  %v8789_v33 = vld [vmem:[%s14127_s28 + $0x170] sm:$0xff] }
0x1fd8   :  { %10236 = vmatprep.mubr.f32.mxu0 %v4166_v57  ;;  %v8787_v57 = vld [vmem:[%s14127_s28 + $0x160] sm:$0xff] }
0x1fd9   :  { %10237 = vmatmul.mubr.f32.vlgmr.msra.gmra.mxu0 %v4167_v18  ;;  %v8786_v18 = vld [vmem:[%s14127_s28 + $0x158] sm:$0xff] }
0x1fda   :  { %10293 = vmatprep.mubr.msk.f32.mxu0 %vm11098_vm2, %v14184_v11 }
0x2099   :  { %v10238_v58 = vpop.f32.mrf.mxu0 }
0x209a   :  { %v4260_v20 = vadd.f32 %v10238_v58, %v12551_v62  ;;  %v8752_v62 = vld [vmem:[%s14127_s28 + $0x138] sm:$0xff]  ;;  %v8785_v58 = vld [vmem:[%s14127_s28 + $0x150] sm:$0xff] }
0x209b   :  { %v4250_v14 = vpop.f32.mrf.mxu0  ;;  %10240 = vmatpush3.msra.mxu1 %v8752_v62  ;;  %v8830_v62 = vld [vmem:[%s14127_s28 + $0x1b8] sm:$0xff] }
0x209c   :  { %v12643_v16 = vadd.f32 %v8740_v23, %v4260_v20  ;;  %v4259_v12 = vadd.f32 %v4250_v14, %v12528_v61  ;;  %v8774_v61 = vld [vmem:[%s14131_s0 + $0x138] sm:$0xff]  ;;  %10241 = vmatprep.subr.mxu1 %v14184_v11  ;;  %v8783_v20 = vld [vmem:[%s14127_s28 + $0x140] sm:$0xff] }
0x209d   :  { %10278 = vmatpush3.msra.mxu0 %v8774_v61  ;;  %10242 = vmatpush3.msra.mxu1 %v8751_v3  ;;  %v8812_v14 = vld [vmem:[%s14131_s0 + $0x178] sm:$0xff]  ;;  %v8829_v61 = vld [vmem:[%s14127_s28 + $0x1b0] sm:$0xff]  ;;  %v8828_v3 = vld [vmem:[%s14127_s28 + $0x1a8] sm:$0xff] }
0x209e   :  { %v12646_v22 = vadd.f32 %v8740_v23, %v4259_v12  ;;  %10279 = vmatprep.subr.mxu0 %v14184_v11  ;;  %10243 = vmatprep.subr.mxu1 %v14184_v11  ;;  %v8784_v23 = vld [vmem:[%s14127_s28 + $0x148] sm:$0xff]  ;;  %v8811_v12 = vld [vmem:[%s14131_s0 + $0x170] sm:$0xff] }
0x209f   :  { %10280 = vmatpush3.msra.mxu0 %v8773_v40  ;;  %10244 = vmatpush3.msra.mxu1 %v8750_v21  ;;  %v8827_v40 = vld [vmem:[%s14127_s28 + $0x1a0] sm:$0xff]  ;;  %v8826_v21 = vld [vmem:[%s14127_s28 + $0x198] sm:$0xff] }
0x20a0   :  { %14236 = vst [vmem:[#allocation6_spill] sm:$0xff] %v12646_v22  ;;  %v4274_v15 = vsel %vm183_vm1, %v12646_v22, 0.0  ;;  %10281 = vmatprep.subr.mxu0 %v14184_v11  ;;  %10245 = vmatprep.subr.mxu1 %v14184_v11 }
0x20a1   :  { %4275 = vadd.xlane.f32.xlu0 %v4274_v15  ;;  %10282 = vmatpush3.msra.mxu0 %v8772_v27  ;;  %v8810_v15 = vld [vmem:[%s14131_s0 + $0x168] sm:$0xff]  ;;  %v8825_v27 = vld [vmem:[%s14127_s28 + $0x190] sm:$0xff] }
0x20a2   :  { %10246 = vmatpush3.msra.mxu1 %v8749_v8  ;;  %10283 = vmatprep.subr.mxu0 %v14184_v11  ;;  %v8824_v8 = vld [vmem:[%s14127_s28 + $0x188] sm:$0xff] }
0x20a3   :  { %10247 = vmatprep.subr.mxu1 %v14184_v11  ;;  %10284 = vmatpush3.msra.mxu0 %v8771_v30  ;;  %v8823_v30 = vld [vmem:[%s14127_s28 + $0x180] sm:$0xff] }
0x20a4   :  { %10248 = vmatpush3.msra.mxu1 %v8748_v29  ;;  %10285 = vmatprep.subr.mxu0 %v14184_v11  ;;  %v8852_v29 = vld [vmem:[%s14131_s0 + $0x1b8] sm:$0xff] }
0x20a5   :  { %10249 = vmatprep.subr.mxu1 %v14184_v11  ;;  %10286 = vmatpush3.msra.mxu0 %v8770_v34  ;;  %v8851_v34 = vld [vmem:[%s14131_s0 + $0x1b0] sm:$0xff] }
0x20a6   :  { %10250 = vmatpush3.msra.mxu1 %v8747_v35  ;;  %10287 = vmatprep.subr.mxu0 %v14184_v11  ;;  %v8850_v35 = vld [vmem:[%s14131_s0 + $0x1a8] sm:$0xff] }
0x20a7   :  { %10251 = vmatprep.subr.mxu1 %v14184_v11  ;;  %10288 = vmatpush3.msra.mxu0 %v8769_v36  ;;  %v8849_v36 = vld [vmem:[%s14131_s0 + $0x1a0] sm:$0xff] }
0x20a8   :  { %10252 = vmatpush3.msra.mxu1 %v8746_v37  ;;  %10289 = vmatprep.subr.mxu0 %v14184_v11  ;;  %v8848_v37 = vld [vmem:[%s14131_s0 + $0x198] sm:$0xff] }
0x20a9   :  { %10253 = vmatprep.subr.mxu1 %v14184_v11  ;;  %10290 = vmatpush3.msra.mxu0 %v8768_v39  ;;  %v8847_v39 = vld [vmem:[%s14131_s0 + $0x190] sm:$0xff] }
0x20aa   :  { %10254 = vmatpush3.msra.mxu1 %v8745_v41  ;;  %10291 = vmatprep.subr.mxu0 %v14184_v11  ;;  %v8846_v41 = vld [vmem:[%s14131_s0 + $0x188] sm:$0xff] }
0x20ab   :  { %10258 = vmatprep.subr.mxu1 %v14184_v11  ;;  %10292 = vmatpush3.msra.mxu0 %v8767_v25  ;;  %v8845_v25 = vld [vmem:[%s14131_s0 + $0x180] sm:$0xff] }
0x20ac   :  { %10301 = vmatprep.subr.mxu0 %v14184_v11 }
0x212a   :  { %v4276_v42 = vpop.xlane.xlu0 %4275 }
0x212b   :  { %v4280_v32 = vmul.f32 0.015625, %v4276_v42  ;;  %v8809_v42 = vld [vmem:[%s14131_s0 + $0x160] sm:$0xff] }
0x212d   :  { %v4282_v13 = vsub.f32 %v12646_v22, %v4280_v32  ;;  %v8808_v32 = vld [vmem:[%s14131_s0 + $0x158] sm:$0xff] }
0x212f   :  { %v4284_v26 = vmul.f32 %v4282_v13, %v4282_v13 }
0x2131   :  { %v4286_v38 = vsel %vm183_vm1, %v4284_v26, 0.0  ;;  %v8806_v26 = vld [vmem:[%s14131_s0 + $0x148] sm:$0xff] }
0x2132   :  { %4287 = vadd.xlane.f32.xlu1 %v4286_v38  ;;  %v8805_v38 = vld [vmem:[%s14131_s0 + $0x140] sm:$0xff] }
0x21bb   :  { %v4288_v7 = vpop.xlane.xlu1 %4287 }
0x21bc   :  { %v4292_v43 = vmul.f32 0.015625, %v4288_v7  ;;  %v8880_v7 = vld [vmem:[%s14128_s29 + $0x1f8] sm:$0xff] }
0x21be   :  { %v4294_v44 = vadd.f32 1e-06, %v4292_v43  ;;  %v8879_v43 = vld [vmem:[%s14128_s29 + $0x1f0] sm:$0xff] }
0x21c0   :  { %10953 = vrsqrt.f32 %v4294_v44  ;;  %v8878_v44 = vld [vmem:[%s14128_s29 + $0x1e8] sm:$0xff] }
0x21cd   :  { %v10954_v45 = vpop.eup %10953 }
0x21ce   :  { %v4298_v63 = vmul.f32 %v10954_v45, %v4282_v13  ;;  %v8807_v13 = vld [vmem:[%s14131_s0 + $0x150] sm:$0xff]  ;;  %v8877_v45 = vld [vmem:[%s14128_s29 + $0x1e0] sm:$0xff] }
0x21d0   :  { %v4306_v1 = vmul.f32 %v12719_v60, %v4298_v63  ;;  %v8876_v63 = vld [vmem:[%s14128_s29 + $0x1d8] sm:$0xff] }
0x21d2   :  { %v12728_v2 = vadd.f32 %v12724_v0, %v4306_v1  ;;  %v8875_v1 = vld [vmem:[%s14128_s29 + $0x1d0] sm:$0xff] }
0x21d4   :  { %10256 = vmatmul.mubr.msk.f32.vlgmr.msra.gmra.mxu1 %vm183_vm1, %v12728_v2  ;;  %10294 = vmatmul.mubr.msk.f32.vlgmr.msra.gmra.mxu0 %vm183_vm1, %v12728_v2 }
0x21d5   :  { %10259 = vmatpush3.msra.mxu1 %v12733_v4  ;;  %10274 = vmatprep.mubr.msk.f32.mxu1 %vm11098_vm2, %v14184_v11 }
0x21d6   :  { %10260 = vmatprep.subr.mxu1 %v14184_v11  ;;  %10303 = vmatprep.mubr.msk.f32.mxu0 %vm11098_vm2, %v14184_v11 }
0x21d7   :  { %10261 = vmatpush3.msra.mxu1 %v12742_v47 }
0x21d8   :  { %10262 = vmatprep.subr.mxu1 %v14184_v11 }
0x21d9   :  { %10263 = vmatpush3.msra.mxu1 %v12751_v5 }
0x21da   :  { %10264 = vmatprep.subr.mxu1 %v14184_v11 }
0x21db   :  { %10265 = vmatpush3.msra.mxu1 %v12760_v9 }
0x21dc   :  { %10266 = vmatprep.subr.mxu1 %v14184_v11 }
0x21dd   :  { %10267 = vmatpush3.msra.mxu1 %v12767_v17 }
0x21de   :  { %10268 = vmatprep.subr.mxu1 %v14184_v11 }
0x21df   :  { %10269 = vmatpush3.msra.mxu1 %v12774_v28 }
0x21e0   :  { %10270 = vmatprep.subr.mxu1 %v14184_v11 }
0x21e1   :  { %10271 = vmatpush3.msra.mxu1 %v12781_v10 }
0x21e2   :  { %10272 = vmatprep.subr.mxu1 %v14184_v11 }
0x21e3   :  { %10273 = vmatpush3.msra.mxu1 %v12788_v19 }
0x21e4   :  { %10275 = vmatmul.mubr.msk.f32.vlgmr.msra.gmra.mxu1 %vm183_vm1, %v12728_v2  ;;  %10296 = vmatprep.subr.mxu1 %v14184_v11 }
0x21e5   :  { %10298 = vmatprep.mubr.msk.f32.mxu1 %vm11098_vm2, %v14184_v11 }
0x2294   :  { %v4402_v31 = vpop.f32.mrf.mxu1  ;;  %v4576_v6 = vpop.f32.mrf.mxu0 }
0x2295   :  { %v4577_v46 = vadd.f32 %v8776_v59, %v4576_v6  ;;  %v4403_v54 = vadd.f32 %v8754_v52, %v4402_v31  ;;  %v8874_v59 = vld [vmem:[%s14128_s29 + $0x1c8] sm:$0xff]  ;;  %v8873_v31 = vld [vmem:[%s14128_s29 + $0x1c0] sm:$0xff] }
0x2296   :  { %v10257_v48 = vpop.f32.mrf.mxu1  ;;  %v10295_v49 = vpop.f32.mrf.mxu0 }
0x2297   :  { %10302 = vmatpush3.msra.mxu0 %v4577_v46 }
0x2298   :  { %10325 = vmatprep.subr.mxu0 %v14184_v11 }
0x22a4   :  { %v4489_v51 = vpop.f32.mrf.mxu1 }
0x22a5   :  { %v4490_v53 = vadd.f32 %v12805_v50, %v4489_v51 }
0x22a6   :  { %v10276_v24 = vpop.f32.mrf.mxu1 }
0x22a7   :  { %10297 = vmatpush3.xpose.msk.msra.mxu1 %vm95_vm0, %v4490_v53 }
0x22a8   :  { %10306 = vmatprep.subr.mxu1 %v14184_v11 }
0x22aa   :  { %10299 = vmatmul.mubr.msk.f32.vlgmr.msra.gmra.mxu1 %vm95_vm0, %v4403_v54 }
0x22ab   :  { %10307 = vmatpush3.msra.mxu1 %v8790_v55  ;;  %10322 = vmatprep.mubr.msk.f32.mxu1 %vm11098_vm2, %v14184_v11 }
0x22ac   :  { %10308 = vmatprep.subr.mxu1 %v14184_v11 }
0x22ad   :  { %10309 = vmatpush3.msra.mxu1 %v8789_v33 }
0x22ae   :  { %10310 = vmatprep.subr.mxu1 %v14184_v11 }
0x22af   :  { %10311 = vmatpush3.msra.mxu1 %v8788_v56 }
0x22b0   :  { %10312 = vmatprep.subr.mxu1 %v14184_v11 }
0x22b1   :  { %10313 = vmatpush3.msra.mxu1 %v8787_v57  ;;  %v8882_v57 = vld [vmem:[%s14132_s1 + $0x7] ss:$0 sm:$0xff] }
0x22b2   :  { %10314 = vmatprep.subr.mxu1 %v14184_v11 }
0x22b3   :  { %10315 = vmatpush3.msra.mxu1 %v8786_v18 }
0x22b4   :  { %10316 = vmatprep.subr.mxu1 %v14184_v11 }
0x22b5   :  { %10317 = vmatpush3.msra.mxu1 %v8785_v58 }
0x22b6   :  { %10318 = vmatprep.subr.mxu1 %v14184_v11 }
0x22b7   :  { %10319 = vmatpush3.msra.mxu1 %v8784_v23 }
0x22b8   :  { %10320 = vmatprep.subr.mxu1 %v14184_v11 }
0x22b9   :  { %10321 = vmatpush3.msra.mxu1 %v8783_v20 }
0x22ba   :  { %10323 = vmatmul.mubr.msk.f32.vlgmr.msra.gmra.mxu1 %vm183_vm1, %v12728_v2  ;;  %10344 = vmatprep.subr.mxu1 %v14184_v11 }
0x22bb   :  { %10345 = vmatpush3.msra.mxu1 %v8812_v14  ;;  %10360 = vmatprep.mubr.msk.f32.mxu1 %vm11098_vm2, %v14184_v11 }
0x22bc   :  { %10346 = vmatprep.subr.mxu1 %v14184_v11 }
0x22bd   :  { %10347 = vmatpush3.msra.mxu1 %v8811_v12 }
0x22be   :  { %10348 = vmatprep.subr.mxu1 %v14184_v11 }
0x22bf   :  { %10349 = vmatpush3.msra.mxu1 %v8810_v15 }
0x22c0   :  { %10350 = vmatprep.subr.mxu1 %v14184_v11 }
0x22c1   :  { %10351 = vmatpush3.msra.mxu1 %v8809_v42 }
0x22c2   :  { %10352 = vmatprep.subr.mxu1 %v14184_v11 }
0x22c3   :  { %10353 = vmatpush3.msra.mxu1 %v8808_v32 }
0x22c4   :  { %10354 = vmatprep.subr.mxu1 %v14184_v11 }
0x22c5   :  { %10355 = vmatpush3.msra.mxu1 %v8807_v13 }
0x22c6   :  { %10356 = vmatprep.subr.mxu1 %v14184_v11 }
0x22c7   :  { %10357 = vmatpush3.msra.mxu1 %v8806_v26 }
0x22c8   :  { %10358 = vmatprep.subr.mxu1 %v14184_v11 }
0x22c9   :  { %10359 = vmatpush3.msra.mxu1 %v8805_v38  ;;  %v13010_v38 = vld [vmem:[%s14128_s29 + $0x178] sm:$0xff] }
0x22ca   :  { %10361 = vmatmul.mubr.msk.f32.vlgmr.msra.gmra.mxu1 %vm183_vm1, %v12728_v2  ;;  %10387 = vmatprep.subr.mxu1 %v14184_v11 }
0x22cb   :  { %10388 = vmatpush3.msra.mxu1 %v8830_v62  ;;  %10403 = vmatprep.mubr.msk.f32.mxu1 %vm11098_vm2, %v14184_v11  ;;  %v13016_v62 = vld [vmem:[%s14128_s29 + $0x170] sm:$0xff] }
0x22cc   :  { %10389 = vmatprep.subr.mxu1 %v14184_v11 }
0x22cd   :  { %10390 = vmatpush3.msra.mxu1 %v8829_v61  ;;  %v13025_v61 = vld [vmem:[%s14128_s29 + $0x168] sm:$0xff] }
0x22ce   :  { %10391 = vmatprep.subr.mxu1 %v14184_v11 }
0x22cf   :  { %10392 = vmatpush3.msra.mxu1 %v8828_v3  ;;  %v13032_v3 = vld [vmem:[%s14128_s29 + $0x160] sm:$0xff] }
0x22d0   :  { %10393 = vmatprep.subr.mxu1 %v14184_v11 }
0x22d1   :  { %10394 = vmatpush3.msra.mxu1 %v8827_v40  ;;  %v13039_v40 = vld [vmem:[%s14128_s29 + $0x158] sm:$0xff] }
0x22d2   :  { %10395 = vmatprep.subr.mxu1 %v14184_v11 }
0x22d3   :  { %10396 = vmatpush3.msra.mxu1 %v8826_v21  ;;  %v13046_v21 = vld [vmem:[%s14128_s29 + $0x150] sm:$0xff] }
0x22d4   :  { %10397 = vmatprep.subr.mxu1 %v14184_v11 }
0x22d5   :  { %10398 = vmatpush3.msra.mxu1 %v8825_v27  ;;  %v13053_v27 = vld [vmem:[%s14128_s29 + $0x148] sm:$0xff] }
0x22d6   :  { %10399 = vmatprep.subr.mxu1 %v14184_v11 }
0x22d7   :  { %10400 = vmatpush3.msra.mxu1 %v8824_v8  ;;  %v13060_v8 = vld [vmem:[%s14128_s29 + $0x140] sm:$0xff] }
0x22d8   :  { %10401 = vmatprep.subr.mxu1 %v14184_v11 }
0x22d9   :  { %10402 = vmatpush3.msra.mxu1 %v8823_v30 }
0x22da   :  { %10404 = vmatmul.mubr.msk.f32.vlgmr.msra.gmra.mxu1 %vm183_vm1, %v12728_v2  ;;  %10425 = vmatprep.subr.mxu1 %v14184_v11 }
0x22db   :  { %10426 = vmatpush3.msra.mxu1 %v8852_v29  ;;  %10441 = vmatprep.mubr.msk.f32.mxu1 %vm11098_vm2, %v14184_v11 }
0x22dc   :  { %10427 = vmatprep.subr.mxu1 %v14184_v11 }
0x22dd   :  { %10428 = vmatpush3.msra.mxu1 %v8851_v34  ;;  %v13073_v34 = vld [vmem:[%s14132_s1 + $0x5] ss:$0 sm:$0xff] }
0x22de   :  { %10429 = vmatprep.subr.mxu1 %v14184_v11 }
0x22df   :  { %10430 = vmatpush3.msra.mxu1 %v8850_v35 }
0x22e0   :  { %10431 = vmatprep.subr.mxu1 %v14184_v11 }
0x22e1   :  { %10432 = vmatpush3.msra.mxu1 %v8849_v36  ;;  %v13078_v36 = vld [vmem:[%s14133_s4 + $0x5] ss:$0 sm:$0xff] }
0x22e2   :  { %10433 = vmatprep.subr.mxu1 %v14184_v11 }
0x22e3   :  { %10434 = vmatpush3.msra.mxu1 %v8848_v37 }
0x22e4   :  { %10435 = vmatprep.subr.mxu1 %v14184_v11 }
0x22e5   :  { %10436 = vmatpush3.msra.mxu1 %v8847_v39  ;;  %v13084_v39 = vld [vmem:[%s14028_s11 + $0x5] ss:$0 sm:$0xff] }
0x22e6   :  { %10437 = vmatprep.subr.mxu1 %v14184_v11 }
0x22e7   :  { %10438 = vmatpush3.msra.mxu1 %v8846_v41 }
0x22e8   :  { %10439 = vmatprep.subr.mxu1 %v14184_v11 }
0x22e9   :  { %10440 = vmatpush3.msra.mxu1 %v8845_v25 }
0x22ea   :  { %10442 = vmatmul.mubr.msk.f32.vlgmr.msra.gmra.mxu1 %vm183_vm1, %v12728_v2  ;;  %10480 = vmatprep.subr.mxu1 %v14184_v11 }
0x22eb   :  { %10481 = vmatpush3.msra.mxu1 %v8880_v7  ;;  %10496 = vmatprep.mubr.msk.f32.mxu1 %vm11098_vm2, %v14184_v11 }
0x22ec   :  { %10482 = vmatprep.subr.mxu1 %v14184_v11 }
0x22ed   :  { %10483 = vmatpush3.msra.mxu1 %v8879_v43 }
0x22ee   :  { %10484 = vmatprep.subr.mxu1 %v14184_v11 }
0x22ef   :  { %10485 = vmatpush3.msra.mxu1 %v8878_v44 }
0x22f0   :  { %10486 = vmatprep.subr.mxu1 %v14184_v11 }
0x22f1   :  { %10487 = vmatpush3.msra.mxu1 %v8877_v45 }
0x22f2   :  { %10488 = vmatprep.subr.mxu1 %v14184_v11 }
0x22f3   :  { %10489 = vmatpush3.msra.mxu1 %v8876_v63 }
0x22f4   :  { %10490 = vmatprep.subr.mxu1 %v14184_v11 }
0x22f5   :  { %10491 = vmatpush3.msra.mxu1 %v8875_v1 }
0x22f6   :  { %10492 = vmatprep.subr.mxu1 %v14184_v11 }
0x22f7   :  { %10493 = vmatpush3.msra.mxu1 %v8874_v59 }
0x22f8   :  { %10494 = vmatprep.subr.mxu1 %v14184_v11 }
0x22f9   :  { %10495 = vmatpush3.msra.mxu1 %v8873_v31 }
0x22fa   :  { %10497 = vmatmul.mubr.msk.f32.vlgmr.msra.gmra.mxu1 %vm183_vm1, %v12728_v2  ;;  %10518 = vmatprep.subr.mxu1 %v14184_v11 }
0x22fb   :  { %10520 = vmatprep.mubr.msk.f32.mxu1 %vm11098_vm2, %v14184_v11 }
0x236a   :  { %v4652_v6 = vpop.f32.mrf.mxu1 }
0x236b   :  { %v4656_v46 = vmul.f32 0.25, %v4652_v6 }
0x236c   :  { %v10300_v48 = vpop.f32.mrf.mxu1 }
0x236d   :  { %v4657_v49 = vsel %vm562_vm3, %v4656_v46, -inf }
0x236e   :  { %4658 = vmax.xlane.f32.xlu0 %v4657_v49 }
0x237a   :  { %v4827_v51 = vpop.f32.mrf.mxu1 }
0x237b   :  { %v4828_v25 = vadd.f32 %v13078_v36, %v4827_v51 }
0x237c   :  { %v10324_v52 = vpop.f32.mrf.mxu1 }
0x237d   :  { %v13099_v52 = vld [vmem:[%s14029_s12 + $0x58] sm:$0xff] }
0x238a   :  { %v5001_v53 = vpop.f32.mrf.mxu1 }
0x238b   :  { %v5002_v7 = vadd.f32 %v13084_v39, %v5001_v53  ;;  %v13105_v53 = vld [vmem:[%s14029_s12 + $0x50] sm:$0xff] }
0x238c   :  { %v10362_v24 = vpop.f32.mrf.mxu1 }
0x238d   :  { %v13116_v24 = vld [vmem:[%s14029_s12 + $0x48] sm:$0xff] }
0x239a   :  { %v12997_v54 = vpop.f32.mrf.mxu1 }
0x239c   :  { %v10405_v55 = vpop.f32.mrf.mxu1 }
0x23aa   :  { %v12999_v33 = vpop.f32.mrf.mxu1 }
0x23ac   :  { %v10443_v56 = vpop.f32.mrf.mxu1 }
0x23ad   :  { %v13122_v56 = vld [vmem:[%s14029_s12 + $0x40] sm:$0xff] }
0x23ba   :  { %v5984_v18 = vpop.f32.mrf.mxu1 }
0x23bb   :  { %v5985_v58 = vadd.f32 %v8882_v57, %v5984_v18  ;;  %v13131_v18 = vld [vmem:[%s14128_s29 + $0x1b8] sm:$0xff] }
0x23bc   :  { %v10498_v23 = vpop.f32.mrf.mxu1 }
0x23bd   :  { %10519 = vmatpush3.xpose.msk.msra.mxu1 %vm95_vm0, %v5985_v58  ;;  %v13139_v58 = vld [vmem:[%s14128_s29 + $0x1b0] sm:$0xff]  ;;  %v13148_v23 = vld [vmem:[%s14128_s29 + $0x1a8] sm:$0xff] }
0x23be   :  { %10523 = vmatprep.subr.mxu1 %v14184_v11 }
0x23f7   :  { %v4659_v20 = vpop.xlane.xlu0 %4658 }
0x23f8   :  { %v4660_v14 = vsub.f32 %v4656_v46, %v4659_v20  ;;  %v13155_v20 = vld [vmem:[%s14128_s29 + $0x1a0] sm:$0xff] }
0x23fa   :  { %v4661_v12 = vmul.f32 1.442695, %v4660_v14  ;;  %v13162_v14 = vld [vmem:[%s14128_s29 + $0x198] sm:$0xff] }
0x23fc   :  { %10955 = vpow2.f32 %v4661_v12  ;;  %v13169_v12 = vld [vmem:[%s14128_s29 + $0x190] sm:$0xff] }
0x2409   :  { %v10956_v15 = vpop.eup %10955 }
0x240a   :  { %v4663_v42 = vsel %vm562_vm3, %v10956_v15, 0.0 }
0x240b   :  { %4664 = vadd.xlane.f32.xlu1 %v4663_v42  ;;  %v13183_v42 = vld [vmem:[%s14128_s29 + $0x180] sm:$0xff] }
0x2494   :  { %v4665_v32 = vpop.xlane.xlu1 %4664 }
0x2495   :  { %10957 = vrcp.f32 %v4665_v32 }
0x24a2   :  { %v10958_v13 = vpop.eup %10957 }
0x24a3   :  { %v4667_v26 = vmul.f32 %v10958_v13, %v10956_v15  ;;  %v13176_v15 = vld [vmem:[%s14128_s29 + $0x188] sm:$0xff] }
0x24a5   :  { %10304 = vmatmul.mubr.msk.f32.vlgmr.msra.gmra.mxu0 %vm562_vm3, %v4667_v26 }
0x24a6   :  { %10326 = vmatpush3.msra.mxu0 %v13010_v38  ;;  %10341 = vmatprep.mubr.msk.f32.mxu0 %vm11098_vm2, %v14184_v11 }
0x24a7   :  { %10327 = vmatprep.subr.mxu0 %v14184_v11 }
0x24a8   :  { %10328 = vmatpush3.msra.mxu0 %v13016_v62 }
0x24a9   :  { %10329 = vmatprep.subr.mxu0 %v14184_v11 }
0x24aa   :  { %10330 = vmatpush3.msra.mxu0 %v13025_v61 }
0x24ab   :  { %10331 = vmatprep.subr.mxu0 %v14184_v11 }
0x24ac   :  { %10332 = vmatpush3.msra.mxu0 %v13032_v3 }
0x24ad   :  { %10333 = vmatprep.subr.mxu0 %v14184_v11 }
0x24ae   :  { %10334 = vmatpush3.msra.mxu0 %v13039_v40 }
0x24af   :  { %10335 = vmatprep.subr.mxu0 %v14184_v11 }
0x24b0   :  { %10336 = vmatpush3.msra.mxu0 %v13046_v21 }
0x24b1   :  { %10337 = vmatprep.subr.mxu0 %v14184_v11 }
0x24b2   :  { %10338 = vmatpush3.msra.mxu0 %v13053_v27 }
0x24b3   :  { %10339 = vmatprep.subr.mxu0 %v14184_v11 }
0x24b4   :  { %10340 = vmatpush3.msra.mxu0 %v13060_v8 }
0x24b5   :  { %10342 = vmatmul.mubr.msk.f32.vlgmr.msra.gmra.mxu0 %vm183_vm1, %v12728_v2  ;;  %10363 = vmatprep.subr.mxu0 %v14184_v11 }
0x24b6   :  { %10365 = vmatprep.mubr.msk.f32.mxu0 %vm11098_vm2, %v14184_v11 }
0x2565   :  { %v4737_v30 = vpop.f32.mrf.mxu0 }
0x2567   :  { %v10305_v29 = vpop.f32.mrf.mxu0 }
0x2575   :  { %v4914_v35 = vpop.f32.mrf.mxu0 }
0x2576   :  { %v4915_v37 = vadd.f32 %v13073_v34, %v4914_v35  ;;  %v13198_v35 = vld [vmem:[%s14132_s1 + $0x6] ss:$0 sm:$0xff] }
0x2577   :  { %v10343_v41 = vpop.f32.mrf.mxu0 }
0x2578   :  { %10364 = vmatpush3.xpose.msk.msra.mxu0 %vm95_vm0, %v4915_v37  ;;  %v13203_v41 = vld [vmem:[%s14133_s4 + $0x6] ss:$0 sm:$0xff] }
0x2579   :  { %10368 = vmatprep.subr.mxu0 %v14184_v11 }
0x257b   :  { %10366 = vmatmul.mubr.msk.f32.vlgmr.msra.gmra.mxu0 %vm95_vm0, %v4828_v25 }
0x257c   :  { %10369 = vmatpush3.msra.mxu0 %v5002_v7  ;;  %10370 = vmatprep.mubr.msk.f32.mxu0 %vm11098_vm2, %v14184_v11  ;;  %v13209_v7 = vld [vmem:[%s14028_s11 + $0x6] ss:$0 sm:$0xff] }
0x257d   :  { %10373 = vmatprep.subr.mxu0 %v14184_v11 }
0x263b   :  { %v5077_v43 = vpop.f32.mrf.mxu0 }
0x263c   :  { %v5081_v44 = vmul.f32 0.25, %v5077_v43 }
0x263d   :  { %v10367_v45 = vpop.f32.mrf.mxu0 }
0x263e   :  { %v5082_v63 = vsel %vm562_vm3, %v5081_v44, -inf  ;;  %v5573_v45 = vadd.f32 %v13209_v7, %v12999_v33 }
0x263f   :  { %5083 = vmax.xlane.f32.xlu0 %v5082_v63 }
0x26c8   :  { %v5084_v1 = vpop.xlane.xlu0 %5083 }
0x26c9   :  { %v5085_v59 = vsub.f32 %v5081_v44, %v5084_v1  ;;  %v5399_v44 = vadd.f32 %v13203_v41, %v12997_v54 }
0x26cb   :  { %v5086_v31 = vmul.f32 1.442695, %v5085_v59 }
0x26cd   :  { %10959 = vpow2.f32 %v5086_v31 }
0x26da   :  { %v10960_v6 = vpop.eup %10959 }
0x26db   :  { %v5088_v46 = vsel %vm562_vm3, %v10960_v6, 0.0 }
0x26dc   :  { %5089 = vadd.xlane.f32.xlu1 %v5088_v46 }
0x2765   :  { %v5090_v48 = vpop.xlane.xlu1 %5089 }
0x2766   :  { %10961 = vrcp.f32 %v5090_v48 }
0x2773   :  { %v10962_v49 = vpop.eup %10961 }
0x2774   :  { %v5092_v51 = vmul.f32 %v10962_v49, %v10960_v6 }
0x2776   :  { %10371 = vmatmul.mubr.msk.f32.vlgmr.msra.gmra.mxu0 %vm562_vm3, %v5092_v51 }
0x2777   :  { %10374 = vmatpush3.msra.mxu0 %v13099_v52  ;;  %10377 = vmatprep.mubr.msk.f32.mxu0 %vm11098_vm2, %v14184_v11 }
0x2778   :  { %10375 = vmatprep.subr.mxu0 %v14184_v11 }
0x2779   :  { %10376 = vmatpush3.msra.mxu0 %v13105_v53 }
0x277a   :  { %10380 = vmatprep.subr.mxu0 %v14184_v11 }
0x2836   :  { %v5162_v55 = vpop.f32.mrf.mxu0 }
0x2837   :  { %10378 = vmatmul.mubr.msk.f32.vlgmr.msra.gmra.mxu0 %vm95_vm0, %v5162_v55 }
0x2838   :  { %10381 = vmatpush3.msra.mxu0 %v13116_v24  ;;  %v10372_v57 = vpop.f32.mrf.mxu0  ;;  %10384 = vmatprep.mubr.msk.f32.mxu0 %vm11098_vm2, %v14184_v11 }
0x2839   :  { %10382 = vmatprep.subr.mxu0 %v14184_v11  ;;  %v13226_v57 = vld [vmem:[%s14029_s12 + $0x68] sm:$0xff] }
0x283a   :  { %10383 = vmatpush3.msra.mxu0 %v13122_v56 }
0x283b   :  { %10406 = vmatprep.subr.mxu0 %v14184_v11  ;;  %10385 = vmatmul.mubr.msk.f32.vlgmr.msra.gmra.mxu0 %vm95_vm0, %v4737_v30 }
0x283c   :  { %10407 = vmatpush3.msra.mxu0 %v13131_v18  ;;  %10422 = vmatprep.mubr.msk.f32.mxu0 %vm11098_vm2, %v14184_v11 }
0x283d   :  { %10408 = vmatprep.subr.mxu0 %v14184_v11 }
0x283e   :  { %10409 = vmatpush3.msra.mxu0 %v13139_v58 }
0x283f   :  { %10410 = vmatprep.subr.mxu0 %v14184_v11 }
0x2840   :  { %10411 = vmatpush3.msra.mxu0 %v13148_v23 }
0x2841   :  { %10412 = vmatprep.subr.mxu0 %v14184_v11 }
0x2842   :  { %10413 = vmatpush3.msra.mxu0 %v13155_v20 }
0x2843   :  { %10414 = vmatprep.subr.mxu0 %v14184_v11 }
0x2844   :  { %10415 = vmatpush3.msra.mxu0 %v13162_v14 }
0x2845   :  { %10416 = vmatprep.subr.mxu0 %v14184_v11 }
0x2846   :  { %10417 = vmatpush3.msra.mxu0 %v13169_v12 }
0x2847   :  { %10418 = vmatprep.subr.mxu0 %v14184_v11 }
0x2848   :  { %10419 = vmatpush3.msra.mxu0 %v13176_v15 }
0x2849   :  { %10420 = vmatprep.subr.mxu0 %v14184_v11 }
0x284a   :  { %10421 = vmatpush3.msra.mxu0 %v13183_v42 }
0x284b   :  { %10423 = vmatmul.mubr.msk.f32.vlgmr.msra.gmra.mxu0 %vm183_vm1, %v12728_v2  ;;  %10444 = vmatprep.subr.mxu0 %v14184_v11 }
0x284c   :  { %10446 = vmatprep.mubr.msk.f32.mxu0 %vm11098_vm2, %v14184_v11 }
0x28f7   :  { %v5238_v32 = vpop.f32.mrf.mxu0 }
0x28f9   :  { %v10379_v13 = vpop.f32.mrf.mxu0 }
0x28fa   :  { %v13243_v13 = vld [vmem:[%s14127_s28 + $0x1f8] sm:$0xff] }
0x28fb   :  { %v5311_v26 = vpop.f32.mrf.mxu0 }
0x28fc   :  { %v13193_v30 = vadd.f32 %v5311_v26, %v5238_v32  ;;  %v13232_v32 = vld [vmem:[%s14029_s12 + $0x60] sm:$0xff] }
0x28fd   :  { %v10386_v29 = vpop.f32.mrf.mxu0 }
0x28fe   :  { %v13249_v29 = vld [vmem:[%s14127_s28 + $0x1f0] sm:$0xff] }
0x290b   :  { %v5485_v37 = vpop.f32.mrf.mxu0 }
0x290c   :  { %v5486_v25 = vadd.f32 %v13198_v35, %v5485_v37 }
0x290d   :  { %v10424_v43 = vpop.f32.mrf.mxu0 }
0x290e   :  { %10445 = vmatpush3.xpose.msk.msra.mxu0 %vm95_vm0, %v5486_v25  ;;  %v13258_v25 = vld [vmem:[%s14127_s28 + $0x1e8] sm:$0xff]  ;;  %v13265_v43 = vld [vmem:[%s14127_s28 + $0x1e0] sm:$0xff] }
0x290f   :  { %10449 = vmatprep.subr.mxu0 %v14184_v11 }
0x2911   :  { %10447 = vmatmul.mubr.msk.f32.vlgmr.msra.gmra.mxu0 %vm95_vm0, %v5399_v44  ;;  %v13272_v44 = vld [vmem:[%s14127_s28 + $0x1d8] sm:$0xff] }
0x2912   :  { %10450 = vmatpush3.msra.mxu0 %v5573_v45  ;;  %10451 = vmatprep.mubr.msk.f32.mxu0 %vm11098_vm2, %v14184_v11  ;;  %v13279_v45 = vld [vmem:[%s14127_s28 + $0x1d0] sm:$0xff] }
0x2913   :  { %10454 = vmatprep.subr.mxu0 %v14184_v11 }
0x29d1   :  { %v5648_v63 = vpop.f32.mrf.mxu0 }
0x29d2   :  { %v5652_v1 = vmul.f32 0.25, %v5648_v63  ;;  %v13286_v63 = vld [vmem:[%s14127_s28 + $0x1c8] sm:$0xff] }
0x29d3   :  { %v10448_v59 = vpop.f32.mrf.mxu0 }
0x29d4   :  { %v5653_v31 = vsel %vm562_vm3, %v5652_v1, -inf  ;;  %v13300_v59 = vld [vmem:[%s14131_s0 + $0x1f8] sm:$0xff] }
0x29d5   :  { %5654 = vmax.xlane.f32.xlu0 %v5653_v31  ;;  %v13309_v31 = vld [vmem:[%s14131_s0 + $0x1f0] sm:$0xff] }
0x2a5e   :  { %v5655_v54 = vpop.xlane.xlu0 %5654 }
0x2a5f   :  { %v5656_v6 = vsub.f32 %v5652_v1, %v5655_v54  ;;  %v13293_v1 = vld [vmem:[%s14127_s28 + $0x1c0] sm:$0xff]  ;;  %v13318_v54 = vld [vmem:[%s14131_s0 + $0x1e8] sm:$0xff] }
0x2a61   :  { %v5657_v46 = vmul.f32 1.442695, %v5656_v6  ;;  %v13325_v6 = vld [vmem:[%s14131_s0 + $0x1e0] sm:$0xff] }
0x2a63   :  { %10963 = vpow2.f32 %v5657_v46  ;;  %v13332_v46 = vld [vmem:[%s14131_s0 + $0x1d8] sm:$0xff] }
0x2a70   :  { %v10964_v48 = vpop.eup %10963 }
0x2a71   :  { %v5659_v33 = vsel %vm562_vm3, %v10964_v48, 0.0 }
0x2a72   :  { %5660 = vadd.xlane.f32.xlu1 %v5659_v33  ;;  %v13346_v33 = vld [vmem:[%s14131_s0 + $0x1c8] sm:$0xff] }
0x2afb   :  { %v5661_v49 = vpop.xlane.xlu1 %5660 }
0x2afc   :  { %10965 = vrcp.f32 %v5661_v49  ;;  %v13353_v49 = vld [vmem:[%s14131_s0 + $0x1c0] sm:$0xff] }
0x2afd   :  { %14237 = vst [vmem:[#allocation7_spill] sm:$0xff] %v13353_v49 }
0x2b09   :  { %v10966_v51 = vpop.eup %10965 }
0x2b0a   :  { %v5663_v55 = vmul.f32 %v10966_v51, %v10964_v48  ;;  %v13339_v48 = vld [vmem:[%s14131_s0 + $0x1d0] sm:$0xff] }
0x2b0c   :  { %10452 = vmatmul.mubr.msk.f32.vlgmr.msra.gmra.mxu0 %vm562_vm3, %v5663_v55 }
0x2b0d   :  { %10455 = vmatpush3.msra.mxu0 %v13226_v57  ;;  %10458 = vmatprep.mubr.msk.f32.mxu0 %vm11098_vm2, %v14184_v11 }
0x2b0e   :  { %10456 = vmatprep.subr.mxu0 %v14184_v11 }
0x2b0f   :  { %10457 = vmatpush3.msra.mxu0 %v13232_v32 }
0x2b10   :  { %10461 = vmatprep.subr.mxu0 %v14184_v11 }
0x2bcc   :  { %v5733_v26 = vpop.f32.mrf.mxu0 }
0x2bcd   :  { %10459 = vmatmul.mubr.msk.f32.vlgmr.msra.gmra.mxu0 %vm95_vm0, %v5733_v26 }
0x2bce   :  { %10462 = vmatpush3.msra.mxu0 %v13243_v13  ;;  %v10453_v37 = vpop.f32.mrf.mxu0  ;;  %10477 = vmatprep.mubr.msk.f32.mxu0 %vm11098_vm2, %v14184_v11 }
0x2bcf   :  { %10463 = vmatprep.subr.mxu0 %v14184_v11 }
0x2bd0   :  { %10464 = vmatpush3.msra.mxu0 %v13249_v29 }
0x2bd1   :  { %10465 = vmatprep.subr.mxu0 %v14184_v11 }
0x2bd2   :  { %10466 = vmatpush3.msra.mxu0 %v13258_v25 }
0x2bd3   :  { %10467 = vmatprep.subr.mxu0 %v14184_v11 }
0x2bd4   :  { %10468 = vmatpush3.msra.mxu0 %v13265_v43 }
0x2bd5   :  { %10469 = vmatprep.subr.mxu0 %v14184_v11 }
0x2bd6   :  { %10470 = vmatpush3.msra.mxu0 %v13272_v44 }
0x2bd7   :  { %10471 = vmatprep.subr.mxu0 %v14184_v11 }
0x2bd8   :  { %10472 = vmatpush3.msra.mxu0 %v13279_v45 }
0x2bd9   :  { %10473 = vmatprep.subr.mxu0 %v14184_v11 }
0x2bda   :  { %10474 = vmatpush3.msra.mxu0 %v13286_v63 }
0x2bdb   :  { %10475 = vmatprep.subr.mxu0 %v14184_v11 }
0x2bdc   :  { %10476 = vmatpush3.msra.mxu0 %v13293_v1 }
0x2bdd   :  { %10478 = vmatmul.mubr.msk.f32.vlgmr.msra.gmra.mxu0 %vm183_vm1, %v12728_v2  ;;  %10499 = vmatprep.subr.mxu0 %v14184_v11 }
0x2bde   :  { %10500 = vmatpush3.msra.mxu0 %v13300_v59  ;;  %10515 = vmatprep.mubr.msk.f32.mxu0 %vm11098_vm2, %v14184_v11 }
0x2bdf   :  { %10501 = vmatprep.subr.mxu0 %v14184_v11 }
0x2be0   :  { %10502 = vmatpush3.msra.mxu0 %v13309_v31 }
0x2be1   :  { %10503 = vmatprep.subr.mxu0 %v14184_v11 }
0x2be2   :  { %10504 = vmatpush3.msra.mxu0 %v13318_v54 }
0x2be3   :  { %10505 = vmatprep.subr.mxu0 %v14184_v11 }
0x2be4   :  { %10506 = vmatpush3.msra.mxu0 %v13325_v6 }
0x2be5   :  { %10507 = vmatprep.subr.mxu0 %v14184_v11 }
0x2be6   :  { %10508 = vmatpush3.msra.mxu0 %v13332_v46 }
0x2be7   :  { %10509 = vmatprep.subr.mxu0 %v14184_v11 }
0x2be8   :  { %10510 = vmatpush3.msra.mxu0 %v13339_v48 }
0x2be9   :  { %10511 = vmatprep.subr.mxu0 %v14184_v11 }
0x2bea   :  { %10512 = vmatpush3.msra.mxu0 %v13346_v33 }
0x2beb   :  { %10513 = vmatprep.subr.mxu0 %v14184_v11 }
0x2bec   :  { %10514 = vmatpush3.msra.mxu0 %v13353_v49 }
0x2bed   :  { %10516 = vmatmul.mubr.msk.f32.vlgmr.msra.gmra.mxu0 %vm183_vm1, %v12728_v2  ;;  %10554 = vmatprep.subr.mxu0 %v14184_v11 }
0x2bee   :  { %10555 = vmatpush3.msra.mxu0 %v12733_v4  ;;  %10570 = vmatprep.mubr.msk.f32.mxu0 %vm11098_vm2, %v14184_v11 }
0x2bef   :  { %10556 = vmatprep.subr.mxu0 %v14184_v11 }
0x2bf0   :  { %10557 = vmatpush3.msra.mxu0 %v12742_v47 }
0x2bf1   :  { %10558 = vmatprep.subr.mxu0 %v14184_v11 }
0x2bf2   :  { %10559 = vmatpush3.msra.mxu0 %v12751_v5  ;;  %v13385_v5 = vld [vmem:[%s14133_s4 + $0x7] ss:$0 sm:$0xff] }
0x2bf3   :  { %10560 = vmatprep.subr.mxu0 %v14184_v11  ;;  %14238 = vst [vmem:[#allocation8_spill] sm:$0xff] %v13385_v5 }
0x2bf4   :  { %10561 = vmatpush3.msra.mxu0 %v12760_v9 }
0x2bf5   :  { %10562 = vmatprep.subr.mxu0 %v14184_v11 }
0x2bf6   :  { %10563 = vmatpush3.msra.mxu0 %v12767_v17 }
0x2bf7   :  { %10564 = vmatprep.subr.mxu0 %v14184_v11 }
0x2bf8   :  { %10565 = vmatpush3.msra.mxu0 %v12774_v28 }
0x2bf9   :  { %10566 = vmatprep.subr.mxu0 %v14184_v11 }
0x2bfa   :  { %10567 = vmatpush3.msra.mxu0 %v12781_v10  ;;  %v13394_v10 = vld [vmem:[%s14028_s11 + $0x7] ss:$0 sm:$0xff] }
0x2bfb   :  { %10568 = vmatprep.subr.mxu0 %v14184_v11  ;;  %14239 = vst [vmem:[#allocation9_spill] sm:$0xff] %v13394_v10 }
0x2bfc   :  { %10569 = vmatpush3.msra.mxu0 %v12788_v19 }
0x2bfd   :  { %10592 = vmatprep.subr.mxu0 %v14184_v11 }
0x2c8d   :  { %v5809_v2 = vpop.f32.mrf.mxu0 }
0x2c8e   :  { %v13380_v4 = vadd.f32 %v5809_v2, %v13193_v30 }
0x2c8f   :  { %v10460_v47 = vpop.f32.mrf.mxu0 }
0x2c90   :  { %v4277_v47 = vsel %vm183_vm1, %v12643_v16, 0.0 }
0x2c9d   :  { %v5897_v9 = vpop.f32.mrf.mxu0 }
0x2c9e   :  { %v5898_v17 = vadd.f32 %v13385_v5, %v5897_v9 }
0x2c9f   :  { %v10479_v28 = vpop.f32.mrf.mxu0 }
0x2ca0   :  { %10521 = vmatmul.mubr.msk.f32.vlgmr.msra.gmra.mxu1 %vm95_vm0, %v5898_v17 }
0x2ca1   :  { %10525 = vmatprep.mubr.msk.f32.mxu1 %vm11098_vm2, %v14184_v11 }
0x2cad   :  { %v6071_v19 = vpop.f32.mrf.mxu0 }
0x2cae   :  { %v6072_v30 = vadd.f32 %v13394_v10, %v6071_v19 }
0x2caf   :  { %v10517_v51 = vpop.f32.mrf.mxu0 }
0x2cb0   :  { %10524 = vmatpush3.msra.mxu1 %v6072_v30 }
0x2cb1   :  { %10528 = vmatprep.subr.mxu1 %v14184_v11 }
0x2d60   :  { %v6147_v55 = vpop.f32.mrf.mxu1 }
0x2d61   :  { %v6151_v26 = vmul.f32 0.25, %v6147_v55 }
0x2d62   :  { %v10522_v37 = vpop.f32.mrf.mxu1 }
0x2d63   :  { %v6152_v2 = vsel %vm562_vm3, %v6151_v26, -inf }
0x2d64   :  { %6153 = vmax.xlane.f32.xlu0 %v6152_v2 }
0x2d68   :  { %4278 = vadd.xlane.f32.xlu0 %v4277_v47 }
0x2ded   :  { %v6154_v9 = vpop.xlane.xlu0 %6153 }
0x2dee   :  { %v6155_v17 = vsub.f32 %v6151_v26, %v6154_v9 }
0x2df0   :  { %v6156_v28 = vmul.f32 1.442695, %v6155_v17 }
0x2df1   :  { %v4279_v22 = vpop.xlane.xlu0 %4278 }
0x2df2   :  { %10967 = vpow2.f32 %v6156_v28  ;;  %v4281_v19 = vmul.f32 0.015625, %v4279_v22  ;;  %v13407_v22 = vld [vmem:[%s14029_s12 + $0x78] sm:$0xff] }
0x2df4   :  { %v4283_v30 = vsub.f32 %v12643_v16, %v4281_v19 }
0x2df6   :  { %v4285_v55 = vmul.f32 %v4283_v30, %v4283_v30 }
0x2df8   :  { %v4289_v37 = vsel %vm183_vm1, %v4285_v55, 0.0  ;;  %v11019_v55 = vld [vmem:[%s14127_s28 + $0x120] sm:$0xff] }
0x2dff   :  { %v10968_v51 = vpop.eup %10967 }
0x2e00   :  { %v6158_v10 = vsel %vm562_vm3, %v10968_v51, 0.0 }
0x2e01   :  { %6159 = vadd.xlane.f32.xlu1 %v6158_v10  ;;  %v13413_v10 = vld [vmem:[%s14029_s12 + $0x70] sm:$0xff] }
0x2e05   :  { %4290 = vadd.xlane.f32.xlu1 %v4289_v37  ;;  %v11020_v37 = vld [vmem:[%s14127_s28 + $0x118] sm:$0xff] }
0x2e8a   :  { %v6160_v2 = vpop.xlane.xlu1 %6159 }
0x2e8b   :  { %10969 = vrcp.f32 %v6160_v2  ;;  %v11021_v2 = vld [vmem:[%s14127_s28 + $0x110] sm:$0xff] }
0x2e8e   :  { %v4291_v5 = vpop.xlane.xlu1 %4290 }
0x2e8f   :  { %v4293_v47 = vmul.f32 0.015625, %v4291_v5 }
0x2e91   :  { %v4295_v49 = vadd.f32 1e-06, %v4293_v47 }
0x2e93   :  { %10971 = vrsqrt.f32 %v4295_v49 }
0x2e98   :  { %v10970_v26 = vpop.eup %10969 }
0x2e99   :  { %v6162_v9 = vmul.f32 %v10970_v26, %v10968_v51  ;;  %v11016_v51 = vld [vmem:[%s14127_s28 + $0x138] sm:$0xff] }
0x2e9b   :  { %10526 = vmatmul.mubr.msk.f32.vlgmr.msra.gmra.mxu1 %vm562_vm3, %v6162_v9  ;;  %v11022_v9 = vld [vmem:[%s14127_s28 + $0x108] sm:$0xff] }
0x2e9c   :  { %10529 = vmatpush3.msra.mxu1 %v13407_v22  ;;  %10532 = vmatprep.mubr.msk.f32.mxu1 %vm11098_vm2, %v14184_v11 }
0x2e9d   :  { %10530 = vmatprep.subr.mxu1 %v14184_v11 }
0x2e9e   :  { %10531 = vmatpush3.msra.mxu1 %v13413_v10 }
0x2e9f   :  { %10535 = vmatprep.subr.mxu1 %v14184_v11 }
0x2ea0   :  { %v10972_v49 = vpop.eup %10971 }
0x2ea1   :  { %v4299_v5 = vmul.f32 %v10972_v49, %v4283_v30 }
0x2ea3   :  { %v4307_v17 = vmul.f32 %v12719_v60, %v4299_v5  ;;  %v11017_v60 = vld [vmem:[%s14127_s28 + $0x130] sm:$0xff]  ;;  %v11023_v5 = vld [vmem:[%s14127_s28 + $0x100] sm:$0xff] }
0x2ea5   :  { %v13423_v28 = vadd.f32 %v12724_v0, %v4307_v17  ;;  %v11018_v0 = vld [vmem:[%s14127_s28 + $0x128] sm:$0xff]  ;;  %v11025_v17 = vld [vmem:[%s14131_s0 + $0x130] sm:$0xff] }
0x2ea7   :  { %10571 = vmatmul.mubr.msk.f32.vlgmr.msra.gmra.mxu0 %vm183_vm1, %v13423_v28 }
0x2ea8   :  { %10594 = vmatprep.mubr.msk.f32.mxu0 %vm11098_vm2, %v14184_v11 }
0x2f5b   :  { %v6232_v19 = vpop.f32.mrf.mxu1 }
0x2f5c   :  { %10533 = vmatmul.mubr.msk.f32.vlgmr.msra.gmra.mxu1 %vm95_vm0, %v6232_v19  ;;  %v11026_v19 = vld [vmem:[%s14131_s0 + $0x128] sm:$0xff] }
0x2f5d   :  { %10536 = vmatpush3.msra.mxu1 %v11016_v51  ;;  %v10527_v30 = vpop.f32.mrf.mxu1  ;;  %10551 = vmatprep.mubr.msk.f32.mxu1 %vm11098_vm2, %v14184_v11  ;;  %v11027_v51 = vld [vmem:[%s14131_s0 + $0x120] sm:$0xff] }
0x2f5e   :  { %10537 = vmatprep.subr.mxu1 %v14184_v11  ;;  %v11028_v30 = vld [vmem:[%s14131_s0 + $0x118] sm:$0xff] }
0x2f5f   :  { %10538 = vmatpush3.msra.mxu1 %v11017_v60  ;;  %v11029_v60 = vld [vmem:[%s14131_s0 + $0x110] sm:$0xff] }
0x2f60   :  { %10539 = vmatprep.subr.mxu1 %v14184_v11 }
0x2f61   :  { %10540 = vmatpush3.msra.mxu1 %v11018_v0  ;;  %v11030_v0 = vld [vmem:[%s14131_s0 + $0x108] sm:$0xff] }
0x2f62   :  { %10541 = vmatprep.subr.mxu1 %v14184_v11 }
0x2f63   :  { %10542 = vmatpush3.msra.mxu1 %v11019_v55  ;;  %v11031_v55 = vld [vmem:[%s14131_s0 + $0x100] sm:$0xff] }
0x2f64   :  { %10543 = vmatprep.subr.mxu1 %v14184_v11 }
0x2f65   :  { %10544 = vmatpush3.msra.mxu1 %v11020_v37  ;;  %v11033_v37 = vld [vmem:[%s14028_s11 + $0x4] ss:$0 sm:$0xff] }
0x2f66   :  { %10545 = vmatprep.subr.mxu1 %v14184_v11 }
0x2f67   :  { %10546 = vmatpush3.msra.mxu1 %v11021_v2  ;;  %v6452_v47 = vpop.f32.mrf.mxu0 }
0x2f68   :  { %10547 = vmatprep.subr.mxu1 %v14184_v11  ;;  %v6453_v26 = vadd.f32 %v12805_v50, %v6452_v47  ;;  %v11024_v50 = vld [vmem:[%s14131_s0 + $0x138] sm:$0xff] }
0x2f69   :  { %10548 = vmatpush3.msra.mxu1 %v11022_v9  ;;  %v10572_v49 = vpop.f32.mrf.mxu0 }
0x2f6a   :  { %10549 = vmatprep.subr.mxu1 %v14184_v11  ;;  %10593 = vmatpush3.xpose.msk.msra.mxu0 %vm95_vm0, %v6453_v26 }
0x2f6b   :  { %10550 = vmatpush3.msra.mxu1 %v11023_v5  ;;  %10597 = vmatprep.subr.mxu0 %v14184_v11 }
0x2f6c   :  { %10552 = vmatmul.mubr.msk.f32.vlgmr.msra.gmra.mxu1 %vm183_vm1, %v13423_v28  ;;  %10573 = vmatprep.subr.mxu1 %v14184_v11 }
0x2f6d   :  { %10574 = vmatpush3.msra.mxu1 %v11024_v50  ;;  %10589 = vmatprep.mubr.msk.f32.mxu1 %vm11098_vm2, %v14184_v11 }
0x2f6e   :  { %10575 = vmatprep.subr.mxu1 %v14184_v11 }
0x2f6f   :  { %10576 = vmatpush3.msra.mxu1 %v11025_v17 }
0x2f70   :  { %10577 = vmatprep.subr.mxu1 %v14184_v11 }
0x2f71   :  { %10578 = vmatpush3.msra.mxu1 %v11026_v19 }
0x2f72   :  { %10579 = vmatprep.subr.mxu1 %v14184_v11 }
0x2f73   :  { %10580 = vmatpush3.msra.mxu1 %v11027_v51 }
0x2f74   :  { %10581 = vmatprep.subr.mxu1 %v14184_v11 }
0x2f75   :  { %10582 = vmatpush3.msra.mxu1 %v11028_v30 }
0x2f76   :  { %10583 = vmatprep.subr.mxu1 %v14184_v11 }
0x2f77   :  { %10584 = vmatpush3.msra.mxu1 %v11029_v60 }
0x2f78   :  { %10585 = vmatprep.subr.mxu1 %v14184_v11 }
0x2f79   :  { %10586 = vmatpush3.msra.mxu1 %v11030_v0 }
0x2f7a   :  { %10587 = vmatprep.subr.mxu1 %v14184_v11 }
0x2f7b   :  { %10588 = vmatpush3.msra.mxu1 %v11031_v55 }
0x2f7c   :  { %10590 = vmatmul.mubr.msk.f32.vlgmr.msra.gmra.mxu1 %vm183_vm1, %v13423_v28  ;;  %10621 = vmatprep.subr.mxu1 %v14184_v11 }
0x2f7d   :  { %10622 = vmatpush3.msra.mxu1 %v13010_v38  ;;  %10637 = vmatprep.mubr.msk.f32.mxu1 %vm11098_vm2, %v14184_v11 }
0x2f7e   :  { %10623 = vmatprep.subr.mxu1 %v14184_v11 }
0x2f7f   :  { %10624 = vmatpush3.msra.mxu1 %v13016_v62 }
0x2f80   :  { %10625 = vmatprep.subr.mxu1 %v14184_v11 }
0x2f81   :  { %10626 = vmatpush3.msra.mxu1 %v13025_v61 }
0x2f82   :  { %10627 = vmatprep.subr.mxu1 %v14184_v11 }
0x2f83   :  { %10628 = vmatpush3.msra.mxu1 %v13032_v3 }
0x2f84   :  { %10629 = vmatprep.subr.mxu1 %v14184_v11 }
0x2f85   :  { %10630 = vmatpush3.msra.mxu1 %v13039_v40  ;;  %v11032_v40 = vld [vmem:[%s14133_s4 + $0x4] ss:$0 sm:$0xff] }
0x2f86   :  { %10631 = vmatprep.subr.mxu1 %v14184_v11 }
0x2f87   :  { %10632 = vmatpush3.msra.mxu1 %v13046_v21 }
0x2f88   :  { %10633 = vmatprep.subr.mxu1 %v14184_v11 }
0x2f89   :  { %10634 = vmatpush3.msra.mxu1 %v13053_v27 }
0x2f8a   :  { %10635 = vmatprep.subr.mxu1 %v14184_v11 }
0x2f8b   :  { %10636 = vmatpush3.msra.mxu1 %v13060_v8 }
0x2f8c   :  { %10638 = vmatmul.mubr.msk.f32.vlgmr.msra.gmra.mxu1 %vm183_vm1, %v13423_v28  ;;  %10659 = vmatprep.subr.mxu1 %v14184_v11 }
0x2f8d   :  { %10661 = vmatprep.mubr.msk.f32.mxu1 %vm11098_vm2, %v14184_v11 }
0x301c   :  { %v6308_v38 = vpop.f32.mrf.mxu1 }
0x301d   :  { %v13528_v62 = vadd.f32 %v6308_v38, %v13380_v4 }
0x301e   :  { %v10534_v61 = vpop.f32.mrf.mxu1 }
0x301f   :  { %v11034_v61 = vld [vmem:[%s14127_s28 + $0x178] sm:$0xff] }
0x302c   :  { %v6382_v3 = vpop.f32.mrf.mxu1 }
0x302d   :  { %v6383_v21 = vadd.f32 %v11032_v40, %v6382_v3  ;;  %v11035_v3 = vld [vmem:[%s14127_s28 + $0x170] sm:$0xff]  ;;  %v11036_v40 = vld [vmem:[%s14127_s28 + $0x168] sm:$0xff] }
0x302e   :  { %v10553_v27 = vpop.f32.mrf.mxu1 }
0x302f   :  { %10595 = vmatmul.mubr.msk.f32.vlgmr.msra.gmra.mxu0 %vm95_vm0, %v6383_v21  ;;  %v11037_v21 = vld [vmem:[%s14127_s28 + $0x160] sm:$0xff]  ;;  %v11038_v27 = vld [vmem:[%s14127_s28 + $0x158] sm:$0xff] }
0x3030   :  { %10599 = vmatprep.mubr.msk.f32.mxu0 %vm11098_vm2, %v14184_v11 }
0x303c   :  { %v6522_v8 = vpop.f32.mrf.mxu1 }
0x303d   :  { %v6523_v4 = vadd.f32 %v11033_v37, %v6522_v8  ;;  %v11039_v8 = vld [vmem:[%s14127_s28 + $0x150] sm:$0xff]  ;;  %v11040_v37 = vld [vmem:[%s14127_s28 + $0x148] sm:$0xff] }
0x303e   :  { %v10591_v2 = vpop.f32.mrf.mxu1 }
0x303f   :  { %10598 = vmatpush3.msra.mxu0 %v6523_v4  ;;  %v11041_v4 = vld [vmem:[%s14127_s28 + $0x140] sm:$0xff]  ;;  %v11042_v2 = vld [vmem:[%s14131_s0 + $0x178] sm:$0xff] }
0x3040   :  { %10602 = vmatprep.subr.mxu0 %v14184_v11 }
0x304c   :  { %v6823_v47 = vpop.f32.mrf.mxu1 }
0x304d   :  { %v6824_v26 = vadd.f32 %v13073_v34, %v6823_v47  ;;  %v11043_v47 = vld [vmem:[%s14131_s0 + $0x170] sm:$0xff] }
0x304e   :  { %v10639_v9 = vpop.f32.mrf.mxu1 }
0x304f   :  { %10660 = vmatpush3.xpose.msk.msra.mxu1 %vm95_vm0, %v6824_v26  ;;  %v11044_v26 = vld [vmem:[%s14131_s0 + $0x168] sm:$0xff]  ;;  %v11045_v9 = vld [vmem:[%s14131_s0 + $0x160] sm:$0xff] }
0x3050   :  { %10664 = vmatprep.subr.mxu1 %v14184_v11 }
0x30ef   :  { %v6598_v49 = vpop.f32.mrf.mxu0 }
0x30f0   :  { %v6602_v5 = vmul.f32 0.25, %v6598_v49  ;;  %v11046_v49 = vld [vmem:[%s14131_s0 + $0x158] sm:$0xff] }
0x30f1   :  { %v10596_v50 = vpop.f32.mrf.mxu0 }
0x30f2   :  { %v6603_v17 = vsel %vm562_vm3, %v6602_v5, -inf  ;;  %v11048_v50 = vld [vmem:[%s14131_s0 + $0x148] sm:$0xff] }
0x30f3   :  { %6604 = vmax.xlane.f32.xlu0 %v6603_v17  ;;  %v11049_v17 = vld [vmem:[%s14131_s0 + $0x140] sm:$0xff] }
0x317c   :  { %v6605_v19 = vpop.xlane.xlu0 %6604 }
0x317d   :  { %v6606_v51 = vsub.f32 %v6602_v5, %v6605_v19  ;;  %v11047_v5 = vld [vmem:[%s14131_s0 + $0x150] sm:$0xff] }
0x317f   :  { %v6607_v30 = vmul.f32 1.442695, %v6606_v51 }
0x3181   :  { %10973 = vpow2.f32 %v6607_v30 }
0x318e   :  { %v10974_v60 = vpop.eup %10973 }
0x318f   :  { %v6609_v0 = vsel %vm562_vm3, %v10974_v60, 0.0 }
0x3190   :  { %6610 = vadd.xlane.f32.xlu1 %v6609_v0 }
0x3219   :  { %v6611_v34 = vpop.xlane.xlu1 %6610 }
0x321a   :  { %10975 = vrcp.f32 %v6611_v34 }
0x3227   :  { %v10976_v55 = vpop.eup %10975 }
0x3228   :  { %v6613_v38 = vmul.f32 %v10976_v55, %v10974_v60 }
0x322a   :  { %10600 = vmatmul.mubr.msk.f32.vlgmr.msra.gmra.mxu0 %vm562_vm3, %v6613_v38 }
0x322b   :  { %10603 = vmatpush3.msra.mxu0 %v11034_v61  ;;  %10618 = vmatprep.mubr.msk.f32.mxu0 %vm11098_vm2, %v14184_v11 }
0x322c   :  { %10604 = vmatprep.subr.mxu0 %v14184_v11 }
0x322d   :  { %10605 = vmatpush3.msra.mxu0 %v11035_v3 }
0x322e   :  { %10606 = vmatprep.subr.mxu0 %v14184_v11 }
0x322f   :  { %10607 = vmatpush3.msra.mxu0 %v11036_v40 }
0x3230   :  { %10608 = vmatprep.subr.mxu0 %v14184_v11 }
0x3231   :  { %10609 = vmatpush3.msra.mxu0 %v11037_v21 }
0x3232   :  { %10610 = vmatprep.subr.mxu0 %v14184_v11 }
0x3233   :  { %10611 = vmatpush3.msra.mxu0 %v11038_v27 }
0x3234   :  { %10612 = vmatprep.subr.mxu0 %v14184_v11 }
0x3235   :  { %10613 = vmatpush3.msra.mxu0 %v11039_v8  ;;  %v11050_v8 = vld [vmem:[%s14127_s28 + $0x1b8] sm:$0xff] }
0x3236   :  { %10614 = vmatprep.subr.mxu0 %v14184_v11 }
0x3237   :  { %10615 = vmatpush3.msra.mxu0 %v11040_v37 }
0x3238   :  { %10616 = vmatprep.subr.mxu0 %v14184_v11 }
0x3239   :  { %10617 = vmatpush3.msra.mxu0 %v11041_v4  ;;  %v11053_v4 = vld [vmem:[%s14127_s28 + $0x1a0] sm:$0xff] }
0x323a   :  { %10619 = vmatmul.mubr.msk.f32.vlgmr.msra.gmra.mxu0 %vm183_vm1, %v13423_v28  ;;  %10640 = vmatprep.subr.mxu0 %v14184_v11 }
0x323b   :  { %10641 = vmatpush3.msra.mxu0 %v11042_v2  ;;  %10656 = vmatprep.mubr.msk.f32.mxu0 %vm11098_vm2, %v14184_v11  ;;  %v11054_v2 = vld [vmem:[%s14127_s28 + $0x198] sm:$0xff] }
0x323c   :  { %10642 = vmatprep.subr.mxu0 %v14184_v11 }
0x323d   :  { %10643 = vmatpush3.msra.mxu0 %v11043_v47  ;;  %v11055_v47 = vld [vmem:[%s14127_s28 + $0x190] sm:$0xff] }
0x323e   :  { %10644 = vmatprep.subr.mxu0 %v14184_v11 }
0x323f   :  { %10645 = vmatpush3.msra.mxu0 %v11044_v26  ;;  %v11056_v26 = vld [vmem:[%s14127_s28 + $0x188] sm:$0xff] }
0x3240   :  { %10646 = vmatprep.subr.mxu0 %v14184_v11 }
0x3241   :  { %10647 = vmatpush3.msra.mxu0 %v11045_v9  ;;  %v11057_v9 = vld [vmem:[%s14127_s28 + $0x180] sm:$0xff] }
0x3242   :  { %10648 = vmatprep.subr.mxu0 %v14184_v11 }
0x3243   :  { %10649 = vmatpush3.msra.mxu0 %v11046_v49  ;;  %v11058_v49 = vld [vmem:[%s14131_s0 + $0x1b8] sm:$0xff] }
0x3244   :  { %10650 = vmatprep.subr.mxu0 %v14184_v11 }
0x3245   :  { %10651 = vmatpush3.msra.mxu0 %v11047_v5  ;;  %v11059_v5 = vld [vmem:[%s14131_s0 + $0x1b0] sm:$0xff] }
0x3246   :  { %10652 = vmatprep.subr.mxu0 %v14184_v11 }
0x3247   :  { %10653 = vmatpush3.msra.mxu0 %v11048_v50  ;;  %v11060_v50 = vld [vmem:[%s14131_s0 + $0x1a8] sm:$0xff] }
0x3248   :  { %10654 = vmatprep.subr.mxu0 %v14184_v11 }
0x3249   :  { %10655 = vmatpush3.msra.mxu0 %v11049_v17  ;;  %v11061_v17 = vld [vmem:[%s14131_s0 + $0x1a0] sm:$0xff] }
0x324a   :  { %10657 = vmatmul.mubr.msk.f32.vlgmr.msra.gmra.mxu0 %vm183_vm1, %v13423_v28  ;;  %10676 = vmatprep.subr.mxu0 %v14184_v11 }
0x324b   :  { %10677 = vmatpush3.msra.mxu0 %v13116_v24  ;;  %10680 = vmatprep.mubr.msk.f32.mxu0 %vm11098_vm2, %v14184_v11 }
0x324c   :  { %10678 = vmatprep.subr.mxu0 %v14184_v11 }
0x324d   :  { %10679 = vmatpush3.msra.mxu0 %v13122_v56 }
0x324e   :  { %10702 = vmatprep.subr.mxu0 %v14184_v11 }
0x32ea   :  { %v6683_v19 = vpop.f32.mrf.mxu0 }
0x32eb   :  { %10681 = vmatmul.mubr.msk.f32.vlgmr.msra.gmra.mxu0 %vm95_vm0, %v6683_v19  ;;  %v11062_v19 = vld [vmem:[%s14131_s0 + $0x198] sm:$0xff] }
0x32ec   :  { %10703 = vmatpush3.msra.mxu0 %v13131_v18  ;;  %v10601_v51 = vpop.f32.mrf.mxu0  ;;  %10718 = vmatprep.mubr.msk.f32.mxu0 %vm11098_vm2, %v14184_v11 }
0x32ed   :  { %10704 = vmatprep.subr.mxu0 %v14184_v11  ;;  %v11063_v51 = vld [vmem:[%s14131_s0 + $0x190] sm:$0xff] }
0x32ee   :  { %10705 = vmatpush3.msra.mxu0 %v13139_v58 }
0x32ef   :  { %10706 = vmatprep.subr.mxu0 %v14184_v11 }
0x32f0   :  { %10707 = vmatpush3.msra.mxu0 %v13148_v23 }
0x32f1   :  { %10708 = vmatprep.subr.mxu0 %v14184_v11 }
0x32f2   :  { %10709 = vmatpush3.msra.mxu0 %v13155_v20 }
0x32f3   :  { %10710 = vmatprep.subr.mxu0 %v14184_v11 }
0x32f4   :  { %10711 = vmatpush3.msra.mxu0 %v13162_v14 }
0x32f5   :  { %10712 = vmatprep.subr.mxu0 %v14184_v11 }
0x32f6   :  { %10713 = vmatpush3.msra.mxu0 %v13169_v12 }
0x32f7   :  { %10714 = vmatprep.subr.mxu0 %v14184_v11 }
0x32f8   :  { %10715 = vmatpush3.msra.mxu0 %v13176_v15 }
0x32f9   :  { %10716 = vmatprep.subr.mxu0 %v14184_v11 }
0x32fa   :  { %v6753_v24 = vpop.f32.mrf.mxu0  ;;  %10717 = vmatpush3.msra.mxu0 %v13183_v42 }
0x32fb   :  { %v6754_v56 = vadd.f32 %v13078_v36, %v6753_v24  ;;  %10719 = vmatmul.mubr.msk.f32.vlgmr.msra.gmra.mxu0 %vm183_vm1, %v13423_v28  ;;  %10740 = vmatprep.subr.mxu0 %v14184_v11  ;;  %v11064_v24 = vld [vmem:[%s14131_s0 + $0x188] sm:$0xff] }
0x32fc   :  { %v10620_v18 = vpop.f32.mrf.mxu0  ;;  %10742 = vmatprep.mubr.msk.f32.mxu0 %vm11098_vm2, %v14184_v11 }
0x32fd   :  { %10662 = vmatmul.mubr.msk.f32.vlgmr.msra.gmra.mxu1 %vm95_vm0, %v6754_v56  ;;  %v11065_v56 = vld [vmem:[%s14131_s0 + $0x180] sm:$0xff]  ;;  %v11066_v18 = vld [vmem:[%s14128_s29 + $0x1f8] sm:$0xff] }
0x32fe   :  { %10666 = vmatprep.mubr.msk.f32.mxu1 %vm11098_vm2, %v14184_v11 }
0x330a   :  { %v6893_v58 = vpop.f32.mrf.mxu0 }
0x330b   :  { %v6894_v23 = vadd.f32 %v13084_v39, %v6893_v58  ;;  %v11067_v58 = vld [vmem:[%s14128_s29 + $0x1f0] sm:$0xff] }
0x330c   :  { %v10658_v20 = vpop.f32.mrf.mxu0 }
0x330d   :  { %10665 = vmatpush3.msra.mxu1 %v6894_v23  ;;  %v11068_v23 = vld [vmem:[%s14128_s29 + $0x1e8] sm:$0xff]  ;;  %v11069_v20 = vld [vmem:[%s14128_s29 + $0x1e0] sm:$0xff] }
0x330e   :  { %10669 = vmatprep.subr.mxu1 %v14184_v11 }
0x33ab   :  { %v13653_v36 = vpop.f32.mrf.mxu0 }
0x33ad   :  { %v10682_v14 = vpop.f32.mrf.mxu0 }
0x33ae   :  { %v11070_v14 = vld [vmem:[%s14128_s29 + $0x1d8] sm:$0xff] }
0x33bb   :  { %v7340_v12 = vpop.f32.mrf.mxu0 }
0x33bc   :  { %v7341_v15 = vadd.f32 %v13198_v35, %v7340_v12  ;;  %v11071_v12 = vld [vmem:[%s14128_s29 + $0x1d0] sm:$0xff] }
0x33bd   :  { %v6969_v42 = vpop.f32.mrf.mxu1  ;;  %v10720_v30 = vpop.f32.mrf.mxu0 }
0x33be   :  { %v6973_v60 = vmul.f32 0.25, %v6969_v42  ;;  %10741 = vmatpush3.xpose.msk.msra.mxu0 %vm95_vm0, %v7341_v15  ;;  %v11072_v15 = vld [vmem:[%s14128_s29 + $0x1c8] sm:$0xff]  ;;  %v11073_v42 = vld [vmem:[%s14128_s29 + $0x1c0] sm:$0xff] }
0x33bf   :  { %v10663_v0 = vpop.f32.mrf.mxu1  ;;  %10745 = vmatprep.subr.mxu0 %v14184_v11 }
0x33c0   :  { %v6974_v39 = vsel %vm562_vm3, %v6973_v60, -inf }
0x33c1   :  { %6975 = vmax.xlane.f32.xlu0 %v6974_v39 }
0x344a   :  { %v6976_v34 = vpop.xlane.xlu0 %6975 }
0x344b   :  { %v6977_v55 = vsub.f32 %v6973_v60, %v6976_v34 }
0x344d   :  { %v6978_v38 = vmul.f32 1.442695, %v6977_v55 }
0x344f   :  { %10977 = vpow2.f32 %v6978_v38 }
0x345c   :  { %v10978_v61 = vpop.eup %10977 }
0x345d   :  { %v6980_v3 = vsel %vm562_vm3, %v10978_v61, 0.0 }
0x345e   :  { %6981 = vadd.xlane.f32.xlu1 %v6980_v3 }
0x34e7   :  { %v6982_v35 = vpop.xlane.xlu1 %6981 }
0x34e8   :  { %10979 = vrcp.f32 %v6982_v35  ;;  %v11074_v35 = vld [vmem:[%s14132_s1 + $0x7] ss:$0 sm:$0xff] }
0x34f5   :  { %v10980_v40 = vpop.eup %10979 }
0x34f6   :  { %v6984_v21 = vmul.f32 %v10980_v40, %v10978_v61 }
0x34f8   :  { %10667 = vmatmul.mubr.msk.f32.vlgmr.msra.gmra.mxu1 %vm562_vm3, %v6984_v21 }
0x34f9   :  { %10670 = vmatpush3.msra.mxu1 %v13099_v52  ;;  %10673 = vmatprep.mubr.msk.f32.mxu1 %vm11098_vm2, %v14184_v11  ;;  %v11051_v52 = vld [vmem:[%s14127_s28 + $0x1b0] sm:$0xff] }
0x34fa   :  { %10671 = vmatprep.subr.mxu1 %v14184_v11 }
0x34fb   :  { %10672 = vmatpush3.msra.mxu1 %v13105_v53  ;;  %v11052_v53 = vld [vmem:[%s14127_s28 + $0x1a8] sm:$0xff] }
0x34fc   :  { %10683 = vmatprep.subr.mxu1 %v14184_v11 }
0x35b8   :  { %v7054_v27 = vpop.f32.mrf.mxu1 }
0x35b9   :  { %10674 = vmatmul.mubr.msk.f32.vlgmr.msra.gmra.mxu1 %vm95_vm0, %v7054_v27 }
0x35ba   :  { %10684 = vmatpush3.msra.mxu1 %v11050_v8  ;;  %v10668_v37 = vpop.f32.mrf.mxu1  ;;  %10699 = vmatprep.mubr.msk.f32.mxu1 %vm11098_vm2, %v14184_v11 }
0x35bb   :  { %10685 = vmatprep.subr.mxu1 %v14184_v11 }
0x35bc   :  { %10686 = vmatpush3.msra.mxu1 %v11051_v52 }
0x35bd   :  { %10687 = vmatprep.subr.mxu1 %v14184_v11 }
0x35be   :  { %10688 = vmatpush3.msra.mxu1 %v11052_v53 }
0x35bf   :  { %10689 = vmatprep.subr.mxu1 %v14184_v11 }
0x35c0   :  { %10690 = vmatpush3.msra.mxu1 %v11053_v4 }
0x35c1   :  { %10691 = vmatprep.subr.mxu1 %v14184_v11 }
0x35c2   :  { %10692 = vmatpush3.msra.mxu1 %v11054_v2 }
0x35c3   :  { %10693 = vmatprep.subr.mxu1 %v14184_v11 }
0x35c4   :  { %10694 = vmatpush3.msra.mxu1 %v11055_v47 }
0x35c5   :  { %10695 = vmatprep.subr.mxu1 %v14184_v11 }
0x35c6   :  { %10696 = vmatpush3.msra.mxu1 %v11056_v26 }
0x35c7   :  { %10697 = vmatprep.subr.mxu1 %v14184_v11 }
0x35c8   :  { %10698 = vmatpush3.msra.mxu1 %v11057_v9 }
0x35c9   :  { %10700 = vmatmul.mubr.msk.f32.vlgmr.msra.gmra.mxu1 %vm183_vm1, %v13423_v28  ;;  %10721 = vmatprep.subr.mxu1 %v14184_v11 }
0x35ca   :  { %10722 = vmatpush3.msra.mxu1 %v11058_v49  ;;  %10737 = vmatprep.mubr.msk.f32.mxu1 %vm11098_vm2, %v14184_v11 }
0x35cb   :  { %10723 = vmatprep.subr.mxu1 %v14184_v11 }
0x35cc   :  { %10724 = vmatpush3.msra.mxu1 %v11059_v5 }
0x35cd   :  { %10725 = vmatprep.subr.mxu1 %v14184_v11 }
0x35ce   :  { %10726 = vmatpush3.msra.mxu1 %v11060_v50 }
0x35cf   :  { %10727 = vmatprep.subr.mxu1 %v14184_v11 }
0x35d0   :  { %10728 = vmatpush3.msra.mxu1 %v11061_v17 }
0x35d1   :  { %10729 = vmatprep.subr.mxu1 %v14184_v11 }
0x35d2   :  { %10730 = vmatpush3.msra.mxu1 %v11062_v19 }
0x35d3   :  { %10731 = vmatprep.subr.mxu1 %v14184_v11 }
0x35d4   :  { %10732 = vmatpush3.msra.mxu1 %v11063_v51 }
0x35d5   :  { %10733 = vmatprep.subr.mxu1 %v14184_v11 }
0x35d6   :  { %10734 = vmatpush3.msra.mxu1 %v11064_v24 }
0x35d7   :  { %10735 = vmatprep.subr.mxu1 %v14184_v11 }
0x35d8   :  { %10736 = vmatpush3.msra.mxu1 %v11065_v56 }
0x35d9   :  { %10738 = vmatmul.mubr.msk.f32.vlgmr.msra.gmra.mxu1 %vm183_vm1, %v13423_v28  ;;  %10776 = vmatprep.subr.mxu1 %v14184_v11 }
0x35da   :  { %10777 = vmatpush3.msra.mxu1 %v11066_v18  ;;  %10792 = vmatprep.mubr.msk.f32.mxu1 %vm11098_vm2, %v14184_v11 }
0x35db   :  { %10778 = vmatprep.subr.mxu1 %v14184_v11 }
0x35dc   :  { %10779 = vmatpush3.msra.mxu1 %v11067_v58 }
0x35dd   :  { %10780 = vmatprep.subr.mxu1 %v14184_v11 }
0x35de   :  { %10781 = vmatpush3.msra.mxu1 %v11068_v23 }
0x35df   :  { %10782 = vmatprep.subr.mxu1 %v14184_v11 }
0x35e0   :  { %10783 = vmatpush3.msra.mxu1 %v11069_v20 }
0x35e1   :  { %10784 = vmatprep.subr.mxu1 %v14184_v11 }
0x35e2   :  { %10785 = vmatpush3.msra.mxu1 %v11070_v14 }
0x35e3   :  { %10786 = vmatprep.subr.mxu1 %v14184_v11 }
0x35e4   :  { %10787 = vmatpush3.msra.mxu1 %v11071_v12 }
0x35e5   :  { %10788 = vmatprep.subr.mxu1 %v14184_v11 }
0x35e6   :  { %10789 = vmatpush3.msra.mxu1 %v11072_v15 }
0x35e7   :  { %10790 = vmatprep.subr.mxu1 %v14184_v11 }
0x35e8   :  { %10791 = vmatpush3.msra.mxu1 %v11073_v42 }
0x35e9   :  { %10793 = vmatmul.mubr.msk.f32.vlgmr.msra.gmra.mxu1 %vm183_vm1, %v13423_v28  ;;  %10814 = vmatprep.subr.mxu1 %v14184_v11 }
0x35ea   :  { %10816 = vmatprep.mubr.msk.f32.mxu1 %vm11098_vm2, %v14184_v11 }
0x3679   :  { %v13778_v30 = vpop.f32.mrf.mxu1 }
0x367b   :  { %v10675_v60 = vpop.f32.mrf.mxu1 }
0x3689   :  { %v7270_v0 = vpop.f32.mrf.mxu1 }
0x368a   :  { %v7271_v39 = vadd.f32 %v13203_v41, %v7270_v0 }
0x368b   :  { %v10701_v34 = vpop.f32.mrf.mxu1 }
0x368c   :  { %10743 = vmatmul.mubr.msk.f32.vlgmr.msra.gmra.mxu0 %vm95_vm0, %v7271_v39 }
0x368d   :  { %10747 = vmatprep.mubr.msk.f32.mxu0 %vm11098_vm2, %v14184_v11 }
0x3699   :  { %v7410_v55 = vpop.f32.mrf.mxu1 }
0x369a   :  { %v7411_v38 = vadd.f32 %v13209_v7, %v7410_v55 }
0x369b   :  { %v10739_v61 = vpop.f32.mrf.mxu1 }
0x369c   :  { %10746 = vmatpush3.msra.mxu0 %v7411_v38  ;;  %v8933_v38 = vld [vmem:[%s14031_s14 + $0x1] ss:$0 sm:$0xff] }
0x369d   :  { %10750 = vmatprep.subr.mxu0 %v14184_v11 }
0x36a9   :  { %v7785_v3 = vpop.f32.mrf.mxu1 }
0x36aa   :  { %v7786_v40 = vadd.f32 %v11074_v35, %v7785_v3 }
0x36ab   :  { %v10794_v41 = vpop.f32.mrf.mxu1 }
0x36ac   :  { %10815 = vmatpush3.xpose.msk.msra.mxu1 %vm95_vm0, %v7786_v40 }
0x36ad   :  { %10819 = vmatprep.subr.mxu1 %v14184_v11 }
0x374c   :  { %v7486_v21 = vpop.f32.mrf.mxu0 }
0x374d   :  { %v7490_v27 = vmul.f32 0.25, %v7486_v21 }
0x374e   :  { %v10744_v8 = vpop.f32.mrf.mxu0 }
0x374f   :  { %v7491_v7 = vsel %vm562_vm3, %v7490_v27, -inf }
0x3750   :  { %7492 = vmax.xlane.f32.xlu0 %v7491_v7 }
0x37d9   :  { %v7493_v37 = vpop.xlane.xlu0 %7492 }
0x37da   :  { %v7494_v52 = vsub.f32 %v7490_v27, %v7493_v37 }
0x37dc   :  { %v7495_v53 = vmul.f32 1.442695, %v7494_v52 }
0x37de   :  { %10981 = vpow2.f32 %v7495_v53 }
0x37eb   :  { %v10982_v4 = vpop.eup %10981 }
0x37ec   :  { %v7497_v2 = vsel %vm562_vm3, %v10982_v4, 0.0 }
0x37ed   :  { %7498 = vadd.xlane.f32.xlu1 %v7497_v2  ;;  %v8942_v2 = vld [vmem:[%s14033_s16 + $0x78] sm:$0xff] }
0x3876   :  { %v7499_v47 = vpop.xlane.xlu1 %7498 }
0x3877   :  { %10983 = vrcp.f32 %v7499_v47  ;;  %v8940_v47 = vld [vmem:[%s14033_s16 + $0x68] sm:$0xff] }
0x3884   :  { %v10984_v26 = vpop.eup %10983 }
0x3885   :  { %v7501_v9 = vmul.f32 %v10984_v26, %v10982_v4  ;;  %v8939_v26 = vld [vmem:[%s14033_s16 + $0x60] sm:$0xff] }
0x3887   :  { %10748 = vmatmul.mubr.msk.f32.vlgmr.msra.gmra.mxu0 %vm562_vm3, %v7501_v9  ;;  %v8938_v9 = vld [vmem:[%s14033_s16 + $0x58] sm:$0xff] }
0x3888   :  { %10751 = vmatpush3.msra.mxu0 %v13226_v57  ;;  %10754 = vmatprep.mubr.msk.f32.mxu0 %vm11098_vm2, %v14184_v11  ;;  %v14240_v57 = vld [vmem:[#allocation7_spill] sm:$0xff] }
0x3889   :  { %10752 = vmatprep.subr.mxu0 %v14184_v11 }
0x388a   :  { %10753 = vmatpush3.msra.mxu0 %v13232_v32  ;;  %v7201_v32 = vadd.f32 %v13653_v36, %v13778_v30 }
0x388b   :  { %10757 = vmatprep.subr.mxu0 %v14184_v11 }
0x3947   :  { %v7571_v49 = vpop.f32.mrf.mxu0 }
0x3948   :  { %10755 = vmatmul.mubr.msk.f32.vlgmr.msra.gmra.mxu0 %vm95_vm0, %v7571_v49  ;;  %v8937_v49 = vld [vmem:[%s14033_s16 + $0x50] sm:$0xff] }
0x3949   :  { %10758 = vmatpush3.msra.mxu0 %v13243_v13  ;;  %v10749_v5 = vpop.f32.mrf.mxu0  ;;  %10773 = vmatprep.mubr.msk.f32.mxu0 %vm11098_vm2, %v14184_v11 }
0x394a   :  { %10759 = vmatprep.subr.mxu0 %v14184_v11  ;;  %v8936_v5 = vld [vmem:[%s14033_s16 + $0x48] sm:$0xff] }
0x394b   :  { %10760 = vmatpush3.msra.mxu0 %v13249_v29 }
0x394c   :  { %10761 = vmatprep.subr.mxu0 %v14184_v11 }
0x394d   :  { %10762 = vmatpush3.msra.mxu0 %v13258_v25 }
0x394e   :  { %10763 = vmatprep.subr.mxu0 %v14184_v11 }
0x394f   :  { %10764 = vmatpush3.msra.mxu0 %v13265_v43 }
0x3950   :  { %10765 = vmatprep.subr.mxu0 %v14184_v11 }
0x3951   :  { %10766 = vmatpush3.msra.mxu0 %v13272_v44  ;;  %v14241_v44 = vld [vmem:[#allocation8_spill] sm:$0xff] }
0x3952   :  { %10767 = vmatprep.subr.mxu0 %v14184_v11 }
0x3953   :  { %10768 = vmatpush3.msra.mxu0 %v13279_v45 }
0x3954   :  { %10769 = vmatprep.subr.mxu0 %v14184_v11 }
0x3955   :  { %10770 = vmatpush3.msra.mxu0 %v13286_v63 }
0x3956   :  { %10771 = vmatprep.subr.mxu0 %v14184_v11 }
0x3957   :  { %10772 = vmatpush3.msra.mxu0 %v13293_v1 }
0x3958   :  { %10774 = vmatmul.mubr.msk.f32.vlgmr.msra.gmra.mxu0 %vm183_vm1, %v13423_v28  ;;  %10795 = vmatprep.subr.mxu0 %v14184_v11 }
0x3959   :  { %10796 = vmatpush3.msra.mxu0 %v13300_v59  ;;  %10811 = vmatprep.mubr.msk.f32.mxu0 %vm11098_vm2, %v14184_v11  ;;  %v14242_v59 = vld [vmem:[#allocation9_spill] sm:$0xff] }
0x395a   :  { %10797 = vmatprep.subr.mxu0 %v14184_v11 }
0x395b   :  { %10798 = vmatpush3.msra.mxu0 %v13309_v31 }
0x395c   :  { %10799 = vmatprep.subr.mxu0 %v14184_v11 }
0x395d   :  { %10800 = vmatpush3.msra.mxu0 %v13318_v54 }
0x395e   :  { %10801 = vmatprep.subr.mxu0 %v14184_v11 }
0x395f   :  { %10802 = vmatpush3.msra.mxu0 %v13325_v6  ;;  %v14243_v6 = vld [vmem:[#allocation6_spill] sm:$0xff] }
0x3960   :  { %10803 = vmatprep.subr.mxu0 %v14184_v11 }
0x3961   :  { %10804 = vmatpush3.msra.mxu0 %v13332_v46  ;;  %v8094_v46 = vadd.f32 %v13528_v62, %v14243_v6  ;;  %v8957_v6 = vld [vmem:[%s14035_s18 + $0xd0] sm:$0xff] }
0x3962   :  { %10805 = vmatprep.subr.mxu0 %v14184_v11 }
0x3963   :  { %10806 = vmatpush3.msra.mxu0 %v13339_v48  ;;  %v8930_v48 = vld [vmem:[%s14030_s13 + $0x1] ss:$0 sm:$0xff] }
0x3964   :  { %10807 = vmatprep.subr.mxu0 %v14184_v11  ;;  %v13853_v50 = vadd.f32 %v8930_v48, %v8094_v46  ;;  %v8956_v46 = vld [vmem:[%s14035_s18 + $0xc8] sm:$0xff] }
0x3965   :  { %10808 = vmatpush3.msra.mxu0 %v13346_v33 }
0x3966   :  { %10809 = vmatprep.subr.mxu0 %v14184_v11  ;;  %v8110_v19 = vsel %vm183_vm1, %v13853_v50, 0.0 }
0x3967   :  { %10810 = vmatpush3.msra.mxu0 %v14240_v57  ;;  %v8935_v57 = vld [vmem:[%s14033_s16 + $0x40] sm:$0xff] }
0x3968   :  { %10812 = vmatmul.mubr.msk.f32.vlgmr.msra.gmra.mxu0 %vm183_vm1, %v13423_v28 }
0x3a08   :  { %v7644_v13 = vpop.f32.mrf.mxu0 }
0x3a09   :  { %v7648_v29 = vadd.f32 %v7644_v13, %v7201_v32 }
0x3a0a   :  { %v10756_v25 = vpop.f32.mrf.mxu0 }
0x3a18   :  { %v7715_v43 = vpop.f32.mrf.mxu0 }
0x3a19   :  { %v7716_v45 = vadd.f32 %v14241_v44, %v7715_v43 }
0x3a1a   :  { %v10775_v63 = vpop.f32.mrf.mxu0 }
0x3a1b   :  { %10817 = vmatmul.mubr.msk.f32.vlgmr.msra.gmra.mxu1 %vm95_vm0, %v7716_v45  ;;  %v8962_v63 = vld [vmem:[%s14035_s18 + $0xf8] sm:$0xff] }
0x3a1c   :  { %10821 = vmatprep.mubr.msk.f32.mxu1 %vm11098_vm2, %v14184_v11  ;;  %10850 = vmatprep.subr.mxu0 %v8962_v63 }
0x3a1d   :  { %10851 = vmatpush3.msra.mxu0 %v8962_v63 }
0x3a28   :  { %v7855_v1 = vpop.f32.mrf.mxu0 }
0x3a29   :  { %v7856_v31 = vadd.f32 %v14242_v59, %v7855_v1  ;;  %v8961_v1 = vld [vmem:[%s14035_s18 + $0xf0] sm:$0xff]  ;;  %v8960_v59 = vld [vmem:[%s14035_s18 + $0xe8] sm:$0xff] }
0x3a2a   :  { %v10813_v54 = vpop.f32.mrf.mxu0  ;;  %10852 = vmatprep.subr.mxu0 %v8961_v1 }
0x3a2b   :  { %10820 = vmatpush3.msra.mxu1 %v7856_v31  ;;  %10853 = vmatpush3.msra.mxu0 %v8961_v1  ;;  %v8959_v31 = vld [vmem:[%s14035_s18 + $0xe0] sm:$0xff]  ;;  %v8958_v54 = vld [vmem:[%s14035_s18 + $0xd8] sm:$0xff] }
0x3a2c   :  { %10824 = vmatprep.subr.mxu1 %v14184_v11  ;;  %10854 = vmatprep.subr.mxu0 %v8960_v59  ;;  %v8965_v1 = vld [vmem:[%s14037_s20] ss:$0 sm:$0xff] }
0x3a2d   :  { %10855 = vmatpush3.msra.mxu0 %v8960_v59 }
0x3a2e   :  { %10856 = vmatprep.subr.mxu0 %v8959_v31 }
0x3a2f   :  { %10857 = vmatpush3.msra.mxu0 %v8959_v31 }
0x3a30   :  { %10858 = vmatprep.subr.mxu0 %v8958_v54 }
0x3a31   :  { %10859 = vmatpush3.msra.mxu0 %v8958_v54  ;;  %v8966_v54 = vld [vmem:[%s14038_s21] ss:$0 sm:$0xff] }
0x3a32   :  { %10860 = vmatprep.subr.mxu0 %v8957_v6 }
0x3a33   :  { %10861 = vmatpush3.msra.mxu0 %v8957_v6 }
0x3a34   :  { %10862 = vmatprep.subr.mxu0 %v8956_v46 }
0x3a35   :  { %10863 = vmatpush3.msra.mxu0 %v8956_v46 }
0x3adb   :  { %v7931_v33 = vpop.f32.mrf.mxu1 }
0x3adc   :  { %v7935_v28 = vmul.f32 0.25, %v7931_v33  ;;  %v8954_v33 = vld [vmem:[%s14035_s18 + $0xb8] sm:$0xff] }
0x3add   :  { %v10818_v36 = vpop.f32.mrf.mxu1 }
0x3ade   :  { %v7936_v17 = vsel %vm562_vm3, %v7935_v28, -inf  ;;  %v8952_v36 = vld [vmem:[%s14035_s18 + $0xa8] sm:$0xff] }
0x3adf   :  { %7937 = vmax.xlane.f32.xlu0 %v7936_v17  ;;  %v8951_v17 = vld [vmem:[%s14035_s18 + $0xa0] sm:$0xff] }
0x3ae3   :  { %8111 = vadd.xlane.f32.xlu0 %v8110_v19  ;;  %v8950_v19 = vld [vmem:[%s14035_s18 + $0x98] sm:$0xff] }
0x3b68   :  { %v7938_v51 = vpop.xlane.xlu0 %7937 }
0x3b69   :  { %v7939_v24 = vsub.f32 %v7935_v28, %v7938_v51  ;;  %v8953_v28 = vld [vmem:[%s14035_s18 + $0xb0] sm:$0xff] }
0x3b6a   :  { %v8949_v51 = vld [vmem:[%s14035_s18 + $0x90] sm:$0xff] }
0x3b6b   :  { %v7940_v56 = vmul.f32 1.442695, %v7939_v24  ;;  %v8948_v24 = vld [vmem:[%s14035_s18 + $0x88] sm:$0xff] }
0x3b6c   :  { %v8112_v62 = vpop.xlane.xlu0 %8111 }
0x3b6d   :  { %10985 = vpow2.f32 %v7940_v56  ;;  %v8116_v18 = vmul.f32 0.015625, %v8112_v62  ;;  %v8947_v56 = vld [vmem:[%s14035_s18 + $0x80] sm:$0xff] }
0x3b6e   :  { %v8944_v62 = vld [vmem:[%s14034_s17 + $0x1] ss:$0 sm:$0xff] }
0x3b6f   :  { %v8118_v58 = vsub.f32 %v13853_v50, %v8116_v18 }
0x3b71   :  { %v8120_v23 = vmul.f32 %v8118_v58, %v8118_v58 }
0x3b73   :  { %v8122_v20 = vsel %vm183_vm1, %v8120_v23, 0.0 }
0x3b74   :  { %8123 = vadd.xlane.f32.xlu0 %v8122_v20 }
0x3b7a   :  { %v10986_v14 = vpop.eup %10985 }
0x3b7b   :  { %v7942_v12 = vsel %vm562_vm3, %v10986_v14, 0.0 }
0x3b7c   :  { %7943 = vadd.xlane.f32.xlu1 %v7942_v12 }
0x3bfd   :  { %v8124_v60 = vpop.xlane.xlu0 %8123 }
0x3bfe   :  { %v8128_v0 = vmul.f32 0.015625, %v8124_v60 }
0x3c00   :  { %v8130_v39 = vadd.f32 1e-06, %v8128_v0 }
0x3c05   :  { %v7944_v15 = vpop.xlane.xlu1 %7943 }
0x3c06   :  { %10987 = vrcp.f32 %v7944_v15 }
0x3c07   :  { %10989 = vrsqrt.f32 %v8130_v39 }
0x3c13   :  { %v10988_v42 = vpop.eup %10987 }
0x3c14   :  { %v7946_v30 = vmul.f32 %v10988_v42, %v10986_v14  ;;  %v10990_v34 = vpop.eup %10989 }
0x3c15   :  { %v8134_v55 = vmul.f32 %v10990_v34, %v8118_v58 }
0x3c16   :  { %10822 = vmatmul.mubr.msk.f32.vlgmr.msra.gmra.mxu1 %vm562_vm3, %v7946_v30 }
0x3c17   :  { %10825 = vmatpush3.msra.mxu1 %v13407_v22  ;;  %10828 = vmatprep.mubr.msk.f32.mxu1 %vm11098_vm2, %v14184_v11  ;;  %v8142_v61 = vmul.f32 %v8933_v38, %v8134_v55  ;;  %v8934_v22 = vld [vmem:[%s14032_s15 + $0x1] ss:$0 sm:$0xff] }
0x3c18   :  { %10826 = vmatprep.subr.mxu1 %v14184_v11 }
0x3c19   :  { %10827 = vmatpush3.msra.mxu1 %v13413_v10  ;;  %v8150_v35 = vadd.f32 %v8934_v22, %v8142_v61 }
0x3c1a   :  { %10831 = vmatprep.subr.mxu1 %v8942_v2 }
0x3cd6   :  { %v8016_v3 = vpop.f32.mrf.mxu1 }
0x3cd7   :  { %10829 = vmatmul.mubr.msk.f32.vlgmr.msra.gmra.mxu1 %vm95_vm0, %v8016_v3 }
0x3cd8   :  { %v10823_v11 = vpop.f32.mrf.mxu1  ;;  %10847 = vmatprep.mubr.msk.f32.mxu1 %vm183_vm1, %v8150_v35  ;;  %10832 = vmatpush3.msra.mxu1 %v8942_v2 }
0x3d97   :  { %v8089_v10 = vpop.f32.mrf.mxu1 }
0x3d98   :  { %v8093_v40 = vadd.f32 %v8089_v10, %v7648_v29 }
0x3d99   :  { %v10830_v41 = vpop.f32.mrf.mxu1 }
0x3d9a   :  { %v8095_v21 = vadd.f32 %v8093_v40, %v12643_v16  ;;  %v8941_v16 = vld [vmem:[%s14033_s16 + $0x70] sm:$0xff] }
0x3d9b   :  { %10833 = vmatprep.subr.mxu1 %v8941_v16 }
0x3d9c   :  { %v13876_v27 = vadd.f32 %v8930_v48, %v8095_v21  ;;  %10834 = vmatpush3.msra.mxu1 %v8941_v16  ;;  %v8955_v48 = vld [vmem:[%s14035_s18 + $0xc0] sm:$0xff] }
0x3d9d   :  { %10835 = vmatprep.subr.mxu1 %v8940_v47  ;;  %10864 = vmatprep.subr.mxu0 %v8955_v48  ;;  %v8964_v21 = vld [vmem:[%s14036_s19 + $0x1] ss:$0 sm:$0xff] }
0x3d9e   :  { %v8113_v8 = vsel %vm183_vm1, %v13876_v27, 0.0  ;;  %10836 = vmatpush3.msra.mxu1 %v8940_v47  ;;  %10865 = vmatpush3.msra.mxu0 %v8955_v48 }
0x3d9f   :  { %8114 = vadd.xlane.f32.xlu1 %v8113_v8  ;;  %10837 = vmatprep.subr.mxu1 %v8939_v26 }
0x3da0   :  { %10838 = vmatpush3.msra.mxu1 %v8939_v26  ;;  %10866 = vmatprep.subr.mxu0 %v8954_v33 }
0x3da1   :  { %10839 = vmatprep.subr.mxu1 %v8938_v9  ;;  %10867 = vmatpush3.msra.mxu0 %v8954_v33 }
0x3da2   :  { %10840 = vmatpush3.msra.mxu1 %v8938_v9  ;;  %10868 = vmatprep.subr.mxu0 %v8953_v28 }
0x3da3   :  { %10841 = vmatprep.subr.mxu1 %v8937_v49  ;;  %10869 = vmatpush3.msra.mxu0 %v8953_v28 }
0x3da4   :  { %10842 = vmatpush3.msra.mxu1 %v8937_v49  ;;  %10870 = vmatprep.subr.mxu0 %v8952_v36 }
0x3da5   :  { %10843 = vmatprep.subr.mxu1 %v8936_v5  ;;  %10871 = vmatpush3.msra.mxu0 %v8952_v36 }
0x3da6   :  { %10844 = vmatpush3.msra.mxu1 %v8936_v5  ;;  %10872 = vmatprep.subr.mxu0 %v8951_v17 }
0x3da7   :  { %10845 = vmatprep.subr.mxu1 %v8935_v57  ;;  %10873 = vmatpush3.msra.mxu0 %v8951_v17 }
0x3da8   :  { %10846 = vmatpush3.msra.mxu1 %v8935_v57  ;;  %10874 = vmatprep.subr.mxu0 %v8950_v19 }
0x3da9   :  { %10875 = vmatpush3.msra.mxu0 %v8950_v19 }
0x3daa   :  { %10876 = vmatprep.subr.mxu0 %v8949_v51 }
0x3dab   :  { %10877 = vmatpush3.msra.mxu0 %v8949_v51 }
0x3dac   :  { %10878 = vmatprep.subr.mxu0 %v8948_v24 }
0x3dad   :  { %10879 = vmatpush3.msra.mxu0 %v8948_v24 }
0x3dae   :  { %10880 = vmatprep.subr.mxu0 %v8947_v56 }
0x3daf   :  { %10881 = vmatpush3.msra.mxu0 %v8947_v56 }
0x3e28   :  { %v8115_v7 = vpop.xlane.xlu1 %8114 }
0x3e29   :  { %v8117_v37 = vmul.f32 0.015625, %v8115_v7 }
0x3e2b   :  { %v8119_v52 = vsub.f32 %v13876_v27, %v8117_v37 }
0x3e2d   :  { %v8121_v53 = vmul.f32 %v8119_v52, %v8119_v52 }
0x3e2f   :  { %v8125_v4 = vsel %vm183_vm1, %v8121_v53, 0.0 }
0x3e30   :  { %8126 = vadd.xlane.f32.xlu1 %v8125_v4 }
0x3eb9   :  { %v8127_v32 = vpop.xlane.xlu1 %8126 }
0x3eba   :  { %v8129_v13 = vmul.f32 0.015625, %v8127_v32 }
0x3ebc   :  { %v8131_v29 = vadd.f32 1e-06, %v8129_v13 }
0x3ebe   :  { %10991 = vrsqrt.f32 %v8131_v29 }
0x3ecb   :  { %v10992_v25 = vpop.eup %10991 }
0x3ecc   :  { %v8135_v43 = vmul.f32 %v10992_v25, %v8119_v52 }
0x3ece   :  { %v8143_v44 = vmul.f32 %v8933_v38, %v8135_v43 }
0x3ed0   :  { %v8151_v45 = vadd.f32 %v8934_v22, %v8143_v44 }
0x3ed2   :  { %10848 = vmatmul.mubr.msk.f32.vlgmr.msra.gmra.mxu1 %vm183_vm1, %v8151_v45 }
0x3f92   :  { %v10849_v18 = vpop.f32.mrf.mxu1 }
0x3f93   :  { %v8247_v58 = vadd.f32 %v10849_v18, %v8944_v62 }
0x3f94   :  { %v8241_v23 = vpop.f32.mrf.mxu1 }
0x3f95   :  { %v8253_v20 = vmul.f32 0.044715, %v8247_v58  ;;  %v8242_v14 = vadd.f32 %v8944_v62, %v8241_v23  ;;  %v8251_v11 = vmul.f32 0.5, %v8247_v58 }
0x3f97   :  { %v8255_v12 = vmul.f32 %v8253_v20, %v8247_v58  ;;  %v8252_v15 = vmul.f32 0.044715, %v8242_v14  ;;  %v8250_v3 = vmul.f32 0.5, %v8242_v14 }
0x3f99   :  { %v8257_v42 = vmul.f32 %v8255_v12, %v8247_v58  ;;  %v8254_v30 = vmul.f32 %v8252_v15, %v8242_v14  ;;  %v8467_v12 = vld [vmem:[%s14041_s24 + $0x38] sm:$0xff]  ;;  %v8466_v15 = vld [vmem:[%s14041_s24 + $0x30] sm:$0xff] }
0x3f9a   :  { %10885 = vmatprep.subr.mxu1 %v8467_v12 }
0x3f9b   :  { %v8259_v60 = vadd.f32 %v8257_v42, %v8247_v58  ;;  %v8256_v0 = vmul.f32 %v8254_v30, %v8242_v14  ;;  %10886 = vmatpush3.msra.mxu1 %v8467_v12  ;;  %v8465_v42 = vld [vmem:[%s14041_s24 + $0x28] sm:$0xff]  ;;  %v8464_v30 = vld [vmem:[%s14041_s24 + $0x20] sm:$0xff] }
0x3f9c   :  { %10887 = vmatprep.subr.mxu1 %v8466_v15 }
0x3f9d   :  { %v8258_v39 = vadd.f32 %v8256_v0, %v8242_v14  ;;  %v8261_v34 = vmul.f32 0.7978846, %v8259_v60  ;;  %10888 = vmatpush3.msra.mxu1 %v8466_v15  ;;  %v8463_v60 = vld [vmem:[%s14041_s24 + $0x18] sm:$0xff]  ;;  %v8462_v0 = vld [vmem:[%s14041_s24 + $0x10] sm:$0xff] }
0x3f9e   :  { %10889 = vmatprep.subr.mxu1 %v8465_v42 }
0x3f9f   :  { %v8260_v55 = vmul.f32 0.7978846, %v8258_v39  ;;  %10993 = vtanh.f32 %v8261_v34  ;;  %10890 = vmatpush3.msra.mxu1 %v8465_v42  ;;  %v8461_v39 = vld [vmem:[%s14041_s24 + $0x8] sm:$0xff]  ;;  %v8460_v34 = vld [vmem:[%s14041_s24] sm:$0xff] }
0x3fa0   :  { %10891 = vmatprep.subr.mxu1 %v8464_v30 }
0x3fa1   :  { %10995 = vtanh.f32 %v8260_v55  ;;  %10892 = vmatpush3.msra.mxu1 %v8464_v30 }
0x3fa2   :  { %10893 = vmatprep.subr.mxu1 %v8463_v60 }
0x3fa3   :  { %10894 = vmatpush3.msra.mxu1 %v8463_v60 }
0x3fa4   :  { %10895 = vmatprep.subr.mxu1 %v8462_v0 }
0x3fa5   :  { %10896 = vmatpush3.msra.mxu1 %v8462_v0 }
0x3fa6   :  { %10897 = vmatprep.subr.mxu1 %v8461_v39 }
0x3fa7   :  { %10898 = vmatpush3.msra.mxu1 %v8461_v39 }
0x3fa8   :  { %10899 = vmatprep.subr.mxu1 %v8460_v34 }
0x3fa9   :  { %10900 = vmatpush3.msra.mxu1 %v8460_v34 }
0x3fac   :  { %v10994_v38 = vpop.eup %10993 }
0x3fad   :  { %v8265_v22 = vadd.f32 1.0, %v10994_v38 }
0x3fae   :  { %v10996_v61 = vpop.eup %10995 }
0x3faf   :  { %v8264_v35 = vadd.f32 1.0, %v10996_v61  ;;  %v8267_v40 = vmul.f32 %v8265_v22, %v8251_v11 }
0x3fb1   :  { %v8266_v10 = vmul.f32 %v8264_v35, %v8250_v3 }
0x3fb3   :  { %10882 = vmatprep.mubr.f32.mxu0 %v8266_v10  ;;  %v8967_v10 = vld [vmem:[%s14039_s22] ss:$0 sm:$0xff]  ;;  %s11099_s22 = smov [#allocation2]  }
0x3fb4   :  { %10883 = vmatmul.mubr.f32.vlgmr.msra.gmra.mxu0 %v8267_v40  ;;  %s8563_s18 = sshll.u32 %s11099_s22, 4  ;;  %s8564_s18 = int_to_ptr.vmem [resolvable:$true] %s8563_s18 }
0x3fb5   :  { %p11080_p1 = scmp.lt.s32.totalorder %s8564_s18, %s8564_s18 }
0x4074   :  { %v10884_v41 = vpop.f32.mrf.mxu0 }
0x4075   :  { %v8361_v8 = vadd.f32 %v10884_v41, %v13876_v27 }
0x4076   :  { %v8351_v7 = vpop.f32.mrf.mxu0 }
0x4077   :  { %v8360_v37 = vadd.f32 %v8351_v7, %v13853_v50  ;;  %v8371_v52 = vadd.f32 %v8964_v21, %v8361_v8  ;;  %v8968_v7 = vld [vmem:[%s14040_s23] ss:$0 sm:$0xff]  ;;  %s11075_s23 = scalar_lea.vmem %s8564_s18, 256 }
0x4078   :  { %p11076_p0 = scmp.ne.s32.totalorder %s8564_s18, %s11075_s23  ;;  %p11081_p2 = scmp.lt.s32.totalorder %s11075_s23, %s11075_s23 }
0x4079   :  { %v8377_v53 = vsel %vm183_vm1, %v8371_v52, 0.0  ;;  %v8370_v4 = vadd.f32 %v8964_v21, %v8360_v37 }
0x407a   :  { %8378 = vadd.xlane.f32.xlu1 %v8377_v53  ;;  %p11082_p3 = por %p11081_p2, %p11080_p1 }
0x407b   :  { %v8374_v2 = vsel %vm183_vm1, %v8370_v4, 0.0 }
0x407c   :  { %8375 = vadd.xlane.f32.xlu0 %v8374_v2  ;;  %p11083_p4 = pnand %p11082_p3, %p11076_p0 }
0x4103   :  { %v8379_v16 = vpop.xlane.xlu1 %8378 }
0x4104   :  { %v8381_v47 = vmul.f32 0.015625, %v8379_v16 }
0x4105   :  { %v8376_v26 = vpop.xlane.xlu0 %8375 }
0x4106   :  { %v8383_v9 = vsub.f32 %v8371_v52, %v8381_v47  ;;  %v8380_v49 = vmul.f32 0.015625, %v8376_v26 }
0x4108   :  { %v8382_v5 = vsub.f32 %v8370_v4, %v8380_v49  ;;  %v8385_v57 = vmul.f32 %v8383_v9, %v8383_v9  ;;  %v8969_v4 = vld [vmem:[%s14042_s25] ss:$0 sm:$0xff] }
0x410a   :  { %v8389_v27 = vsel %vm183_vm1, %v8385_v57, 0.0  ;;  %v8384_v32 = vmul.f32 %v8382_v5, %v8382_v5 }
0x410b   :  { %8390 = vadd.xlane.f32.xlu1 %v8389_v27 }
0x410c   :  { %v8386_v50 = vsel %vm183_vm1, %v8384_v32, 0.0 }
0x410d   :  { %8387 = vadd.xlane.f32.xlu0 %v8386_v50 }
0x4194   :  { %v8391_v13 = vpop.xlane.xlu1 %8390 }
0x4195   :  { %v8393_v29 = vmul.f32 0.015625, %v8391_v13 }
0x4196   :  { %v8388_v25 = vpop.xlane.xlu0 %8387 }
0x4197   :  { %v8395_v43 = vadd.f32 1e-06, %v8393_v29  ;;  %v8392_v44 = vmul.f32 0.015625, %v8388_v25 }
0x4199   :  { %10997 = vrsqrt.f32 %v8395_v43  ;;  %v8394_v45 = vadd.f32 1e-06, %v8392_v44 }
0x419b   :  { %10999 = vrsqrt.f32 %v8394_v45 }
0x41a6   :  { %v10998_v63 = vpop.eup %10997 }
0x41a7   :  { %v8399_v59 = vmul.f32 %v10998_v63, %v8383_v9 }
0x41a8   :  { %v11000_v31 = vpop.eup %10999 }
0x41a9   :  { %v8407_v6 = vmul.f32 %v8965_v1, %v8399_v59  ;;  %v8398_v46 = vmul.f32 %v11000_v31, %v8382_v5 }
0x41ab   :  { %v8415_v48 = vadd.f32 %v8966_v54, %v8407_v6  ;;  %v8406_v33 = vmul.f32 %v8965_v1, %v8398_v46 }
0x41ad   :  { %v8421_v28 = vsel %vm183_vm1, %v8415_v48, 0.0  ;;  %v8414_v36 = vadd.f32 %v8966_v54, %v8406_v33 }
0x41ae   :  { %8422 = vadd.xlane.f32.xlu1 %v8421_v28 }
0x41af   :  { %v8418_v17 = vsel %vm183_vm1, %v8414_v36, 0.0 }
0x41b0   :  { %8419 = vadd.xlane.f32.xlu0 %v8418_v17 }
0x4237   :  { %v8423_v19 = vpop.xlane.xlu1 %8422 }
0x4238   :  { %v8425_v51 = vmul.f32 0.015625, %v8423_v19 }
0x4239   :  { %v8420_v24 = vpop.xlane.xlu0 %8419 }
0x423a   :  { %v8427_v56 = vsub.f32 %v8415_v48, %v8425_v51  ;;  %v8424_v62 = vmul.f32 0.015625, %v8420_v24 }
0x423c   :  { %v8426_v18 = vsub.f32 %v8414_v36, %v8424_v62  ;;  %v8429_v58 = vmul.f32 %v8427_v56, %v8427_v56 }
0x423e   :  { %v8433_v23 = vsel %vm183_vm1, %v8429_v58, 0.0  ;;  %v8428_v20 = vmul.f32 %v8426_v18, %v8426_v18 }
0x423f   :  { %8434 = vadd.xlane.f32.xlu1 %v8433_v23 }
0x4240   :  { %v8430_v14 = vsel %vm183_vm1, %v8428_v20, 0.0 }
0x4241   :  { %8431 = vadd.xlane.f32.xlu0 %v8430_v14 }
0x42c8   :  { %v8435_v55 = vpop.xlane.xlu1 %8434 }
0x42c9   :  { %v8437_v38 = vmul.f32 0.015625, %v8435_v55 }
0x42ca   :  { %v8432_v61 = vpop.xlane.xlu0 %8431 }
0x42cb   :  { %v8439_v22 = vadd.f32 1e-06, %v8437_v38  ;;  %v8436_v3 = vmul.f32 0.015625, %v8432_v61 }
0x42cd   :  { %11001 = vrsqrt.f32 %v8439_v22  ;;  %v8438_v35 = vadd.f32 1e-06, %v8436_v3 }
0x42cf   :  { %11003 = vrsqrt.f32 %v8438_v35 }
0x42da   :  { %v11002_v11 = vpop.eup %11001 }
0x42db   :  { %v8443_v40 = vmul.f32 %v11002_v11, %v8427_v56 }
0x42dc   :  { %v11004_v41 = vpop.eup %11003 }
0x42dd   :  { %v8442_v21 = vmul.f32 %v11004_v41, %v8426_v18  ;;  %v8451_v8 = vmul.f32 %v8967_v10, %v8443_v40 }
0x42df   :  { %v8450_v37 = vmul.f32 %v8967_v10, %v8442_v21  ;;  %v8459_v53 = vadd.f32 %v8968_v7, %v8451_v8 }
0x42e1   :  { %v8458_v52 = vadd.f32 %v8968_v7, %v8450_v37 }
0x42e3   :  { %10901 = vmatprep.mubr.msk.f32.mxu1 %vm183_vm1, %v8458_v52 }
0x42e4   :  { %10902 = vmatmul.mubr.msk.f32.vlgmr.msra.gmra.mxu1 %vm183_vm1, %v8459_v53 }
0x43a4   :  { %v10903_v2 = vpop.f32.mrf.mxu1 }
0x43a5   :  { %v8553_v16 = vadd.f32 %v10903_v2, %v8969_v4 }
0x43a6   :  { %v8547_v47 = vpop.f32.mrf.mxu1 }
0x43a7   :  { %8557 = vst.msk [vmem:[#allocation2 + $0x8] sm:$0xff] %vm95_vm0, %v8553_v16  ;;  %v8548_v26 = vadd.f32 %v8969_v4, %v8547_v47 }
0x43a9   :  { %8556 = vst.msk [vmem:[#allocation2] sm:$0xff] %vm95_vm0, %v8548_v26 }
0x43aa   :  { %11086 = shalt.err (!%p11083_p4)
}
0x43ab   :  { %s11100_s19 = smov 128   ;;  %s11101_s25 = smov 8  }
0x43ac   :  { %8569 = dma.vmem_to_hbm [thread:$0]  %s8564_s18, 256, %s14043_s26, [#allocation3], %s11100_s19, %s11100_s19, %s11101_s25  }
0x43ad   :  { %11095 = dma.done.wait [#allocation3], 256  }
0x43ae   :  { %11096 = vsyncadd [#allocation3], 4294967040 }
0x43af   :  { %8573 = vsyncpa [#allocation3], 1 }

</bundles_post_ra>
